<compile_context>
chip_gen: v6e
topology: v6e:2x2x1
jax: 0.10.0
libtpu: 0.0.40
codegen_flags: <defaults>
</compile_context>

<pallas_src>
import functools

import jax
import jax.numpy as jnp
from jax.experimental import pallas as pl
from jax.experimental.pallas import tpu as pltpu


_VMEM_LIMIT = 32 * 1024 * 1024   # explicit VMEM budget, safe on v5e/v6e/v7x


# ----------------------------- fused matmul kernel ---------------------------

def _gelu_tanh(x):
    # TODO(synk): tanh-approximate GELU (EUP tanh) inside the kernel; the
    # PyTorch reference nn.GELU is exact-erf (drift ~1e-3).
    c = 0.7978845608028654  # sqrt(2/pi)
    return 0.5 * x * (1.0 + jnp.tanh(c * (x + 0.044715 * x * x * x)))


def layer_norm(x, g, b, eps=1e-6):
    """Plain-JAX LayerNorm (only used as a fallback when LN cannot be fused)."""
    m = jnp.mean(x, axis=-1, keepdims=True)
    v = jnp.mean((x - m) ** 2, axis=-1, keepdims=True)
    return (x - m) / jnp.sqrt(v + eps) * g + b


def _build_mm_kernel(*, fuse_ln, use_bias, act, use_affine, use_res,
                     softmax_scale, multi_k, ln_eps):
    """Fused matmul kernel: (LN) -> dot -> (+bias) -> act -> (bn affine)
    -> (+residual) -> (row softmax)."""

    def kernel(*refs):
        if multi_k:
            acc_ref = refs[-1]
            refs = refs[:-1]
        o_ref = refs[-1]
        it = iter(refs[:-1])
        a_ref = next(it)
        b_ref = next(it)
        ln_g_ref = next(it) if fuse_ln else None
        ln_b_ref = next(it) if fuse_ln else None
        bias_ref = next(it) if use_bias else None
        scale_ref = next(it) if use_affine else None
        shift_ref = next(it) if use_affine else None
        res_ref = next(it) if use_res else None

        a = a_ref[...]
        if fuse_ln:                         # pre-LN fused in the prologue (f32)
            a = a.astype(jnp.float32)
            mu = jnp.mean(a, axis=-1, keepdims=True)
            var = jnp.mean((a - mu) ** 2, axis=-1, keepdims=True)
            a = (a - mu) * jax.lax.rsqrt(var + ln_eps)
            a = a * ln_g_ref[...] + ln_b_ref[...]
        y = jnp.dot(a.astype(jnp.bfloat16), b_ref[...],
                    preferred_element_type=jnp.float32)

        def epilogue(y):
            if use_bias:
                y = y + bias_ref[...]
            if act == 'leaky':
                y = jnp.where(y >= 0, y, 0.02 * y)
            elif act == 'gelu':
                y = _gelu_tanh(y)
            if use_affine:
                y = y * scale_ref[...] + shift_ref[...]
            if use_res:
                y = y + res_ref[...]
            if softmax_scale is not None:   # SumToOne: softmax(scale*y, -1)
                y = y * softmax_scale
                y = y - jnp.max(y, axis=-1, keepdims=True)
                e = jnp.exp(y)
                y = e / jnp.sum(e, axis=-1, keepdims=True)
            return y

        if not multi_k:
            o_ref[...] = epilogue(y).astype(o_ref.dtype)
        else:
            @pl.when(pl.program_id(2) == 0)
            def _():
                acc_ref[...] = jnp.zeros_like(acc_ref)

            acc_ref[...] += y

            @pl.when(pl.program_id(2) == pl.num_programs(2) - 1)
            def _():
                o_ref[...] = epilogue(acc_ref[...]).astype(o_ref.dtype)

    return kernel


def _pick_tile(dim, full_cap, pref, align):
    """Return (tile, padded_dim).  Prefer a full-dim block (no padding, valid
    for any size), then an `align`-multiple that divides dim, else pad."""
    if dim <= full_cap:
        return dim, dim
    t = pref
    while t >= align:
        if dim % t == 0:
            return t, dim
        t -= align
    return pref, pl.cdiv(dim, pref) * pref


def matmul_fused(a, b, *, bias=None, bn_scale=None, bn_shift=None, act='none',
                 softmax_scale=None, ln_gamma=None, ln_beta=None, ln_eps=1e-6,
                 residual=None):
    """f32 (M,K)@(K,N): bf16 MXU operands, f32 accumulation.
    Optionally fused: LayerNorm prologue, bias, activation, BatchNorm affine,
    residual add, row softmax."""
    M, K = a.shape
    K2, N = b.shape
    assert K == K2

    tm, Mp = _pick_tile(M, 512, 256, 16)
    tn, Np = _pick_tile(N, 512, 256, 128)
    tk, Kp = _pick_tile(K, 2048, 512, 128)
    ngm, ngn, ngk = Mp // tm, Np // tn, Kp // tk
    multi_k = ngk > 1

    fuse_ln = (ln_gamma is not None) and (Kp == K) and (not multi_k)
    if (ln_gamma is not None) and not fuse_ln:
        # fallback: K is tiled / padded -> do LN outside (rare at these sizes)
        a = layer_norm(a.astype(jnp.float32), ln_gamma, ln_beta, ln_eps)

    a = a.astype(jnp.float32 if fuse_ln else jnp.bfloat16)
    b = b.astype(jnp.bfloat16)

    if Mp != M:
        a = jnp.pad(a, ((0, Mp - M), (0, 0)))
    if Kp != K:                          # zero K-padding is benign for the dot
        a = jnp.pad(a, ((0, 0), (0, Kp - K)))
        b = jnp.pad(b, ((0, Kp - K), (0, 0)))
    if Np != N:
        b = jnp.pad(b, ((0, 0), (0, Np - N)))

    def vec_n(v):
        v = v.astype(jnp.float32)
        if Np != N:
            v = jnp.pad(v, (0, Np - N))
        return v.reshape(1, Np)

    use_bias = bias is not None
    use_affine = bn_scale is not None
    use_res = residual is not None
    if softmax_scale is not None:
        assert ngn == 1 and Np == N, "fused softmax needs the full row in one block"

    if multi_k:
        grid = (ngm, ngn, ngk)
        a_map = lambda i, j, k: (i, k)
        b_map = lambda i, j, k: (k, j)
        vecn_map = lambda i, j, k: (0, j)
        veck_map = lambda i, j, k: (0, 0)
        o_map = lambda i, j, k: (i, j)
        semantics = ("parallel", "parallel", "arbitrary")
        scratch = [pltpu.VMEM((tm, tn), jnp.float32)]
    else:
        grid = (ngm, ngn)
        a_map = lambda i, j: (i, 0)
        b_map = lambda i, j: (0, j)
        vecn_map = lambda i, j: (0, j)
        veck_map = lambda i, j: (0, 0)
        o_map = lambda i, j: (i, j)
        semantics = ("parallel", "parallel")
        scratch = []

    operands = [a, b]
    in_specs = [pl.BlockSpec((tm, tk), a_map), pl.BlockSpec((tk, tn), b_map)]
    if fuse_ln:
        operands += [ln_gamma.astype(jnp.float32).reshape(1, K),
                     ln_beta.astype(jnp.float32).reshape(1, K)]
        in_specs += [pl.BlockSpec((1, tk), veck_map),
                     pl.BlockSpec((1, tk), veck_map)]
    if use_bias:
        operands.append(vec_n(bias))
        in_specs.append(pl.BlockSpec((1, tn), vecn_map))
    if use_affine:
        operands += [vec_n(bn_scale), vec_n(bn_shift)]
        in_specs += [pl.BlockSpec((1, tn), vecn_map),
                     pl.BlockSpec((1, tn), vecn_map)]
    if use_res:
        r = residual.astype(jnp.float32)
        if Mp != M or Np != N:
            r = jnp.pad(r, ((0, Mp - M), (0, Np - N)))
        operands.append(r)
        in_specs.append(pl.BlockSpec((tm, tn), o_map))

    kernel = _build_mm_kernel(fuse_ln=fuse_ln, use_bias=use_bias, act=act,
                              use_affine=use_affine, use_res=use_res,
                              softmax_scale=softmax_scale, multi_k=multi_k,
                              ln_eps=ln_eps)

    out = pl.pallas_call(
        kernel,
        out_shape=jax.ShapeDtypeStruct((Mp, Np), jnp.float32),
        grid=grid,
        in_specs=in_specs,
        out_specs=pl.BlockSpec((tm, tn), o_map),
        scratch_shapes=scratch,
        compiler_params=pltpu.CompilerParams(
            dimension_semantics=semantics,
            vmem_limit_bytes=_VMEM_LIMIT),
    )(*operands)

    if Mp != M or Np != N:
        out = out[:M, :N]
    return out


# ------------------------------ fused attention -------------------------------

def _attn_kernel(q_ref, k_ref, v_ref, o_ref, *, scale):
    q = q_ref[...]                       # (G, N, D) bf16
    k = k_ref[...]
    v = v_ref[...]
    s = jnp.einsum('gqd,gkd->gqk', q, k,
                   preferred_element_type=jnp.float32) * scale
    s = s - jnp.max(s, axis=-1, keepdims=True)
    p = jnp.exp(s)
    p = p / jnp.sum(p, axis=-1, keepdims=True)
    o_ref[...] = jnp.einsum('gqk,gkd->gqd', p.astype(v.dtype), v,
                            preferred_element_type=jnp.float32)


def attention_pallas(q, k, v, scale):
    """Fused softmax attention; q/k/v: (batch*heads, tokens, head_dim).
    Heads are packed G per block; the head-group axis is 'parallel'.
    # TODO(synk): for production token counts, flash-tile the KV axis instead
    # of materializing the full (N,N) score block (VMEM, esp. v7x 64 MiB)."""
    BH, N, D = q.shape
    G = 1
    for g in (16, 8, 4, 2, 1):
        if BH % g == 0:
            G = g
            break
    q = q.astype(jnp.bfloat16)
    k = k.astype(jnp.bfloat16)
    v = v.astype(jnp.bfloat16)
    return pl.pallas_call(
        functools.partial(_attn_kernel, scale=scale),
        out_shape=jax.ShapeDtypeStruct((BH, N, D), jnp.float32),
        grid=(BH // G,),
        in_specs=[pl.BlockSpec((G, N, D), lambda i: (i, 0, 0)) for _ in range(3)],
        out_specs=pl.BlockSpec((G, N, D), lambda i: (i, 0, 0)),
        compiler_params=pltpu.CompilerParams(
            dimension_semantics=("parallel",),
            vmem_limit_bytes=_VMEM_LIMIT),
    )(q, k, v)


# --------------------------- conv / norm helpers (NHWC) -----------------------

def conv1x1(x, w, b=None, **epi):
    """x: (B,H,W,C); w: (O,C) PyTorch-shaped; epilogue kwargs forwarded."""
    B, H, W, C = x.shape
    O = w.shape[0]
    y = matmul_fused(x.reshape(B * H * W, C), w.reshape(O, C).T, bias=b, **epi)
    return y.reshape(B, H, W, O)


def conv3x3(x, w, b=None, **epi):
    """x: (B,H,W,C); w: (O,C,3,3); stride=1, padding=1 (NHWC im2col + matmul).
    # TODO(synk): generate the 9-tap gather via shifted VMEM reads inside the
    # kernel instead of materializing the im2col slab in HBM."""
    B, H, W, C = x.shape
    O = w.shape[0]
    xp = jnp.pad(x, ((0, 0), (1, 1), (1, 1), (0, 0)))
    cols = [xp[:, kh:kh + H, kw:kw + W, :] for kh in range(3) for kw in range(3)]
    patches = jnp.concatenate(cols, axis=-1)              # (B,H,W,9*C), (kh,kw,c)
    wm = w.transpose(2, 3, 1, 0).reshape(9 * C, O)        # (kh,kw,c) x O
    y = matmul_fused(patches.reshape(B * H * W, 9 * C), wm, bias=b, **epi)
    return y.reshape(B, H, W, O)


def conv_bn_block(x, p, w=None):
    """Conv(1x1 / 3x3) -> LeakyReLU(0.02) -> BatchNorm2d(eval) -> Dropout(id),
    all fused into the matmul epilogue.  `w` optionally overrides p['w'] (used
    for algebraically folded 1x1 lateral convs)."""
    bn = p['bn']
    eps = 1e-5
    scale = bn['gamma'] / jnp.sqrt(bn['var'] + eps)
    shift = bn['beta'] - bn['mean'] * scale
    w = p['w'] if w is None else w
    conv = conv1x1 if w.ndim == 2 else conv3x3
    return conv(x, w, b=p['b'], act='leaky', bn_scale=scale, bn_shift=shift)


def interpolate_bilinear_align_corners(x, out_h, out_w):
    """F.interpolate(..., mode='bilinear', align_corners=True) for NHWC."""
    B, H, W, C = x.shape
    ys = jnp.arange(out_h, dtype=jnp.float32) * ((H - 1) / max(out_h - 1, 1))
    xs = jnp.arange(out_w, dtype=jnp.float32) * ((W - 1) / max(out_w - 1, 1))
    y0 = jnp.floor(ys).astype(jnp.int32)
    x0 = jnp.floor(xs).astype(jnp.int32)
    y1 = jnp.minimum(y0 + 1, H - 1)
    x1 = jnp.minimum(x0 + 1, W - 1)
    wy = (ys - y0.astype(jnp.float32))[None, :, None, None]
    wx = (xs - x0.astype(jnp.float32))[None, None, :, None]
    r0, r1 = x[:, y0, :, :], x[:, y1, :, :]
    v00, v01 = r0[:, :, x0, :], r0[:, :, x1, :]
    v10, v11 = r1[:, :, x0, :], r1[:, :, x1, :]
    top = v00 * (1.0 - wx) + v01 * wx
    bot = v10 * (1.0 - wx) + v11 * wx
    return top * (1.0 - wy) + bot * wy


# ------------------------------------ SpatViT --------------------------------

def spat_vit_encoder(x_nhwc, p, cfg):
    # TODO(synk): original SpatViT (not in the reference snippet) uses deformable
    # sampling attention (n_points=8) and drop-path; standard pre-LN MHSA blocks
    # are used here with matching embed_dim/depth/heads/out_indices,
    # use_abs_pos_emb=False, eval mode.
    B, H, W, C = x_nhwc.shape
    ps, E = cfg['seg_patches'], cfg['embed_dim']
    Hp, Wp = H // ps, W // ps
    N = Hp * Wp
    nh = cfg['num_heads']
    hd = E // nh
    scale = hd ** -0.5

    # patch embedding: Conv2d(C, E, kernel=ps, stride=ps) as a fused matmul
    xr = x_nhwc.reshape(B, Hp, ps, Wp, ps, C).transpose(0, 1, 3, 2, 4, 5)
    xr = xr.reshape(B * N, ps * ps * C)
    wm = p['patch_w'].transpose(2, 3, 1, 0).reshape(ps * ps * C, E)
    tok = matmul_fused(xr, wm, bias=p['patch_b']).reshape(B, N, E)

    def block(tok, bp):
        tok2d = tok.reshape(B * N, E)
        # pre-LN fused into the qkv matmul prologue
        qkv = matmul_fused(tok2d, bp['qkv_w'], bias=bp['qkv_b'],
                           ln_gamma=bp['ln1_g'], ln_beta=bp['ln1_b'])
        qkv = qkv.reshape(B, N, 3, nh, hd).transpose(2, 0, 3, 1, 4)
        q = qkv[0].reshape(B * nh, N, hd)
        k = qkv[1].reshape(B * nh, N, hd)
        v = qkv[2].reshape(B * nh, N, hd)
        o = attention_pallas(q, k, v, scale)
        o = o.reshape(B, nh, N, hd).transpose(0, 2, 1, 3).reshape(B * N, E)
        # residual add fused into the proj matmul epilogue
        tok2d = matmul_fused(o, bp['proj_w'], bias=bp['proj_b'], residual=tok2d)

        # pre-LN fused into fc1 prologue; GELU fused in its epilogue
        h = matmul_fused(tok2d, bp['fc1_w'], bias=bp['fc1_b'], act='gelu',
                         ln_gamma=bp['ln2_g'], ln_beta=bp['ln2_b'])
        # residual add fused into fc2 epilogue
        tok2d = matmul_fused(h, bp['fc2_w'], bias=bp['fc2_b'], residual=tok2d)
        tok = tok2d.reshape(B, N, E)
        return tok, tok

    # TODO(synk): at production sizes, collect only out_indices layers instead
    # of stacking all depth layers (HBM write bandwidth); negligible at demo size.
    _, all_toks = jax.lax.scan(block, tok, p['blocks'])   # (depth, B, N, E)

    def to_map(t):                                        # NHWC feature map
        return t.reshape(B, Hp, Wp, E)

    feats = [to_map(tok)]                                 # img_fea[0] (unused downstream)
    for idx in cfg['out_indices']:
        feats.append(to_map(all_toks[idx]))
    return feats


# --------------------------------- SpatSIGMA_Unmix ----------------------------

def spat_sigma_unmix_forward(params, patch, cfg):
    B, C, H, W = patch.shape
    x_nhwc = patch.transpose(0, 2, 3, 1)                  # single boundary transpose

    img_fea = spat_vit_encoder(x_nhwc, params['encoder'], cfg)

    # lateral 1x1 convs that feed 3x3 paths (kept separate: folding into the
    # 3x3 would triple the im2col K / MXU flops)
    x1 = conv1x1(img_fea[1], params['conv_features'][0])
    x2 = conv1x1(img_fea[2], params['conv_features'][1])

    # lateral 1x1 convs that feed 1x1 paths: fold conv_features{3,4} into
    # conv2/conv1 (linear-compose weights in f32) -> one fused pass each
    w_p4 = params['conv1']['w'] @ params['conv_features'][3]     # (T,E)
    w_p3 = params['conv2']['w'] @ params['conv_features'][2]     # (T,E)
    p4 = conv_bn_block(img_fea[4], params['conv1'], w=w_p4)
    p3 = conv_bn_block(img_fea[3], params['conv2'], w=w_p3)
    p2 = conv_bn_block(x2, params['conv3'])
    p1 = conv_bn_block(x1, params['conv4'])

    p1 = jnp.concatenate([p1, p2, p3, p4], axis=-1)
    p1 = interpolate_bilinear_align_corners(p1, H, W)
    p1 = conv3x3(p1, params['smooth']['w'], params['smooth']['b'])

    # conv5 (1x1 -> LeakyReLU -> BN) + SumToOne softmax(scale*x), all fused
    bn = params['conv5']['bn']
    eps = 1e-5
    bscale = bn['gamma'] / jnp.sqrt(bn['var'] + eps)
    bshift = bn['beta'] - bn['mean'] * bscale
    R = cfg['num_em']
    w5 = params['conv5']['w']
    abunds_flat = matmul_fused(p1.reshape(B * H * W, -1), w5.reshape(R, -1).T,
                               bias=params['conv5']['b'], act='leaky',
                               bn_scale=bscale, bn_shift=bshift,
                               softmax_scale=float(cfg['scale']))

    # TODO(synk): exact Decoder definition is not in the reference snippet;
    # implemented as the standard linear-mixture 1x1 conv (num_em -> channels, no bias).
    out_flat = matmul_fused(abunds_flat, params['decoder']['w'].T)

    abunds = abunds_flat.reshape(B, H, W, R).transpose(0, 3, 1, 2)   # back to NCHW
    output = out_flat.reshape(B, H, W, C).transpose(0, 3, 1, 2)
    return abunds, output


# ------------------------------------ params ----------------------------------

def init_params(key, cfg):
    E, C, ps = cfg['embed_dim'], cfg['channels'], cfg['seg_patches']
    T, R, depth = cfg['NUM_TOKENS'], cfg['num_em'], cfg['depth']
    Hm = cfg['mlp_ratio'] * E
    keys = iter(jax.random.split(key, 128))

    def w(shape, std=0.02):
        return jax.random.normal(next(keys), shape, jnp.float32) * std

    def bn(c):
        return dict(gamma=jnp.ones((c,), jnp.float32), beta=jnp.zeros((c,), jnp.float32),
                    mean=jnp.zeros((c,), jnp.float32), var=jnp.ones((c,), jnp.float32))

    blocks = dict(  # linear weights stored (in, out); stacked over depth for lax.scan
        ln1_g=jnp.ones((depth, E), jnp.float32), ln1_b=jnp.zeros((depth, E), jnp.float32),
        qkv_w=w((depth, E, 3 * E)), qkv_b=jnp.zeros((depth, 3 * E), jnp.float32),
        proj_w=w((depth, E, E)), proj_b=jnp.zeros((depth, E), jnp.float32),
        ln2_g=jnp.ones((depth, E), jnp.float32), ln2_b=jnp.zeros((depth, E), jnp.float32),
        fc1_w=w((depth, E, Hm)), fc1_b=jnp.zeros((depth, Hm), jnp.float32),
        fc2_w=w((depth, Hm, E)), fc2_b=jnp.zeros((depth, E), jnp.float32),
    )
    return dict(
        encoder=dict(patch_w=w((E, C, ps, ps)), patch_b=jnp.zeros((E,), jnp.float32),
                     blocks=blocks),
        conv_features=[w((T, E), std=0.3) for _ in range(4)],
        conv1=dict(w=w((T, T), std=0.3), b=jnp.zeros((T,), jnp.float32), bn=bn(T)),
        conv2=dict(w=w((T, T), std=0.3), b=jnp.zeros((T,), jnp.float32), bn=bn(T)),
        conv3=dict(w=w((T, T, 3, 3), std=0.3), b=jnp.zeros((T,), jnp.float32), bn=bn(T)),
        conv4=dict(w=w((T, T, 3, 3), std=0.3), b=jnp.zeros((T,), jnp.float32), bn=bn(T)),
        smooth=dict(w=w((T, 4 * T, 3, 3), std=0.3), b=jnp.zeros((T,), jnp.float32)),
        conv5=dict(w=w((R, T), std=0.3), b=jnp.zeros((R,), jnp.float32), bn=bn(R)),
        decoder=dict(w=jnp.abs(w((C, R), std=0.3))),
    )


# -------------------------------------- main ----------------------------------

if __name__ == "__main__":
    cfg = dict(
        batch=2, channels=4, patch_size=16, seg_patches=4,
        embed_dim=96,            # SpatViT embed dim (small demo; module default is 768)
        depth=12, num_heads=12, mlp_ratio=4,
        NUM_TOKENS=32, num_em=4, scale=3.0,
        out_indices=(3, 5, 7, 11),
    )
    key = jax.random.PRNGKey(0)
    pkey, xkey = jax.random.split(key)
    params = init_params(pkey, cfg)
    x = jax.random.uniform(
        xkey, (cfg['batch'], cfg['channels'], cfg['patch_size'], cfg['patch_size']),
        jnp.float32)

    fwd = jax.jit(lambda p, inp: spat_sigma_unmix_forward(p, inp, cfg))
    abunds, output = fwd(params, x)
    jax.block_until_ready((abunds, output))

    assert abunds.shape == (cfg['batch'], cfg['num_em'], cfg['patch_size'], cfg['patch_size'])
    assert output.shape == x.shape
    assert bool(jnp.allclose(jnp.sum(abunds, axis=1), 1.0, atol=1e-4))
    print("KERNEL_OK")
</pallas_src>

<mosaic_0001>
module attributes {stable_mosaic.version = 11 : i64} {
  func.func @kernel(%arg0: i32, %arg1: i32, %arg2: memref<32x64xbf16, #tpu.memory_space<vmem>>, %arg3: memref<64x96xbf16, #tpu.memory_space<vmem>>, %arg4: memref<1x96xf32, #tpu.memory_space<vmem>>, %arg5: memref<32x96xf32, #tpu.memory_space<vmem>>) attributes {dimension_semantics = [#tpu.dimension_semantics<parallel>, #tpu.dimension_semantics<parallel>], iteration_bounds = array<i64: 1, 1>, scalar_prefetch = 0 : i64, scratch_operands = 0 : i64, tpu.core_type = #tpu.core_type<tc>, window_params = [{transform_indices = @transform_0, window_bounds = array<i64: 32, 64>}, {transform_indices = @transform_1, window_bounds = array<i64: 64, 96>}, {transform_indices = @transform_2, window_bounds = array<i64: 1, 96>}, {transform_indices = @transform_3, window_bounds = array<i64: 32, 96>}]} {
    %c0 = arith.constant 0 : index
    %c0_0 = arith.constant 0 : index
    %0 = vector.load %arg2[%c0, %c0_0] : memref<32x64xbf16, #tpu.memory_space<vmem>>, vector<32x64xbf16>
    %c0_1 = arith.constant 0 : index
    %c0_2 = arith.constant 0 : index
    %1 = vector.load %arg3[%c0_1, %c0_2] : memref<64x96xbf16, #tpu.memory_space<vmem>>, vector<64x96xbf16>
    %cst = arith.constant dense<0.000000e+00> : vector<32x96xf32>
    %2 = tpu.matmul %0, %1, %cst {dimension_numbers = #tpu.dot_dimension_numbers<[1], [0], [0], [1], [0, 0, 1, 1], [], []>} : vector<32x64xbf16>, vector<64x96xbf16>, vector<32x96xf32> -> vector<32x96xf32>
    %c0_3 = arith.constant 0 : index
    %c0_4 = arith.constant 0 : index
    %3 = vector.load %arg4[%c0_3, %c0_4] : memref<1x96xf32, #tpu.memory_space<vmem>>, vector<1x96xf32>
    %4 = vector.broadcast %3 : vector<1x96xf32> to vector<32x96xf32>
    %5 = arith.addf %2, %4 : vector<32x96xf32>
    %c0_5 = arith.constant 0 : index
    %c0_6 = arith.constant 0 : index
    %6 = vector.load %arg5[%c0_5, %c0_6] : memref<32x96xf32, #tpu.memory_space<vmem>>, vector<32x96xf32>
    tpu.vector_store %arg5[%c0_5, %c0_6], %5 {strides = array<i32>} : memref<32x96xf32, #tpu.memory_space<vmem>>, vector<32x96xf32>,
    return
  }
  func.func @transform_0(%arg0: i32, %arg1: i32) -> (i32, i32) {
    %c0_i32 = arith.constant 0 : i32
    %c0_i32_0 = arith.constant 0 : i32
    return %arg0, %c0_i32 : i32, i32
  }
  func.func @transform_1(%arg0: i32, %arg1: i32) -> (i32, i32) {
    %c0_i32 = arith.constant 0 : i32
    %c0_i32_0 = arith.constant 0 : i32
    return %c0_i32, %arg1 : i32, i32
  }
  func.func @transform_2(%arg0: i32, %arg1: i32) -> (i32, i32) {
    %c0_i32 = arith.constant 0 : i32
    %c0_i32_0 = arith.constant 0 : i32
    return %c0_i32, %arg1 : i32, i32
  }
  func.func @transform_3(%arg0: i32, %arg1: i32) -> (i32, i32) {
    %c0_i32 = arith.constant 0 : i32
    return %arg0, %arg1 : i32, i32
  }
}

module attributes {stable_mosaic.version = 11 : i64} {
  func.func @kernel(%arg0: i32, %arg1: i32, %arg2: memref<32x96xf32, #tpu.memory_space<vmem>>, %arg3: memref<96x288xbf16, #tpu.memory_space<vmem>>, %arg4: memref<1x96xf32, #tpu.memory_space<vmem>>, %arg5: memref<1x96xf32, #tpu.memory_space<vmem>>, %arg6: memref<1x288xf32, #tpu.memory_space<vmem>>, %arg7: memref<32x288xf32, #tpu.memory_space<vmem>>) attributes {dimension_semantics = [#tpu.dimension_semantics<parallel>, #tpu.dimension_semantics<parallel>], iteration_bounds = array<i64: 1, 1>, scalar_prefetch = 0 : i64, scratch_operands = 0 : i64, tpu.core_type = #tpu.core_type<tc>, window_params = [{transform_indices = @transform_0, window_bounds = array<i64: 32, 96>}, {transform_indices = @transform_1, window_bounds = array<i64: 96, 288>}, {pipeline_mode = #tpu.pipeline_mode<synchronous>, transform_indices = @transform_2, window_bounds = array<i64: 1, 96>}, {pipeline_mode = #tpu.pipeline_mode<synchronous>, transform_indices = @transform_3, window_bounds = array<i64: 1, 96>}, {transform_indices = @transform_4, window_bounds = array<i64: 1, 288>}, {transform_indices = @transform_5, window_bounds = array<i64: 32, 288>}]} {
    %c0 = arith.constant 0 : index
    %c0_0 = arith.constant 0 : index
    %0 = vector.load %arg2[%c0, %c0_0] : memref<32x96xf32, #tpu.memory_space<vmem>>, vector<32x96xf32>
    %cst = arith.constant dense<0.000000e+00> : vector<32xf32>
    %1 = vector.multi_reduction <add>, %0, %cst [1] : vector<32x96xf32> to vector<32xf32>
    %2 = vector.shape_cast %1 : vector<32xf32> to vector<32x1xf32>
    %cst_1 = arith.constant 9.600000e+01 : f32
    %3 = vector.broadcast %cst_1 : f32 to vector<32x1xf32>
    %4 = arith.divf %2, %3 : vector<32x1xf32>
    %5 = vector.broadcast %4 : vector<32x1xf32> to vector<32x96xf32>
    %6 = arith.subf %0, %5 : vector<32x96xf32>
    %7 = arith.mulf %6, %6 : vector<32x96xf32>
    %cst_2 = arith.constant dense<0.000000e+00> : vector<32xf32>
    %8 = vector.multi_reduction <add>, %7, %cst_2 [1] : vector<32x96xf32> to vector<32xf32>
    %9 = vector.shape_cast %8 : vector<32xf32> to vector<32x1xf32>
    %cst_3 = arith.constant 9.600000e+01 : f32
    %10 = vector.broadcast %cst_3 : f32 to vector<32x1xf32>
    %11 = arith.divf %9, %10 : vector<32x1xf32>
    %12 = vector.broadcast %4 : vector<32x1xf32> to vector<32x96xf32>
    %13 = arith.subf %0, %12 : vector<32x96xf32>
    %cst_4 = arith.constant 9.99999997E-7 : f32
    %14 = vector.broadcast %cst_4 : f32 to vector<32x1xf32>
    %15 = arith.addf %11, %14 : vector<32x1xf32>
    %16 = math.rsqrt %15 : vector<32x1xf32>
    %17 = vector.broadcast %16 : vector<32x1xf32> to vector<32x96xf32>
    %18 = arith.mulf %13, %17 : vector<32x96xf32>
    %c0_5 = arith.constant 0 : index
    %c0_6 = arith.constant 0 : index
    %19 = vector.load %arg4[%c0_5, %c0_6] : memref<1x96xf32, #tpu.memory_space<vmem>>, vector<1x96xf32>
    %20 = vector.broadcast %19 : vector<1x96xf32> to vector<32x96xf32>
    %21 = arith.mulf %18, %20 : vector<32x96xf32>
    %c0_7 = arith.constant 0 : index
    %c0_8 = arith.constant 0 : index
    %22 = vector.load %arg5[%c0_7, %c0_8] : memref<1x96xf32, #tpu.memory_space<vmem>>, vector<1x96xf32>
    %23 = vector.broadcast %22 : vector<1x96xf32> to vector<32x96xf32>
    %24 = arith.addf %21, %23 : vector<32x96xf32>
    %25 = arith.truncf %24 : vector<32x96xf32> to vector<32x96xbf16>
    %c0_9 = arith.constant 0 : index
    %c0_10 = arith.constant 0 : index
    %26 = vector.load %arg3[%c0_9, %c0_10] : memref<96x288xbf16, #tpu.memory_space<vmem>>, vector<96x288xbf16>
    %cst_11 = arith.constant dense<0.000000e+00> : vector<32x288xf32>
    %27 = tpu.matmul %25, %26, %cst_11 {dimension_numbers = #tpu.dot_dimension_numbers<[1], [0], [0], [1], [0, 0, 1, 1], [], []>} : vector<32x96xbf16>, vector<96x288xbf16>, vector<32x288xf32> -> vector<32x288xf32>
    %c0_12 = arith.constant 0 : index
    %c0_13 = arith.constant 0 : index
    %28 = vector.load %arg6[%c0_12, %c0_13] : memref<1x288xf32, #tpu.memory_space<vmem>>, vector<1x288xf32>
    %29 = vector.broadcast %28 : vector<1x288xf32> to vector<32x288xf32>
    %30 = arith.addf %27, %29 : vector<32x288xf32>
    %c0_14 = arith.constant 0 : index
    %c0_15 = arith.constant 0 : index
    %31 = vector.load %arg7[%c0_14, %c0_15] : memref<32x288xf32, #tpu.memory_space<vmem>>, vector<32x288xf32>
    tpu.vector_store %arg7[%c0_14, %c0_15], %30 {strides = array<i32>} : memref<32x288xf32, #tpu.memory_space<vmem>>, vector<32x288xf32>,
    return
  }
  func.func @transform_0(%arg0: i32, %arg1: i32) -> (i32, i32) {
    %c0_i32 = arith.constant 0 : i32
    %c0_i32_0 = arith.constant 0 : i32
    return %arg0, %c0_i32 : i32, i32
  }
  func.func @transform_1(%arg0: i32, %arg1: i32) -> (i32, i32) {
    %c0_i32 = arith.constant 0 : i32
    %c0_i32_0 = arith.constant 0 : i32
    return %c0_i32, %arg1 : i32, i32
  }
  func.func @transform_2(%arg0: i32, %arg1: i32) -> (i32, i32) {
    %c0_i32 = arith.constant 0 : i32
    %c0_i32_0 = arith.constant 0 : i32
    %c0_i32_1 = arith.constant 0 : i32
    return %c0_i32, %c0_i32_0 : i32, i32
  }
  func.func @transform_3(%arg0: i32, %arg1: i32) -> (i32, i32) {
    %c0_i32 = arith.constant 0 : i32
    %c0_i32_0 = arith.constant 0 : i32
    %c0_i32_1 = arith.constant 0 : i32
    return %c0_i32, %c0_i32_0 : i32, i32
  }
  func.func @transform_4(%arg0: i32, %arg1: i32) -> (i32, i32) {
    %c0_i32 = arith.constant 0 : i32
    %c0_i32_0 = arith.constant 0 : i32
    return %c0_i32, %arg1 : i32, i32
  }
  func.func @transform_5(%arg0: i32, %arg1: i32) -> (i32, i32) {
    %c0_i32 = arith.constant 0 : i32
    return %arg0, %arg1 : i32, i32
  }
}

module attributes {stable_mosaic.version = 11 : i64} {
  func.func @_attn_kernel(%arg0: i32, %arg1: memref<8x16x8xbf16, #tpu.memory_space<vmem>>, %arg2: memref<8x16x8xbf16, #tpu.memory_space<vmem>>, %arg3: memref<8x16x8xbf16, #tpu.memory_space<vmem>>, %arg4: memref<8x16x8xf32, #tpu.memory_space<vmem>>) attributes {dimension_semantics = [#tpu.dimension_semantics<parallel>], iteration_bounds = array<i64: 3>, scalar_prefetch = 0 : i64, scratch_operands = 0 : i64, tpu.core_type = #tpu.core_type<tc>, window_params = [{transform_indices = @transform_0, window_bounds = array<i64: 8, 16, 8>}, {transform_indices = @transform_1, window_bounds = array<i64: 8, 16, 8>}, {transform_indices = @transform_2, window_bounds = array<i64: 8, 16, 8>}, {transform_indices = @transform_3, window_bounds = array<i64: 8, 16, 8>}]} {
    %c0 = arith.constant 0 : index
    %c0_0 = arith.constant 0 : index
    %c0_1 = arith.constant 0 : index
    %0 = vector.load %arg1[%c0, %c0_0, %c0_1] : memref<8x16x8xbf16, #tpu.memory_space<vmem>>, vector<8x16x8xbf16>
    %c0_2 = arith.constant 0 : index
    %c0_3 = arith.constant 0 : index
    %c0_4 = arith.constant 0 : index
    %1 = vector.load %arg2[%c0_2, %c0_3, %c0_4] : memref<8x16x8xbf16, #tpu.memory_space<vmem>>, vector<8x16x8xbf16>
    %c0_5 = arith.constant 0 : index
    %c0_6 = arith.constant 0 : index
    %c0_7 = arith.constant 0 : index
    %2 = vector.load %arg3[%c0_5, %c0_6, %c0_7] : memref<8x16x8xbf16, #tpu.memory_space<vmem>>, vector<8x16x8xbf16>
    "tpu.trace_start"() <{level = 10 : i32, message = "gqd,gkd->gqk"}> : () -> ()
    %cst = arith.constant dense<0.000000e+00> : vector<8x16x16xf32>
    %3 = tpu.matmul %0, %1, %cst {dimension_numbers = #tpu.dot_dimension_numbers<[2], [2], [1], [1], [0, 0, 0, 1, 1, 1], [0], [0]>} : vector<8x16x8xbf16>, vector<8x16x8xbf16>, vector<8x16x16xf32> -> vector<8x16x16xf32>
    "tpu.trace_stop"() : () -> ()
    %cst_8 = arith.constant 0.353553385 : f32
    %4 = vector.broadcast %cst_8 : f32 to vector<8x16x16xf32>
    %5 = arith.mulf %3, %4 : vector<8x16x16xf32>
    %cst_9 = arith.constant dense<0xFF800000> : vector<8x16xf32>
    %6 = vector.multi_reduction <maximumf>, %5, %cst_9 [2] : vector<8x16x16xf32> to vector<8x16xf32>
    %7 = vector.shape_cast %6 : vector<8x16xf32> to vector<8x16x1xf32>
    %8 = vector.broadcast %7 : vector<8x16x1xf32> to vector<8x16x16xf32>
    %9 = arith.subf %5, %8 : vector<8x16x16xf32>
    %10 = math.exp %9 : vector<8x16x16xf32>
    %cst_10 = arith.constant dense<0.000000e+00> : vector<8x16xf32>
    %11 = vector.multi_reduction <add>, %10, %cst_10 [2] : vector<8x16x16xf32> to vector<8x16xf32>
    %12 = vector.shape_cast %11 : vector<8x16xf32> to vector<8x16x1xf32>
    %13 = vector.broadcast %12 : vector<8x16x1xf32> to vector<8x16x16xf32>
    %14 = arith.divf %10, %13 : vector<8x16x16xf32>
    %15 = arith.truncf %14 : vector<8x16x16xf32> to vector<8x16x16xbf16>
    "tpu.trace_start"() <{level = 10 : i32, message = "gqk,gkd->gqd"}> : () -> ()
    %cst_11 = arith.constant dense<0.000000e+00> : vector<8x16x8xf32>
    %16 = tpu.matmul %15, %2, %cst_11 {dimension_numbers = #tpu.dot_dimension_numbers<[2], [1], [1], [2], [0, 0, 0, 1, 1, 2], [0], [0]>} : vector<8x16x16xbf16>, vector<8x16x8xbf16>, vector<8x16x8xf32> -> vector<8x16x8xf32>
    "tpu.trace_stop"() : () -> ()
    %c0_12 = arith.constant 0 : index
    %c0_13 = arith.constant 0 : index
    %c0_14 = arith.constant 0 : index
    %17 = vector.load %arg4[%c0_12, %c0_13, %c0_14] : memref<8x16x8xf32, #tpu.memory_space<vmem>>, vector<8x16x8xf32>
    tpu.vector_store %arg4[%c0_12, %c0_13, %c0_14], %16 {strides = array<i32>} : memref<8x16x8xf32, #tpu.memory_space<vmem>>, vector<8x16x8xf32>,
    return
  }
  func.func @transform_0(%arg0: i32) -> (i32, i32, i32) {
    %c0_i32 = arith.constant 0 : i32
    %c0_i32_0 = arith.constant 0 : i32
    %c0_i32_1 = arith.constant 0 : i32
    return %arg0, %c0_i32, %c0_i32_0 : i32, i32, i32
  }
  func.func @transform_1(%arg0: i32) -> (i32, i32, i32) {
    %c0_i32 = arith.constant 0 : i32
    %c0_i32_0 = arith.constant 0 : i32
    %c0_i32_1 = arith.constant 0 : i32
    return %arg0, %c0_i32, %c0_i32_0 : i32, i32, i32
  }
  func.func @transform_2(%arg0: i32) -> (i32, i32, i32) {
    %c0_i32 = arith.constant 0 : i32
    %c0_i32_0 = arith.constant 0 : i32
    %c0_i32_1 = arith.constant 0 : i32
    return %arg0, %c0_i32, %c0_i32_0 : i32, i32, i32
  }
  func.func @transform_3(%arg0: i32) -> (i32, i32, i32) {
    %c0_i32 = arith.constant 0 : i32
    %c0_i32_0 = arith.constant 0 : i32
    %c0_i32_1 = arith.constant 0 : i32
    return %arg0, %c0_i32, %c0_i32_0 : i32, i32, i32
  }
}

module attributes {stable_mosaic.version = 11 : i64} {
  func.func @kernel(%arg0: i32, %arg1: i32, %arg2: memref<32x96xbf16, #tpu.memory_space<vmem>>, %arg3: memref<96x96xbf16, #tpu.memory_space<vmem>>, %arg4: memref<1x96xf32, #tpu.memory_space<vmem>>, %arg5: memref<32x96xf32, #tpu.memory_space<vmem>>, %arg6: memref<32x96xf32, #tpu.memory_space<vmem>>) attributes {dimension_semantics = [#tpu.dimension_semantics<parallel>, #tpu.dimension_semantics<parallel>], iteration_bounds = array<i64: 1, 1>, scalar_prefetch = 0 : i64, scratch_operands = 0 : i64, tpu.core_type = #tpu.core_type<tc>, window_params = [{transform_indices = @transform_0, window_bounds = array<i64: 32, 96>}, {transform_indices = @transform_1, window_bounds = array<i64: 96, 96>}, {transform_indices = @transform_2, window_bounds = array<i64: 1, 96>}, {transform_indices = @transform_3, window_bounds = array<i64: 32, 96>}, {transform_indices = @transform_4, window_bounds = array<i64: 32, 96>}]} {
    %c0 = arith.constant 0 : index
    %c0_0 = arith.constant 0 : index
    %0 = vector.load %arg2[%c0, %c0_0] : memref<32x96xbf16, #tpu.memory_space<vmem>>, vector<32x96xbf16>
    %c0_1 = arith.constant 0 : index
    %c0_2 = arith.constant 0 : index
    %1 = vector.load %arg3[%c0_1, %c0_2] : memref<96x96xbf16, #tpu.memory_space<vmem>>, vector<96x96xbf16>
    %cst = arith.constant dense<0.000000e+00> : vector<32x96xf32>
    %2 = tpu.matmul %0, %1, %cst {dimension_numbers = #tpu.dot_dimension_numbers<[1], [0], [0], [1], [0, 0, 1, 1], [], []>} : vector<32x96xbf16>, vector<96x96xbf16>, vector<32x96xf32> -> vector<32x96xf32>
    %c0_3 = arith.constant 0 : index
    %c0_4 = arith.constant 0 : index
    %3 = vector.load %arg4[%c0_3, %c0_4] : memref<1x96xf32, #tpu.memory_space<vmem>>, vector<1x96xf32>
    %4 = vector.broadcast %3 : vector<1x96xf32> to vector<32x96xf32>
    %5 = arith.addf %2, %4 : vector<32x96xf32>
    %c0_5 = arith.constant 0 : index
    %c0_6 = arith.constant 0 : index
    %6 = vector.load %arg5[%c0_5, %c0_6] : memref<32x96xf32, #tpu.memory_space<vmem>>, vector<32x96xf32>
    %7 = arith.addf %5, %6 : vector<32x96xf32>
    %c0_7 = arith.constant 0 : index
    %c0_8 = arith.constant 0 : index
    %8 = vector.load %arg6[%c0_7, %c0_8] : memref<32x96xf32, #tpu.memory_space<vmem>>, vector<32x96xf32>
    tpu.vector_store %arg6[%c0_7, %c0_8], %7 {strides = array<i32>} : memref<32x96xf32, #tpu.memory_space<vmem>>, vector<32x96xf32>,
    return
  }
  func.func @transform_0(%arg0: i32, %arg1: i32) -> (i32, i32) {
    %c0_i32 = arith.constant 0 : i32
    %c0_i32_0 = arith.constant 0 : i32
    return %arg0, %c0_i32 : i32, i32
  }
  func.func @transform_1(%arg0: i32, %arg1: i32) -> (i32, i32) {
    %c0_i32 = arith.constant 0 : i32
    %c0_i32_0 = arith.constant 0 : i32
    return %c0_i32, %arg1 : i32, i32
  }
  func.func @transform_2(%arg0: i32, %arg1: i32) -> (i32, i32) {
    %c0_i32 = arith.constant 0 : i32
    %c0_i32_0 = arith.constant 0 : i32
    return %c0_i32, %arg1 : i32, i32
  }
  func.func @transform_3(%arg0: i32, %arg1: i32) -> (i32, i32) {
    %c0_i32 = arith.constant 0 : i32
    return %arg0, %arg1 : i32, i32
  }
  func.func @transform_4(%arg0: i32, %arg1: i32) -> (i32, i32) {
    %c0_i32 = arith.constant 0 : i32
    return %arg0, %arg1 : i32, i32
  }
}

module attributes {stable_mosaic.version = 11 : i64} {
  func.func @kernel(%arg0: i32, %arg1: i32, %arg2: memref<32x96xf32, #tpu.memory_space<vmem>>, %arg3: memref<96x384xbf16, #tpu.memory_space<vmem>>, %arg4: memref<1x96xf32, #tpu.memory_space<vmem>>, %arg5: memref<1x96xf32, #tpu.memory_space<vmem>>, %arg6: memref<1x384xf32, #tpu.memory_space<vmem>>, %arg7: memref<32x384xf32, #tpu.memory_space<vmem>>) attributes {dimension_semantics = [#tpu.dimension_semantics<parallel>, #tpu.dimension_semantics<parallel>], iteration_bounds = array<i64: 1, 1>, scalar_prefetch = 0 : i64, scratch_operands = 0 : i64, tpu.core_type = #tpu.core_type<tc>, window_params = [{transform_indices = @transform_0, window_bounds = array<i64: 32, 96>}, {transform_indices = @transform_1, window_bounds = array<i64: 96, 384>}, {pipeline_mode = #tpu.pipeline_mode<synchronous>, transform_indices = @transform_2, window_bounds = array<i64: 1, 96>}, {pipeline_mode = #tpu.pipeline_mode<synchronous>, transform_indices = @transform_3, window_bounds = array<i64: 1, 96>}, {transform_indices = @transform_4, window_bounds = array<i64: 1, 384>}, {transform_indices = @transform_5, window_bounds = array<i64: 32, 384>}]} {
    %c0 = arith.constant 0 : index
    %c0_0 = arith.constant 0 : index
    %0 = vector.load %arg2[%c0, %c0_0] : memref<32x96xf32, #tpu.memory_space<vmem>>, vector<32x96xf32>
    %cst = arith.constant dense<0.000000e+00> : vector<32xf32>
    %1 = vector.multi_reduction <add>, %0, %cst [1] : vector<32x96xf32> to vector<32xf32>
    %2 = vector.shape_cast %1 : vector<32xf32> to vector<32x1xf32>
    %cst_1 = arith.constant 9.600000e+01 : f32
    %3 = vector.broadcast %cst_1 : f32 to vector<32x1xf32>
    %4 = arith.divf %2, %3 : vector<32x1xf32>
    %5 = vector.broadcast %4 : vector<32x1xf32> to vector<32x96xf32>
    %6 = arith.subf %0, %5 : vector<32x96xf32>
    %7 = arith.mulf %6, %6 : vector<32x96xf32>
    %cst_2 = arith.constant dense<0.000000e+00> : vector<32xf32>
    %8 = vector.multi_reduction <add>, %7, %cst_2 [1] : vector<32x96xf32> to vector<32xf32>
    %9 = vector.shape_cast %8 : vector<32xf32> to vector<32x1xf32>
    %cst_3 = arith.constant 9.600000e+01 : f32
    %10 = vector.broadcast %cst_3 : f32 to vector<32x1xf32>
    %11 = arith.divf %9, %10 : vector<32x1xf32>
    %12 = vector.broadcast %4 : vector<32x1xf32> to vector<32x96xf32>
    %13 = arith.subf %0, %12 : vector<32x96xf32>
    %cst_4 = arith.constant 9.99999997E-7 : f32
    %14 = vector.broadcast %cst_4 : f32 to vector<32x1xf32>
    %15 = arith.addf %11, %14 : vector<32x1xf32>
    %16 = math.rsqrt %15 : vector<32x1xf32>
    %17 = vector.broadcast %16 : vector<32x1xf32> to vector<32x96xf32>
    %18 = arith.mulf %13, %17 : vector<32x96xf32>
    %c0_5 = arith.constant 0 : index
    %c0_6 = arith.constant 0 : index
    %19 = vector.load %arg4[%c0_5, %c0_6] : memref<1x96xf32, #tpu.memory_space<vmem>>, vector<1x96xf32>
    %20 = vector.broadcast %19 : vector<1x96xf32> to vector<32x96xf32>
    %21 = arith.mulf %18, %20 : vector<32x96xf32>
    %c0_7 = arith.constant 0 : index
    %c0_8 = arith.constant 0 : index
    %22 = vector.load %arg5[%c0_7, %c0_8] : memref<1x96xf32, #tpu.memory_space<vmem>>, vector<1x96xf32>
    %23 = vector.broadcast %22 : vector<1x96xf32> to vector<32x96xf32>
    %24 = arith.addf %21, %23 : vector<32x96xf32>
    %25 = arith.truncf %24 : vector<32x96xf32> to vector<32x96xbf16>
    %c0_9 = arith.constant 0 : index
    %c0_10 = arith.constant 0 : index
    %26 = vector.load %arg3[%c0_9, %c0_10] : memref<96x384xbf16, #tpu.memory_space<vmem>>, vector<96x384xbf16>
    %cst_11 = arith.constant dense<0.000000e+00> : vector<32x384xf32>
    %27 = tpu.matmul %25, %26, %cst_11 {dimension_numbers = #tpu.dot_dimension_numbers<[1], [0], [0], [1], [0, 0, 1, 1], [], []>} : vector<32x96xbf16>, vector<96x384xbf16>, vector<32x384xf32> -> vector<32x384xf32>
    %c0_12 = arith.constant 0 : index
    %c0_13 = arith.constant 0 : index
    %28 = vector.load %arg6[%c0_12, %c0_13] : memref<1x384xf32, #tpu.memory_space<vmem>>, vector<1x384xf32>
    %29 = vector.broadcast %28 : vector<1x384xf32> to vector<32x384xf32>
    %30 = arith.addf %27, %29 : vector<32x384xf32>
    %cst_14 = arith.constant 5.000000e-01 : f32
    %31 = vector.broadcast %cst_14 : f32 to vector<32x384xf32>
    %32 = arith.mulf %31, %30 : vector<32x384xf32>
    %cst_15 = arith.constant 4.471500e-02 : f32
    %33 = vector.broadcast %cst_15 : f32 to vector<32x384xf32>
    %34 = arith.mulf %33, %30 : vector<32x384xf32>
    %35 = arith.mulf %34, %30 : vector<32x384xf32>
    %36 = arith.mulf %35, %30 : vector<32x384xf32>
    %37 = arith.addf %30, %36 : vector<32x384xf32>
    %cst_16 = arith.constant 0.797884583 : f32
    %38 = vector.broadcast %cst_16 : f32 to vector<32x384xf32>
    %39 = arith.mulf %38, %37 : vector<32x384xf32>
    %40 = math.tanh %39 : vector<32x384xf32>
    %cst_17 = arith.constant 1.000000e+00 : f32
    %41 = vector.broadcast %cst_17 : f32 to vector<32x384xf32>
    %42 = arith.addf %41, %40 : vector<32x384xf32>
    %43 = arith.mulf %32, %42 : vector<32x384xf32>
    %c0_18 = arith.constant 0 : index
    %c0_19 = arith.constant 0 : index
    %44 = vector.load %arg7[%c0_18, %c0_19] : memref<32x384xf32, #tpu.memory_space<vmem>>, vector<32x384xf32>
    tpu.vector_store %arg7[%c0_18, %c0_19], %43 {strides = array<i32>} : memref<32x384xf32, #tpu.memory_space<vmem>>, vector<32x384xf32>,
    return
  }
  func.func @transform_0(%arg0: i32, %arg1: i32) -> (i32, i32) {
    %c0_i32 = arith.constant 0 : i32
    %c0_i32_0 = arith.constant 0 : i32
    return %arg0, %c0_i32 : i32, i32
  }
  func.func @transform_1(%arg0: i32, %arg1: i32) -> (i32, i32) {
    %c0_i32 = arith.constant 0 : i32
    %c0_i32_0 = arith.constant 0 : i32
    return %c0_i32, %arg1 : i32, i32
  }
  func.func @transform_2(%arg0: i32, %arg1: i32) -> (i32, i32) {
    %c0_i32 = arith.constant 0 : i32
    %c0_i32_0 = arith.constant 0 : i32
    %c0_i32_1 = arith.constant 0 : i32
    return %c0_i32, %c0_i32_0 : i32, i32
  }
  func.func @transform_3(%arg0: i32, %arg1: i32) -> (i32, i32) {
    %c0_i32 = arith.constant 0 : i32
    %c0_i32_0 = arith.constant 0 : i32
    %c0_i32_1 = arith.constant 0 : i32
    return %c0_i32, %c0_i32_0 : i32, i32
  }
  func.func @transform_4(%arg0: i32, %arg1: i32) -> (i32, i32) {
    %c0_i32 = arith.constant 0 : i32
    %c0_i32_0 = arith.constant 0 : i32
    return %c0_i32, %arg1 : i32, i32
  }
  func.func @transform_5(%arg0: i32, %arg1: i32) -> (i32, i32) {
    %c0_i32 = arith.constant 0 : i32
    return %arg0, %arg1 : i32, i32
  }
}

module attributes {stable_mosaic.version = 11 : i64} {
  func.func @kernel(%arg0: i32, %arg1: i32, %arg2: memref<32x384xbf16, #tpu.memory_space<vmem>>, %arg3: memref<384x96xbf16, #tpu.memory_space<vmem>>, %arg4: memref<1x96xf32, #tpu.memory_space<vmem>>, %arg5: memref<32x96xf32, #tpu.memory_space<vmem>>, %arg6: memref<32x96xf32, #tpu.memory_space<vmem>>) attributes {dimension_semantics = [#tpu.dimension_semantics<parallel>, #tpu.dimension_semantics<parallel>], iteration_bounds = array<i64: 1, 1>, scalar_prefetch = 0 : i64, scratch_operands = 0 : i64, tpu.core_type = #tpu.core_type<tc>, window_params = [{transform_indices = @transform_0, window_bounds = array<i64: 32, 384>}, {transform_indices = @transform_1, window_bounds = array<i64: 384, 96>}, {transform_indices = @transform_2, window_bounds = array<i64: 1, 96>}, {transform_indices = @transform_3, window_bounds = array<i64: 32, 96>}, {transform_indices = @transform_4, window_bounds = array<i64: 32, 96>}]} {
    %c0 = arith.constant 0 : index
    %c0_0 = arith.constant 0 : index
    %0 = vector.load %arg2[%c0, %c0_0] : memref<32x384xbf16, #tpu.memory_space<vmem>>, vector<32x384xbf16>
    %c0_1 = arith.constant 0 : index
    %c0_2 = arith.constant 0 : index
    %1 = vector.load %arg3[%c0_1, %c0_2] : memref<384x96xbf16, #tpu.memory_space<vmem>>, vector<384x96xbf16>
    %cst = arith.constant dense<0.000000e+00> : vector<32x96xf32>
    %2 = tpu.matmul %0, %1, %cst {dimension_numbers = #tpu.dot_dimension_numbers<[1], [0], [0], [1], [0, 0, 1, 1], [], []>} : vector<32x384xbf16>, vector<384x96xbf16>, vector<32x96xf32> -> vector<32x96xf32>
    %c0_3 = arith.constant 0 : index
    %c0_4 = arith.constant 0 : index
    %3 = vector.load %arg4[%c0_3, %c0_4] : memref<1x96xf32, #tpu.memory_space<vmem>>, vector<1x96xf32>
    %4 = vector.broadcast %3 : vector<1x96xf32> to vector<32x96xf32>
    %5 = arith.addf %2, %4 : vector<32x96xf32>
    %c0_5 = arith.constant 0 : index
    %c0_6 = arith.constant 0 : index
    %6 = vector.load %arg5[%c0_5, %c0_6] : memref<32x96xf32, #tpu.memory_space<vmem>>, vector<32x96xf32>
    %7 = arith.addf %5, %6 : vector<32x96xf32>
    %c0_7 = arith.constant 0 : index
    %c0_8 = arith.constant 0 : index
    %8 = vector.load %arg6[%c0_7, %c0_8] : memref<32x96xf32, #tpu.memory_space<vmem>>, vector<32x96xf32>
    tpu.vector_store %arg6[%c0_7, %c0_8], %7 {strides = array<i32>} : memref<32x96xf32, #tpu.memory_space<vmem>>, vector<32x96xf32>,
    return
  }
  func.func @transform_0(%arg0: i32, %arg1: i32) -> (i32, i32) {
    %c0_i32 = arith.constant 0 : i32
    %c0_i32_0 = arith.constant 0 : i32
    return %arg0, %c0_i32 : i32, i32
  }
  func.func @transform_1(%arg0: i32, %arg1: i32) -> (i32, i32) {
    %c0_i32 = arith.constant 0 : i32
    %c0_i32_0 = arith.constant 0 : i32
    return %c0_i32, %arg1 : i32, i32
  }
  func.func @transform_2(%arg0: i32, %arg1: i32) -> (i32, i32) {
    %c0_i32 = arith.constant 0 : i32
    %c0_i32_0 = arith.constant 0 : i32
    return %c0_i32, %arg1 : i32, i32
  }
  func.func @transform_3(%arg0: i32, %arg1: i32) -> (i32, i32) {
    %c0_i32 = arith.constant 0 : i32
    return %arg0, %arg1 : i32, i32
  }
  func.func @transform_4(%arg0: i32, %arg1: i32) -> (i32, i32) {
    %c0_i32 = arith.constant 0 : i32
    return %arg0, %arg1 : i32, i32
  }
}

module attributes {stable_mosaic.version = 11 : i64} {
  func.func @kernel(%arg0: i32, %arg1: i32, %arg2: memref<32x96xbf16, #tpu.memory_space<vmem>>, %arg3: memref<96x32xbf16, #tpu.memory_space<vmem>>, %arg4: memref<32x32xf32, #tpu.memory_space<vmem>>) attributes {dimension_semantics = [#tpu.dimension_semantics<parallel>, #tpu.dimension_semantics<parallel>], iteration_bounds = array<i64: 1, 1>, scalar_prefetch = 0 : i64, scratch_operands = 0 : i64, tpu.core_type = #tpu.core_type<tc>, window_params = [{transform_indices = @transform_0, window_bounds = array<i64: 32, 96>}, {transform_indices = @transform_1, window_bounds = array<i64: 96, 32>}, {transform_indices = @transform_2, window_bounds = array<i64: 32, 32>}]} {
    %c0 = arith.constant 0 : index
    %c0_0 = arith.constant 0 : index
    %0 = vector.load %arg2[%c0, %c0_0] : memref<32x96xbf16, #tpu.memory_space<vmem>>, vector<32x96xbf16>
    %c0_1 = arith.constant 0 : index
    %c0_2 = arith.constant 0 : index
    %1 = vector.load %arg3[%c0_1, %c0_2] : memref<96x32xbf16, #tpu.memory_space<vmem>>, vector<96x32xbf16>
    %cst = arith.constant dense<0.000000e+00> : vector<32x32xf32>
    %2 = tpu.matmul %0, %1, %cst {dimension_numbers = #tpu.dot_dimension_numbers<[1], [0], [0], [1], [0, 0, 1, 1], [], []>} : vector<32x96xbf16>, vector<96x32xbf16>, vector<32x32xf32> -> vector<32x32xf32>
    %c0_3 = arith.constant 0 : index
    %c0_4 = arith.constant 0 : index
    %3 = vector.load %arg4[%c0_3, %c0_4] : memref<32x32xf32, #tpu.memory_space<vmem>>, vector<32x32xf32>
    tpu.vector_store %arg4[%c0_3, %c0_4], %2 {strides = array<i32>} : memref<32x32xf32, #tpu.memory_space<vmem>>, vector<32x32xf32>,
    return
  }
  func.func @transform_0(%arg0: i32, %arg1: i32) -> (i32, i32) {
    %c0_i32 = arith.constant 0 : i32
    %c0_i32_0 = arith.constant 0 : i32
    return %arg0, %c0_i32 : i32, i32
  }
  func.func @transform_1(%arg0: i32, %arg1: i32) -> (i32, i32) {
    %c0_i32 = arith.constant 0 : i32
    %c0_i32_0 = arith.constant 0 : i32
    return %c0_i32, %arg1 : i32, i32
  }
  func.func @transform_2(%arg0: i32, %arg1: i32) -> (i32, i32) {
    %c0_i32 = arith.constant 0 : i32
    return %arg0, %arg1 : i32, i32
  }
}

module attributes {stable_mosaic.version = 11 : i64} {
  func.func @kernel(%arg0: i32, %arg1: i32, %arg2: memref<32x288xbf16, #tpu.memory_space<vmem>>, %arg3: memref<288x32xbf16, #tpu.memory_space<vmem>>, %arg4: memref<1x32xf32, #tpu.memory_space<vmem>>, %arg5: memref<1x32xf32, #tpu.memory_space<vmem>>, %arg6: memref<1x32xf32, #tpu.memory_space<vmem>>, %arg7: memref<32x32xf32, #tpu.memory_space<vmem>>) attributes {dimension_semantics = [#tpu.dimension_semantics<parallel>, #tpu.dimension_semantics<parallel>], iteration_bounds = array<i64: 1, 1>, scalar_prefetch = 0 : i64, scratch_operands = 0 : i64, tpu.core_type = #tpu.core_type<tc>, window_params = [{transform_indices = @transform_0, window_bounds = array<i64: 32, 288>}, {transform_indices = @transform_1, window_bounds = array<i64: 288, 32>}, {transform_indices = @transform_2, window_bounds = array<i64: 1, 32>}, {transform_indices = @transform_3, window_bounds = array<i64: 1, 32>}, {transform_indices = @transform_4, window_bounds = array<i64: 1, 32>}, {transform_indices = @transform_5, window_bounds = array<i64: 32, 32>}]} {
    %c0 = arith.constant 0 : index
    %c0_0 = arith.constant 0 : index
    %0 = vector.load %arg2[%c0, %c0_0] : memref<32x288xbf16, #tpu.memory_space<vmem>>, vector<32x288xbf16>
    %c0_1 = arith.constant 0 : index
    %c0_2 = arith.constant 0 : index
    %1 = vector.load %arg3[%c0_1, %c0_2] : memref<288x32xbf16, #tpu.memory_space<vmem>>, vector<288x32xbf16>
    %cst = arith.constant dense<0.000000e+00> : vector<32x32xf32>
    %2 = tpu.matmul %0, %1, %cst {dimension_numbers = #tpu.dot_dimension_numbers<[1], [0], [0], [1], [0, 0, 1, 1], [], []>} : vector<32x288xbf16>, vector<288x32xbf16>, vector<32x32xf32> -> vector<32x32xf32>
    %c0_3 = arith.constant 0 : index
    %c0_4 = arith.constant 0 : index
    %3 = vector.load %arg4[%c0_3, %c0_4] : memref<1x32xf32, #tpu.memory_space<vmem>>, vector<1x32xf32>
    %4 = vector.broadcast %3 : vector<1x32xf32> to vector<32x32xf32>
    %5 = arith.addf %2, %4 : vector<32x32xf32>
    %cst_5 = arith.constant 0.000000e+00 : f32
    %6 = vector.broadcast %cst_5 : f32 to vector<32x32xf32>
    %7 = arith.cmpf oge, %5, %6 : vector<32x32xf32>
    %cst_6 = arith.constant 2.000000e-02 : f32
    %8 = vector.broadcast %cst_6 : f32 to vector<32x32xf32>
    %9 = arith.mulf %8, %5 : vector<32x32xf32>
    %10 = arith.select %7, %5, %9 : vector<32x32xi1>, vector<32x32xf32>
    %c0_7 = arith.constant 0 : index
    %c0_8 = arith.constant 0 : index
    %11 = vector.load %arg5[%c0_7, %c0_8] : memref<1x32xf32, #tpu.memory_space<vmem>>, vector<1x32xf32>
    %12 = vector.broadcast %11 : vector<1x32xf32> to vector<32x32xf32>
    %13 = arith.mulf %10, %12 : vector<32x32xf32>
    %c0_9 = arith.constant 0 : index
    %c0_10 = arith.constant 0 : index
    %14 = vector.load %arg6[%c0_9, %c0_10] : memref<1x32xf32, #tpu.memory_space<vmem>>, vector<1x32xf32>
    %15 = vector.broadcast %14 : vector<1x32xf32> to vector<32x32xf32>
    %16 = arith.addf %13, %15 : vector<32x32xf32>
    %c0_11 = arith.constant 0 : index
    %c0_12 = arith.constant 0 : index
    %17 = vector.load %arg7[%c0_11, %c0_12] : memref<32x32xf32, #tpu.memory_space<vmem>>, vector<32x32xf32>
    tpu.vector_store %arg7[%c0_11, %c0_12], %16 {strides = array<i32>} : memref<32x32xf32, #tpu.memory_space<vmem>>, vector<32x32xf32>,
    return
  }
  func.func @transform_0(%arg0: i32, %arg1: i32) -> (i32, i32) {
    %c0_i32 = arith.constant 0 : i32
    %c0_i32_0 = arith.constant 0 : i32
    return %arg0, %c0_i32 : i32, i32
  }
  func.func @transform_1(%arg0: i32, %arg1: i32) -> (i32, i32) {
    %c0_i32 = arith.constant 0 : i32
    %c0_i32_0 = arith.constant 0 : i32
    return %c0_i32, %arg1 : i32, i32
  }
  func.func @transform_2(%arg0: i32, %arg1: i32) -> (i32, i32) {
    %c0_i32 = arith.constant 0 : i32
    %c0_i32_0 = arith.constant 0 : i32
    return %c0_i32, %arg1 : i32, i32
  }
  func.func @transform_3(%arg0: i32, %arg1: i32) -> (i32, i32) {
    %c0_i32 = arith.constant 0 : i32
    %c0_i32_0 = arith.constant 0 : i32
    return %c0_i32, %arg1 : i32, i32
  }
  func.func @transform_4(%arg0: i32, %arg1: i32) -> (i32, i32) {
    %c0_i32 = arith.constant 0 : i32
    %c0_i32_0 = arith.constant 0 : i32
    return %c0_i32, %arg1 : i32, i32
  }
  func.func @transform_5(%arg0: i32, %arg1: i32) -> (i32, i32) {
    %c0_i32 = arith.constant 0 : i32
    return %arg0, %arg1 : i32, i32
  }
}

module attributes {stable_mosaic.version = 11 : i64} {
  func.func @kernel(%arg0: i32, %arg1: i32, %arg2: memref<32x96xbf16, #tpu.memory_space<vmem>>, %arg3: memref<96x32xbf16, #tpu.memory_space<vmem>>, %arg4: memref<1x32xf32, #tpu.memory_space<vmem>>, %arg5: memref<1x32xf32, #tpu.memory_space<vmem>>, %arg6: memref<1x32xf32, #tpu.memory_space<vmem>>, %arg7: memref<32x32xf32, #tpu.memory_space<vmem>>) attributes {dimension_semantics = [#tpu.dimension_semantics<parallel>, #tpu.dimension_semantics<parallel>], iteration_bounds = array<i64: 1, 1>, scalar_prefetch = 0 : i64, scratch_operands = 0 : i64, tpu.core_type = #tpu.core_type<tc>, window_params = [{transform_indices = @transform_0, window_bounds = array<i64: 32, 96>}, {transform_indices = @transform_1, window_bounds = array<i64: 96, 32>}, {transform_indices = @transform_2, window_bounds = array<i64: 1, 32>}, {transform_indices = @transform_3, window_bounds = array<i64: 1, 32>}, {transform_indices = @transform_4, window_bounds = array<i64: 1, 32>}, {transform_indices = @transform_5, window_bounds = array<i64: 32, 32>}]} {
    %c0 = arith.constant 0 : index
    %c0_0 = arith.constant 0 : index
    %0 = vector.load %arg2[%c0, %c0_0] : memref<32x96xbf16, #tpu.memory_space<vmem>>, vector<32x96xbf16>
    %c0_1 = arith.constant 0 : index
    %c0_2 = arith.constant 0 : index
    %1 = vector.load %arg3[%c0_1, %c0_2] : memref<96x32xbf16, #tpu.memory_space<vmem>>, vector<96x32xbf16>
    %cst = arith.constant dense<0.000000e+00> : vector<32x32xf32>
    %2 = tpu.matmul %0, %1, %cst {dimension_numbers = #tpu.dot_dimension_numbers<[1], [0], [0], [1], [0, 0, 1, 1], [], []>} : vector<32x96xbf16>, vector<96x32xbf16>, vector<32x32xf32> -> vector<32x32xf32>
    %c0_3 = arith.constant 0 : index
    %c0_4 = arith.constant 0 : index
    %3 = vector.load %arg4[%c0_3, %c0_4] : memref<1x32xf32, #tpu.memory_space<vmem>>, vector<1x32xf32>
    %4 = vector.broadcast %3 : vector<1x32xf32> to vector<32x32xf32>
    %5 = arith.addf %2, %4 : vector<32x32xf32>
    %cst_5 = arith.constant 0.000000e+00 : f32
    %6 = vector.broadcast %cst_5 : f32 to vector<32x32xf32>
    %7 = arith.cmpf oge, %5, %6 : vector<32x32xf32>
    %cst_6 = arith.constant 2.000000e-02 : f32
    %8 = vector.broadcast %cst_6 : f32 to vector<32x32xf32>
    %9 = arith.mulf %8, %5 : vector<32x32xf32>
    %10 = arith.select %7, %5, %9 : vector<32x32xi1>, vector<32x32xf32>
    %c0_7 = arith.constant 0 : index
    %c0_8 = arith.constant 0 : index
    %11 = vector.load %arg5[%c0_7, %c0_8] : memref<1x32xf32, #tpu.memory_space<vmem>>, vector<1x32xf32>
    %12 = vector.broadcast %11 : vector<1x32xf32> to vector<32x32xf32>
    %13 = arith.mulf %10, %12 : vector<32x32xf32>
    %c0_9 = arith.constant 0 : index
    %c0_10 = arith.constant 0 : index
    %14 = vector.load %arg6[%c0_9, %c0_10] : memref<1x32xf32, #tpu.memory_space<vmem>>, vector<1x32xf32>
    %15 = vector.broadcast %14 : vector<1x32xf32> to vector<32x32xf32>
    %16 = arith.addf %13, %15 : vector<32x32xf32>
    %c0_11 = arith.constant 0 : index
    %c0_12 = arith.constant 0 : index
    %17 = vector.load %arg7[%c0_11, %c0_12] : memref<32x32xf32, #tpu.memory_space<vmem>>, vector<32x32xf32>
    tpu.vector_store %arg7[%c0_11, %c0_12], %16 {strides = array<i32>} : memref<32x32xf32, #tpu.memory_space<vmem>>, vector<32x32xf32>,
    return
  }
  func.func @transform_0(%arg0: i32, %arg1: i32) -> (i32, i32) {
    %c0_i32 = arith.constant 0 : i32
    %c0_i32_0 = arith.constant 0 : i32
    return %arg0, %c0_i32 : i32, i32
  }
  func.func @transform_1(%arg0: i32, %arg1: i32) -> (i32, i32) {
    %c0_i32 = arith.constant 0 : i32
    %c0_i32_0 = arith.constant 0 : i32
    return %c0_i32, %arg1 : i32, i32
  }
  func.func @transform_2(%arg0: i32, %arg1: i32) -> (i32, i32) {
    %c0_i32 = arith.constant 0 : i32
    %c0_i32_0 = arith.constant 0 : i32
    return %c0_i32, %arg1 : i32, i32
  }
  func.func @transform_3(%arg0: i32, %arg1: i32) -> (i32, i32) {
    %c0_i32 = arith.constant 0 : i32
    %c0_i32_0 = arith.constant 0 : i32
    return %c0_i32, %arg1 : i32, i32
  }
  func.func @transform_4(%arg0: i32, %arg1: i32) -> (i32, i32) {
    %c0_i32 = arith.constant 0 : i32
    %c0_i32_0 = arith.constant 0 : i32
    return %c0_i32, %arg1 : i32, i32
  }
  func.func @transform_5(%arg0: i32, %arg1: i32) -> (i32, i32) {
    %c0_i32 = arith.constant 0 : i32
    return %arg0, %arg1 : i32, i32
  }
}

module attributes {stable_mosaic.version = 11 : i64} {
  func.func @kernel(%arg0: i32, %arg1: i32, %arg2: memref<512x1152xbf16, #tpu.memory_space<vmem>>, %arg3: memref<1152x32xbf16, #tpu.memory_space<vmem>>, %arg4: memref<1x32xf32, #tpu.memory_space<vmem>>, %arg5: memref<512x32xf32, #tpu.memory_space<vmem>>) attributes {dimension_semantics = [#tpu.dimension_semantics<parallel>, #tpu.dimension_semantics<parallel>], iteration_bounds = array<i64: 1, 1>, scalar_prefetch = 0 : i64, scratch_operands = 0 : i64, tpu.core_type = #tpu.core_type<tc>, window_params = [{transform_indices = @transform_0, window_bounds = array<i64: 512, 1152>}, {transform_indices = @transform_1, window_bounds = array<i64: 1152, 32>}, {transform_indices = @transform_2, window_bounds = array<i64: 1, 32>}, {transform_indices = @transform_3, window_bounds = array<i64: 512, 32>}]} {
    %c0 = arith.constant 0 : index
    %c0_0 = arith.constant 0 : index
    %0 = vector.load %arg2[%c0, %c0_0] : memref<512x1152xbf16, #tpu.memory_space<vmem>>, vector<512x1152xbf16>
    %c0_1 = arith.constant 0 : index
    %c0_2 = arith.constant 0 : index
    %1 = vector.load %arg3[%c0_1, %c0_2] : memref<1152x32xbf16, #tpu.memory_space<vmem>>, vector<1152x32xbf16>
    %cst = arith.constant dense<0.000000e+00> : vector<512x32xf32>
    %2 = tpu.matmul %0, %1, %cst {dimension_numbers = #tpu.dot_dimension_numbers<[1], [0], [0], [1], [0, 0, 1, 1], [], []>} : vector<512x1152xbf16>, vector<1152x32xbf16>, vector<512x32xf32> -> vector<512x32xf32>
    %c0_3 = arith.constant 0 : index
    %c0_4 = arith.constant 0 : index
    %3 = vector.load %arg4[%c0_3, %c0_4] : memref<1x32xf32, #tpu.memory_space<vmem>>, vector<1x32xf32>
    %4 = vector.broadcast %3 : vector<1x32xf32> to vector<512x32xf32>
    %5 = arith.addf %2, %4 : vector<512x32xf32>
    %c0_5 = arith.constant 0 : index
    %c0_6 = arith.constant 0 : index
    %6 = vector.load %arg5[%c0_5, %c0_6] : memref<512x32xf32, #tpu.memory_space<vmem>>, vector<512x32xf32>
    tpu.vector_store %arg5[%c0_5, %c0_6], %5 {strides = array<i32>} : memref<512x32xf32, #tpu.memory_space<vmem>>, vector<512x32xf32>,
    return
  }
  func.func @transform_0(%arg0: i32, %arg1: i32) -> (i32, i32) {
    %c0_i32 = arith.constant 0 : i32
    %c0_i32_0 = arith.constant 0 : i32
    return %arg0, %c0_i32 : i32, i32
  }
  func.func @transform_1(%arg0: i32, %arg1: i32) -> (i32, i32) {
    %c0_i32 = arith.constant 0 : i32
    %c0_i32_0 = arith.constant 0 : i32
    return %c0_i32, %arg1 : i32, i32
  }
  func.func @transform_2(%arg0: i32, %arg1: i32) -> (i32, i32) {
    %c0_i32 = arith.constant 0 : i32
    %c0_i32_0 = arith.constant 0 : i32
    return %c0_i32, %arg1 : i32, i32
  }
  func.func @transform_3(%arg0: i32, %arg1: i32) -> (i32, i32) {
    %c0_i32 = arith.constant 0 : i32
    return %arg0, %arg1 : i32, i32
  }
}

module attributes {stable_mosaic.version = 11 : i64} {
  func.func @kernel(%arg0: i32, %arg1: i32, %arg2: memref<512x32xbf16, #tpu.memory_space<vmem>>, %arg3: memref<32x4xbf16, #tpu.memory_space<vmem>>, %arg4: memref<1x4xf32, #tpu.memory_space<vmem>>, %arg5: memref<1x4xf32, #tpu.memory_space<vmem>>, %arg6: memref<1x4xf32, #tpu.memory_space<vmem>>, %arg7: memref<512x4xf32, #tpu.memory_space<vmem>>) attributes {dimension_semantics = [#tpu.dimension_semantics<parallel>, #tpu.dimension_semantics<parallel>], iteration_bounds = array<i64: 1, 1>, scalar_prefetch = 0 : i64, scratch_operands = 0 : i64, tpu.core_type = #tpu.core_type<tc>, window_params = [{transform_indices = @transform_0, window_bounds = array<i64: 512, 32>}, {transform_indices = @transform_1, window_bounds = array<i64: 32, 4>}, {transform_indices = @transform_2, window_bounds = array<i64: 1, 4>}, {transform_indices = @transform_3, window_bounds = array<i64: 1, 4>}, {transform_indices = @transform_4, window_bounds = array<i64: 1, 4>}, {transform_indices = @transform_5, window_bounds = array<i64: 512, 4>}]} {
    %c0 = arith.constant 0 : index
    %c0_0 = arith.constant 0 : index
    %0 = vector.load %arg2[%c0, %c0_0] : memref<512x32xbf16, #tpu.memory_space<vmem>>, vector<512x32xbf16>
    %c0_1 = arith.constant 0 : index
    %c0_2 = arith.constant 0 : index
    %1 = vector.load %arg3[%c0_1, %c0_2] : memref<32x4xbf16, #tpu.memory_space<vmem>>, vector<32x4xbf16>
    %cst = arith.constant dense<0.000000e+00> : vector<512x4xf32>
    %2 = tpu.matmul %0, %1, %cst {dimension_numbers = #tpu.dot_dimension_numbers<[1], [0], [0], [1], [0, 0, 1, 1], [], []>} : vector<512x32xbf16>, vector<32x4xbf16>, vector<512x4xf32> -> vector<512x4xf32>
    %c0_3 = arith.constant 0 : index
    %c0_4 = arith.constant 0 : index
    %3 = vector.load %arg4[%c0_3, %c0_4] : memref<1x4xf32, #tpu.memory_space<vmem>>, vector<1x4xf32>
    %4 = vector.broadcast %3 : vector<1x4xf32> to vector<512x4xf32>
    %5 = arith.addf %2, %4 : vector<512x4xf32>
    %cst_5 = arith.constant 0.000000e+00 : f32
    %6 = vector.broadcast %cst_5 : f32 to vector<512x4xf32>
    %7 = arith.cmpf oge, %5, %6 : vector<512x4xf32>
    %cst_6 = arith.constant 2.000000e-02 : f32
    %8 = vector.broadcast %cst_6 : f32 to vector<512x4xf32>
    %9 = arith.mulf %8, %5 : vector<512x4xf32>
    %10 = arith.select %7, %5, %9 : vector<512x4xi1>, vector<512x4xf32>
    %c0_7 = arith.constant 0 : index
    %c0_8 = arith.constant 0 : index
    %11 = vector.load %arg5[%c0_7, %c0_8] : memref<1x4xf32, #tpu.memory_space<vmem>>, vector<1x4xf32>
    %12 = vector.broadcast %11 : vector<1x4xf32> to vector<512x4xf32>
    %13 = arith.mulf %10, %12 : vector<512x4xf32>
    %c0_9 = arith.constant 0 : index
    %c0_10 = arith.constant 0 : index
    %14 = vector.load %arg6[%c0_9, %c0_10] : memref<1x4xf32, #tpu.memory_space<vmem>>, vector<1x4xf32>
    %15 = vector.broadcast %14 : vector<1x4xf32> to vector<512x4xf32>
    %16 = arith.addf %13, %15 : vector<512x4xf32>
    %cst_11 = arith.constant 3.000000e+00 : f32
    %17 = vector.broadcast %cst_11 : f32 to vector<512x4xf32>
    %18 = arith.mulf %16, %17 : vector<512x4xf32>
    %cst_12 = arith.constant dense<0xFF800000> : vector<512xf32>
    %19 = vector.multi_reduction <maximumf>, %18, %cst_12 [1] : vector<512x4xf32> to vector<512xf32>
    %20 = vector.shape_cast %19 : vector<512xf32> to vector<512x1xf32>
    %21 = vector.broadcast %20 : vector<512x1xf32> to vector<512x4xf32>
    %22 = arith.subf %18, %21 : vector<512x4xf32>
    %23 = math.exp %22 : vector<512x4xf32>
    %cst_13 = arith.constant dense<0.000000e+00> : vector<512xf32>
    %24 = vector.multi_reduction <add>, %23, %cst_13 [1] : vector<512x4xf32> to vector<512xf32>
    %25 = vector.shape_cast %24 : vector<512xf32> to vector<512x1xf32>
    %26 = vector.broadcast %25 : vector<512x1xf32> to vector<512x4xf32>
    %27 = arith.divf %23, %26 : vector<512x4xf32>
    %c0_14 = arith.constant 0 : index
    %c0_15 = arith.constant 0 : index
    %28 = vector.load %arg7[%c0_14, %c0_15] : memref<512x4xf32, #tpu.memory_space<vmem>>, vector<512x4xf32>
    tpu.vector_store %arg7[%c0_14, %c0_15], %27 {strides = array<i32>} : memref<512x4xf32, #tpu.memory_space<vmem>>, vector<512x4xf32>,
    return
  }
  func.func @transform_0(%arg0: i32, %arg1: i32) -> (i32, i32) {
    %c0_i32 = arith.constant 0 : i32
    %c0_i32_0 = arith.constant 0 : i32
    return %arg0, %c0_i32 : i32, i32
  }
  func.func @transform_1(%arg0: i32, %arg1: i32) -> (i32, i32) {
    %c0_i32 = arith.constant 0 : i32
    %c0_i32_0 = arith.constant 0 : i32
    return %c0_i32, %arg1 : i32, i32
  }
  func.func @transform_2(%arg0: i32, %arg1: i32) -> (i32, i32) {
    %c0_i32 = arith.constant 0 : i32
    %c0_i32_0 = arith.constant 0 : i32
    return %c0_i32, %arg1 : i32, i32
  }
  func.func @transform_3(%arg0: i32, %arg1: i32) -> (i32, i32) {
    %c0_i32 = arith.constant 0 : i32
    %c0_i32_0 = arith.constant 0 : i32
    return %c0_i32, %arg1 : i32, i32
  }
  func.func @transform_4(%arg0: i32, %arg1: i32) -> (i32, i32) {
    %c0_i32 = arith.constant 0 : i32
    %c0_i32_0 = arith.constant 0 : i32
    return %c0_i32, %arg1 : i32, i32
  }
  func.func @transform_5(%arg0: i32, %arg1: i32) -> (i32, i32) {
    %c0_i32 = arith.constant 0 : i32
    return %arg0, %arg1 : i32, i32
  }
}

module attributes {stable_mosaic.version = 11 : i64} {
  func.func @kernel(%arg0: i32, %arg1: i32, %arg2: memref<512x4xbf16, #tpu.memory_space<vmem>>, %arg3: memref<4x4xbf16, #tpu.memory_space<vmem>>, %arg4: memref<512x4xf32, #tpu.memory_space<vmem>>) attributes {dimension_semantics = [#tpu.dimension_semantics<parallel>, #tpu.dimension_semantics<parallel>], iteration_bounds = array<i64: 1, 1>, scalar_prefetch = 0 : i64, scratch_operands = 0 : i64, tpu.core_type = #tpu.core_type<tc>, window_params = [{transform_indices = @transform_0, window_bounds = array<i64: 512, 4>}, {transform_indices = @transform_1, window_bounds = array<i64: 4, 4>}, {transform_indices = @transform_2, window_bounds = array<i64: 512, 4>}]} {
    %c0 = arith.constant 0 : index
    %c0_0 = arith.constant 0 : index
    %0 = vector.load %arg2[%c0, %c0_0] : memref<512x4xbf16, #tpu.memory_space<vmem>>, vector<512x4xbf16>
    %c0_1 = arith.constant 0 : index
    %c0_2 = arith.constant 0 : index
    %1 = vector.load %arg3[%c0_1, %c0_2] : memref<4x4xbf16, #tpu.memory_space<vmem>>, vector<4x4xbf16>
    %cst = arith.constant dense<0.000000e+00> : vector<512x4xf32>
    %2 = tpu.matmul %0, %1, %cst {dimension_numbers = #tpu.dot_dimension_numbers<[1], [0], [0], [1], [0, 0, 1, 1], [], []>} : vector<512x4xbf16>, vector<4x4xbf16>, vector<512x4xf32> -> vector<512x4xf32>
    %c0_3 = arith.constant 0 : index
    %c0_4 = arith.constant 0 : index
    %3 = vector.load %arg4[%c0_3, %c0_4] : memref<512x4xf32, #tpu.memory_space<vmem>>, vector<512x4xf32>
    tpu.vector_store %arg4[%c0_3, %c0_4], %2 {strides = array<i32>} : memref<512x4xf32, #tpu.memory_space<vmem>>, vector<512x4xf32>,
    return
  }
  func.func @transform_0(%arg0: i32, %arg1: i32) -> (i32, i32) {
    %c0_i32 = arith.constant 0 : i32
    %c0_i32_0 = arith.constant 0 : i32
    return %arg0, %c0_i32 : i32, i32
  }
  func.func @transform_1(%arg0: i32, %arg1: i32) -> (i32, i32) {
    %c0_i32 = arith.constant 0 : i32
    %c0_i32_0 = arith.constant 0 : i32
    return %c0_i32, %arg1 : i32, i32
  }
  func.func @transform_2(%arg0: i32, %arg1: i32) -> (i32, i32) {
    %c0_i32 = arith.constant 0 : i32
    return %arg0, %arg1 : i32, i32
  }
}

</mosaic_0001>

<bundles_post_ra>
// kernel: custom-call.13
= control target key start
LH: loop header
LB: loop body
LE: loop exit
PB: predicated region body
PF: predicated region fallthrough
CT: control target
= control target key end

     0   :  { %s6_s0 = inlined_call_operand.vmem [shape: bf16[12,2,16,96], index: 0, kind: output, shape index: {}]  }

// kernel: _lambda_.10
= control target key start
LH: loop header
LB: loop body
LE: loop exit
PB: predicated region body
PF: predicated region fallthrough
CT: control target
= control target key end

     0   :  { %vm68_vm0 = vcmask 523264   ;;  %vm124_vm1 = vcmask 785408   ;;  %s219_s1 = inlined_call_operand.vmem [shape: bf16[64,96], index: 1, kind: input, shape index: {}]   ;;  %s220_s0 = inlined_call_operand.vmem [shape: bf16[32,64], index: 0, kind: input, shape index: {}]   ;;  %s221_s2 = inlined_call_operand.vmem [shape: f32[1,96], index: 2, kind: input, shape index: {}]   ;;  %s222_s3 = inlined_call_operand.vmem [shape: f32[32,96], index: 3, kind: output, shape index: {}]  }
   0x1   :  { %v160_v0 = vld [vmem:[%s219_s1 + $0x18] sm:$0xff]   ;;  %v161_v1 = vld [vmem:[%s219_s1 + $0x10] sm:$0xff]   ;;  %v162_v2 = vld [vmem:[%s219_s1 + $0x8] sm:$0xff]  }
   0x2   :  { %148 = vmatprep.subr.bf16.mxu0 %v160_v0  ;;  %v164_v3 = vld [vmem:[%s220_s0] sm:$0xff]   ;;  %v165_v5 = vld [vmem:[%s220_s0 + $0x8] sm:$0xff]  }
   0x3   :  { %149 = vmatpush3.bf16.msra.mxu0 %v160_v0  ;;  %156 = vmatprep.mubr.msk.bf16.mxu0 %vm68_vm0, %v164_v3  ;;  %v163_v4 = vld [vmem:[%s219_s1] sm:$0xff]  }
   0x4   :  { %150 = vmatprep.subr.bf16.mxu0 %v161_v1  ;;  %v133_v6 = vld [vmem:[%s221_s2] ss:$0 sm:$0xff] }
   0x7   :  { %151 = vmatpush3.bf16.msra.mxu0 %v161_v1 }
   0x8   :  { %152 = vmatprep.subr.bf16.mxu0 %v162_v2 }
   0xb   :  { %153 = vmatpush3.bf16.msra.mxu0 %v162_v2 }
   0xc   :  { %154 = vmatprep.subr.bf16.mxu0 %v163_v4 }
   0xf   :  { %155 = vmatpush3.bf16.msra.mxu0 %v163_v4 }
  0x12   :  { %157 = vmatmul.mubr.msk.bf16.vlgmr.msra.gmra.mxu0 %vm68_vm0, %v165_v5 }
  0xd2   :  { %v158_v7 = vpop.f32.mrf.mxu0 }
  0xd3   :  { %v118_v8 = vadd.f32 %v158_v7, %v133_v6 }
  0xd4   :  { %v109_v9 = vpop.f32.mrf.mxu0 }
  0xd5   :  { %127 = vst.msk [vmem:[%s222_s3 + $0x10] sm:$0xff] %vm124_vm1, %v118_v8  ;;  %v110_v10 = vadd.f32 %v133_v6, %v109_v9 }
  0xd6   :  { %v159_v11 = vpop.f32.mrf.mxu0 }
  0xd7   :  { %125 = vst.msk [vmem:[%s222_s3] sm:$0xff] %vm124_vm1, %v110_v10  ;;  %v121_v12 = vadd.f32 %v159_v11, %v133_v6 }
  0xd8   :  { %v112_v13 = vpop.f32.mrf.mxu0 }
  0xd9   :  { %128 = vst.msk [vmem:[%s222_s3 + $0x18] sm:$0xff] %vm124_vm1, %v121_v12  ;;  %v113_v14 = vadd.f32 %v133_v6, %v112_v13 }
  0xdb   :  { %126 = vst.msk [vmem:[%s222_s3 + $0x8] sm:$0xff] %vm124_vm1, %v113_v14 }

// kernel: closed_call.18
= control target key start
LH: loop header
LB: loop body
LE: loop exit
PB: predicated region body
PF: predicated region fallthrough
CT: control target
= control target key end

     0   :  { %vm25_vm0 = vcmask 785408   ;;  %v446_v41 = vmov 0   ;;  %vm350_vm1 = vcmask 261120   ;;  %s624_s0 = inlined_call_operand.vmem [shape: f32[32,96], index: 0, kind: input, shape index: {}]   ;;  %s625_s1 = inlined_call_operand.vmem [shape: bf16[96,288], index: 1, kind: input, shape index: {}]   ;;  %s626_s2 = inlined_call_operand.vmem [shape: f32[1,96], index: 2, kind: input, shape index: {}]   ;;  %s627_s3 = inlined_call_operand.vmem [shape: f32[1,96], index: 3, kind: input, shape index: {}]   ;;  %s628_s4 = inlined_call_operand.vmem [shape: f32[1,288], index: 4, kind: input, shape index: {}]   ;;  %s629_s5 = inlined_call_operand.vmem [shape: f32[32,288], index: 5, kind: output, shape index: {}]  }
   0x1   :  { %v21_v0 = vld [vmem:[%s624_s0] sm:$0xff]  ;;  %v23_v1 = vld [vmem:[%s624_s0 + $0x10] sm:$0xff]  ;;  %v22_v2 = vld [vmem:[%s624_s0 + $0x8] sm:$0xff]  ;;  %278 = vmatprep.mubr.bf16.mxu0 %v446_v41 }
   0x2   :  { %v26_v3 = vsel %vm25_vm0, %v21_v0, 0.0  ;;  %v32_v4 = vsel %vm25_vm0, %v23_v1, 0.0  ;;  %v24_v5 = vld [vmem:[%s624_s0 + $0x18] sm:$0xff]  ;;  %v29_v6 = vsel %vm25_vm0, %v22_v2, 0.0  ;;  %v417_v30 = vld [vmem:[%s625_s1 + $0x64] ss:$12 sps:$4 sm:$0xff]  }
   0x3   :  { %27 = vadd.xlane.f32.xlu0 %v26_v3  ;;  %33 = vadd.xlane.f32.xlu1 %v32_v4  ;;  %v35_v7 = vsel %vm25_vm0, %v24_v5, 0.0  ;;  %v414_v28 = vld [vmem:[%s625_s1 + $0x7c] ss:$12 sps:$4 sm:$0xff]   ;;  %v416_v29 = vld [vmem:[%s625_s1 + $0x78] ss:$12 sps:$4 sm:$0xff]  }
   0x4   :  { %250 = vmatprep.subr.bf16.mxu0 %v414_v28  ;;  %v419_v31 = vld [vmem:[%s625_s1 + $0x80] ss:$12 sps:$4 sm:$0xff]   ;;  %v423_v34 = vld [vmem:[%s625_s1 + $0x68] ss:$12 sps:$4 sm:$0xff]   ;;  %v427_v37 = vld [vmem:[%s625_s1 + $0x50] ss:$12 sps:$4 sm:$0xff]  }
   0x5   :  { %251 = vmatpush1.bf16.msra.mxu0 %v416_v29  ;;  %v420_v32 = vld [vmem:[%s625_s1 + $0x60] ss:$12 sps:$4 sm:$0xff]   ;;  %397 = vmatprep.subr.bf16.mxu1 %v419_v31  ;;  %v424_v35 = vld [vmem:[%s625_s1 + $0x48] ss:$12 sps:$4 sm:$0xff]   ;;  %v428_v38 = vld [vmem:[%s625_s1 + $0x30] ss:$12 sps:$4 sm:$0xff]  }
   0x6   :  { %252 = vmatprep.subr.bf16.mxu0 %v417_v30  ;;  %398 = vmatpush3.bf16.msra.mxu1 %v419_v31  ;;  %v421_v33 = vld [vmem:[%s625_s1 + $0x4c] ss:$12 sps:$4 sm:$0xff]   ;;  %v425_v36 = vld [vmem:[%s625_s1 + $0x34] ss:$12 sps:$4 sm:$0xff]   ;;  %v429_v39 = vld [vmem:[%s625_s1 + $0x1c] ss:$12 sps:$4 sm:$0xff]  }
   0x7   :  { %30 = vadd.xlane.f32.xlu0 %v29_v6  ;;  %36 = vadd.xlane.f32.xlu1 %v35_v7  ;;  %v431_v40 = vld [vmem:[%s625_s1 + $0x38] ss:$12 sps:$4 sm:$0xff]   ;;  %v435_v44 = vld [vmem:[%s625_s1 + $0x20] ss:$12 sps:$4 sm:$0xff]   ;;  %v437_v46 = vld [vmem:[%s625_s1 + $0x8] ss:$12 sps:$4 sm:$0xff]  }
   0x8   :  { %399 = vmatprep.subr.bf16.mxu1 %v423_v34  ;;  %v432_v42 = vld [vmem:[%s625_s1 + $0x18] ss:$12 sps:$4 sm:$0xff]   ;;  %v436_v45 = vld [vmem:[%s625_s1] ss:$12 sps:$4 sm:$0xff]  }
   0x9   :  { %253 = vmatpush1.bf16.msra.mxu0 %v420_v32  ;;  %v433_v43 = vld [vmem:[%s625_s1 + $0x4] ss:$12 sps:$4 sm:$0xff]   ;;  %v365_v61 = vld [vmem:[%s626_s2] ss:$0 sm:$0xff] }
   0xa   :  { %254 = vmatprep.subr.bf16.mxu0 %v421_v33  ;;  %400 = vmatpush3.bf16.msra.mxu1 %v423_v34 }
   0xb   :  { %401 = vmatprep.subr.bf16.mxu1 %v427_v37 }
   0xd   :  { %255 = vmatpush1.bf16.msra.mxu0 %v424_v35 }
   0xe   :  { %256 = vmatprep.subr.bf16.mxu0 %v425_v36  ;;  %402 = vmatpush3.bf16.msra.mxu1 %v427_v37 }
   0xf   :  { %403 = vmatprep.subr.bf16.mxu1 %v431_v40 }
  0x11   :  { %257 = vmatpush1.bf16.msra.mxu0 %v428_v38 }
  0x12   :  { %258 = vmatprep.subr.bf16.mxu0 %v429_v39  ;;  %404 = vmatpush3.bf16.msra.mxu1 %v431_v40 }
  0x13   :  { %405 = vmatprep.subr.bf16.mxu1 %v435_v44 }
  0x15   :  { %259 = vmatpush1.bf16.msra.mxu0 %v432_v42 }
  0x16   :  { %260 = vmatprep.subr.bf16.mxu0 %v433_v43  ;;  %406 = vmatpush3.bf16.msra.mxu1 %v435_v44 }
  0x17   :  { %407 = vmatprep.subr.bf16.mxu1 %v437_v46 }
  0x19   :  { %261 = vmatpush1.bf16.msra.mxu0 %v436_v45 }
  0x1a   :  { %408 = vmatpush3.bf16.msra.mxu1 %v437_v46 }
  0x8c   :  { %v28_v8 = vpop.xlane.xlu0 %27  ;;  %v34_v9 = vpop.xlane.xlu1 %33 }
  0x8d   :  { %v39_v10 = vmul.f32 0.010416667, %v28_v8  ;;  %v41_v11 = vmul.f32 0.010416667, %v34_v9 }
  0x8f   :  { %v493_v12 = vsub.f32 %v21_v0, %v39_v10  ;;  %v495_v13 = vsub.f32 %v23_v1, %v41_v11 }
  0x90   :  { %v31_v14 = vpop.xlane.xlu0 %30  ;;  %v37_v15 = vpop.xlane.xlu1 %36 }
  0x91   :  { %v40_v16 = vmul.f32 0.010416667, %v31_v14  ;;  %v42_v17 = vmul.f32 0.010416667, %v37_v15  ;;  %v47_v18 = vmul.f32 %v493_v12, %v493_v12  ;;  %v49_v19 = vmul.f32 %v495_v13, %v495_v13 }
  0x93   :  { %v501_v20 = vsub.f32 %v22_v2, %v40_v16  ;;  %v503_v21 = vsub.f32 %v24_v5, %v42_v17  ;;  %v51_v22 = vsel %vm25_vm0, %v47_v18, 0.0  ;;  %v57_v23 = vsel %vm25_vm0, %v49_v19, 0.0  ;;  %v366_v2 = vld [vmem:[%s627_s3] ss:$0 sm:$0xff] }
  0x94   :  { %52 = vadd.xlane.f32.xlu0 %v51_v22  ;;  %v127_v18 = vld [vmem:[%s628_s4] sm:$0x7] }
  0x95   :  { %v48_v24 = vmul.f32 %v501_v20, %v501_v20  ;;  %v50_v25 = vmul.f32 %v503_v21, %v503_v21 }
  0x97   :  { %v54_v26 = vsel %vm25_vm0, %v48_v24, 0.0  ;;  %v60_v27 = vsel %vm25_vm0, %v50_v25, 0.0 }
  0x98   :  { %58 = vadd.xlane.f32.xlu0 %v57_v23  ;;  %55 = vadd.xlane.f32.xlu1 %v54_v26 }
  0x9c   :  { %61 = vadd.xlane.f32.xlu1 %v60_v27 }
 0x11d   :  { %v53_v47 = vpop.xlane.xlu0 %52 }
 0x11e   :  { %v63_v48 = vmul.f32 0.010416667, %v53_v47 }
 0x120   :  { %v67_v49 = vadd.f32 1e-06, %v63_v48 }
 0x121   :  { %v56_v50 = vpop.xlane.xlu1 %55  ;;  %v59_v51 = vpop.xlane.xlu0 %58 }
 0x122   :  { %438 = vrsqrt.f32 %v67_v49  ;;  %v64_v52 = vmul.f32 0.010416667, %v56_v50  ;;  %v65_v53 = vmul.f32 0.010416667, %v59_v51 }
 0x124   :  { %v68_v54 = vadd.f32 1e-06, %v64_v52  ;;  %v69_v55 = vadd.f32 1e-06, %v65_v53 }
 0x125   :  { %v62_v56 = vpop.xlane.xlu1 %61 }
 0x126   :  { %440 = vrsqrt.f32 %v68_v54  ;;  %v66_v57 = vmul.f32 0.010416667, %v62_v56 }
 0x127   :  { %442 = vrsqrt.f32 %v69_v55 }
 0x128   :  { %v70_v58 = vadd.f32 1e-06, %v66_v57 }
 0x12a   :  { %444 = vrsqrt.f32 %v70_v58 }
 0x12f   :  { %v439_v59 = vpop.eup %438 }
 0x130   :  { %v75_v60 = vmul.f32 %v439_v59, %v493_v12 }
 0x132   :  { %v86_v1 = vmul.f32 %v365_v61, %v75_v60 }
 0x133   :  { %v441_v62 = vpop.eup %440 }
 0x134   :  { %v443_v63 = vpop.eup %442  ;;  %v76_v0 = vmul.f32 %v441_v62, %v501_v20  ;;  %v97_v6 = vadd.f32 %v366_v2, %v86_v1 }
 0x135   :  { %v77_v3 = vmul.f32 %v443_v63, %v495_v13  ;;  %v129_v13 = vlaneseq }
 0x136   :  { %v87_v4 = vmul.f32 %v365_v61, %v76_v0 }
 0x137   :  { %v445_v5 = vpop.eup %444  ;;  %v88_v9 = vmul.f32 %v365_v61, %v77_v3  ;;  %v130_v16 = vshrl.u32 %v129_v13, 7 }
 0x138   :  { %v98_v7 = vadd.f32 %v366_v2, %v87_v4  ;;  %v78_v8 = vmul.f32 %v445_v5, %v503_v21 }
 0x139   :  { %v99_v12 = vadd.f32 %v366_v2, %v88_v9  ;;  %v131_v17 = vsub.s32 0, %v130_v16  ;;  %v135_v19 = vsub.s32 1, %v130_v16  ;;  %v139_v21 = vsub.s32 2, %v130_v16 }
 0x13a   :  { %v101_v10 = vpack.c.bf16 %v98_v7, %v97_v6  ;;  %v89_v11 = vmul.f32 %v365_v61, %v78_v8 }
 0x13b   :  { %v132_v20 = vrot.slane %v127_v18, %v131_v17  ;;  %v136_v22 = vrot.slane %v127_v18, %v135_v19  ;;  %v140_v25 = vrot.slane %v127_v18, %v139_v21 }
 0x13c   :  { %385 = vmatmul.mubr.msk.bf16.vlgmr.msra.gmra.mxu0 %vm25_vm0, %v101_v10  ;;  %409 = vmatprep.mubr.msk.bf16.mxu1 %vm25_vm0, %v101_v10  ;;  %v100_v14 = vadd.f32 %v366_v2, %v89_v11 }
 0x13d   :  { %288 = vmatprep.mubr.bf16.mxu0 %v446_v41 }
 0x13e   :  { %v102_v15 = vpack.c.bf16 %v100_v14, %v99_v12 }
 0x140   :  { %410 = vmatmul.mubr.msk.bf16.vlgmr.msra.gmra.mxu1 %vm25_vm0, %v102_v15 }
 0x144   :  { %386 = vmatmul.mubr.msk.bf16.gmra.mxu0 %vm25_vm0, %v102_v15 }
 0x1fc   :  { %v280_v23 = vpop.f32.mrf.mxu0 }
 0x1fd   :  { %v281_v24 = vadd.f32 %v280_v23, %v132_v20 }
 0x1fe   :  { %v282_v26 = vpop.f32.mrf.mxu0 }
 0x1ff   :  { %348 = vst [vmem:[%s629_s5] sm:$0xff] %v281_v24  ;;  %v283_v27 = vadd.f32 %v282_v26, %v136_v22 }
 0x200   :  { %v284_v28 = vpop.f32.mrf.mxu0  ;;  %v411_v29 = vpop.f32.mrf.mxu1 }
 0x201   :  { %349 = vst [vmem:[%s629_s5 + $0x8] sm:$0xff] %v283_v27  ;;  %v285_v30 = vadd.f32 %v284_v28, %v132_v20  ;;  %v342_v31 = vadd.f32 %v411_v29, %v140_v25 }
 0x202   :  { %v286_v32 = vpop.f32.mrf.mxu0  ;;  %v333_v33 = vpop.f32.mrf.mxu1 }
 0x203   :  { %352 = vst [vmem:[%s629_s5 + $0x18] sm:$0xff] %v285_v30  ;;  %357 = vst.msk [vmem:[%s629_s5 + $0x40] sm:$0xff] %vm350_vm1, %v342_v31  ;;  %v287_v34 = vadd.f32 %v286_v32, %v136_v22  ;;  %v334_v35 = vadd.f32 %v333_v33, %v140_v25 }
 0x204   :  { %v290_v36 = vpop.f32.mrf.mxu0  ;;  %v412_v37 = vpop.f32.mrf.mxu1 }
 0x205   :  { %353 = vst [vmem:[%s629_s5 + $0x20] sm:$0xff] %v287_v34  ;;  %351 = vst.msk [vmem:[%s629_s5 + $0x10] sm:$0xff] %vm350_vm1, %v334_v35  ;;  %v291_v38 = vadd.f32 %v290_v36, %v132_v20  ;;  %v345_v39 = vadd.f32 %v412_v37, %v140_v25 }
 0x206   :  { %v292_v40 = vpop.f32.mrf.mxu0  ;;  %v336_v41 = vpop.f32.mrf.mxu1 }
 0x207   :  { %355 = vst [vmem:[%s629_s5 + $0x30] sm:$0xff] %v291_v38  ;;  %360 = vst.msk [vmem:[%s629_s5 + $0x58] sm:$0xff] %vm350_vm1, %v345_v39  ;;  %v293_v42 = vadd.f32 %v292_v40, %v136_v22  ;;  %v337_v43 = vadd.f32 %v336_v41, %v140_v25 }
 0x208   :  { %v294_v44 = vpop.f32.mrf.mxu0 }
 0x209   :  { %356 = vst [vmem:[%s629_s5 + $0x38] sm:$0xff] %v293_v42  ;;  %354 = vst.msk [vmem:[%s629_s5 + $0x28] sm:$0xff] %vm350_vm1, %v337_v43  ;;  %v295_v45 = vadd.f32 %v294_v44, %v132_v20 }
 0x20a   :  { %v296_v46 = vpop.f32.mrf.mxu0 }
 0x20b   :  { %358 = vst [vmem:[%s629_s5 + $0x48] sm:$0xff] %v295_v45  ;;  %v297_v47 = vadd.f32 %v296_v46, %v136_v22 }
 0x20d   :  { %359 = vst [vmem:[%s629_s5 + $0x50] sm:$0xff] %v297_v47 }

// kernel: closed_call.19
= control target key start
LH: loop header
LB: loop body
LE: loop exit
PB: predicated region body
PF: predicated region fallthrough
CT: control target
= control target key end

     0   :  { %s1753_s12 = smov 0   ;;  %s2081_s0 = inlined_call_operand.vmem [shape: bf16[24,16,8], index: 0, kind: input, shape index: {}]   ;;  %s2082_s1 = inlined_call_operand.vmem [shape: bf16[24,16,8], index: 1, kind: input, shape index: {}]   ;;  %s2083_s2 = inlined_call_operand.vmem [shape: bf16[24,16,8], index: 2, kind: input, shape index: {}]   ;;  %s2084_s3 = inlined_call_operand.vmem [shape: f32[24,16,8], index: 3, kind: output, shape index: {}]  }
   0x1 LB: > { %s1434_s13 = sadd.s32 4294967295, %s1729_s12   ;;  %p1438_p0 = scmp.ge.s32.totalorder %s1729_s12, 1  ;;  %s1729_s12 = sphi %s1753_s12, %s13_s12  }
   0x2   : > { %p163_p1 = scmp.lt.s32.totalorder %s1729_s12, 4 }
   0x4   : > { %p164_p2 = pnand %p1438_p0, %p163_p1 }
   0x5   : > { %s1439_s14 = sshll.u32 (!%p164_p2), %s1434_s13, 3 }
   0x6   : > { %167 = sbr.rel (%p164_p2) target bundleno = 764 (0x2fc), region = 32  ;;  %p202_p3 = scmp.lt.s32.totalorder (!%p164_p2), %s1439_s14, 23 }
   0xb   : > { %v1731_v0 = vmov 0.0   ;;  %vm1732_vm0 = vmmov 0   ;;  %s2086_s14 = smov (!%p202_p3, %s1439_s14), 23  ;;  %vm288_vm1 = vcmask 64512   ;;  %vm751_vm2 = vcmask 130048  }
   0xc   : > { %1529 = vmatprep.subr.bf16.mxu0 %v1731_v0  ;;  %1535 = vmatprep.subr.bf16.mxu1 %v1731_v0  ;;  %s1770_s15 = sshll.u32 %s2086_s14, 3  ;;  %s1496_s25 = sshll.u32 %s2086_s14, 4 }
   0xd   : > { %1531 = vmatprep.mubr.msk.bf16.mxu0 %vm1732_vm0, %v1731_v0  ;;  %1537 = vmatprep.mubr.msk.bf16.mxu1 %vm1732_vm0, %v1731_v0  ;;  %s1776_s18 = scalar_lea.vmem %s2082_s1, %s1770_s15  ;;  %s1783_s21 = scalar_lea.vmem %s2081_s0, %s1770_s15 }
   0xe   : > { %v1635_v1 = vld [vmem:[%s1776_s18] sm:$0xff]   ;;  %v1636_v2 = vld [vmem:[%s1776_s18 + $0x8] sm:$0xff]   ;;  %v1639_v5 = vld [vmem:[%s1776_s18 + $0x10] sm:$0xff]   ;;  %s1812_s24 = scalar_lea.vmem %s2083_s2, %s1770_s15  ;;  %s2044_s28 = scalar_lea.vmem %s2084_s3, %s1496_s25 }
   0xf   : > { %v293_v3 = vsel %vm288_vm1, %v1635_v1, 0  ;;  %v350_v4 = vsel %vm288_vm1, %v1636_v2, 0  ;;  %v1640_v6 = vld [vmem:[%s1776_s18 + $0x18] sm:$0xff]   ;;  %v1637_v7 = vld [vmem:[%s1783_s21] sm:$0xff]   ;;  %v1638_v8 = vld [vmem:[%s1783_s21 + $0x8] sm:$0xff]   ;;  %v407_v9 = vsel %vm288_vm1, %v1639_v5, 0 }
  0x10   : > { %1530 = vmatpush3.bf16.xpose.msra.mxu0 %v293_v3  ;;  %1536 = vmatpush3.bf16.xpose.msra.mxu1 %v350_v4  ;;  %v464_v10 = vsel %vm288_vm1, %v1640_v6, 0  ;;  %v1643_v11 = vld [vmem:[%s1776_s18 + $0x20] sm:$0xff]   ;;  %v1644_v12 = vld [vmem:[%s1776_s18 + $0x28] sm:$0xff]   ;;  %v1641_v13 = vld [vmem:[%s1783_s21 + $0x10] sm:$0xff]  }
  0x11   : > { %1541 = vmatprep.subr.bf16.mxu0 %v1731_v0  ;;  %1547 = vmatprep.subr.bf16.mxu1 %v1731_v0  ;;  %v1642_v14 = vld [vmem:[%s1783_s21 + $0x18] sm:$0xff]   ;;  %v521_v15 = vsel %vm288_vm1, %v1643_v11, 0  ;;  %v578_v16 = vsel %vm288_vm1, %v1644_v12, 0  ;;  %v1647_v17 = vld [vmem:[%s1776_s18 + $0x30] sm:$0xff]   ;;  %v1645_v19 = vld [vmem:[%s1783_s21 + $0x20] sm:$0xff]  }
  0x12   : > { %v1648_v18 = vld [vmem:[%s1776_s18 + $0x38] sm:$0xff]   ;;  %v1646_v20 = vld [vmem:[%s1783_s21 + $0x28] sm:$0xff]   ;;  %v635_v21 = vsel %vm288_vm1, %v1647_v17, 0  ;;  %v1649_v23 = vld [vmem:[%s1783_s21 + $0x30] sm:$0xff]  }
  0x13   : > { %v692_v22 = vsel %vm288_vm1, %v1648_v18, 0  ;;  %v1650_v24 = vld [vmem:[%s1783_s21 + $0x38] sm:$0xff]  }
  0x17   : > { %1532 = vmatmul.mubr.msk.bf16.vlgmr.msra.gmra.mxu0 %vm288_vm1, %v1637_v7  ;;  %1538 = vmatmul.mubr.msk.bf16.vlgmr.msra.gmra.mxu1 %vm288_vm1, %v1638_v8 }
  0x18   : > { %1542 = vmatpush3.bf16.xpose.msra.mxu0 %v407_v9  ;;  %1548 = vmatpush3.bf16.xpose.msra.mxu1 %v464_v10 }
  0x19   : > { %1543 = vmatprep.mubr.msk.bf16.mxu0 %vm1732_vm0, %v1731_v0  ;;  %1549 = vmatprep.mubr.msk.bf16.mxu1 %vm1732_vm0, %v1731_v0 }
  0x1a   : > { %1553 = vmatprep.subr.bf16.mxu0 %v1731_v0  ;;  %1559 = vmatprep.subr.bf16.mxu1 %v1731_v0 }
  0x1f   : > { %1544 = vmatmul.mubr.msk.bf16.vlgmr.msra.gmra.mxu0 %vm288_vm1, %v1641_v13  ;;  %1550 = vmatmul.mubr.msk.bf16.vlgmr.msra.gmra.mxu1 %vm288_vm1, %v1642_v14 }
  0x20   : > { %1554 = vmatpush3.bf16.xpose.msra.mxu0 %v521_v15  ;;  %1560 = vmatpush3.bf16.xpose.msra.mxu1 %v578_v16 }
  0x21   : > { %1555 = vmatprep.mubr.msk.bf16.mxu0 %vm1732_vm0, %v1731_v0  ;;  %1561 = vmatprep.mubr.msk.bf16.mxu1 %vm1732_vm0, %v1731_v0 }
  0x22   : > { %1565 = vmatprep.subr.bf16.mxu0 %v1731_v0  ;;  %1571 = vmatprep.subr.bf16.mxu1 %v1731_v0 }
  0x27   : > { %1556 = vmatmul.mubr.msk.bf16.vlgmr.msra.gmra.mxu0 %vm288_vm1, %v1645_v19  ;;  %1562 = vmatmul.mubr.msk.bf16.vlgmr.msra.gmra.mxu1 %vm288_vm1, %v1646_v20 }
  0x28   : > { %1566 = vmatpush3.bf16.xpose.msra.mxu0 %v635_v21  ;;  %1572 = vmatpush3.bf16.xpose.msra.mxu1 %v692_v22 }
  0x29   : > { %1567 = vmatprep.mubr.msk.bf16.mxu0 %vm1732_vm0, %v1731_v0  ;;  %1573 = vmatprep.mubr.msk.bf16.mxu1 %vm1732_vm0, %v1731_v0 }
  0x2a   : > { %1577 = vmatprep.subr.bf16.mxu0 %v1731_v0  ;;  %1583 = vmatprep.subr.bf16.mxu1 %v1731_v0 }
  0x2f   : > { %1568 = vmatmul.mubr.msk.bf16.vlgmr.msra.gmra.mxu0 %vm288_vm1, %v1649_v23  ;;  %1574 = vmatmul.mubr.msk.bf16.vlgmr.msra.gmra.mxu1 %vm288_vm1, %v1650_v24 }
  0x30   : > { %1579 = vmatprep.mubr.msk.bf16.mxu0 %vm1732_vm0, %v1731_v0  ;;  %1585 = vmatprep.mubr.msk.bf16.mxu1 %vm1732_vm0, %v1731_v0 }
  0xd7   : > { %v329_v25 = vpop.f32.mrf.mxu0  ;;  %v386_v27 = vpop.f32.mrf.mxu1 }
  0xd8   : > { %v1846_v26 = vmul.f32 0.35355338, %v329_v25  ;;  %v1848_v28 = vmul.f32 0.35355338, %v386_v27 }
  0xd9   : > { %v1533_v29 = vpop.f32.mrf.mxu0  ;;  %v1539_v30 = vpop.f32.mrf.mxu1 }
  0xda   : > { %v752_v31 = vsel %vm751_vm2, %v1846_v26, -inf  ;;  %v758_v32 = vsel %vm751_vm2, %v1848_v28, -inf }
  0xdb   : > { %753 = vmax.xlane.f32.xlu0 %v752_v31  ;;  %v332_v33 = vpop.f32.mrf.mxu0  ;;  %759 = vmax.xlane.f32.xlu1 %v758_v32  ;;  %v389_v34 = vpop.f32.mrf.mxu1 }
  0xdc   : > { %v1854_v35 = vmul.f32 0.35355338, %v332_v33  ;;  %v1856_v36 = vmul.f32 0.35355338, %v389_v34 }
  0xdd   : > { %v1534_v37 = vpop.f32.mrf.mxu0  ;;  %v1540_v38 = vpop.f32.mrf.mxu1 }
  0xde   : > { %v755_v39 = vsel %vm751_vm2, %v1854_v35, -inf  ;;  %v761_v40 = vsel %vm751_vm2, %v1856_v36, -inf }
  0xdf   : > { %756 = vmax.xlane.f32.xlu0 %v755_v39  ;;  %v443_v41 = vpop.f32.mrf.mxu0  ;;  %762 = vmax.xlane.f32.xlu1 %v761_v40  ;;  %v500_v42 = vpop.f32.mrf.mxu1 }
  0xe0   : > { %v1862_v43 = vmul.f32 0.35355338, %v443_v41  ;;  %v1864_v44 = vmul.f32 0.35355338, %v500_v42 }
  0xe1   : > { %v1545_v45 = vpop.f32.mrf.mxu0  ;;  %v1551_v46 = vpop.f32.mrf.mxu1 }
  0xe2   : > { %v764_v47 = vsel %vm751_vm2, %v1862_v43, -inf  ;;  %v770_v51 = vsel %vm751_vm2, %v1864_v44, -inf }
  0xe3   : > { %765 = vmax.xlane.f32.xlu0 %v764_v47  ;;  %v446_v48 = vpop.f32.mrf.mxu0  ;;  %v503_v49 = vpop.f32.mrf.mxu1 }
  0xe4   : > { %v1868_v50 = vmul.f32 0.35355338, %v446_v48  ;;  %v1872_v53 = vmul.f32 0.35355338, %v503_v49 }
  0xe5   : > { %v1546_v52 = vpop.f32.mrf.mxu0  ;;  %v1552_v54 = vpop.f32.mrf.mxu1 }
  0xe6   : > { %v767_v55 = vsel %vm751_vm2, %v1868_v50, -inf  ;;  %v773_v62 = vsel %vm751_vm2, %v1872_v53, -inf }
  0xe7   : > { %771 = vmax.xlane.f32.xlu0 %v770_v51  ;;  %768 = vmax.xlane.f32.xlu1 %v767_v55  ;;  %v557_v56 = vpop.f32.mrf.mxu0  ;;  %v614_v57 = vpop.f32.mrf.mxu1 }
  0xe8   : > { %v1876_v58 = vmul.f32 0.35355338, %v557_v56  ;;  %v1878_v59 = vmul.f32 0.35355338, %v614_v57 }
  0xe9   : > { %v1557_v60 = vpop.f32.mrf.mxu0  ;;  %v1563_v61 = vpop.f32.mrf.mxu1 }
  0xea   : > { %v776_v63 = vsel %vm751_vm2, %v1876_v58, -inf  ;;  %v782_v4 = vsel %vm751_vm2, %v1878_v59, -inf }
  0xeb   : > { %774 = vmax.xlane.f32.xlu1 %v773_v62  ;;  %777 = vmax.xlane.f32.xlu0 %v776_v63  ;;  %v560_v1 = vpop.f32.mrf.mxu0  ;;  %v617_v2 = vpop.f32.mrf.mxu1 }
  0xec   : > { %v1884_v3 = vmul.f32 0.35355338, %v560_v1  ;;  %v1888_v6 = vmul.f32 0.35355338, %v617_v2 }
  0xed   : > { %v1558_v5 = vpop.f32.mrf.mxu0  ;;  %v1564_v7 = vpop.f32.mrf.mxu1 }
  0xee   : > { %v779_v8 = vsel %vm751_vm2, %v1884_v3, -inf  ;;  %v785_v15 = vsel %vm751_vm2, %v1888_v6, -inf }
  0xef   : > { %783 = vmax.xlane.f32.xlu0 %v782_v4  ;;  %780 = vmax.xlane.f32.xlu1 %v779_v8  ;;  %v671_v9 = vpop.f32.mrf.mxu0  ;;  %v728_v10 = vpop.f32.mrf.mxu1 }
  0xf0   : > { %v1892_v11 = vmul.f32 0.35355338, %v671_v9  ;;  %v1894_v12 = vmul.f32 0.35355338, %v728_v10 }
  0xf1   : > { %v1569_v13 = vpop.f32.mrf.mxu0  ;;  %v1575_v14 = vpop.f32.mrf.mxu1 }
  0xf2   : > { %v788_v16 = vsel %vm751_vm2, %v1892_v11, -inf  ;;  %v794_v20 = vsel %vm751_vm2, %v1894_v12, -inf }
  0xf3   : > { %786 = vmax.xlane.f32.xlu1 %v785_v15  ;;  %789 = vmax.xlane.f32.xlu0 %v788_v16  ;;  %v674_v17 = vpop.f32.mrf.mxu0  ;;  %v731_v18 = vpop.f32.mrf.mxu1 }
  0xf4   : > { %v1900_v19 = vmul.f32 0.35355338, %v674_v17  ;;  %v1904_v22 = vmul.f32 0.35355338, %v731_v18 }
  0xf5   : > { %v1570_v21 = vpop.f32.mrf.mxu0  ;;  %v1576_v23 = vpop.f32.mrf.mxu1 }
  0xf6   : > { %v791_v24 = vsel %vm751_vm2, %v1900_v19, -inf  ;;  %v797_v25 = vsel %vm751_vm2, %v1904_v22, -inf }
  0xf7   : > { %795 = vmax.xlane.f32.xlu0 %v794_v20  ;;  %792 = vmax.xlane.f32.xlu1 %v791_v24 }
  0xfb   : > { %798 = vmax.xlane.f32.xlu1 %v797_v25 }
 0x164   : > { %v754_v27 = vpop.xlane.xlu0 %753  ;;  %v760_v29 = vpop.xlane.xlu1 %759 }
 0x165   : > { %v800_v30 = vsub.f32 %v1846_v26, %v754_v27  ;;  %v802_v31 = vsub.f32 %v1848_v28, %v760_v29 }
 0x167   : > { %v816_v32 = vmul.f32 1.442695, %v800_v30  ;;  %v820_v33 = vmul.f32 1.442695, %v802_v31 }
 0x168   : > { %v757_v34 = vpop.xlane.xlu0 %756  ;;  %v763_v37 = vpop.xlane.xlu1 %762 }
 0x169   : > { %1659 = vpow2.f32 %v816_v32  ;;  %v801_v38 = vsub.f32 %v1854_v35, %v757_v34  ;;  %v803_v39 = vsub.f32 %v1856_v36, %v763_v37 }
 0x16a   : > { %1661 = vpow2.f32 %v820_v33 }
 0x16b   : > { %v818_v40 = vmul.f32 1.442695, %v801_v38  ;;  %v822_v41 = vmul.f32 1.442695, %v803_v39 }
 0x16c   : > { %v766_v42 = vpop.xlane.xlu0 %765 }
 0x16d   : > { %1663 = vpow2.f32 %v818_v40  ;;  %v804_v45 = vsub.f32 %v1862_v43, %v766_v42 }
 0x16e   : > { %1665 = vpow2.f32 %v822_v41 }
 0x16f   : > { %v824_v26 = vmul.f32 1.442695, %v804_v45 }
 0x170   : > { %v772_v46 = vpop.xlane.xlu0 %771  ;;  %v769_v28 = vpop.xlane.xlu1 %768 }
 0x171   : > { %1667 = vpow2.f32 %v824_v26  ;;  %v806_v47 = vsub.f32 %v1864_v44, %v772_v46  ;;  %v805_v48 = vsub.f32 %v1868_v50, %v769_v28  ;;  %v1651_v46 = vld [vmem:[%s1812_s24] sm:$0xff]   ;;  %v1652_v28 = vld [vmem:[%s1812_s24 + $0x8] sm:$0xff]  }
 0x172   : > { %1578 = vmatpush3.bf16.msra.mxu0 %v1651_v46  ;;  %1584 = vmatpush3.bf16.msra.mxu1 %v1652_v28 }
 0x173   : > { %v828_v49 = vmul.f32 1.442695, %v806_v47  ;;  %v826_v35 = vmul.f32 1.442695, %v805_v48  ;;  %1589 = vmatprep.subr.bf16.mxu0 %v1731_v0  ;;  %1595 = vmatprep.subr.bf16.mxu1 %v1731_v0 }
 0x174   : > { %v775_v51 = vpop.xlane.xlu1 %774  ;;  %v778_v36 = vpop.xlane.xlu0 %777 }
 0x175   : > { %1669 = vpow2.f32 %v828_v49  ;;  %v807_v52 = vsub.f32 %v1872_v53, %v775_v51  ;;  %v808_v54 = vsub.f32 %v1876_v58, %v778_v36 }
 0x176   : > { %v1919_v55 = vpop.eup %1659  ;;  %1671 = vpow2.f32 %v826_v35 }
 0x177   : > { %v830_v43 = vmul.f32 1.442695, %v807_v52  ;;  %v832_v56 = vmul.f32 1.442695, %v808_v54  ;;  %v848_v57 = vsel %vm751_vm2, %v1919_v55, 0.0  ;;  %v1923_v44 = vpop.eup %1661 }
 0x178   : > { %v784_v50 = vpop.xlane.xlu0 %783  ;;  %v781_v60 = vpop.xlane.xlu1 %780  ;;  %849 = vadd.xlane.f32.xlu0 %v848_v57  ;;  %v854_v1 = vsel %vm751_vm2, %v1923_v44, 0.0 }
 0x179   : > { %1673 = vpow2.f32 %v830_v43  ;;  %v810_v61 = vsub.f32 %v1878_v59, %v784_v50  ;;  %v809_v53 = vsub.f32 %v1884_v3, %v781_v60 }
 0x17a   : > { %v1927_v62 = vpop.eup %1663  ;;  %1675 = vpow2.f32 %v832_v56 }
 0x17b   : > { %v836_v58 = vmul.f32 1.442695, %v810_v61  ;;  %v834_v63 = vmul.f32 1.442695, %v809_v53  ;;  %v851_v2 = vsel %vm751_vm2, %v1927_v62, 0.0  ;;  %v1933_v4 = vpop.eup %1665 }
 0x17c   : > { %v787_v5 = vpop.xlane.xlu1 %786  ;;  %855 = vadd.xlane.f32.xlu0 %v854_v1  ;;  %v790_v7 = vpop.xlane.xlu0 %789  ;;  %852 = vadd.xlane.f32.xlu1 %v851_v2  ;;  %v857_v14 = vsel %vm751_vm2, %v1933_v4, 0.0  ;;  %v1653_v2 = vld [vmem:[%s1812_s24 + $0x10] sm:$0xff]  }
 0x17d   : > { %1677 = vpow2.f32 %v836_v58  ;;  %v811_v59 = vsub.f32 %v1888_v6, %v787_v5  ;;  %v812_v3 = vsub.f32 %v1892_v11, %v790_v7 }
 0x17e   : > { %v1937_v8 = vpop.eup %1667  ;;  %1679 = vpow2.f32 %v834_v63 }
 0x17f   : > { %v838_v9 = vmul.f32 1.442695, %v811_v59  ;;  %v840_v10 = vmul.f32 1.442695, %v812_v3  ;;  %v860_v13 = vsel %vm751_vm2, %v1937_v8, 0.0 }
 0x180   : > { %861 = vadd.xlane.f32.xlu0 %v860_v13  ;;  %v796_v15 = vpop.xlane.xlu0 %795  ;;  %858 = vadd.xlane.f32.xlu1 %v857_v14  ;;  %v793_v16 = vpop.xlane.xlu1 %792 }
 0x181   : > { %1681 = vpow2.f32 %v838_v9  ;;  %v814_v6 = vsub.f32 %v1894_v12, %v796_v15  ;;  %v813_v11 = vsub.f32 %v1900_v19, %v793_v16 }
 0x182   : > { %v1945_v17 = vpop.eup %1669  ;;  %1683 = vpow2.f32 %v840_v10 }
 0x183   : > { %v1947_v18 = vpop.eup %1671  ;;  %v844_v20 = vmul.f32 1.442695, %v814_v6  ;;  %v842_v21 = vmul.f32 1.442695, %v813_v11  ;;  %v866_v23 = vsel %vm751_vm2, %v1945_v17, 0.0  ;;  %v1655_v6 = vld [vmem:[%s1812_s24 + $0x20] sm:$0xff]  }
 0x184   : > { %867 = vadd.xlane.f32.xlu0 %v866_v23  ;;  %v863_v24 = vsel %vm751_vm2, %v1947_v18, 0.0  ;;  %v799_v25 = vpop.xlane.xlu1 %798 }
 0x185   : > { %1685 = vpow2.f32 %v844_v20  ;;  %864 = vadd.xlane.f32.xlu1 %v863_v24  ;;  %v815_v12 = vsub.f32 %v1904_v22, %v799_v25  ;;  %v1656_v25 = vld [vmem:[%s1812_s24 + $0x28] sm:$0xff]  }
 0x186   : > { %v1954_v19 = vpop.eup %1673  ;;  %1687 = vpow2.f32 %v842_v21 }
 0x187   : > { %v1956_v27 = vpop.eup %1675  ;;  %v846_v29 = vmul.f32 1.442695, %v815_v12  ;;  %v869_v30 = vsel %vm751_vm2, %v1954_v19, 0.0 }
 0x188   : > { %v872_v31 = vsel %vm751_vm2, %v1956_v27, 0.0 }
 0x189   : > { %1689 = vpow2.f32 %v846_v29  ;;  %873 = vadd.xlane.f32.xlu0 %v872_v31  ;;  %870 = vadd.xlane.f32.xlu1 %v869_v30 }
 0x18a   : > { %v1962_v32 = vpop.eup %1677 }
 0x18b   : > { %v1964_v33 = vpop.eup %1679  ;;  %v878_v22 = vsel %vm751_vm2, %v1962_v32, 0.0 }
 0x18c   : > { %v875_v34 = vsel %vm751_vm2, %v1964_v33, 0.0 }
 0x18d   : > { %879 = vadd.xlane.f32.xlu0 %v878_v22  ;;  %876 = vadd.xlane.f32.xlu1 %v875_v34 }
 0x18e   : > { %v1970_v37 = vpop.eup %1681 }
 0x18f   : > { %v1972_v38 = vpop.eup %1683  ;;  %v881_v39 = vsel %vm751_vm2, %v1970_v37, 0.0 }
 0x190   : > { %v884_v40 = vsel %vm751_vm2, %v1972_v38, 0.0 }
 0x191   : > { %885 = vadd.xlane.f32.xlu0 %v884_v40  ;;  %882 = vadd.xlane.f32.xlu1 %v881_v39 }
 0x192   : > { %v1978_v41 = vpop.eup %1685 }
 0x193   : > { %v1980_v42 = vpop.eup %1687  ;;  %v890_v45 = vsel %vm751_vm2, %v1978_v41, 0.0 }
 0x194   : > { %v887_v26 = vsel %vm751_vm2, %v1980_v42, 0.0 }
 0x195   : > { %891 = vadd.xlane.f32.xlu0 %v890_v45  ;;  %888 = vadd.xlane.f32.xlu1 %v887_v26 }
 0x196   : > { %v1988_v47 = vpop.eup %1689 }
 0x197   : > { %v893_v48 = vsel %vm751_vm2, %v1988_v47, 0.0 }
 0x199   : > { %894 = vadd.xlane.f32.xlu1 %v893_v48 }
 0x201   : > { %v850_v49 = vpop.xlane.xlu0 %849 }
 0x202   : > { %1691 = vrcp.f32 %v850_v49 }
 0x205   : > { %v856_v35 = vpop.xlane.xlu0 %855  ;;  %v853_v51 = vpop.xlane.xlu1 %852 }
 0x206   : > { %1693 = vrcp.f32 %v853_v51 }
 0x207   : > { %1695 = vrcp.f32 %v856_v35 }
 0x209   : > { %v862_v36 = vpop.xlane.xlu0 %861  ;;  %v859_v52 = vpop.xlane.xlu1 %858 }
 0x20a   : > { %1697 = vrcp.f32 %v859_v52 }
 0x20b   : > { %1699 = vrcp.f32 %v862_v36 }
 0x20d   : > { %v868_v54 = vpop.xlane.xlu0 %867 }
 0x20e   : > { %v865_v43 = vpop.xlane.xlu1 %864 }
 0x20f   : > { %1701 = vrcp.f32 %v865_v43  ;;  %v1692_v56 = vpop.eup %1691 }
 0x210   : > { %1703 = vrcp.f32 %v868_v54  ;;  %v897_v61 = vmul.f32 %v1692_v56, %v1919_v55 }
 0x212   : > { %v874_v57 = vpop.xlane.xlu0 %873  ;;  %v871_v50 = vpop.xlane.xlu1 %870 }
 0x213   : > { %v1694_v60 = vpop.eup %1693  ;;  %1705 = vrcp.f32 %v871_v50 }
 0x214   : > { %v899_v53 = vmul.f32 %v1694_v60, %v1927_v62  ;;  %v1696_v58 = vpop.eup %1695  ;;  %1707 = vrcp.f32 %v874_v57  ;;  %v1654_v62 = vld [vmem:[%s1812_s24 + $0x18] sm:$0xff]  }
 0x215   : > { %v901_v59 = vmul.f32 %v1696_v58, %v1923_v44 }
 0x216   : > { %v880_v63 = vpop.xlane.xlu0 %879  ;;  %v877_v1 = vpop.xlane.xlu1 %876  ;;  %v928_v5 = vpack.c.bf16 %v899_v53, %v897_v61 }
 0x217   : > { %v1698_v7 = vpop.eup %1697  ;;  %1709 = vrcp.f32 %v877_v1 }
 0x218   : > { %1580 = vmatmul.mubr.msk.bf16.vlgmr.msra.gmra.mxu0 %vm751_vm2, %v928_v5  ;;  %v903_v3 = vmul.f32 %v1698_v7, %v1933_v4  ;;  %v1700_v9 = vpop.eup %1699  ;;  %1711 = vrcp.f32 %v880_v63 }
 0x219   : > { %1590 = vmatpush3.bf16.msra.mxu0 %v1653_v2  ;;  %1591 = vmatprep.mubr.msk.bf16.mxu0 %vm1732_vm0, %v1731_v0  ;;  %v905_v44 = vmul.f32 %v1700_v9, %v1937_v8 }
 0x21a   : > { %v886_v55 = vpop.xlane.xlu0 %885  ;;  %v883_v10 = vpop.xlane.xlu1 %882  ;;  %v929_v13 = vpack.c.bf16 %v903_v3, %v901_v59  ;;  %1601 = vmatprep.subr.bf16.mxu0 %v1731_v0 }
 0x21b   : > { %1713 = vrcp.f32 %v883_v10 }
 0x21c   : > { %v1702_v14 = vpop.eup %1701  ;;  %1586 = vmatmul.mubr.msk.bf16.vlgmr.msra.gmra.mxu1 %vm751_vm2, %v929_v13  ;;  %1715 = vrcp.f32 %v886_v55 }
 0x21d   : > { %v907_v4 = vmul.f32 %v1702_v14, %v1947_v18  ;;  %1596 = vmatpush3.bf16.msra.mxu1 %v1654_v62  ;;  %1597 = vmatprep.mubr.msk.bf16.mxu1 %vm1732_vm0, %v1731_v0  ;;  %v1704_v11 = vpop.eup %1703 }
 0x21e   : > { %v892_v15 = vpop.xlane.xlu0 %891  ;;  %v889_v16 = vpop.xlane.xlu1 %888  ;;  %1607 = vmatprep.subr.bf16.mxu1 %v1731_v0  ;;  %v909_v18 = vmul.f32 %v1704_v11, %v1945_v17 }
 0x21f   : > { %v930_v20 = vpack.c.bf16 %v907_v4, %v905_v44  ;;  %1717 = vrcp.f32 %v889_v16 }
 0x220   : > { %v1706_v21 = vpop.eup %1705  ;;  %1719 = vrcp.f32 %v892_v15 }
 0x221   : > { %1592 = vmatmul.mubr.msk.bf16.vlgmr.msra.gmra.mxu0 %vm751_vm2, %v930_v20  ;;  %v911_v23 = vmul.f32 %v1706_v21, %v1954_v19  ;;  %v1708_v24 = vpop.eup %1707  ;;  %v1657_v19 = vld [vmem:[%s1812_s24 + $0x30] sm:$0xff]  }
 0x222   : > { %v895_v8 = vpop.xlane.xlu1 %894  ;;  %1602 = vmatpush3.bf16.msra.mxu0 %v1655_v6  ;;  %1603 = vmatprep.mubr.msk.bf16.mxu0 %vm1732_vm0, %v1731_v0  ;;  %v913_v30 = vmul.f32 %v1708_v24, %v1956_v27  ;;  %v1658_v27 = vld [vmem:[%s1812_s24 + $0x38] sm:$0xff]  }
 0x223   : > { %1721 = vrcp.f32 %v895_v8  ;;  %1613 = vmatprep.subr.bf16.mxu0 %v1731_v0  ;;  %v931_v12 = vpack.c.bf16 %v911_v23, %v909_v18 }
 0x224   : > { %v1710_v29 = vpop.eup %1709 }
 0x225   : > { %1598 = vmatmul.mubr.msk.bf16.vlgmr.msra.gmra.mxu1 %vm751_vm2, %v931_v12  ;;  %v915_v17 = vmul.f32 %v1710_v29, %v1964_v33  ;;  %v1712_v31 = vpop.eup %1711 }
 0x226   : > { %1608 = vmatpush3.bf16.msra.mxu1 %v1656_v25  ;;  %1609 = vmatprep.mubr.msk.bf16.mxu1 %vm1732_vm0, %v1731_v0  ;;  %v917_v39 = vmul.f32 %v1712_v31, %v1962_v32 }
 0x227   : > { %v932_v22 = vpack.c.bf16 %v915_v17, %v913_v30  ;;  %1619 = vmatprep.subr.bf16.mxu1 %v1731_v0 }
 0x228   : > { %v1714_v34 = vpop.eup %1713 }
 0x229   : > { %1604 = vmatmul.mubr.msk.bf16.vlgmr.msra.gmra.mxu0 %vm751_vm2, %v932_v22  ;;  %v919_v40 = vmul.f32 %v1714_v34, %v1970_v37  ;;  %v1716_v45 = vpop.eup %1715 }
 0x22a   : > { %1614 = vmatpush3.bf16.msra.mxu0 %v1657_v19  ;;  %1615 = vmatprep.mubr.msk.bf16.mxu0 %vm1732_vm0, %v1731_v0  ;;  %v921_v28 = vmul.f32 %v1716_v45, %v1972_v38 }
 0x22b   : > { %v933_v33 = vpack.c.bf16 %v919_v40, %v917_v39 }
 0x22c   : > { %v1718_v26 = vpop.eup %1717 }
 0x22d   : > { %v1720_v46 = vpop.eup %1719  ;;  %1610 = vmatmul.mubr.msk.bf16.vlgmr.msra.gmra.mxu1 %vm751_vm2, %v933_v33  ;;  %v923_v48 = vmul.f32 %v1718_v26, %v1980_v42 }
 0x22e   : > { %1620 = vmatpush3.bf16.msra.mxu1 %v1658_v27  ;;  %1621 = vmatprep.mubr.msk.bf16.mxu1 %vm1732_vm0, %v1731_v0  ;;  %v925_v49 = vmul.f32 %v1720_v46, %v1978_v41 }
 0x22f   : > { %v934_v37 = vpack.c.bf16 %v923_v48, %v921_v28 }
 0x230   : > { %v1722_v32 = vpop.eup %1721 }
 0x231   : > { %v927_v35 = vmul.f32 %v1722_v32, %v1988_v47  ;;  %1616 = vmatmul.mubr.msk.bf16.vlgmr.msra.gmra.mxu0 %vm751_vm2, %v934_v37 }
 0x233   : > { %v935_v51 = vpack.c.bf16 %v927_v35, %v925_v49 }
 0x235   : > { %1622 = vmatmul.mubr.msk.bf16.vlgmr.msra.gmra.mxu1 %vm751_vm2, %v935_v51 }
 0x2d8   : > { %v979_v0 = vpop.f32.mrf.mxu0 }
 0x2d9   : > { %1336 = vst.msk [vmem:[%s2044_s28] sm:$0xff] %vm288_vm1, %v979_v0 }
 0x2da   : > { %v1581_v38 = vpop.f32.mrf.mxu0 }
 0x2dc   : > { %v982_v41 = vpop.f32.mrf.mxu0  ;;  %v1029_v42 = vpop.f32.mrf.mxu1 }
 0x2dd   : > { %1337 = vst.msk [vmem:[%s2044_s28 + $0x8] sm:$0xff] %vm288_vm1, %v982_v41  ;;  %1338 = vst.msk [vmem:[%s2044_s28 + $0x10] sm:$0xff] %vm288_vm1, %v1029_v42 }
 0x2de   : > { %v1582_v47 = vpop.f32.mrf.mxu0  ;;  %v1587_v36 = vpop.f32.mrf.mxu1 }
 0x2e0   : > { %v1032_v52 = vpop.f32.mrf.mxu1 }
 0x2e1   : > { %v1079_v54 = vpop.f32.mrf.mxu0  ;;  %1339 = vst.msk [vmem:[%s2044_s28 + $0x18] sm:$0xff] %vm288_vm1, %v1032_v52 }
 0x2e2   : > { %1340 = vst.msk [vmem:[%s2044_s28 + $0x20] sm:$0xff] %vm288_vm1, %v1079_v54  ;;  %v1588_v43 = vpop.f32.mrf.mxu1 }
 0x2e3   : > { %v1593_v56 = vpop.f32.mrf.mxu0 }
 0x2e5   : > { %v1082_v57 = vpop.f32.mrf.mxu0  ;;  %v1129_v50 = vpop.f32.mrf.mxu1 }
 0x2e6   : > { %1341 = vst.msk [vmem:[%s2044_s28 + $0x28] sm:$0xff] %vm288_vm1, %v1082_v57  ;;  %1342 = vst.msk [vmem:[%s2044_s28 + $0x30] sm:$0xff] %vm288_vm1, %v1129_v50 }
 0x2e7   : > { %v1594_v60 = vpop.f32.mrf.mxu0  ;;  %v1599_v61 = vpop.f32.mrf.mxu1 }
 0x2e9   : > { %v1132_v53 = vpop.f32.mrf.mxu1  ;;  %v1179_v58 = vpop.f32.mrf.mxu0 }
 0x2ea   : > { %1343 = vst.msk [vmem:[%s2044_s28 + $0x38] sm:$0xff] %vm288_vm1, %v1132_v53  ;;  %1344 = vst.msk [vmem:[%s2044_s28 + $0x40] sm:$0xff] %vm288_vm1, %v1179_v58 }
 0x2eb   : > { %v1600_v63 = vpop.f32.mrf.mxu1  ;;  %v1605_v1 = vpop.f32.mrf.mxu0 }
 0x2ed   : > { %v1182_v2 = vpop.f32.mrf.mxu0  ;;  %v1229_v5 = vpop.f32.mrf.mxu1 }
 0x2ee   : > { %1345 = vst.msk [vmem:[%s2044_s28 + $0x48] sm:$0xff] %vm288_vm1, %v1182_v2  ;;  %1346 = vst.msk [vmem:[%s2044_s28 + $0x50] sm:$0xff] %vm288_vm1, %v1229_v5 }
 0x2ef   : > { %v1606_v7 = vpop.f32.mrf.mxu0  ;;  %v1611_v59 = vpop.f32.mrf.mxu1 }
 0x2f1   : > { %v1232_v3 = vpop.f32.mrf.mxu1  ;;  %v1279_v9 = vpop.f32.mrf.mxu0 }
 0x2f2   : > { %1347 = vst.msk [vmem:[%s2044_s28 + $0x58] sm:$0xff] %vm288_vm1, %v1232_v3  ;;  %1348 = vst.msk [vmem:[%s2044_s28 + $0x60] sm:$0xff] %vm288_vm1, %v1279_v9 }
 0x2f3   : > { %v1612_v55 = vpop.f32.mrf.mxu1  ;;  %v1617_v10 = vpop.f32.mrf.mxu0 }
 0x2f5   : > { %v1282_v62 = vpop.f32.mrf.mxu0  ;;  %v1329_v13 = vpop.f32.mrf.mxu1 }
 0x2f6   : > { %1349 = vst.msk [vmem:[%s2044_s28 + $0x68] sm:$0xff] %vm288_vm1, %v1282_v62  ;;  %1350 = vst.msk [vmem:[%s2044_s28 + $0x70] sm:$0xff] %vm288_vm1, %v1329_v13 }
 0x2f7   : > { %v1618_v14 = vpop.f32.mrf.mxu0  ;;  %v1623_v44 = vpop.f32.mrf.mxu1 }
 0x2f9   : > { %v1332_v4 = vpop.f32.mrf.mxu1 }
 0x2fa   : > { %1351 = vst.msk [vmem:[%s2044_s28 + $0x78] sm:$0xff] %vm288_vm1, %v1332_v4 }
 0x2fb   : > { %v1624_v15 = vpop.f32.mrf.mxu1 }
 0x2fc PF: > { %s13_s12 = sadd.s32 1, %s1729_s12  }
 0x2fd   : > { %p10_p4 = scmp.ge.s32.totalorder %s13_s12, 5  }
 0x2ff   :  { %12 = sbr.rel (!%p10_p4) target bundleno = 1 (0x1), region = 68 }

// kernel: closed_call.20
= control target key start
LH: loop header
LB: loop body
LE: loop exit
PB: predicated region body
PF: predicated region fallthrough
CT: control target
= control target key end

     0   :  { %vm87_vm0 = vcmask 785408   ;;  %s284_s1 = inlined_call_operand.vmem [shape: bf16[96,96], index: 1, kind: input, shape index: {}]   ;;  %s285_s0 = inlined_call_operand.vmem [shape: bf16[32,96], index: 0, kind: input, shape index: {}]   ;;  %s286_s2 = inlined_call_operand.vmem [shape: f32[1,96], index: 2, kind: input, shape index: {}]   ;;  %s287_s3 = inlined_call_operand.vmem [shape: f32[32,96], index: 3, kind: input, shape index: {}]   ;;  %s288_s4 = inlined_call_operand.vmem [shape: f32[32,96], index: 4, kind: output, shape index: {}]  }
   0x1   :  { %v194_v0 = vld [vmem:[%s284_s1 + $0x28] sm:$0xff]   ;;  %v195_v1 = vld [vmem:[%s284_s1 + $0x20] sm:$0xff]   ;;  %v196_v2 = vld [vmem:[%s284_s1 + $0x18] sm:$0xff]  }
   0x2   :  { %178 = vmatprep.subr.bf16.mxu0 %v194_v0  ;;  %v200_v3 = vld [vmem:[%s285_s0] sm:$0xff]   ;;  %v197_v4 = vld [vmem:[%s284_s1 + $0x10] sm:$0xff]   ;;  %v198_v5 = vld [vmem:[%s284_s1 + $0x8] sm:$0xff]  }
   0x3   :  { %179 = vmatpush3.bf16.msra.mxu0 %v194_v0  ;;  %190 = vmatprep.mubr.msk.bf16.mxu0 %vm87_vm0, %v200_v3  ;;  %v199_v6 = vld [vmem:[%s284_s1] sm:$0xff]   ;;  %v201_v7 = vld [vmem:[%s285_s0 + $0x8] sm:$0xff]   ;;  %v145_v10 = vld [vmem:[%s287_s3 + $0x10] sm:$0xff] }
   0x4   :  { %180 = vmatprep.subr.bf16.mxu0 %v195_v1  ;;  %v159_v8 = vld [vmem:[%s286_s2] ss:$0 sm:$0xff]  ;;  %v146_v17 = vld [vmem:[%s287_s3 + $0x18] sm:$0xff]  ;;  %v144_v21 = vld [vmem:[%s287_s3 + $0x8] sm:$0xff] }
   0x5   :  { %v143_v13 = vld [vmem:[%s287_s3] sm:$0xff] }
   0x7   :  { %181 = vmatpush3.bf16.msra.mxu0 %v195_v1 }
   0x8   :  { %182 = vmatprep.subr.bf16.mxu0 %v196_v2 }
   0xb   :  { %183 = vmatpush3.bf16.msra.mxu0 %v196_v2 }
   0xc   :  { %184 = vmatprep.subr.bf16.mxu0 %v197_v4 }
   0xf   :  { %185 = vmatpush3.bf16.msra.mxu0 %v197_v4 }
  0x10   :  { %186 = vmatprep.subr.bf16.mxu0 %v198_v5 }
  0x13   :  { %187 = vmatpush3.bf16.msra.mxu0 %v198_v5 }
  0x14   :  { %188 = vmatprep.subr.bf16.mxu0 %v199_v6 }
  0x17   :  { %189 = vmatpush3.bf16.msra.mxu0 %v199_v6 }
  0x1a   :  { %191 = vmatmul.mubr.msk.bf16.vlgmr.msra.gmra.mxu0 %vm87_vm0, %v201_v7 }
  0xda   :  { %v192_v9 = vpop.f32.mrf.mxu0 }
  0xdb   :  { %v137_v11 = vadd.f32 %v192_v9, %v159_v8 }
  0xdc   :  { %v128_v12 = vpop.f32.mrf.mxu0 }
  0xdd   :  { %v149_v14 = vadd.f32 %v145_v10, %v137_v11  ;;  %v129_v15 = vadd.f32 %v159_v8, %v128_v12 }
  0xde   :  { %v193_v16 = vpop.f32.mrf.mxu0 }
  0xdf   :  { %153 = vst.msk [vmem:[%s288_s4 + $0x10] sm:$0xff] %vm87_vm0, %v149_v14  ;;  %v147_v18 = vadd.f32 %v143_v13, %v129_v15  ;;  %v140_v19 = vadd.f32 %v193_v16, %v159_v8 }
  0xe0   :  { %v131_v20 = vpop.f32.mrf.mxu0 }
  0xe1   :  { %151 = vst.msk [vmem:[%s288_s4] sm:$0xff] %vm87_vm0, %v147_v18  ;;  %v150_v22 = vadd.f32 %v146_v17, %v140_v19  ;;  %v132_v23 = vadd.f32 %v159_v8, %v131_v20 }
  0xe3   :  { %154 = vst.msk [vmem:[%s288_s4 + $0x18] sm:$0xff] %vm87_vm0, %v150_v22  ;;  %v148_v24 = vadd.f32 %v144_v21, %v132_v23 }
  0xe5   :  { %152 = vst.msk [vmem:[%s288_s4 + $0x8] sm:$0xff] %vm87_vm0, %v148_v24 }

// kernel: closed_call.21
= control target key start
LH: loop header
LB: loop body
LE: loop exit
PB: predicated region body
PF: predicated region fallthrough
CT: control target
= control target key end

     0   :  { %vm25_vm0 = vcmask 785408   ;;  %v577_v41 = vmov 0   ;;  %s847_s0 = inlined_call_operand.vmem [shape: f32[32,96], index: 0, kind: input, shape index: {}]   ;;  %s848_s1 = inlined_call_operand.vmem [shape: bf16[96,384], index: 1, kind: input, shape index: {}]   ;;  %s849_s2 = inlined_call_operand.vmem [shape: f32[1,96], index: 2, kind: input, shape index: {}]   ;;  %s850_s3 = inlined_call_operand.vmem [shape: f32[1,96], index: 3, kind: input, shape index: {}]   ;;  %s851_s4 = inlined_call_operand.vmem [shape: f32[1,384], index: 4, kind: input, shape index: {}]   ;;  %s852_s5 = inlined_call_operand.vmem [shape: f32[32,384], index: 5, kind: output, shape index: {}]  }
   0x1   :  { %v21_v0 = vld [vmem:[%s847_s0] sm:$0xff]  ;;  %v23_v1 = vld [vmem:[%s847_s0 + $0x10] sm:$0xff]  ;;  %v22_v2 = vld [vmem:[%s847_s0 + $0x8] sm:$0xff]  ;;  %278 = vmatprep.mubr.bf16.mxu0 %v577_v41 }
   0x2   :  { %v26_v3 = vsel %vm25_vm0, %v21_v0, 0.0  ;;  %v32_v4 = vsel %vm25_vm0, %v23_v1, 0.0  ;;  %v24_v5 = vld [vmem:[%s847_s0 + $0x18] sm:$0xff]  ;;  %v29_v6 = vsel %vm25_vm0, %v22_v2, 0.0  ;;  %v524_v30 = vld [vmem:[%s848_s1 + $0x64] ss:$12 sps:$4 sm:$0xff]  }
   0x3   :  { %27 = vadd.xlane.f32.xlu0 %v26_v3  ;;  %33 = vadd.xlane.f32.xlu1 %v32_v4  ;;  %v35_v7 = vsel %vm25_vm0, %v24_v5, 0.0  ;;  %v521_v28 = vld [vmem:[%s848_s1 + $0x7c] ss:$12 sps:$4 sm:$0xff]   ;;  %v523_v29 = vld [vmem:[%s848_s1 + $0x78] ss:$12 sps:$4 sm:$0xff]  }
   0x4   :  { %250 = vmatprep.subr.bf16.mxu0 %v521_v28  ;;  %v526_v31 = vld [vmem:[%s848_s1 + $0x80] ss:$12 sps:$4 sm:$0xff]   ;;  %v530_v34 = vld [vmem:[%s848_s1 + $0x68] ss:$12 sps:$4 sm:$0xff]   ;;  %v534_v37 = vld [vmem:[%s848_s1 + $0x50] ss:$12 sps:$4 sm:$0xff]  }
   0x5   :  { %251 = vmatpush1.bf16.msra.mxu0 %v523_v29  ;;  %v527_v32 = vld [vmem:[%s848_s1 + $0x60] ss:$12 sps:$4 sm:$0xff]   ;;  %504 = vmatprep.subr.bf16.mxu1 %v526_v31  ;;  %v531_v35 = vld [vmem:[%s848_s1 + $0x48] ss:$12 sps:$4 sm:$0xff]   ;;  %v535_v38 = vld [vmem:[%s848_s1 + $0x30] ss:$12 sps:$4 sm:$0xff]  }
   0x6   :  { %252 = vmatprep.subr.bf16.mxu0 %v524_v30  ;;  %505 = vmatpush3.bf16.msra.mxu1 %v526_v31  ;;  %v528_v33 = vld [vmem:[%s848_s1 + $0x4c] ss:$12 sps:$4 sm:$0xff]   ;;  %v532_v36 = vld [vmem:[%s848_s1 + $0x34] ss:$12 sps:$4 sm:$0xff]   ;;  %v536_v39 = vld [vmem:[%s848_s1 + $0x1c] ss:$12 sps:$4 sm:$0xff]  }
   0x7   :  { %30 = vadd.xlane.f32.xlu0 %v29_v6  ;;  %36 = vadd.xlane.f32.xlu1 %v35_v7  ;;  %v538_v40 = vld [vmem:[%s848_s1 + $0x38] ss:$12 sps:$4 sm:$0xff]   ;;  %v542_v44 = vld [vmem:[%s848_s1 + $0x20] ss:$12 sps:$4 sm:$0xff]   ;;  %v544_v46 = vld [vmem:[%s848_s1 + $0x8] ss:$12 sps:$4 sm:$0xff]  }
   0x8   :  { %506 = vmatprep.subr.bf16.mxu1 %v530_v34  ;;  %v539_v42 = vld [vmem:[%s848_s1 + $0x18] ss:$12 sps:$4 sm:$0xff]   ;;  %v543_v45 = vld [vmem:[%s848_s1] ss:$12 sps:$4 sm:$0xff]  }
   0x9   :  { %253 = vmatpush1.bf16.msra.mxu0 %v527_v32  ;;  %v540_v43 = vld [vmem:[%s848_s1 + $0x4] ss:$12 sps:$4 sm:$0xff]   ;;  %v472_v61 = vld [vmem:[%s849_s2] ss:$0 sm:$0xff] }
   0xa   :  { %254 = vmatprep.subr.bf16.mxu0 %v528_v33  ;;  %507 = vmatpush3.bf16.msra.mxu1 %v530_v34 }
   0xb   :  { %508 = vmatprep.subr.bf16.mxu1 %v534_v37 }
   0xd   :  { %255 = vmatpush1.bf16.msra.mxu0 %v531_v35 }
   0xe   :  { %256 = vmatprep.subr.bf16.mxu0 %v532_v36  ;;  %509 = vmatpush3.bf16.msra.mxu1 %v534_v37 }
   0xf   :  { %510 = vmatprep.subr.bf16.mxu1 %v538_v40 }
  0x11   :  { %257 = vmatpush1.bf16.msra.mxu0 %v535_v38 }
  0x12   :  { %258 = vmatprep.subr.bf16.mxu0 %v536_v39  ;;  %511 = vmatpush3.bf16.msra.mxu1 %v538_v40 }
  0x13   :  { %512 = vmatprep.subr.bf16.mxu1 %v542_v44 }
  0x15   :  { %259 = vmatpush1.bf16.msra.mxu0 %v539_v42 }
  0x16   :  { %260 = vmatprep.subr.bf16.mxu0 %v540_v43  ;;  %513 = vmatpush3.bf16.msra.mxu1 %v542_v44 }
  0x17   :  { %514 = vmatprep.subr.bf16.mxu1 %v544_v46 }
  0x19   :  { %261 = vmatpush1.bf16.msra.mxu0 %v543_v45 }
  0x1a   :  { %515 = vmatpush3.bf16.msra.mxu1 %v544_v46 }
  0x8c   :  { %v28_v8 = vpop.xlane.xlu0 %27  ;;  %v34_v9 = vpop.xlane.xlu1 %33 }
  0x8d   :  { %v39_v10 = vmul.f32 0.010416667, %v28_v8  ;;  %v41_v11 = vmul.f32 0.010416667, %v34_v9 }
  0x8f   :  { %v624_v12 = vsub.f32 %v21_v0, %v39_v10  ;;  %v626_v13 = vsub.f32 %v23_v1, %v41_v11 }
  0x90   :  { %v31_v14 = vpop.xlane.xlu0 %30  ;;  %v37_v15 = vpop.xlane.xlu1 %36 }
  0x91   :  { %v40_v16 = vmul.f32 0.010416667, %v31_v14  ;;  %v42_v17 = vmul.f32 0.010416667, %v37_v15  ;;  %v47_v18 = vmul.f32 %v624_v12, %v624_v12  ;;  %v49_v19 = vmul.f32 %v626_v13, %v626_v13 }
  0x93   :  { %v632_v20 = vsub.f32 %v22_v2, %v40_v16  ;;  %v634_v21 = vsub.f32 %v24_v5, %v42_v17  ;;  %v51_v22 = vsel %vm25_vm0, %v47_v18, 0.0  ;;  %v57_v23 = vsel %vm25_vm0, %v49_v19, 0.0  ;;  %v473_v2 = vld [vmem:[%s850_s3] ss:$0 sm:$0xff] }
  0x94   :  { %52 = vadd.xlane.f32.xlu0 %v51_v22  ;;  %v127_v18 = vld [vmem:[%s851_s4] sm:$0x7] }
  0x95   :  { %v48_v24 = vmul.f32 %v632_v20, %v632_v20  ;;  %v50_v25 = vmul.f32 %v634_v21, %v634_v21 }
  0x97   :  { %v54_v26 = vsel %vm25_vm0, %v48_v24, 0.0  ;;  %v60_v27 = vsel %vm25_vm0, %v50_v25, 0.0 }
  0x98   :  { %58 = vadd.xlane.f32.xlu0 %v57_v23  ;;  %55 = vadd.xlane.f32.xlu1 %v54_v26 }
  0x9c   :  { %61 = vadd.xlane.f32.xlu1 %v60_v27 }
 0x11d   :  { %v53_v47 = vpop.xlane.xlu0 %52 }
 0x11e   :  { %v63_v48 = vmul.f32 0.010416667, %v53_v47 }
 0x120   :  { %v67_v49 = vadd.f32 1e-06, %v63_v48 }
 0x121   :  { %v56_v50 = vpop.xlane.xlu1 %55  ;;  %v59_v51 = vpop.xlane.xlu0 %58 }
 0x122   :  { %545 = vrsqrt.f32 %v67_v49  ;;  %v64_v52 = vmul.f32 0.010416667, %v56_v50  ;;  %v65_v53 = vmul.f32 0.010416667, %v59_v51 }
 0x124   :  { %v68_v54 = vadd.f32 1e-06, %v64_v52  ;;  %v69_v55 = vadd.f32 1e-06, %v65_v53 }
 0x125   :  { %v62_v56 = vpop.xlane.xlu1 %61 }
 0x126   :  { %547 = vrsqrt.f32 %v68_v54  ;;  %v66_v57 = vmul.f32 0.010416667, %v62_v56 }
 0x127   :  { %549 = vrsqrt.f32 %v69_v55 }
 0x128   :  { %v70_v58 = vadd.f32 1e-06, %v66_v57 }
 0x12a   :  { %551 = vrsqrt.f32 %v70_v58 }
 0x12f   :  { %v546_v59 = vpop.eup %545 }
 0x130   :  { %v75_v60 = vmul.f32 %v546_v59, %v624_v12 }
 0x132   :  { %v86_v1 = vmul.f32 %v472_v61, %v75_v60 }
 0x133   :  { %v548_v62 = vpop.eup %547 }
 0x134   :  { %v550_v63 = vpop.eup %549  ;;  %v76_v0 = vmul.f32 %v548_v62, %v632_v20  ;;  %v97_v6 = vadd.f32 %v473_v2, %v86_v1 }
 0x135   :  { %v77_v3 = vmul.f32 %v550_v63, %v626_v13  ;;  %v129_v13 = vlaneseq }
 0x136   :  { %v87_v4 = vmul.f32 %v472_v61, %v76_v0 }
 0x137   :  { %v552_v5 = vpop.eup %551  ;;  %v88_v9 = vmul.f32 %v472_v61, %v77_v3  ;;  %v130_v16 = vshrl.u32 %v129_v13, 7 }
 0x138   :  { %v98_v7 = vadd.f32 %v473_v2, %v87_v4  ;;  %v78_v8 = vmul.f32 %v552_v5, %v634_v21 }
 0x139   :  { %v99_v12 = vadd.f32 %v473_v2, %v88_v9  ;;  %v131_v17 = vsub.s32 0, %v130_v16  ;;  %v135_v19 = vsub.s32 1, %v130_v16  ;;  %v139_v21 = vsub.s32 2, %v130_v16 }
 0x13a   :  { %v101_v10 = vpack.c.bf16 %v98_v7, %v97_v6  ;;  %v89_v11 = vmul.f32 %v472_v61, %v78_v8 }
 0x13b   :  { %v715_v20 = vrot.slane %v127_v18, %v131_v17  ;;  %v717_v22 = vrot.slane %v127_v18, %v135_v19  ;;  %v140_v26 = vrot.slane %v127_v18, %v139_v21 }
 0x13c   :  { %492 = vmatmul.mubr.msk.bf16.vlgmr.msra.gmra.mxu0 %vm25_vm0, %v101_v10  ;;  %516 = vmatprep.mubr.msk.bf16.mxu1 %vm25_vm0, %v101_v10  ;;  %v100_v14 = vadd.f32 %v473_v2, %v89_v11 }
 0x13d   :  { %288 = vmatprep.mubr.bf16.mxu0 %v577_v41 }
 0x13e   :  { %v102_v15 = vpack.c.bf16 %v100_v14, %v99_v12 }
 0x140   :  { %517 = vmatmul.mubr.msk.bf16.vlgmr.msra.gmra.mxu1 %vm25_vm0, %v102_v15 }
 0x144   :  { %493 = vmatmul.mubr.msk.bf16.gmra.mxu0 %vm25_vm0, %v102_v15 }
 0x1fc   :  { %v280_v23 = vpop.f32.mrf.mxu0 }
 0x1fd   :  { %v720_v24 = vadd.f32 %v280_v23, %v715_v20 }
 0x1fe   :  { %v282_v25 = vpop.f32.mrf.mxu0 }
 0x1ff   :  { %v360_v27 = vmul.f32 0.044715, %v720_v24  ;;  %v724_v28 = vadd.f32 %v282_v25, %v717_v22 }
 0x200   :  { %v284_v29 = vpop.f32.mrf.mxu0  ;;  %v518_v30 = vpop.f32.mrf.mxu1 }
 0x201   :  { %v372_v31 = vmul.f32 %v360_v27, %v720_v24  ;;  %v361_v32 = vmul.f32 0.044715, %v724_v28  ;;  %v729_v33 = vadd.f32 %v284_v29, %v715_v20  ;;  %v731_v34 = vadd.f32 %v518_v30, %v140_v26 }
 0x202   :  { %v286_v35 = vpop.f32.mrf.mxu0  ;;  %v333_v36 = vpop.f32.mrf.mxu1 }
 0x203   :  { %v384_v37 = vmul.f32 %v372_v31, %v720_v24  ;;  %v373_v38 = vmul.f32 %v361_v32, %v724_v28  ;;  %v363_v39 = vmul.f32 0.044715, %v729_v33  ;;  %v368_v40 = vmul.f32 0.044715, %v731_v34 }
 0x204   :  { %v738_v41 = vadd.f32 %v286_v35, %v717_v22  ;;  %v740_v42 = vadd.f32 %v333_v36, %v140_v26  ;;  %v290_v43 = vpop.f32.mrf.mxu0  ;;  %v519_v55 = vpop.f32.mrf.mxu1 }
 0x205   :  { %v396_v44 = vadd.f32 %v384_v37, %v720_v24  ;;  %v385_v45 = vmul.f32 %v373_v38, %v724_v28  ;;  %v375_v46 = vmul.f32 %v363_v39, %v729_v33  ;;  %v746_v47 = vadd.f32 %v290_v43, %v715_v20 }
 0x206   :  { %v380_v48 = vmul.f32 %v368_v40, %v731_v34  ;;  %v364_v49 = vmul.f32 0.044715, %v738_v41  ;;  %v292_v50 = vpop.f32.mrf.mxu0  ;;  %v362_v54 = vmul.f32 0.044715, %v740_v42  ;;  %v761_v2 = vadd.f32 %v519_v55, %v140_v26  ;;  %v336_v9 = vpop.f32.mrf.mxu1 }
 0x207   :  { %v408_v51 = vmul.f32 0.7978846, %v396_v44  ;;  %v397_v52 = vadd.f32 %v385_v45, %v724_v28  ;;  %v387_v53 = vmul.f32 %v375_v46, %v729_v33  ;;  %v366_v58 = vmul.f32 0.044715, %v746_v47 }
 0x208   :  { %v392_v56 = vmul.f32 %v380_v48, %v731_v34  ;;  %v376_v57 = vmul.f32 %v364_v49, %v738_v41  ;;  %v374_v61 = vmul.f32 %v362_v54, %v740_v42  ;;  %v294_v62 = vpop.f32.mrf.mxu0  ;;  %v765_v5 = vadd.f32 %v292_v50, %v717_v22 }
 0x209   :  { %553 = vtanh.f32 %v408_v51  ;;  %v409_v59 = vmul.f32 0.7978846, %v397_v52  ;;  %v399_v60 = vadd.f32 %v387_v53, %v729_v33  ;;  %v378_v1 = vmul.f32 %v366_v58, %v746_v47 }
 0x20a   :  { %v404_v63 = vadd.f32 %v392_v56, %v731_v34  ;;  %v388_v0 = vmul.f32 %v376_v57, %v738_v41  ;;  %v386_v4 = vmul.f32 %v374_v61, %v740_v42  ;;  %v371_v11 = vmul.f32 0.044715, %v761_v2  ;;  %v296_v12 = vpop.f32.mrf.mxu0 }
 0x20b   :  { %555 = vtanh.f32 %v409_v59  ;;  %v411_v3 = vmul.f32 0.7978846, %v399_v60  ;;  %v390_v8 = vmul.f32 %v378_v1, %v746_v47  ;;  %v367_v13 = vmul.f32 0.044715, %v765_v5 }
 0x20c   :  { %v416_v6 = vmul.f32 0.7978846, %v404_v63  ;;  %v400_v7 = vadd.f32 %v388_v0, %v738_v41  ;;  %v398_v10 = vadd.f32 %v386_v4, %v740_v42  ;;  %v383_v17 = vmul.f32 %v371_v11, %v761_v2 }
 0x20d   :  { %557 = vtanh.f32 %v411_v3  ;;  %v402_v15 = vadd.f32 %v390_v8, %v746_v47  ;;  %v774_v18 = vadd.f32 %v336_v9, %v140_v26  ;;  %v777_v19 = vadd.f32 %v294_v62, %v715_v20 }
 0x20e   :  { %559 = vtanh.f32 %v416_v6  ;;  %v412_v14 = vmul.f32 0.7978846, %v400_v7  ;;  %v410_v16 = vmul.f32 0.7978846, %v398_v10  ;;  %v379_v23 = vmul.f32 %v367_v13, %v765_v5 }
 0x20f   :  { %v414_v21 = vmul.f32 0.7978846, %v402_v15  ;;  %v781_v25 = vadd.f32 %v296_v12, %v717_v22  ;;  %v395_v27 = vmul.f32 %v383_v17, %v761_v2  ;;  %v365_v29 = vmul.f32 0.044715, %v774_v18 }
 0x210   :  { %561 = vtanh.f32 %v412_v14  ;;  %v391_v30 = vmul.f32 %v379_v23, %v765_v5  ;;  %v369_v26 = vmul.f32 0.044715, %v777_v19  ;;  %v348_v40 = vmul.f32 0.5, %v720_v24 }
 0x211   :  { %563 = vtanh.f32 %v410_v16  ;;  %v407_v20 = vadd.f32 %v395_v27, %v761_v2  ;;  %v377_v31 = vmul.f32 %v365_v29, %v774_v18  ;;  %v370_v32 = vmul.f32 0.044715, %v781_v25 }
 0x212   :  { %565 = vtanh.f32 %v414_v21  ;;  %v403_v35 = vadd.f32 %v391_v30, %v765_v5  ;;  %v381_v22 = vmul.f32 %v369_v26, %v777_v19  ;;  %v349_v50 = vmul.f32 0.5, %v724_v28 }
 0x213   :  { %v419_v36 = vmul.f32 0.7978846, %v407_v20  ;;  %v389_v37 = vmul.f32 %v377_v31, %v774_v18  ;;  %v382_v38 = vmul.f32 %v370_v32, %v781_v25  ;;  %v351_v56 = vmul.f32 0.5, %v729_v33 }
 0x214   :  { %v415_v43 = vmul.f32 0.7978846, %v403_v35  ;;  %v393_v44 = vmul.f32 %v381_v22, %v777_v19  ;;  %v356_v61 = vmul.f32 0.5, %v731_v34  ;;  %v352_v3 = vmul.f32 0.5, %v738_v41 }
 0x215   :  { %567 = vtanh.f32 %v419_v36  ;;  %v401_v46 = vadd.f32 %v389_v37, %v774_v18  ;;  %v394_v48 = vmul.f32 %v382_v38, %v781_v25  ;;  %v350_v34 = vmul.f32 0.5, %v740_v42 }
 0x216   :  { %v554_v39 = vpop.eup %553  ;;  %569 = vtanh.f32 %v415_v43  ;;  %v405_v51 = vadd.f32 %v393_v44, %v777_v19  ;;  %v354_v9 = vmul.f32 0.5, %v746_v47  ;;  %v359_v14 = vmul.f32 0.5, %v761_v2 }
 0x217   :  { %v432_v45 = vadd.f32 1.0, %v554_v39  ;;  %v413_v54 = vmul.f32 0.7978846, %v401_v46  ;;  %v406_v24 = vadd.f32 %v394_v48, %v781_v25  ;;  %v355_v15 = vmul.f32 0.5, %v765_v5 }
 0x218   :  { %v556_v49 = vpop.eup %555  ;;  %v417_v57 = vmul.f32 0.7978846, %v405_v51  ;;  %v353_v27 = vmul.f32 0.5, %v774_v18  ;;  %v357_v2 = vmul.f32 0.5, %v777_v19  ;;  %v358_v20 = vmul.f32 0.5, %v781_v25 }
 0x219   :  { %v444_v52 = vmul.f32 %v432_v45, %v348_v40  ;;  %v433_v53 = vadd.f32 1.0, %v556_v49  ;;  %571 = vtanh.f32 %v413_v54  ;;  %v418_v28 = vmul.f32 0.7978846, %v406_v24 }
 0x21a   :  { %v558_v55 = vpop.eup %557  ;;  %573 = vtanh.f32 %v417_v57 }
 0x21b   :  { %v560_v58 = vpop.eup %559  ;;  %456 = vst [vmem:[%s852_s5] sm:$0xff] %v444_v52  ;;  %v445_v59 = vmul.f32 %v433_v53, %v349_v50  ;;  %v435_v60 = vadd.f32 1.0, %v558_v55  ;;  %575 = vtanh.f32 %v418_v28 }
 0x21c   :  { %v440_v62 = vadd.f32 1.0, %v560_v58 }
 0x21d   :  { %v562_v63 = vpop.eup %561  ;;  %457 = vst [vmem:[%s852_s5 + $0x8] sm:$0xff] %v445_v59  ;;  %v447_v33 = vmul.f32 %v435_v60, %v351_v56 }
 0x21e   :  { %v564_v0 = vpop.eup %563  ;;  %v452_v1 = vmul.f32 %v440_v62, %v356_v61  ;;  %v436_v4 = vadd.f32 1.0, %v562_v63 }
 0x21f   :  { %v566_v6 = vpop.eup %565  ;;  %459 = vst [vmem:[%s852_s5 + $0x18] sm:$0xff] %v447_v33  ;;  %v434_v7 = vadd.f32 1.0, %v564_v0 }
 0x220   :  { %464 = vst [vmem:[%s852_s5 + $0x40] sm:$0xff] %v452_v1  ;;  %v448_v8 = vmul.f32 %v436_v4, %v352_v3  ;;  %v438_v10 = vadd.f32 1.0, %v566_v6 }
 0x221   :  { %v446_v11 = vmul.f32 %v434_v7, %v350_v34 }
 0x222   :  { %460 = vst [vmem:[%s852_s5 + $0x20] sm:$0xff] %v448_v8  ;;  %v450_v41 = vmul.f32 %v438_v10, %v354_v9  ;;  %v568_v42 = vpop.eup %567 }
 0x223   :  { %458 = vst [vmem:[%s852_s5 + $0x10] sm:$0xff] %v446_v11  ;;  %v570_v12 = vpop.eup %569  ;;  %v443_v47 = vadd.f32 1.0, %v568_v42 }
 0x224   :  { %462 = vst [vmem:[%s852_s5 + $0x30] sm:$0xff] %v450_v41  ;;  %v439_v13 = vadd.f32 1.0, %v570_v12 }
 0x225   :  { %v455_v16 = vmul.f32 %v443_v47, %v359_v14 }
 0x226   :  { %v572_v17 = vpop.eup %571  ;;  %v451_v21 = vmul.f32 %v439_v13, %v355_v15 }
 0x227   :  { %v574_v23 = vpop.eup %573  ;;  %467 = vst [vmem:[%s852_s5 + $0x58] sm:$0xff] %v455_v16  ;;  %v437_v29 = vadd.f32 1.0, %v572_v17 }
 0x228   :  { %v576_v30 = vpop.eup %575  ;;  %463 = vst [vmem:[%s852_s5 + $0x38] sm:$0xff] %v451_v21  ;;  %v441_v5 = vadd.f32 1.0, %v574_v23 }
 0x229   :  { %v449_v26 = vmul.f32 %v437_v29, %v353_v27  ;;  %v442_v31 = vadd.f32 1.0, %v576_v30 }
 0x22a   :  { %v453_v32 = vmul.f32 %v441_v5, %v357_v2 }
 0x22b   :  { %461 = vst [vmem:[%s852_s5 + $0x28] sm:$0xff] %v449_v26  ;;  %v454_v35 = vmul.f32 %v442_v31, %v358_v20 }
 0x22c   :  { %465 = vst [vmem:[%s852_s5 + $0x48] sm:$0xff] %v453_v32 }
 0x22d   :  { %466 = vst [vmem:[%s852_s5 + $0x50] sm:$0xff] %v454_v35 }

// kernel: closed_call.22
= control target key start
LH: loop header
LB: loop body
LE: loop exit
PB: predicated region body
PF: predicated region fallthrough
CT: control target
= control target key end

     0   :  { %vm363_vm0 = vcmask 785408   ;;  %s639_s1 = inlined_call_operand.vmem [shape: bf16[384,96], index: 1, kind: input, shape index: {}]   ;;  %s640_s0 = inlined_call_operand.vmem [shape: bf16[32,384], index: 0, kind: input, shape index: {}]   ;;  %s641_s2 = inlined_call_operand.vmem [shape: f32[1,96], index: 2, kind: input, shape index: {}]   ;;  %s642_s3 = inlined_call_operand.vmem [shape: f32[32,96], index: 3, kind: input, shape index: {}]   ;;  %s643_s4 = inlined_call_operand.vmem [shape: f32[32,96], index: 4, kind: output, shape index: {}]  }
   0x1   :  { %v461_v0 = vld [vmem:[%s639_s1 + $0x78] sm:$0xff]   ;;  %v463_v2 = vld [vmem:[%s639_s1 + $0x70] sm:$0xff]   ;;  %v466_v5 = vld [vmem:[%s639_s1 + $0x68] sm:$0xff]  }
   0x2   :  { %v462_v1 = vld [vmem:[%s639_s1 + $0x38] sm:$0xff]   ;;  %403 = vmatprep.subr.bf16.mxu0 %v461_v0  ;;  %v465_v4 = vld [vmem:[%s639_s1 + $0x30] sm:$0xff]   ;;  %v468_v7 = vld [vmem:[%s639_s1 + $0x28] sm:$0xff]  }
   0x3   :  { %404 = vmatpush3.bf16.msra.mxu0 %v462_v1  ;;  %v464_v3 = vld [vmem:[%s639_s1 + $0xb8] sm:$0xff]   ;;  %v467_v6 = vld [vmem:[%s639_s1 + $0xb0] sm:$0xff]   ;;  %v469_v8 = vld [vmem:[%s639_s1 + $0x60] sm:$0xff]  }
   0x4   :  { %405 = vmatprep.subr.bf16.mxu0 %v463_v2  ;;  %441 = vmatprep.subr.bf16.mxu1 %v464_v3  ;;  %v470_v9 = vld [vmem:[%s639_s1 + $0xa8] sm:$0xff]   ;;  %v471_v10 = vld [vmem:[%s639_s1 + $0x20] sm:$0xff]   ;;  %v472_v11 = vld [vmem:[%s639_s1 + $0x58] sm:$0xff]  }
   0x5   :  { %442 = vmatpush3.bf16.msra.mxu1 %v464_v3  ;;  %v473_v12 = vld [vmem:[%s639_s1 + $0xa0] sm:$0xff]   ;;  %v474_v13 = vld [vmem:[%s639_s1 + $0x18] sm:$0xff]   ;;  %v475_v15 = vld [vmem:[%s639_s1 + $0x50] sm:$0xff]  }
   0x6   :  { %443 = vmatprep.subr.bf16.mxu1 %v467_v6  ;;  %v476_v14 = vld [vmem:[%s639_s1 + $0x98] sm:$0xff]   ;;  %v477_v16 = vld [vmem:[%s639_s1 + $0x10] sm:$0xff]   ;;  %v478_v18 = vld [vmem:[%s639_s1 + $0x48] sm:$0xff]  }
   0x7   :  { %406 = vmatpush3.bf16.msra.mxu0 %v465_v4  ;;  %v479_v17 = vld [vmem:[%s639_s1 + $0x90] sm:$0xff]   ;;  %v480_v19 = vld [vmem:[%s639_s1 + $0x8] sm:$0xff]   ;;  %v481_v20 = vld [vmem:[%s639_s1 + $0x40] sm:$0xff]  }
   0x8   :  { %407 = vmatprep.subr.bf16.mxu0 %v466_v5  ;;  %v482_v21 = vld [vmem:[%s639_s1 + $0x88] sm:$0xff]   ;;  %v486_v22 = vld [vmem:[%s640_s0 + $0x4] ss:$12 sps:$4 sm:$0xff]   ;;  %v372_v32 = vld [vmem:[%s641_s2] ss:$0 sm:$0xff] }
   0x9   :  { %444 = vmatpush3.bf16.msra.mxu1 %v467_v6  ;;  %v483_v23 = vld [vmem:[%s639_s1] sm:$0xff]   ;;  %289 = vmatprep.mubr.bf16.mxu0 %v486_v22  ;;  %v488_v24 = vld [vmem:[%s640_s0 + $0x8] ss:$12 sps:$4 sm:$0xff]   ;;  %v358_v60 = vld [vmem:[%s642_s3 + $0x18] sm:$0xff] }
   0xa   :  { %445 = vmatprep.subr.bf16.mxu1 %v470_v9  ;;  %v487_v25 = vld [vmem:[%s639_s1 + $0x80] sm:$0xff]   ;;  %457 = vmatprep.mubr.bf16.mxu1 %v488_v24  ;;  %v490_v27 = vld [vmem:[%s640_s0 + $0x1c] ss:$12 sps:$4 sm:$0xff]   ;;  %v357_v54 = vld [vmem:[%s642_s3 + $0x10] sm:$0xff] }
   0xb   :  { %408 = vmatpush3.bf16.msra.mxu0 %v468_v7  ;;  %v484_v26 = vld [vmem:[%s640_s0] ss:$12 sps:$4 sm:$0xff]   ;;  %v492_v29 = vld [vmem:[%s640_s0 + $0x18] ss:$12 sps:$4 sm:$0xff]  }
   0xc   :  { %409 = vmatprep.subr.bf16.mxu0 %v469_v8  ;;  %v489_v28 = vld [vmem:[%s640_s0 + $0x20] ss:$12 sps:$4 sm:$0xff]  }
   0xd   :  { %446 = vmatpush3.bf16.msra.mxu1 %v470_v9  ;;  %v355_v39 = vld [vmem:[%s642_s3] sm:$0xff]  ;;  %v356_v48 = vld [vmem:[%s642_s3 + $0x8] sm:$0xff] }
   0xe   :  { %447 = vmatprep.subr.bf16.mxu1 %v473_v12 }
   0xf   :  { %410 = vmatpush3.bf16.msra.mxu0 %v471_v10 }
  0x10   :  { %411 = vmatprep.subr.bf16.mxu0 %v472_v11 }
  0x11   :  { %448 = vmatpush3.bf16.msra.mxu1 %v473_v12 }
  0x12   :  { %449 = vmatprep.subr.bf16.mxu1 %v476_v14 }
  0x13   :  { %412 = vmatpush3.bf16.msra.mxu0 %v474_v13 }
  0x14   :  { %413 = vmatprep.subr.bf16.mxu0 %v475_v15 }
  0x15   :  { %450 = vmatpush3.bf16.msra.mxu1 %v476_v14 }
  0x16   :  { %451 = vmatprep.subr.bf16.mxu1 %v479_v17 }
  0x17   :  { %414 = vmatpush3.bf16.msra.mxu0 %v477_v16 }
  0x18   :  { %415 = vmatprep.subr.bf16.mxu0 %v478_v18 }
  0x19   :  { %452 = vmatpush3.bf16.msra.mxu1 %v479_v17 }
  0x1a   :  { %453 = vmatprep.subr.bf16.mxu1 %v482_v21 }
  0x1b   :  { %416 = vmatpush3.bf16.msra.mxu0 %v480_v19 }
  0x1c   :  { %417 = vmatprep.subr.bf16.mxu0 %v481_v20 }
  0x1d   :  { %454 = vmatpush3.bf16.msra.mxu1 %v482_v21 }
  0x1e   :  { %455 = vmatprep.subr.bf16.mxu1 %v487_v25 }
  0x1f   :  { %418 = vmatpush3.bf16.msra.mxu0 %v483_v23 }
  0x21   :  { %456 = vmatpush3.bf16.msra.mxu1 %v487_v25 }
  0x22   :  { %290 = vmatmul.mubr.bf16.vlgmr.msra.gmra.mxu0 %v484_v26 }
  0x23   :  { %297 = vmatprep.mubr.bf16.mxu0 %v490_v27 }
  0x24   :  { %458 = vmatmul.mubr.bf16.vlgmr.msra.gmra.mxu1 %v489_v28 }
  0x2a   :  { %298 = vmatmul.mubr.bf16.gmra.mxu0 %v492_v29 }
  0xe2   :  { %v419_v30 = vpop.f32.mrf.mxu0 }
  0xe4   :  { %v420_v31 = vpop.f32.mrf.mxu0  ;;  %v459_v34 = vpop.f32.mrf.mxu1 }
  0xe5   :  { %v421_v33 = vadd.f32 %v420_v31, %v419_v30 }
  0xe6   :  { %v422_v35 = vpop.f32.mrf.mxu0  ;;  %v340_v37 = vpop.f32.mrf.mxu1 }
  0xe7   :  { %v292_v36 = vadd.f32 %v421_v33, %v372_v32 }
  0xe8   :  { %v423_v38 = vpop.f32.mrf.mxu0  ;;  %v460_v42 = vpop.f32.mrf.mxu1 }
  0xe9   :  { %v424_v40 = vadd.f32 %v423_v38, %v422_v35  ;;  %v341_v41 = vadd.f32 %v340_v37, %v292_v36 }
  0xea   :  { %v425_v43 = vpop.f32.mrf.mxu0  ;;  %v343_v46 = vpop.f32.mrf.mxu1 }
  0xeb   :  { %v359_v44 = vadd.f32 %v355_v39, %v341_v41  ;;  %v295_v45 = vadd.f32 %v424_v40, %v372_v32 }
  0xec   :  { %v426_v47 = vpop.f32.mrf.mxu0 }
  0xed   :  { %364 = vst.msk [vmem:[%s643_s4] sm:$0xff] %vm363_vm0, %v359_v44  ;;  %v427_v49 = vadd.f32 %v426_v47, %v425_v43  ;;  %v344_v50 = vadd.f32 %v343_v46, %v295_v45 }
  0xee   :  { %v428_v51 = vpop.f32.mrf.mxu0 }
  0xef   :  { %v300_v52 = vadd.f32 %v427_v49, %v372_v32  ;;  %v360_v53 = vadd.f32 %v356_v48, %v344_v50 }
  0xf0   :  { %v429_v55 = vpop.f32.mrf.mxu0 }
  0xf1   :  { %v349_v56 = vadd.f32 %v459_v34, %v300_v52  ;;  %365 = vst.msk [vmem:[%s643_s4 + $0x8] sm:$0xff] %vm363_vm0, %v360_v53  ;;  %v430_v57 = vadd.f32 %v429_v55, %v428_v51 }
  0xf3   :  { %v361_v58 = vadd.f32 %v357_v54, %v349_v56  ;;  %v303_v59 = vadd.f32 %v430_v57, %v372_v32 }
  0xf5   :  { %366 = vst.msk [vmem:[%s643_s4 + $0x10] sm:$0xff] %vm363_vm0, %v361_v58  ;;  %v352_v61 = vadd.f32 %v460_v42, %v303_v59 }
  0xf7   :  { %v362_v62 = vadd.f32 %v358_v60, %v352_v61 }
  0xf9   :  { %367 = vst.msk [vmem:[%s643_s4 + $0x18] sm:$0xff] %vm363_vm0, %v362_v62 }

// kernel: _lambda_.11
= control target key start
LH: loop header
LB: loop body
LE: loop exit
PB: predicated region body
PF: predicated region fallthrough
CT: control target
= control target key end

     0   :  { %vm74_vm0 = vcmask 785408   ;;  %vm130_vm1 = vcmask 261120   ;;  %s234_s1 = inlined_call_operand.vmem [shape: bf16[96,32], index: 1, kind: input, shape index: {}]   ;;  %s235_s0 = inlined_call_operand.vmem [shape: bf16[32,96], index: 0, kind: input, shape index: {}]   ;;  %s236_s2 = inlined_call_operand.vmem [shape: f32[32,32], index: 2, kind: output, shape index: {}]  }
   0x1   :  { %v173_v0 = vld [vmem:[%s234_s1 + $0x28] sm:$0xff]   ;;  %v174_v1 = vld [vmem:[%s234_s1 + $0x20] sm:$0xff]   ;;  %v175_v2 = vld [vmem:[%s234_s1 + $0x18] sm:$0xff]  }
   0x2   :  { %157 = vmatprep.subr.bf16.mxu0 %v173_v0  ;;  %v179_v3 = vld [vmem:[%s235_s0] sm:$0xff]   ;;  %v176_v4 = vld [vmem:[%s234_s1 + $0x10] sm:$0xff]   ;;  %v177_v5 = vld [vmem:[%s234_s1 + $0x8] sm:$0xff]  }
   0x3   :  { %158 = vmatpush3.bf16.msra.mxu0 %v173_v0  ;;  %169 = vmatprep.mubr.msk.bf16.mxu0 %vm74_vm0, %v179_v3  ;;  %v178_v6 = vld [vmem:[%s234_s1] sm:$0xff]   ;;  %v180_v7 = vld [vmem:[%s235_s0 + $0x8] sm:$0xff]  }
   0x4   :  { %159 = vmatprep.subr.bf16.mxu0 %v174_v1 }
   0x7   :  { %160 = vmatpush3.bf16.msra.mxu0 %v174_v1 }
   0x8   :  { %161 = vmatprep.subr.bf16.mxu0 %v175_v2 }
   0xb   :  { %162 = vmatpush3.bf16.msra.mxu0 %v175_v2 }
   0xc   :  { %163 = vmatprep.subr.bf16.mxu0 %v176_v4 }
   0xf   :  { %164 = vmatpush3.bf16.msra.mxu0 %v176_v4 }
  0x10   :  { %165 = vmatprep.subr.bf16.mxu0 %v177_v5 }
  0x13   :  { %166 = vmatpush3.bf16.msra.mxu0 %v177_v5 }
  0x14   :  { %167 = vmatprep.subr.bf16.mxu0 %v178_v6 }
  0x17   :  { %168 = vmatpush3.bf16.msra.mxu0 %v178_v6 }
  0x1a   :  { %170 = vmatmul.mubr.msk.bf16.vlgmr.msra.gmra.mxu0 %vm74_vm0, %v180_v7 }
  0xda   :  { %v171_v8 = vpop.f32.mrf.mxu0 }
  0xdb   :  { %133 = vst.msk [vmem:[%s236_s2 + $0x10] sm:$0xff] %vm130_vm1, %v171_v8 }
  0xdc   :  { %v115_v9 = vpop.f32.mrf.mxu0 }
  0xdd   :  { %131 = vst.msk [vmem:[%s236_s2] sm:$0xff] %vm130_vm1, %v115_v9 }
  0xde   :  { %v172_v10 = vpop.f32.mrf.mxu0 }
  0xdf   :  { %134 = vst.msk [vmem:[%s236_s2 + $0x18] sm:$0xff] %vm130_vm1, %v172_v10 }
  0xe0   :  { %v118_v11 = vpop.f32.mrf.mxu0 }
  0xe1   :  { %132 = vst.msk [vmem:[%s236_s2 + $0x8] sm:$0xff] %vm130_vm1, %v118_v11 }

// kernel: _lambda_.16
= control target key start
LH: loop header
LB: loop body
LE: loop exit
PB: predicated region body
PF: predicated region fallthrough
CT: control target
= control target key end

     0   :  { %vm210_vm0 = vcmask 261120   ;;  %s581_s1 = inlined_call_operand.vmem [shape: bf16[288,32], index: 1, kind: input, shape index: {}]   ;;  %s582_s0 = inlined_call_operand.vmem [shape: bf16[32,288], index: 0, kind: input, shape index: {}]   ;;  %s583_s2 = inlined_call_operand.vmem [shape: f32[1,32], index: 2, kind: input, shape index: {}]   ;;  %s584_s3 = inlined_call_operand.vmem [shape: f32[1,32], index: 3, kind: input, shape index: {}]   ;;  %s585_s4 = inlined_call_operand.vmem [shape: f32[1,32], index: 4, kind: input, shape index: {}]   ;;  %s586_s5 = inlined_call_operand.vmem [shape: f32[32,32], index: 5, kind: output, shape index: {}]  }
   0x1   :  { %v426_v0 = vld [vmem:[%s581_s1 + $0x78] sm:$0xff]   ;;  %v428_v2 = vld [vmem:[%s581_s1 + $0x70] sm:$0xff]   ;;  %v430_v4 = vld [vmem:[%s581_s1 + $0x68] sm:$0xff]  }
   0x2   :  { %v427_v1 = vld [vmem:[%s581_s1 + $0x38] sm:$0xff]   ;;  %386 = vmatprep.subr.bf16.mxu0 %v426_v0  ;;  %v429_v3 = vld [vmem:[%s581_s1 + $0x30] sm:$0xff]   ;;  %v431_v5 = vld [vmem:[%s581_s1 + $0x28] sm:$0xff]  }
   0x3   :  { %387 = vmatpush3.bf16.msra.mxu0 %v427_v1  ;;  %v432_v6 = vld [vmem:[%s581_s1 + $0x60] sm:$0xff]   ;;  %v434_v8 = vld [vmem:[%s581_s1 + $0x58] sm:$0xff]   ;;  %v441_v10 = vld [vmem:[%s581_s1 + $0x88] sm:$0xff]  }
   0x4   :  { %388 = vmatprep.subr.bf16.mxu0 %v428_v2  ;;  %v433_v7 = vld [vmem:[%s581_s1 + $0x20] sm:$0xff]   ;;  %v435_v9 = vld [vmem:[%s581_s1 + $0x18] sm:$0xff]   ;;  %v436_v11 = vld [vmem:[%s581_s1 + $0x50] sm:$0xff]   ;;  %418 = vmatprep.subr.bf16.mxu1 %v441_v10 }
   0x5   :  { %v437_v12 = vld [vmem:[%s581_s1 + $0x10] sm:$0xff]   ;;  %v438_v13 = vld [vmem:[%s581_s1 + $0x48] sm:$0xff]   ;;  %419 = vmatpush3.bf16.msra.mxu1 %v441_v10  ;;  %v446_v15 = vld [vmem:[%s581_s1 + $0x80] sm:$0xff]  }
   0x6   :  { %v445_v14 = vld [vmem:[%s582_s0 + $0x4] ss:$12 sps:$4 sm:$0xff]   ;;  %v447_v16 = vld [vmem:[%s582_s0 + $0x8] ss:$12 sps:$4 sm:$0xff]   ;;  %420 = vmatprep.subr.bf16.mxu1 %v446_v15  ;;  %v448_v17 = vld [vmem:[%s582_s0 + $0x20] ss:$12 sps:$4 sm:$0xff]  }
   0x7   :  { %389 = vmatpush3.bf16.msra.mxu0 %v429_v3  ;;  %249 = vmatprep.mubr.bf16.mxu0 %v445_v14  ;;  %v439_v18 = vld [vmem:[%s581_s1 + $0x8] sm:$0xff]   ;;  %v440_v19 = vld [vmem:[%s581_s1 + $0x40] sm:$0xff]  }
   0x8   :  { %390 = vmatprep.subr.bf16.mxu0 %v430_v4  ;;  %422 = vmatprep.mubr.msk.bf16.mxu1 %vm210_vm0, %v447_v16  ;;  %v442_v20 = vld [vmem:[%s581_s1] sm:$0xff]   ;;  %v449_v22 = vld [vmem:[%s582_s0 + $0x1c] ss:$12 sps:$4 sm:$0xff]  }
   0x9   :  { %421 = vmatpush3.bf16.msra.mxu1 %v446_v15  ;;  %v443_v21 = vld [vmem:[%s582_s0] ss:$12 sps:$4 sm:$0xff]   ;;  %v451_v23 = vld [vmem:[%s582_s0 + $0x18] ss:$12 sps:$4 sm:$0xff]  }
   0xa   :  { %v357_v28 = vld [vmem:[%s583_s2] ss:$0 sm:$0xff] }
   0xb   :  { %391 = vmatpush3.bf16.msra.mxu0 %v431_v5  ;;  %v384_v39 = vld [vmem:[%s584_s3] ss:$0 sm:$0xff] }
   0xc   :  { %392 = vmatprep.subr.bf16.mxu0 %v432_v6  ;;  %423 = vmatmul.mubr.msk.bf16.vlgmr.msra.gmra.mxu1 %vm210_vm0, %v448_v17  ;;  %v385_v43 = vld [vmem:[%s585_s4] ss:$0 sm:$0xff] }
   0xf   :  { %393 = vmatpush3.bf16.msra.mxu0 %v433_v7 }
  0x10   :  { %394 = vmatprep.subr.bf16.mxu0 %v434_v8 }
  0x13   :  { %395 = vmatpush3.bf16.msra.mxu0 %v435_v9 }
  0x14   :  { %396 = vmatprep.subr.bf16.mxu0 %v436_v11 }
  0x17   :  { %397 = vmatpush3.bf16.msra.mxu0 %v437_v12 }
  0x18   :  { %398 = vmatprep.subr.bf16.mxu0 %v438_v13 }
  0x1b   :  { %399 = vmatpush3.bf16.msra.mxu0 %v439_v18 }
  0x1c   :  { %400 = vmatprep.subr.bf16.mxu0 %v440_v19 }
  0x1f   :  { %401 = vmatpush3.bf16.msra.mxu0 %v442_v20 }
  0x22   :  { %250 = vmatmul.mubr.bf16.vlgmr.msra.gmra.mxu0 %v443_v21 }
  0x23   :  { %257 = vmatprep.mubr.bf16.mxu0 %v449_v22 }
  0x2a   :  { %258 = vmatmul.mubr.bf16.gmra.mxu0 %v451_v23 }
  0xcc   :  { %v424_v24 = vpop.f32.mrf.mxu1 }
  0xce   :  { %v300_v26 = vpop.f32.mrf.mxu1 }
  0xd0   :  { %v425_v31 = vpop.f32.mrf.mxu1 }
  0xd2   :  { %v303_v37 = vpop.f32.mrf.mxu1 }
  0xe2   :  { %v402_v25 = vpop.f32.mrf.mxu0 }
  0xe4   :  { %v403_v27 = vpop.f32.mrf.mxu0 }
  0xe5   :  { %v404_v29 = vadd.f32 %v403_v27, %v402_v25 }
  0xe6   :  { %v405_v30 = vpop.f32.mrf.mxu0 }
  0xe7   :  { %v252_v32 = vadd.f32 %v404_v29, %v357_v28 }
  0xe8   :  { %v406_v33 = vpop.f32.mrf.mxu0 }
  0xe9   :  { %v407_v34 = vadd.f32 %v406_v33, %v405_v30  ;;  %v301_v35 = vadd.f32 %v300_v26, %v252_v32 }
  0xea   :  { %v408_v36 = vpop.f32.mrf.mxu0 }
  0xeb   :  { %vm315_vm1 = vcmp.ge.f32.partialorder %v301_v35, 0.0  ;;  %v319_v38 = vmul.f32 0.02, %v301_v35  ;;  %v255_v40 = vadd.f32 %v407_v34, %v357_v28 }
  0xec   :  { %v409_v41 = vpop.f32.mrf.mxu0 }
  0xed   :  { %v323_v42 = vsel %vm315_vm1, %v301_v35, %v319_v38  ;;  %v410_v44 = vadd.f32 %v409_v41, %v408_v36  ;;  %v304_v45 = vadd.f32 %v303_v37, %v255_v40 }
  0xee   :  { %v334_v46 = vmul.f32 %v384_v39, %v323_v42  ;;  %v411_v47 = vpop.f32.mrf.mxu0 }
  0xef   :  { %v260_v48 = vadd.f32 %v410_v44, %v357_v28  ;;  %vm316_vm2 = vcmp.ge.f32.partialorder %v304_v45, 0.0  ;;  %v320_v49 = vmul.f32 0.02, %v304_v45 }
  0xf0   :  { %v345_v50 = vadd.f32 %v385_v43, %v334_v46  ;;  %v412_v51 = vpop.f32.mrf.mxu0 }
  0xf1   :  { %v309_v52 = vadd.f32 %v424_v24, %v260_v48  ;;  %v324_v53 = vsel %vm316_vm2, %v304_v45, %v320_v49  ;;  %v413_v54 = vadd.f32 %v412_v51, %v411_v47 }
  0xf2   :  { %349 = vst.msk [vmem:[%s586_s5] sm:$0xff] %vm210_vm0, %v345_v50  ;;  %v335_v55 = vmul.f32 %v384_v39, %v324_v53 }
  0xf3   :  { %vm317_vm3 = vcmp.ge.f32.partialorder %v309_v52, 0.0  ;;  %v321_v56 = vmul.f32 0.02, %v309_v52  ;;  %v263_v57 = vadd.f32 %v413_v54, %v357_v28 }
  0xf4   :  { %v346_v58 = vadd.f32 %v385_v43, %v335_v55 }
  0xf5   :  { %v325_v59 = vsel %vm317_vm3, %v309_v52, %v321_v56  ;;  %v312_v60 = vadd.f32 %v425_v31, %v263_v57 }
  0xf6   :  { %v336_v61 = vmul.f32 %v384_v39, %v325_v59  ;;  %350 = vst.msk [vmem:[%s586_s5 + $0x8] sm:$0xff] %vm210_vm0, %v346_v58 }
  0xf7   :  { %vm318_vm4 = vcmp.ge.f32.partialorder %v312_v60, 0.0  ;;  %v322_v62 = vmul.f32 0.02, %v312_v60 }
  0xf8   :  { %v347_v63 = vadd.f32 %v385_v43, %v336_v61 }
  0xf9   :  { %v326_v0 = vsel %vm318_vm4, %v312_v60, %v322_v62 }
  0xfa   :  { %351 = vst.msk [vmem:[%s586_s5 + $0x10] sm:$0xff] %vm210_vm0, %v347_v63  ;;  %v337_v1 = vmul.f32 %v384_v39, %v326_v0 }
  0xfc   :  { %v348_v2 = vadd.f32 %v385_v43, %v337_v1 }
  0xfe   :  { %352 = vst.msk [vmem:[%s586_s5 + $0x18] sm:$0xff] %vm210_vm0, %v348_v2 }

// kernel: _lambda_.14
= control target key start
LH: loop header
LB: loop body
LE: loop exit
PB: predicated region body
PF: predicated region fallthrough
CT: control target
= control target key end

     0   :  { %vm90_vm0 = vcmask 785408   ;;  %vm180_vm3 = vcmask 261120   ;;  %s315_s1 = inlined_call_operand.vmem [shape: bf16[96,32], index: 1, kind: input, shape index: {}]   ;;  %s316_s0 = inlined_call_operand.vmem [shape: bf16[32,96], index: 0, kind: input, shape index: {}]   ;;  %s317_s2 = inlined_call_operand.vmem [shape: f32[1,32], index: 2, kind: input, shape index: {}]   ;;  %s318_s3 = inlined_call_operand.vmem [shape: f32[1,32], index: 3, kind: input, shape index: {}]   ;;  %s319_s4 = inlined_call_operand.vmem [shape: f32[1,32], index: 4, kind: input, shape index: {}]   ;;  %s320_s5 = inlined_call_operand.vmem [shape: f32[32,32], index: 5, kind: output, shape index: {}]  }
   0x1   :  { %v226_v0 = vld [vmem:[%s315_s1 + $0x28] sm:$0xff]   ;;  %v227_v1 = vld [vmem:[%s315_s1 + $0x20] sm:$0xff]   ;;  %v228_v2 = vld [vmem:[%s315_s1 + $0x18] sm:$0xff]  }
   0x2   :  { %210 = vmatprep.subr.bf16.mxu0 %v226_v0  ;;  %v232_v3 = vld [vmem:[%s316_s0] sm:$0xff]   ;;  %v229_v4 = vld [vmem:[%s315_s1 + $0x10] sm:$0xff]   ;;  %v230_v5 = vld [vmem:[%s315_s1 + $0x8] sm:$0xff]  }
   0x3   :  { %211 = vmatpush3.bf16.msra.mxu0 %v226_v0  ;;  %222 = vmatprep.mubr.msk.bf16.mxu0 %vm90_vm0, %v232_v3  ;;  %v231_v6 = vld [vmem:[%s315_s1] sm:$0xff]   ;;  %v233_v7 = vld [vmem:[%s316_s0 + $0x8] sm:$0xff]  }
   0x4   :  { %212 = vmatprep.subr.bf16.mxu0 %v227_v1  ;;  %v189_v8 = vld [vmem:[%s317_s2] ss:$0 sm:$0xff] }
   0x5   :  { %v200_v13 = vld [vmem:[%s318_s3] ss:$0 sm:$0xff] }
   0x6   :  { %v201_v17 = vld [vmem:[%s319_s4] ss:$0 sm:$0xff] }
   0x7   :  { %213 = vmatpush3.bf16.msra.mxu0 %v227_v1 }
   0x8   :  { %214 = vmatprep.subr.bf16.mxu0 %v228_v2 }
   0xb   :  { %215 = vmatpush3.bf16.msra.mxu0 %v228_v2 }
   0xc   :  { %216 = vmatprep.subr.bf16.mxu0 %v229_v4 }
   0xf   :  { %217 = vmatpush3.bf16.msra.mxu0 %v229_v4 }
  0x10   :  { %218 = vmatprep.subr.bf16.mxu0 %v230_v5 }
  0x13   :  { %219 = vmatpush3.bf16.msra.mxu0 %v230_v5 }
  0x14   :  { %220 = vmatprep.subr.bf16.mxu0 %v231_v6 }
  0x17   :  { %221 = vmatpush3.bf16.msra.mxu0 %v231_v6 }
  0x1a   :  { %223 = vmatmul.mubr.msk.bf16.vlgmr.msra.gmra.mxu0 %vm90_vm0, %v233_v7 }
  0xda   :  { %v224_v9 = vpop.f32.mrf.mxu0 }
  0xdb   :  { %v140_v10 = vadd.f32 %v224_v9, %v189_v8 }
  0xdc   :  { %v131_v11 = vpop.f32.mrf.mxu0 }
  0xdd   :  { %vm148_vm1 = vcmp.ge.f32.partialorder %v140_v10, 0.0  ;;  %v152_v12 = vmul.f32 0.02, %v140_v10  ;;  %v132_v14 = vadd.f32 %v189_v8, %v131_v11 }
  0xde   :  { %v225_v15 = vpop.f32.mrf.mxu0 }
  0xdf   :  { %v156_v16 = vsel %vm148_vm1, %v140_v10, %v152_v12  ;;  %vm146_vm2 = vcmp.ge.f32.partialorder %v132_v14, 0.0  ;;  %v150_v18 = vmul.f32 0.02, %v132_v14  ;;  %v143_v19 = vadd.f32 %v225_v15, %v189_v8 }
  0xe0   :  { %v167_v20 = vmul.f32 %v200_v13, %v156_v16  ;;  %v134_v21 = vpop.f32.mrf.mxu0 }
  0xe1   :  { %v154_v22 = vsel %vm146_vm2, %v132_v14, %v150_v18  ;;  %vm149_vm4 = vcmp.ge.f32.partialorder %v143_v19, 0.0  ;;  %v153_v23 = vmul.f32 0.02, %v143_v19  ;;  %v135_v24 = vadd.f32 %v189_v8, %v134_v21 }
  0xe2   :  { %v178_v25 = vadd.f32 %v201_v17, %v167_v20  ;;  %v165_v26 = vmul.f32 %v200_v13, %v154_v22 }
  0xe3   :  { %v157_v27 = vsel %vm149_vm4, %v143_v19, %v153_v23  ;;  %vm147_vm5 = vcmp.ge.f32.partialorder %v135_v24, 0.0  ;;  %v151_v28 = vmul.f32 0.02, %v135_v24 }
  0xe4   :  { %183 = vst.msk [vmem:[%s320_s5 + $0x10] sm:$0xff] %vm180_vm3, %v178_v25  ;;  %v176_v29 = vadd.f32 %v201_v17, %v165_v26  ;;  %v168_v30 = vmul.f32 %v200_v13, %v157_v27 }
  0xe5   :  { %v155_v31 = vsel %vm147_vm5, %v135_v24, %v151_v28 }
  0xe6   :  { %181 = vst.msk [vmem:[%s320_s5] sm:$0xff] %vm180_vm3, %v176_v29  ;;  %v179_v32 = vadd.f32 %v201_v17, %v168_v30  ;;  %v166_v33 = vmul.f32 %v200_v13, %v155_v31 }
  0xe8   :  { %184 = vst.msk [vmem:[%s320_s5 + $0x18] sm:$0xff] %vm180_vm3, %v179_v32  ;;  %v177_v34 = vadd.f32 %v201_v17, %v166_v33 }
  0xea   :  { %182 = vst.msk [vmem:[%s320_s5 + $0x8] sm:$0xff] %vm180_vm3, %v177_v34 }

// kernel: _lambda_.19
= control target key start
LH: loop header
LB: loop body
LE: loop exit
PB: predicated region body
PF: predicated region fallthrough
CT: control target
= control target key end

     0   :  { %vm334_vm0 = vcmask 1041408   ;;  %vm237_vm1 = vcmask 31744   ;;  %s1296_s1 = inlined_call_operand.vmem [shape: bf16[4,4], index: 1, kind: input, shape index: {}]   ;;  %s1297_s0 = inlined_call_operand.vmem [shape: bf16[512,4], index: 0, kind: input, shape index: {}]   ;;  %s1298_s2 = inlined_call_operand.vmem [shape: f32[512,4], index: 2, kind: output, shape index: {}]  }
   0x1   :  { %v76_v0 = vld [vmem:[%s1296_s1] sm:$0x3]  ;;  %v864_v4 = vld [vmem:[%s1297_s0 + $0x8] sm:$0xff]   ;;  %v866_v6 = vld [vmem:[%s1297_s0 + $0x10] sm:$0xff]  }
   0x2   :  { %860 = vmatprep.subr.msk.bf16.mxu0 %vm334_vm0, %v76_v0  ;;  %861 = vmatprep.subr.msk.bf16.mxu1 %vm334_vm0, %v76_v0  ;;  %v336_v1 = vsel %vm334_vm0, %v76_v0, 0  ;;  %v862_v2 = vld [vmem:[%s1297_s0] sm:$0xff]   ;;  %v865_v5 = vld [vmem:[%s1297_s0 + $0x88] sm:$0xff]   ;;  %v867_v7 = vld [vmem:[%s1297_s0 + $0x90] sm:$0xff]  }
   0x3   :  { %793 = vmatpush3.bf16.msra.mxu0 %v336_v1  ;;  %859 = vmatpush3.bf16.msra.mxu1 %v336_v1  ;;  %v863_v3 = vld [vmem:[%s1297_s0 + $0x80] sm:$0xff]   ;;  %v868_v8 = vld [vmem:[%s1297_s0 + $0x18] sm:$0xff]   ;;  %v872_v12 = vld [vmem:[%s1297_s0 + $0x28] sm:$0xff]  }
   0x4   :  { %794 = vmatprep.mubr.msk.bf16.mxu0 %vm237_vm1, %v862_v2  ;;  %826 = vmatprep.mubr.msk.bf16.mxu1 %vm237_vm1, %v863_v3  ;;  %v869_v9 = vld [vmem:[%s1297_s0 + $0x98] sm:$0xff]   ;;  %v870_v10 = vld [vmem:[%s1297_s0 + $0x20] sm:$0xff]   ;;  %v873_v13 = vld [vmem:[%s1297_s0 + $0xa8] sm:$0xff]  }
   0x5   :  { %v871_v11 = vld [vmem:[%s1297_s0 + $0xa0] sm:$0xff]   ;;  %v874_v14 = vld [vmem:[%s1297_s0 + $0x30] sm:$0xff]   ;;  %v876_v16 = vld [vmem:[%s1297_s0 + $0x38] sm:$0xff]  }
   0x6   :  { %795 = vmatmul.mubr.msk.bf16.vlgmr.msra.gmra.mxu0 %vm237_vm1, %v864_v4  ;;  %827 = vmatmul.mubr.msk.bf16.vlgmr.msra.gmra.mxu1 %vm237_vm1, %v865_v5  ;;  %v875_v15 = vld [vmem:[%s1297_s0 + $0xb0] sm:$0xff]   ;;  %v877_v17 = vld [vmem:[%s1297_s0 + $0xb8] sm:$0xff]   ;;  %v878_v18 = vld [vmem:[%s1297_s0 + $0x40] sm:$0xff]  }
   0x7   :  { %798 = vmatprep.mubr.msk.bf16.mxu0 %vm237_vm1, %v866_v6  ;;  %830 = vmatprep.mubr.msk.bf16.mxu1 %vm237_vm1, %v867_v7  ;;  %v879_v19 = vld [vmem:[%s1297_s0 + $0xc0] sm:$0xff]   ;;  %v880_v20 = vld [vmem:[%s1297_s0 + $0x48] sm:$0xff]   ;;  %v882_v22 = vld [vmem:[%s1297_s0 + $0x50] sm:$0xff]  }
   0x8   :  { %v881_v21 = vld [vmem:[%s1297_s0 + $0xc8] sm:$0xff]   ;;  %v883_v23 = vld [vmem:[%s1297_s0 + $0xd0] sm:$0xff]   ;;  %v884_v24 = vld [vmem:[%s1297_s0 + $0x58] sm:$0xff]  }
   0x9   :  { %v885_v25 = vld [vmem:[%s1297_s0 + $0xd8] sm:$0xff]   ;;  %v886_v26 = vld [vmem:[%s1297_s0 + $0x60] sm:$0xff]   ;;  %v888_v28 = vld [vmem:[%s1297_s0 + $0x68] sm:$0xff]  }
   0xa   :  { %v887_v27 = vld [vmem:[%s1297_s0 + $0xe0] sm:$0xff]   ;;  %v889_v29 = vld [vmem:[%s1297_s0 + $0xe8] sm:$0xff]   ;;  %v890_v30 = vld [vmem:[%s1297_s0 + $0x70] sm:$0xff]  }
   0xb   :  { %v891_v31 = vld [vmem:[%s1297_s0 + $0xf0] sm:$0xff]   ;;  %v892_v32 = vld [vmem:[%s1297_s0 + $0x78] sm:$0xff]  }
   0xc   :  { %v893_v33 = vld [vmem:[%s1297_s0 + $0xf8] sm:$0xff]  }
   0xe   :  { %799 = vmatmul.mubr.msk.bf16.gmra.mxu0 %vm237_vm1, %v868_v8  ;;  %831 = vmatmul.mubr.msk.bf16.gmra.mxu1 %vm237_vm1, %v869_v9 }
   0xf   :  { %802 = vmatprep.mubr.msk.bf16.mxu0 %vm237_vm1, %v870_v10  ;;  %834 = vmatprep.mubr.msk.bf16.mxu1 %vm237_vm1, %v871_v11 }
  0x16   :  { %803 = vmatmul.mubr.msk.bf16.gmra.mxu0 %vm237_vm1, %v872_v12  ;;  %835 = vmatmul.mubr.msk.bf16.gmra.mxu1 %vm237_vm1, %v873_v13 }
  0x17   :  { %806 = vmatprep.mubr.msk.bf16.mxu0 %vm237_vm1, %v874_v14  ;;  %838 = vmatprep.mubr.msk.bf16.mxu1 %vm237_vm1, %v875_v15 }
  0x1e   :  { %807 = vmatmul.mubr.msk.bf16.gmra.mxu0 %vm237_vm1, %v876_v16  ;;  %839 = vmatmul.mubr.msk.bf16.gmra.mxu1 %vm237_vm1, %v877_v17 }
  0x1f   :  { %810 = vmatprep.mubr.msk.bf16.mxu0 %vm237_vm1, %v878_v18  ;;  %842 = vmatprep.mubr.msk.bf16.mxu1 %vm237_vm1, %v879_v19 }
  0x26   :  { %811 = vmatmul.mubr.msk.bf16.gmra.mxu0 %vm237_vm1, %v880_v20  ;;  %843 = vmatmul.mubr.msk.bf16.gmra.mxu1 %vm237_vm1, %v881_v21 }
  0x27   :  { %814 = vmatprep.mubr.msk.bf16.mxu0 %vm237_vm1, %v882_v22  ;;  %846 = vmatprep.mubr.msk.bf16.mxu1 %vm237_vm1, %v883_v23 }
  0x2e   :  { %815 = vmatmul.mubr.msk.bf16.gmra.mxu0 %vm237_vm1, %v884_v24  ;;  %847 = vmatmul.mubr.msk.bf16.gmra.mxu1 %vm237_vm1, %v885_v25 }
  0x2f   :  { %818 = vmatprep.mubr.msk.bf16.mxu0 %vm237_vm1, %v886_v26  ;;  %850 = vmatprep.mubr.msk.bf16.mxu1 %vm237_vm1, %v887_v27 }
  0x36   :  { %819 = vmatmul.mubr.msk.bf16.gmra.mxu0 %vm237_vm1, %v888_v28  ;;  %851 = vmatmul.mubr.msk.bf16.gmra.mxu1 %vm237_vm1, %v889_v29 }
  0x37   :  { %822 = vmatprep.mubr.msk.bf16.mxu0 %vm237_vm1, %v890_v30  ;;  %854 = vmatprep.mubr.msk.bf16.mxu1 %vm237_vm1, %v891_v31 }
  0x3e   :  { %823 = vmatmul.mubr.msk.bf16.gmra.mxu0 %vm237_vm1, %v892_v32  ;;  %855 = vmatmul.mubr.msk.bf16.gmra.mxu1 %vm237_vm1, %v893_v33 }
  0xc6   :  { %v796_v34 = vpop.f32.mrf.mxu0  ;;  %v828_v35 = vpop.f32.mrf.mxu1 }
  0xc7   :  { %629 = vst.msk [vmem:[%s1298_s2 + $0x10] sm:$0xff] %vm237_vm1, %v796_v34  ;;  %661 = vst.msk [vmem:[%s1298_s2 + $0x110] sm:$0xff] %vm237_vm1, %v828_v35 }
  0xc8   :  { %v372_v36 = vpop.f32.mrf.mxu0  ;;  %v500_v37 = vpop.f32.mrf.mxu1 }
  0xc9   :  { %627 = vst.msk [vmem:[%s1298_s2] sm:$0xff] %vm237_vm1, %v372_v36  ;;  %659 = vst.msk [vmem:[%s1298_s2 + $0x100] sm:$0xff] %vm237_vm1, %v500_v37 }
  0xca   :  { %v797_v38 = vpop.f32.mrf.mxu0  ;;  %v829_v39 = vpop.f32.mrf.mxu1 }
  0xcb   :  { %630 = vst.msk [vmem:[%s1298_s2 + $0x18] sm:$0xff] %vm237_vm1, %v797_v38  ;;  %662 = vst.msk [vmem:[%s1298_s2 + $0x118] sm:$0xff] %vm237_vm1, %v829_v39 }
  0xcc   :  { %v375_v40 = vpop.f32.mrf.mxu0  ;;  %v503_v41 = vpop.f32.mrf.mxu1 }
  0xcd   :  { %628 = vst.msk [vmem:[%s1298_s2 + $0x8] sm:$0xff] %vm237_vm1, %v375_v40  ;;  %660 = vst.msk [vmem:[%s1298_s2 + $0x108] sm:$0xff] %vm237_vm1, %v503_v41 }
  0xce   :  { %v800_v42 = vpop.f32.mrf.mxu0  ;;  %v832_v43 = vpop.f32.mrf.mxu1 }
  0xcf   :  { %633 = vst.msk [vmem:[%s1298_s2 + $0x30] sm:$0xff] %vm237_vm1, %v800_v42  ;;  %665 = vst.msk [vmem:[%s1298_s2 + $0x130] sm:$0xff] %vm237_vm1, %v832_v43 }
  0xd0   :  { %v388_v44 = vpop.f32.mrf.mxu0  ;;  %v516_v45 = vpop.f32.mrf.mxu1 }
  0xd1   :  { %631 = vst.msk [vmem:[%s1298_s2 + $0x20] sm:$0xff] %vm237_vm1, %v388_v44  ;;  %663 = vst.msk [vmem:[%s1298_s2 + $0x120] sm:$0xff] %vm237_vm1, %v516_v45 }
  0xd2   :  { %v801_v46 = vpop.f32.mrf.mxu0  ;;  %v833_v47 = vpop.f32.mrf.mxu1 }
  0xd3   :  { %634 = vst.msk [vmem:[%s1298_s2 + $0x38] sm:$0xff] %vm237_vm1, %v801_v46  ;;  %666 = vst.msk [vmem:[%s1298_s2 + $0x138] sm:$0xff] %vm237_vm1, %v833_v47 }
  0xd4   :  { %v391_v48 = vpop.f32.mrf.mxu0  ;;  %v519_v49 = vpop.f32.mrf.mxu1 }
  0xd5   :  { %632 = vst.msk [vmem:[%s1298_s2 + $0x28] sm:$0xff] %vm237_vm1, %v391_v48  ;;  %664 = vst.msk [vmem:[%s1298_s2 + $0x128] sm:$0xff] %vm237_vm1, %v519_v49 }
  0xd6   :  { %v804_v50 = vpop.f32.mrf.mxu0  ;;  %v836_v51 = vpop.f32.mrf.mxu1 }
  0xd7   :  { %637 = vst.msk [vmem:[%s1298_s2 + $0x50] sm:$0xff] %vm237_vm1, %v804_v50  ;;  %669 = vst.msk [vmem:[%s1298_s2 + $0x150] sm:$0xff] %vm237_vm1, %v836_v51 }
  0xd8   :  { %v404_v52 = vpop.f32.mrf.mxu0  ;;  %v532_v53 = vpop.f32.mrf.mxu1 }
  0xd9   :  { %635 = vst.msk [vmem:[%s1298_s2 + $0x40] sm:$0xff] %vm237_vm1, %v404_v52  ;;  %667 = vst.msk [vmem:[%s1298_s2 + $0x140] sm:$0xff] %vm237_vm1, %v532_v53 }
  0xda   :  { %v805_v54 = vpop.f32.mrf.mxu0  ;;  %v837_v55 = vpop.f32.mrf.mxu1 }
  0xdb   :  { %638 = vst.msk [vmem:[%s1298_s2 + $0x58] sm:$0xff] %vm237_vm1, %v805_v54  ;;  %670 = vst.msk [vmem:[%s1298_s2 + $0x158] sm:$0xff] %vm237_vm1, %v837_v55 }
  0xdc   :  { %v407_v56 = vpop.f32.mrf.mxu0  ;;  %v535_v57 = vpop.f32.mrf.mxu1 }
  0xdd   :  { %636 = vst.msk [vmem:[%s1298_s2 + $0x48] sm:$0xff] %vm237_vm1, %v407_v56  ;;  %668 = vst.msk [vmem:[%s1298_s2 + $0x148] sm:$0xff] %vm237_vm1, %v535_v57 }
  0xde   :  { %v808_v58 = vpop.f32.mrf.mxu0  ;;  %v840_v59 = vpop.f32.mrf.mxu1 }
  0xdf   :  { %641 = vst.msk [vmem:[%s1298_s2 + $0x70] sm:$0xff] %vm237_vm1, %v808_v58  ;;  %673 = vst.msk [vmem:[%s1298_s2 + $0x170] sm:$0xff] %vm237_vm1, %v840_v59 }
  0xe0   :  { %v420_v60 = vpop.f32.mrf.mxu0  ;;  %v548_v61 = vpop.f32.mrf.mxu1 }
  0xe1   :  { %639 = vst.msk [vmem:[%s1298_s2 + $0x60] sm:$0xff] %vm237_vm1, %v420_v60  ;;  %671 = vst.msk [vmem:[%s1298_s2 + $0x160] sm:$0xff] %vm237_vm1, %v548_v61 }
  0xe2   :  { %v809_v62 = vpop.f32.mrf.mxu0  ;;  %v841_v63 = vpop.f32.mrf.mxu1 }
  0xe3   :  { %642 = vst.msk [vmem:[%s1298_s2 + $0x78] sm:$0xff] %vm237_vm1, %v809_v62  ;;  %674 = vst.msk [vmem:[%s1298_s2 + $0x178] sm:$0xff] %vm237_vm1, %v841_v63 }
  0xe4   :  { %v423_v0 = vpop.f32.mrf.mxu0  ;;  %v551_v1 = vpop.f32.mrf.mxu1 }
  0xe5   :  { %640 = vst.msk [vmem:[%s1298_s2 + $0x68] sm:$0xff] %vm237_vm1, %v423_v0  ;;  %672 = vst.msk [vmem:[%s1298_s2 + $0x168] sm:$0xff] %vm237_vm1, %v551_v1 }
  0xe6   :  { %v812_v2 = vpop.f32.mrf.mxu0  ;;  %v844_v3 = vpop.f32.mrf.mxu1 }
  0xe7   :  { %645 = vst.msk [vmem:[%s1298_s2 + $0x90] sm:$0xff] %vm237_vm1, %v812_v2  ;;  %677 = vst.msk [vmem:[%s1298_s2 + $0x190] sm:$0xff] %vm237_vm1, %v844_v3 }
  0xe8   :  { %v436_v4 = vpop.f32.mrf.mxu0  ;;  %v564_v5 = vpop.f32.mrf.mxu1 }
  0xe9   :  { %643 = vst.msk [vmem:[%s1298_s2 + $0x80] sm:$0xff] %vm237_vm1, %v436_v4  ;;  %675 = vst.msk [vmem:[%s1298_s2 + $0x180] sm:$0xff] %vm237_vm1, %v564_v5 }
  0xea   :  { %v813_v6 = vpop.f32.mrf.mxu0  ;;  %v845_v7 = vpop.f32.mrf.mxu1 }
  0xeb   :  { %646 = vst.msk [vmem:[%s1298_s2 + $0x98] sm:$0xff] %vm237_vm1, %v813_v6  ;;  %678 = vst.msk [vmem:[%s1298_s2 + $0x198] sm:$0xff] %vm237_vm1, %v845_v7 }
  0xec   :  { %v439_v8 = vpop.f32.mrf.mxu0  ;;  %v567_v9 = vpop.f32.mrf.mxu1 }
  0xed   :  { %644 = vst.msk [vmem:[%s1298_s2 + $0x88] sm:$0xff] %vm237_vm1, %v439_v8  ;;  %676 = vst.msk [vmem:[%s1298_s2 + $0x188] sm:$0xff] %vm237_vm1, %v567_v9 }
  0xee   :  { %v816_v10 = vpop.f32.mrf.mxu0  ;;  %v848_v11 = vpop.f32.mrf.mxu1 }
  0xef   :  { %649 = vst.msk [vmem:[%s1298_s2 + $0xb0] sm:$0xff] %vm237_vm1, %v816_v10  ;;  %681 = vst.msk [vmem:[%s1298_s2 + $0x1b0] sm:$0xff] %vm237_vm1, %v848_v11 }
  0xf0   :  { %v452_v12 = vpop.f32.mrf.mxu0  ;;  %v580_v13 = vpop.f32.mrf.mxu1 }
  0xf1   :  { %647 = vst.msk [vmem:[%s1298_s2 + $0xa0] sm:$0xff] %vm237_vm1, %v452_v12  ;;  %679 = vst.msk [vmem:[%s1298_s2 + $0x1a0] sm:$0xff] %vm237_vm1, %v580_v13 }
  0xf2   :  { %v817_v14 = vpop.f32.mrf.mxu0  ;;  %v849_v15 = vpop.f32.mrf.mxu1 }
  0xf3   :  { %650 = vst.msk [vmem:[%s1298_s2 + $0xb8] sm:$0xff] %vm237_vm1, %v817_v14  ;;  %682 = vst.msk [vmem:[%s1298_s2 + $0x1b8] sm:$0xff] %vm237_vm1, %v849_v15 }
  0xf4   :  { %v455_v16 = vpop.f32.mrf.mxu0  ;;  %v583_v17 = vpop.f32.mrf.mxu1 }
  0xf5   :  { %648 = vst.msk [vmem:[%s1298_s2 + $0xa8] sm:$0xff] %vm237_vm1, %v455_v16  ;;  %680 = vst.msk [vmem:[%s1298_s2 + $0x1a8] sm:$0xff] %vm237_vm1, %v583_v17 }
  0xf6   :  { %v820_v18 = vpop.f32.mrf.mxu0  ;;  %v852_v19 = vpop.f32.mrf.mxu1 }
  0xf7   :  { %653 = vst.msk [vmem:[%s1298_s2 + $0xd0] sm:$0xff] %vm237_vm1, %v820_v18  ;;  %685 = vst.msk [vmem:[%s1298_s2 + $0x1d0] sm:$0xff] %vm237_vm1, %v852_v19 }
  0xf8   :  { %v468_v20 = vpop.f32.mrf.mxu0  ;;  %v596_v21 = vpop.f32.mrf.mxu1 }
  0xf9   :  { %651 = vst.msk [vmem:[%s1298_s2 + $0xc0] sm:$0xff] %vm237_vm1, %v468_v20  ;;  %683 = vst.msk [vmem:[%s1298_s2 + $0x1c0] sm:$0xff] %vm237_vm1, %v596_v21 }
  0xfa   :  { %v821_v22 = vpop.f32.mrf.mxu0  ;;  %v853_v23 = vpop.f32.mrf.mxu1 }
  0xfb   :  { %654 = vst.msk [vmem:[%s1298_s2 + $0xd8] sm:$0xff] %vm237_vm1, %v821_v22  ;;  %686 = vst.msk [vmem:[%s1298_s2 + $0x1d8] sm:$0xff] %vm237_vm1, %v853_v23 }
  0xfc   :  { %v471_v24 = vpop.f32.mrf.mxu0  ;;  %v599_v25 = vpop.f32.mrf.mxu1 }
  0xfd   :  { %652 = vst.msk [vmem:[%s1298_s2 + $0xc8] sm:$0xff] %vm237_vm1, %v471_v24  ;;  %684 = vst.msk [vmem:[%s1298_s2 + $0x1c8] sm:$0xff] %vm237_vm1, %v599_v25 }
  0xfe   :  { %v824_v26 = vpop.f32.mrf.mxu0  ;;  %v856_v27 = vpop.f32.mrf.mxu1 }
  0xff   :  { %657 = vst.msk [vmem:[%s1298_s2 + $0xf0] sm:$0xff] %vm237_vm1, %v824_v26  ;;  %689 = vst.msk [vmem:[%s1298_s2 + $0x1f0] sm:$0xff] %vm237_vm1, %v856_v27 }
 0x100   :  { %v484_v28 = vpop.f32.mrf.mxu0  ;;  %v612_v29 = vpop.f32.mrf.mxu1 }
 0x101   :  { %655 = vst.msk [vmem:[%s1298_s2 + $0xe0] sm:$0xff] %vm237_vm1, %v484_v28  ;;  %687 = vst.msk [vmem:[%s1298_s2 + $0x1e0] sm:$0xff] %vm237_vm1, %v612_v29 }
 0x102   :  { %v825_v30 = vpop.f32.mrf.mxu0  ;;  %v857_v31 = vpop.f32.mrf.mxu1 }
 0x103   :  { %658 = vst.msk [vmem:[%s1298_s2 + $0xf8] sm:$0xff] %vm237_vm1, %v825_v30  ;;  %690 = vst.msk [vmem:[%s1298_s2 + $0x1f8] sm:$0xff] %vm237_vm1, %v857_v31 }
 0x104   :  { %v487_v32 = vpop.f32.mrf.mxu0  ;;  %v615_v33 = vpop.f32.mrf.mxu1 }
 0x105   :  { %656 = vst.msk [vmem:[%s1298_s2 + $0xe8] sm:$0xff] %vm237_vm1, %v487_v32  ;;  %688 = vst.msk [vmem:[%s1298_s2 + $0x1e8] sm:$0xff] %vm237_vm1, %v615_v33 }

// kernel: _lambda_.18
= control target key start
LH: loop header
LB: loop body
LE: loop exit
PB: predicated region body
PF: predicated region fallthrough
CT: control target
= control target key end

     0   :  { %vm268_vm0 = vcmask 261120   ;;  %vm1052_vm6 = vcmask 31744   ;;  %s3691_s1 = inlined_call_operand.vmem [shape: bf16[32,4], index: 1, kind: input, shape index: {}]   ;;  %s3692_s0 = inlined_call_operand.vmem [shape: bf16[512,32], index: 0, kind: input, shape index: {}]   ;;  %s3693_s2 = inlined_call_operand.vmem [shape: f32[1,4], index: 2, kind: input, shape index: {}]   ;;  %s3694_s3 = inlined_call_operand.vmem [shape: f32[1,4], index: 3, kind: input, shape index: {}]   ;;  %s3695_s4 = inlined_call_operand.vmem [shape: f32[1,4], index: 4, kind: input, shape index: {}]   ;;  %s3696_s5 = inlined_call_operand.vmem [shape: f32[512,4], index: 5, kind: output, shape index: {}]  }
   0x1   :  { %v2000_v0 = vld [vmem:[%s3691_s1 + $0x8] sm:$0xff]   ;;  %v2001_v1 = vld [vmem:[%s3691_s1] sm:$0xff]   ;;  %v2006_v6 = vld [vmem:[%s3692_s0 + $0x10] sm:$0xff]  }
   0x2   :  { %1928 = vmatprep.subr.bf16.mxu0 %v2000_v0  ;;  %1996 = vmatprep.subr.bf16.mxu1 %v2000_v0  ;;  %v2002_v2 = vld [vmem:[%s3692_s0] sm:$0xff]   ;;  %v2004_v4 = vld [vmem:[%s3692_s0 + $0x8] sm:$0xff]   ;;  %v2007_v7 = vld [vmem:[%s3692_s0 + $0x90] sm:$0xff]  }
   0x3   :  { %1929 = vmatpush3.bf16.msra.mxu0 %v2000_v0  ;;  %1998 = vmatpush3.bf16.msra.mxu1 %v2000_v0  ;;  %v2003_v3 = vld [vmem:[%s3692_s0 + $0x80] sm:$0xff]   ;;  %v2005_v5 = vld [vmem:[%s3692_s0 + $0x88] sm:$0xff]   ;;  %v2008_v8 = vld [vmem:[%s3692_s0 + $0x18] sm:$0xff]  }
   0x4   :  { %1930 = vmatprep.subr.bf16.mxu0 %v2001_v1  ;;  %1997 = vmatprep.subr.bf16.mxu1 %v2001_v1  ;;  %v2009_v9 = vld [vmem:[%s3692_s0 + $0x98] sm:$0xff]   ;;  %v2010_v10 = vld [vmem:[%s3692_s0 + $0x20] sm:$0xff]   ;;  %v2011_v12 = vld [vmem:[%s3692_s0 + $0x28] sm:$0xff]  }
   0x5   :  { %1932 = vmatprep.mubr.msk.bf16.mxu0 %vm268_vm0, %v2002_v2  ;;  %1964 = vmatprep.mubr.msk.bf16.mxu1 %vm268_vm0, %v2003_v3  ;;  %v2012_v11 = vld [vmem:[%s3692_s0 + $0xa0] sm:$0xff]   ;;  %v2013_v13 = vld [vmem:[%s3692_s0 + $0xa8] sm:$0xff]   ;;  %v2014_v14 = vld [vmem:[%s3692_s0 + $0x30] sm:$0xff]  }
   0x6   :  { %v2016_v15 = vld [vmem:[%s3692_s0 + $0xb0] sm:$0xff]   ;;  %v2015_v16 = vld [vmem:[%s3692_s0 + $0x38] sm:$0xff]   ;;  %v2018_v18 = vld [vmem:[%s3692_s0 + $0x40] sm:$0xff]  }
   0x7   :  { %1931 = vmatpush3.bf16.msra.mxu0 %v2001_v1  ;;  %1999 = vmatpush3.bf16.msra.mxu1 %v2001_v1  ;;  %v2017_v17 = vld [vmem:[%s3692_s0 + $0xb8] sm:$0xff]   ;;  %v2020_v19 = vld [vmem:[%s3692_s0 + $0xc0] sm:$0xff]   ;;  %v2019_v20 = vld [vmem:[%s3692_s0 + $0x48] sm:$0xff]  }
   0x8   :  { %v2021_v21 = vld [vmem:[%s3692_s0 + $0xc8] sm:$0xff]   ;;  %v2022_v22 = vld [vmem:[%s3692_s0 + $0x50] sm:$0xff]   ;;  %v2023_v24 = vld [vmem:[%s3692_s0 + $0x58] sm:$0xff]  }
   0x9   :  { %v2024_v23 = vld [vmem:[%s3692_s0 + $0xd0] sm:$0xff]   ;;  %v2025_v25 = vld [vmem:[%s3692_s0 + $0xd8] sm:$0xff]   ;;  %v2026_v26 = vld [vmem:[%s3692_s0 + $0x60] sm:$0xff]  }
   0xa   :  { %1933 = vmatmul.mubr.msk.bf16.vlgmr.msra.gmra.mxu0 %vm268_vm0, %v2004_v4  ;;  %1965 = vmatmul.mubr.msk.bf16.vlgmr.msra.gmra.mxu1 %vm268_vm0, %v2005_v5  ;;  %v2028_v27 = vld [vmem:[%s3692_s0 + $0xe0] sm:$0xff]   ;;  %v2027_v28 = vld [vmem:[%s3692_s0 + $0x68] sm:$0xff]   ;;  %v2030_v30 = vld [vmem:[%s3692_s0 + $0x70] sm:$0xff]  }
   0xb   :  { %1936 = vmatprep.mubr.msk.bf16.mxu0 %vm268_vm0, %v2006_v6  ;;  %1968 = vmatprep.mubr.msk.bf16.mxu1 %vm268_vm0, %v2007_v7  ;;  %v2029_v29 = vld [vmem:[%s3692_s0 + $0xe8] sm:$0xff]   ;;  %v2032_v31 = vld [vmem:[%s3692_s0 + $0xf0] sm:$0xff]   ;;  %v2031_v32 = vld [vmem:[%s3692_s0 + $0x78] sm:$0xff]  }
   0xc   :  { %v2033_v33 = vld [vmem:[%s3692_s0 + $0xf8] sm:$0xff]   ;;  %v2460_v36 = vld [vmem:[%s3693_s2] ss:$0 sm:$0xff] }
   0xd   :  { %v2476_v62 = vld [vmem:[%s3694_s3] ss:$0 sm:$0xff] }
  0x12   :  { %1937 = vmatmul.mubr.msk.bf16.gmra.mxu0 %vm268_vm0, %v2008_v8  ;;  %1969 = vmatmul.mubr.msk.bf16.gmra.mxu1 %vm268_vm0, %v2009_v9 }
  0x13   :  { %1940 = vmatprep.mubr.msk.bf16.mxu0 %vm268_vm0, %v2010_v10  ;;  %1972 = vmatprep.mubr.msk.bf16.mxu1 %vm268_vm0, %v2012_v11  ;;  %v2482_v10 = vld [vmem:[%s3695_s4] ss:$0 sm:$0xff] }
  0x1a   :  { %1941 = vmatmul.mubr.msk.bf16.gmra.mxu0 %vm268_vm0, %v2011_v12  ;;  %1973 = vmatmul.mubr.msk.bf16.gmra.mxu1 %vm268_vm0, %v2013_v13 }
  0x1b   :  { %1944 = vmatprep.mubr.msk.bf16.mxu0 %vm268_vm0, %v2014_v14  ;;  %1976 = vmatprep.mubr.msk.bf16.mxu1 %vm268_vm0, %v2016_v15 }
  0x22   :  { %1945 = vmatmul.mubr.msk.bf16.gmra.mxu0 %vm268_vm0, %v2015_v16  ;;  %1977 = vmatmul.mubr.msk.bf16.gmra.mxu1 %vm268_vm0, %v2017_v17 }
  0x23   :  { %1948 = vmatprep.mubr.msk.bf16.mxu0 %vm268_vm0, %v2018_v18  ;;  %1980 = vmatprep.mubr.msk.bf16.mxu1 %vm268_vm0, %v2020_v19 }
  0x2a   :  { %1949 = vmatmul.mubr.msk.bf16.gmra.mxu0 %vm268_vm0, %v2019_v20  ;;  %1981 = vmatmul.mubr.msk.bf16.gmra.mxu1 %vm268_vm0, %v2021_v21 }
  0x2b   :  { %1952 = vmatprep.mubr.msk.bf16.mxu0 %vm268_vm0, %v2022_v22  ;;  %1984 = vmatprep.mubr.msk.bf16.mxu1 %vm268_vm0, %v2024_v23 }
  0x32   :  { %1953 = vmatmul.mubr.msk.bf16.gmra.mxu0 %vm268_vm0, %v2023_v24  ;;  %1985 = vmatmul.mubr.msk.bf16.gmra.mxu1 %vm268_vm0, %v2025_v25 }
  0x33   :  { %1956 = vmatprep.mubr.msk.bf16.mxu0 %vm268_vm0, %v2026_v26  ;;  %1988 = vmatprep.mubr.msk.bf16.mxu1 %vm268_vm0, %v2028_v27 }
  0x3a   :  { %1957 = vmatmul.mubr.msk.bf16.gmra.mxu0 %vm268_vm0, %v2027_v28  ;;  %1989 = vmatmul.mubr.msk.bf16.gmra.mxu1 %vm268_vm0, %v2029_v29 }
  0x3b   :  { %1960 = vmatprep.mubr.msk.bf16.mxu0 %vm268_vm0, %v2030_v30  ;;  %1992 = vmatprep.mubr.msk.bf16.mxu1 %vm268_vm0, %v2032_v31 }
  0x42   :  { %1961 = vmatmul.mubr.msk.bf16.gmra.mxu0 %vm268_vm0, %v2031_v32  ;;  %1993 = vmatmul.mubr.msk.bf16.gmra.mxu1 %vm268_vm0, %v2033_v33 }
  0xca   :  { %v1934_v34 = vpop.f32.mrf.mxu0  ;;  %v1966_v35 = vpop.f32.mrf.mxu1 }
  0xcb   :  { %v408_v39 = vadd.f32 %v1934_v34, %v2460_v36  ;;  %v536_v42 = vadd.f32 %v1966_v35, %v2460_v36 }
  0xcc   :  { %v399_v37 = vpop.f32.mrf.mxu0  ;;  %v527_v38 = vpop.f32.mrf.mxu1 }
  0xcd   :  { %v400_v43 = vadd.f32 %v2460_v36, %v399_v37  ;;  %v528_v46 = vadd.f32 %v2460_v36, %v527_v38  ;;  %vm656_vm1 = vcmp.ge.f32.partialorder %v408_v39, 0.0  ;;  %v720_v48 = vmul.f32 0.02, %v408_v39 }
  0xce   :  { %v1935_v40 = vpop.f32.mrf.mxu0  ;;  %v1967_v41 = vpop.f32.mrf.mxu1  ;;  %v752_v50 = vmul.f32 0.02, %v536_v42  ;;  %vm688_vm2 = vcmp.ge.f32.partialorder %v536_v42, 0.0 }
  0xcf   :  { %v411_v47 = vadd.f32 %v1935_v40, %v2460_v36  ;;  %v539_v51 = vadd.f32 %v1967_v41, %v2460_v36  ;;  %vm654_vm3 = vcmp.ge.f32.partialorder %v400_v43, 0.0  ;;  %v718_v55 = vmul.f32 0.02, %v400_v43 }
  0xd0   :  { %v402_v44 = vpop.f32.mrf.mxu0  ;;  %v530_v45 = vpop.f32.mrf.mxu1  ;;  %v750_v56 = vmul.f32 0.02, %v528_v46  ;;  %v784_v61 = vsel %vm656_vm1, %v408_v39, %v720_v48  ;;  %vm686_vm4 = vcmp.ge.f32.partialorder %v528_v46, 0.0  ;;  %v816_v63 = vsel %vm688_vm2, %v536_v42, %v752_v50 }
  0xd1   :  { %v403_v52 = vadd.f32 %v2460_v36, %v402_v44  ;;  %v531_v53 = vadd.f32 %v2460_v36, %v530_v45  ;;  %v721_v57 = vmul.f32 0.02, %v411_v47  ;;  %vm657_vm5 = vcmp.ge.f32.partialorder %v411_v47, 0.0 }
  0xd2   :  { %v1938_v49 = vpop.f32.mrf.mxu0  ;;  %v1970_v54 = vpop.f32.mrf.mxu1  ;;  %v753_v0 = vmul.f32 0.02, %v539_v51  ;;  %v782_v4 = vsel %vm654_vm3, %v400_v43, %v718_v55  ;;  %vm689_vm7 = vcmp.ge.f32.partialorder %v539_v51, 0.0  ;;  %v814_v5 = vsel %vm686_vm4, %v528_v46, %v750_v56 }
  0xd3   :  { %v424_v58 = vadd.f32 %v1938_v49, %v2460_v36  ;;  %v552_v59 = vadd.f32 %v1970_v54, %v2460_v36  ;;  %v719_v1 = vmul.f32 0.02, %v403_v52  ;;  %v751_v2 = vmul.f32 0.02, %v531_v53 }
  0xd4   :  { %v415_v60 = vpop.f32.mrf.mxu0  ;;  %v543_v3 = vpop.f32.mrf.mxu1  ;;  %vm655_vm8 = vcmp.ge.f32.partialorder %v403_v52, 0.0  ;;  %vm687_vm9 = vcmp.ge.f32.partialorder %v531_v53, 0.0  ;;  %v785_v6 = vsel %vm657_vm5, %v411_v47, %v721_v57  ;;  %v887_v11 = vmul.f32 %v2476_v62, %v816_v63 }
  0xd5   :  { %v724_v7 = vmul.f32 0.02, %v424_v58  ;;  %v756_v8 = vmul.f32 0.02, %v552_v59  ;;  %vm660_vm10 = vcmp.ge.f32.partialorder %v424_v58, 0.0  ;;  %vm692_vm11 = vcmp.ge.f32.partialorder %v552_v59, 0.0 }
  0xd6   :  { %v1939_v9 = vpop.f32.mrf.mxu0  ;;  %v855_v12 = vmul.f32 %v2476_v62, %v784_v61  ;;  %v817_v13 = vsel %vm689_vm7, %v539_v51, %v753_v0  ;;  %v783_v14 = vsel %vm655_vm8, %v403_v52, %v719_v1  ;;  %v815_v15 = vsel %vm687_vm9, %v531_v53, %v751_v2  ;;  %v1971_v17 = vpop.f32.mrf.mxu1 }
  0xd7   :  { %v416_v16 = vadd.f32 %v2460_v36, %v415_v60  ;;  %v958_v18 = vadd.f32 %v2482_v10, %v887_v11  ;;  %v856_v20 = vmul.f32 %v2476_v62, %v785_v6  ;;  %v853_v21 = vmul.f32 %v2476_v62, %v782_v4 }
  0xd8   :  { %v926_v19 = vadd.f32 %v2482_v10, %v855_v12  ;;  %v2491_v22 = vsel %vm660_vm10, %v424_v58, %v724_v7  ;;  %v2493_v23 = vsel %vm692_vm11, %v552_v59, %v756_v8  ;;  %v544_v24 = vadd.f32 %v2460_v36, %v543_v3  ;;  %v418_v26 = vpop.f32.mrf.mxu0  ;;  %v546_v33 = vpop.f32.mrf.mxu1 }
  0xd9   :  { %v427_v25 = vadd.f32 %v1939_v9, %v2460_v36  ;;  %v2497_v27 = vmul.f32 3.0, %v958_v18  ;;  %v927_v29 = vadd.f32 %v2482_v10, %v856_v20  ;;  %v924_v30 = vadd.f32 %v2482_v10, %v853_v21 }
  0xda   :  { %v2499_v28 = vmul.f32 3.0, %v926_v19  ;;  %vm658_vm12 = vcmp.ge.f32.partialorder %v416_v16, 0.0  ;;  %v722_v31 = vmul.f32 0.02, %v416_v16  ;;  %v555_v32 = vadd.f32 %v1971_v17, %v2460_v36  ;;  %v1942_v34 = vpop.f32.mrf.mxu0  ;;  %v1974_v45 = vpop.f32.mrf.mxu1 }
  0xdb   :  { %v888_v35 = vmul.f32 %v2476_v62, %v817_v13  ;;  %v1155_v37 = vsel %vm1052_vm6, %v2497_v27, -inf  ;;  %v2509_v39 = vmul.f32 3.0, %v927_v29  ;;  %v2511_v40 = vmul.f32 3.0, %v924_v30 }
  0xdc   :  { %v1059_v38 = vsel %vm1052_vm6, %v2499_v28, -inf  ;;  %v725_v41 = vmul.f32 0.02, %v427_v25  ;;  %1156 = vmax.xlane.f32.xlu0 %v1155_v37  ;;  %v419_v42 = vadd.f32 %v2460_v36, %v418_v26  ;;  %v885_v44 = vmul.f32 %v2476_v62, %v814_v5  ;;  %v431_v52 = vpop.f32.mrf.mxu0  ;;  %v559_v59 = vpop.f32.mrf.mxu1 }
  0xdd   :  { %1060 = vmax.xlane.f32.xlu1 %v1059_v38  ;;  %v959_v43 = vadd.f32 %v2482_v10, %v888_v35  ;;  %vm690_vm13 = vcmp.ge.f32.partialorder %v544_v24, 0.0  ;;  %vm661_vm14 = vcmp.ge.f32.partialorder %v427_v25, 0.0  ;;  %v547_v46 = vadd.f32 %v2460_v36, %v546_v33 }
  0xde   :  { %v1062_v47 = vsel %vm1052_vm6, %v2509_v39, -inf  ;;  %v754_v48 = vmul.f32 0.02, %v544_v24  ;;  %v440_v49 = vadd.f32 %v1942_v34, %v2460_v36  ;;  %v956_v51 = vadd.f32 %v2482_v10, %v885_v44  ;;  %v1943_v3 = vpop.f32.mrf.mxu0  ;;  %v1975_v12 = vpop.f32.mrf.mxu1 }
  0xdf   :  { %v2520_v50 = vmul.f32 3.0, %v959_v43  ;;  %v2524_v53 = vsel %vm658_vm12, %v416_v16, %v722_v31  ;;  %vm693_vm15 = vcmp.ge.f32.partialorder %v555_v32, 0.0  ;;  %v757_v54 = vmul.f32 0.02, %v555_v32 }
  0xe0   :  { %v1053_v55 = vsel %vm1052_vm6, %v2511_v40, -inf  ;;  %v789_v56 = vsel %vm661_vm14, %v427_v25, %v725_v41  ;;  %vm659_vm0 = vcmp.ge.f32.partialorder %v419_v42, 0.0  ;;  %v723_v57 = vmul.f32 0.02, %v419_v42  ;;  %v434_v19 = vpop.f32.mrf.mxu0  ;;  %v562_v31 = vpop.f32.mrf.mxu1 }
  0xe1   :  { %1063 = vmax.xlane.f32.xlu1 %v1062_v47  ;;  %1054 = vmax.xlane.f32.xlu0 %v1053_v55  ;;  %v2528_v58 = vmul.f32 3.0, %v956_v51  ;;  %vm691_vm1 = vcmp.ge.f32.partialorder %v547_v46, 0.0  ;;  %v755_v60 = vmul.f32 0.02, %v547_v46  ;;  %v886_v61 = vmul.f32 %v2476_v62, %v815_v15 }
  0xe2   :  { %v854_v63 = vmul.f32 %v2476_v62, %v783_v14  ;;  %vm664_vm2 = vcmp.ge.f32.partialorder %v440_v49, 0.0  ;;  %v728_v0 = vmul.f32 0.02, %v440_v49  ;;  %v1158_v1 = vsel %vm1052_vm6, %v2520_v50, -inf  ;;  %v1946_v43 = vpop.f32.mrf.mxu0 }
  0xe3   :  { %v432_v2 = vadd.f32 %v2460_v36, %v431_v52  ;;  %v1149_v4 = vsel %vm1052_vm6, %v2528_v58, -inf  ;;  %v957_v5 = vadd.f32 %v2482_v10, %v886_v61  ;;  %v860_v7 = vmul.f32 %v2476_v62, %v789_v56  ;;  %v1978_v61 = vpop.f32.mrf.mxu1 }
  0xe4   :  { %v925_v6 = vadd.f32 %v2482_v10, %v854_v63  ;;  %v2541_v8 = vsel %vm690_vm13, %v544_v24, %v754_v48  ;;  %v821_v9 = vsel %vm693_vm15, %v555_v32, %v757_v54  ;;  %v787_v11 = vsel %vm659_vm0, %v419_v42, %v723_v57 }
  0xe5   :  { %1159 = vmax.xlane.f32.xlu1 %v1158_v1  ;;  %1150 = vmax.xlane.f32.xlu0 %v1149_v4  ;;  %v819_v13 = vsel %vm691_vm1, %v547_v46, %v755_v60  ;;  %v443_v14 = vadd.f32 %v1943_v3, %v2460_v36  ;;  %v2547_v15 = vmul.f32 3.0, %v957_v5  ;;  %v2552_v17 = vsel %vm664_vm2, %v440_v49, %v728_v0  ;;  %v447_v60 = vpop.f32.mrf.mxu0 }
  0xe6   :  { %v2549_v16 = vmul.f32 3.0, %v925_v6  ;;  %v568_v18 = vadd.f32 %v1974_v45, %v2460_v36  ;;  %v931_v20 = vadd.f32 %v2482_v10, %v860_v7  ;;  %v859_v21 = vmul.f32 %v2476_v62, %v2491_v22 }
  0xe7   :  { %vm662_vm3 = vcmp.ge.f32.partialorder %v432_v2, 0.0  ;;  %v726_v24 = vmul.f32 0.02, %v432_v2  ;;  %v1152_v25 = vsel %vm1052_vm6, %v2547_v15, -inf  ;;  %v892_v32 = vmul.f32 %v2476_v62, %v821_v9 }
  0xe8   :  { %v1056_v26 = vsel %vm1052_vm6, %v2549_v16, -inf  ;;  %v2562_v29 = vmul.f32 3.0, %v931_v20  ;;  %v930_v30 = vadd.f32 %v2482_v10, %v859_v21  ;;  %v891_v22 = vmul.f32 %v2476_v62, %v2493_v23 }
  0xe9   :  { %1153 = vmax.xlane.f32.xlu1 %v1152_v25  ;;  %1057 = vmax.xlane.f32.xlu0 %v1056_v26  ;;  %vm665_vm4 = vcmp.ge.f32.partialorder %v443_v14, 0.0  ;;  %v729_v33 = vmul.f32 0.02, %v443_v14  ;;  %v435_v34 = vadd.f32 %v2460_v36, %v434_v19  ;;  %v858_v35 = vmul.f32 %v2476_v62, %v787_v11  ;;  %v575_v19 = vpop.f32.mrf.mxu1 }
  0xea   :  { %v560_v37 = vadd.f32 %v2460_v36, %v559_v59  ;;  %v2571_v38 = vmul.f32 3.0, %v930_v30  ;;  %v963_v41 = vadd.f32 %v2482_v10, %v892_v32  ;;  %v962_v42 = vadd.f32 %v2482_v10, %v891_v22 }
  0xeb   :  { %v571_v44 = vadd.f32 %v1975_v12, %v2460_v36  ;;  %v1074_v23 = vsel %vm1052_vm6, %v2562_v29, -inf  ;;  %v563_v45 = vadd.f32 %v2460_v36, %v562_v31  ;;  %v929_v46 = vadd.f32 %v2482_v10, %v858_v35  ;;  %v1979_v35 = vpop.f32.mrf.mxu1 }
  0xec   :  { %v1071_v47 = vsel %vm1052_vm6, %v2571_v38, -inf  ;;  %v2582_v48 = vmul.f32 3.0, %v963_v41  ;;  %v2584_v49 = vmul.f32 3.0, %v962_v42  ;;  %v857_v51 = vmul.f32 %v2476_v62, %v2524_v53 }
  0xed   :  { %1075 = vmax.xlane.f32.xlu1 %v1074_v23  ;;  %v2589_v52 = vsel %vm662_vm3, %v432_v2, %v726_v24  ;;  %v793_v54 = vsel %vm665_vm4, %v443_v14, %v729_v33  ;;  %vm696_vm5 = vcmp.ge.f32.partialorder %v568_v18, 0.0  ;;  %v760_v55 = vmul.f32 0.02, %v568_v18  ;;  %1072 = vmax.xlane.f32.xlu0 %v1071_v47  ;;  %v1947_v14 = vpop.f32.mrf.mxu0 }
  0xee   :  { %vm663_vm7 = vcmp.ge.f32.partialorder %v435_v34, 0.0  ;;  %v727_v56 = vmul.f32 0.02, %v435_v34  ;;  %v758_v57 = vmul.f32 0.02, %v560_v37  ;;  %v928_v59 = vadd.f32 %v2482_v10, %v857_v51 }
  0xef   :  { %vm694_vm8 = vcmp.ge.f32.partialorder %v560_v37, 0.0  ;;  %vm697_vm9 = vcmp.ge.f32.partialorder %v571_v44, 0.0  ;;  %v1170_v53 = vsel %vm1052_vm6, %v2582_v48, -inf  ;;  %v2595_v63 = vmul.f32 3.0, %v929_v46 }
  0xf0   :  { %v761_v0 = vmul.f32 0.02, %v571_v44  ;;  %v759_v1 = vmul.f32 0.02, %v563_v45  ;;  %v1167_v2 = vsel %vm1052_vm6, %v2584_v49, -inf  ;;  %v2599_v3 = vmul.f32 3.0, %v928_v59 }
  0xf1   :  { %1171 = vmax.xlane.f32.xlu1 %v1170_v53  ;;  %vm695_vm10 = vcmp.ge.f32.partialorder %v563_v45, 0.0  ;;  %1168 = vmax.xlane.f32.xlu0 %v1167_v2  ;;  %v456_v4 = vadd.f32 %v1946_v43, %v2460_v36  ;;  %v890_v5 = vmul.f32 %v2476_v62, %v819_v13  ;;  %v889_v6 = vmul.f32 %v2476_v62, %v2541_v8 }
  0xf2   :  { %v824_v7 = vsel %vm696_vm5, %v568_v18, %v760_v55  ;;  %v791_v9 = vsel %vm663_vm7, %v435_v34, %v727_v56  ;;  %v2608_v11 = vsel %vm694_vm8, %v560_v37, %v758_v57  ;;  %v448_v12 = vadd.f32 %v2460_v36, %v447_v60  ;;  %v450_v34 = vpop.f32.mrf.mxu0  ;;  %v578_v57 = vpop.f32.mrf.mxu1 }
  0xf3   :  { %v1068_v20 = vsel %vm1052_vm6, %v2595_v63, -inf  ;;  %v459_v21 = vadd.f32 %v1947_v14, %v2460_v36  ;;  %v961_v13 = vadd.f32 %v2482_v10, %v890_v5  ;;  %v960_v8 = vadd.f32 %v2482_v10, %v889_v6 }
  0xf4   :  { %v825_v18 = vsel %vm697_vm9, %v571_v44, %v761_v0  ;;  %v2618_v24 = vsel %vm695_vm10, %v563_v45, %v759_v1  ;;  %v1065_v25 = vsel %vm1052_vm6, %v2599_v3, -inf  ;;  %v864_v26 = vmul.f32 %v2476_v62, %v793_v54  ;;  %v1950_v55 = vpop.f32.mrf.mxu0 }
  0xf5   :  { %1069 = vmax.xlane.f32.xlu1 %v1068_v20  ;;  %vm668_vm11 = vcmp.ge.f32.partialorder %v456_v4, 0.0  ;;  %1066 = vmax.xlane.f32.xlu0 %v1065_v25  ;;  %v2623_v30 = vmul.f32 3.0, %v961_v13  ;;  %v2625_v31 = vmul.f32 3.0, %v960_v8  ;;  %v863_v32 = vmul.f32 %v2476_v62, %v2552_v17 }
  0xf6   :  { %v732_v22 = vmul.f32 0.02, %v456_v4  ;;  %vm666_vm12 = vcmp.ge.f32.partialorder %v448_v12, 0.0  ;;  %v584_v33 = vadd.f32 %v1978_v61, %v2460_v36  ;;  %v935_v37 = vadd.f32 %v2482_v10, %v864_v26  ;;  %v463_v13 = vpop.f32.mrf.mxu0 }
  0xf7   :  { %v730_v41 = vmul.f32 0.02, %v448_v12  ;;  %vm669_vm13 = vcmp.ge.f32.partialorder %v459_v21, 0.0  ;;  %v1164_v42 = vsel %vm1052_vm6, %v2623_v30, -inf  ;;  %v934_v43 = vadd.f32 %v2482_v10, %v863_v32 }
  0xf8   :  { %v1161_v44 = vsel %vm1052_vm6, %v2625_v31, -inf  ;;  %v2636_v17 = vmul.f32 3.0, %v935_v37  ;;  %v896_v23 = vmul.f32 %v2476_v62, %v825_v18  ;;  %v895_v45 = vmul.f32 %v2476_v62, %v824_v7 }
  0xf9   :  { %1165 = vmax.xlane.f32.xlu1 %v1164_v42  ;;  %v733_v46 = vmul.f32 0.02, %v459_v21  ;;  %1162 = vmax.xlane.f32.xlu0 %v1161_v44  ;;  %v451_v47 = vadd.f32 %v2460_v36, %v450_v34  ;;  %v576_v51 = vadd.f32 %v2460_v36, %v575_v19  ;;  %v2642_v54 = vmul.f32 3.0, %v934_v43 }
  0xfa   :  { %v587_v56 = vadd.f32 %v1979_v35, %v2460_v36  ;;  %v967_v59 = vadd.f32 %v2482_v10, %v896_v23  ;;  %v966_v60 = vadd.f32 %v2482_v10, %v895_v45  ;;  %v862_v61 = vmul.f32 %v2476_v62, %v791_v9  ;;  %v1982_v9 = vpop.f32.mrf.mxu1 }
  0xfb   :  { %v796_v53 = vsel %vm668_vm11, %v456_v4, %v732_v22  ;;  %vm700_vm14 = vcmp.ge.f32.partialorder %v584_v33, 0.0  ;;  %v1086_v0 = vsel %vm1052_vm6, %v2636_v17, -inf  ;;  %v1083_v1 = vsel %vm1052_vm6, %v2642_v54, -inf }
  0xfc   :  { %v2653_v2 = vmul.f32 3.0, %v967_v59  ;;  %v2655_v5 = vmul.f32 3.0, %v966_v60  ;;  %v933_v6 = vadd.f32 %v2482_v10, %v862_v61  ;;  %v861_v7 = vmul.f32 %v2476_v62, %v2589_v52  ;;  %v591_v34 = vpop.f32.mrf.mxu1 }
  0xfd   :  { %1087 = vmax.xlane.f32.xlu1 %v1086_v0  ;;  %v2661_v4 = vsel %vm666_vm12, %v448_v12, %v730_v41  ;;  %v797_v14 = vsel %vm669_vm13, %v459_v21, %v733_v46  ;;  %v764_v19 = vmul.f32 0.02, %v584_v33  ;;  %v731_v20 = vmul.f32 0.02, %v451_v47  ;;  %1084 = vmax.xlane.f32.xlu0 %v1083_v1  ;;  %v1951_v41 = vpop.f32.mrf.mxu0 }
  0xfe   :  { %vm667_vm15 = vcmp.ge.f32.partialorder %v451_v47, 0.0  ;;  %v762_v8 = vmul.f32 0.02, %v576_v51  ;;  %v765_v18 = vmul.f32 0.02, %v587_v56  ;;  %v932_v25 = vadd.f32 %v2482_v10, %v861_v7 }
  0xff   :  { %vm698_vm0 = vcmp.ge.f32.partialorder %v576_v51, 0.0  ;;  %vm701_vm1 = vcmp.ge.f32.partialorder %v587_v56, 0.0  ;;  %v1182_v52 = vsel %vm1052_vm6, %v2653_v2, -inf  ;;  %v2667_v26 = vmul.f32 3.0, %v933_v6  ;;  %v466_v1 = vpop.f32.mrf.mxu0 }
 0x100   :  { %v2670_v12 = vadd.f32 %v2460_v36, %v578_v57  ;;  %v1179_v21 = vsel %vm1052_vm6, %v2655_v5, -inf  ;;  %v2675_v32 = vadd.f32 %v1950_v55, %v2460_v36  ;;  %v2677_v22 = vmul.f32 3.0, %v932_v25 }
 0x101   :  { %1183 = vmax.xlane.f32.xlu1 %v1182_v52  ;;  %v828_v35 = vsel %vm700_vm14, %v584_v33, %v764_v19  ;;  %v795_v37 = vsel %vm667_vm15, %v451_v47, %v731_v20  ;;  %1180 = vmax.xlane.f32.xlu0 %v1179_v21  ;;  %v894_v42 = vmul.f32 %v2476_v62, %v2618_v24  ;;  %v1080_v33 = vsel %vm1052_vm6, %v2667_v26, -inf }
 0x102   :  { %v893_v43 = vmul.f32 %v2476_v62, %v2608_v11  ;;  %v2685_v44 = vsel %vm698_vm0, %v576_v51, %v762_v8  ;;  %v829_v23 = vsel %vm701_vm1, %v587_v56, %v765_v18  ;;  %v464_v45 = vadd.f32 %v2460_v36, %v463_v13  ;;  %v1983_v56 = vpop.f32.mrf.mxu1 }
 0x103   :  { %v475_v46 = vadd.f32 %v1951_v41, %v2460_v36  ;;  %v965_v47 = vadd.f32 %v2482_v10, %v894_v42  ;;  %v868_v24 = vmul.f32 %v2476_v62, %v797_v14  ;;  %vm699_vm2 = vcmp.ge.f32.partialorder %v2670_v12, 0.0 }
 0x104   :  { %v964_v55 = vadd.f32 %v2482_v10, %v893_v43  ;;  %v763_v11 = vmul.f32 0.02, %v2670_v12  ;;  %vm672_vm3 = vcmp.ge.f32.partialorder %v2675_v32, 0.0  ;;  %v1077_v51 = vsel %vm1052_vm6, %v2677_v22, -inf  ;;  %v594_v8 = vpop.f32.mrf.mxu1 }
 0x105   :  { %1081 = vmax.xlane.f32.xlu1 %v1080_v33  ;;  %v736_v57 = vmul.f32 0.02, %v2675_v32  ;;  %1078 = vmax.xlane.f32.xlu0 %v1077_v51  ;;  %v600_v59 = vadd.f32 %v1982_v9, %v2460_v36  ;;  %v2702_v60 = vmul.f32 3.0, %v965_v47  ;;  %vm670_vm4 = vcmp.ge.f32.partialorder %v464_v45, 0.0  ;;  %v1954_v47 = vpop.f32.mrf.mxu0 }
 0x106   :  { %v2704_v61 = vmul.f32 3.0, %v964_v55  ;;  %v734_v0 = vmul.f32 0.02, %v464_v45  ;;  %v939_v6 = vadd.f32 %v2482_v10, %v868_v24  ;;  %v867_v7 = vmul.f32 %v2476_v62, %v796_v53 }
 0x107   :  { %vm673_vm5 = vcmp.ge.f32.partialorder %v475_v46, 0.0  ;;  %v737_v14 = vmul.f32 0.02, %v475_v46  ;;  %v1176_v19 = vsel %vm1052_vm6, %v2702_v60, -inf  ;;  %v900_v18 = vmul.f32 %v2476_v62, %v829_v23 }
 0x108   :  { %v1173_v20 = vsel %vm1052_vm6, %v2704_v61, -inf  ;;  %v2712_v9 = vmul.f32 3.0, %v939_v6  ;;  %v938_v13 = vadd.f32 %v2482_v10, %v867_v7  ;;  %v899_v25 = vmul.f32 %v2476_v62, %v828_v35 }
 0x109   :  { %1177 = vmax.xlane.f32.xlu1 %v1176_v19  ;;  %vm704_vm7 = vcmp.ge.f32.partialorder %v600_v59, 0.0  ;;  %v768_v53 = vmul.f32 0.02, %v600_v59  ;;  %1174 = vmax.xlane.f32.xlu0 %v1173_v20  ;;  %v467_v52 = vadd.f32 %v2460_v36, %v466_v1  ;;  %v866_v21 = vmul.f32 %v2476_v62, %v795_v37 }
 0x10a   :  { %v592_v41 = vadd.f32 %v2460_v36, %v591_v34  ;;  %v2720_v42 = vmul.f32 3.0, %v938_v13  ;;  %v971_v43 = vadd.f32 %v2482_v10, %v900_v18  ;;  %v970_v33 = vadd.f32 %v2482_v10, %v899_v25  ;;  %v479_v18 = vpop.f32.mrf.mxu0  ;;  %v1986_v25 = vpop.f32.mrf.mxu1 }
 0x10b   :  { %v603_v23 = vadd.f32 %v1983_v56, %v2460_v36  ;;  %v1098_v35 = vsel %vm1052_vm6, %v2712_v9, -inf  ;;  %v595_v55 = vadd.f32 %v2460_v36, %v594_v8  ;;  %v937_v24 = vadd.f32 %v2482_v10, %v866_v21 }
 0x10c   :  { %v1095_v34 = vsel %vm1052_vm6, %v2720_v42, -inf  ;;  %v2731_v37 = vmul.f32 3.0, %v971_v43  ;;  %v2733_v51 = vmul.f32 3.0, %v970_v33  ;;  %v865_v1 = vmul.f32 %v2476_v62, %v2661_v4  ;;  %v1955_v33 = vpop.f32.mrf.mxu0 }
 0x10d   :  { %1099 = vmax.xlane.f32.xlu1 %v1098_v35  ;;  %v827_v56 = vsel %vm699_vm2, %v2670_v12, %v763_v11  ;;  %v800_v6 = vsel %vm672_vm3, %v2675_v32, %v736_v57  ;;  %v2744_v7 = vsel %vm670_vm4, %v464_v45, %v734_v0  ;;  %v801_v19 = vsel %vm673_vm5, %v475_v46, %v737_v14  ;;  %v607_v35 = vpop.f32.mrf.mxu1 }
 0x10e   :  { %1096 = vmax.xlane.f32.xlu0 %v1095_v34  ;;  %v832_v20 = vsel %vm704_vm7, %v600_v59, %v768_v53  ;;  %v735_v13 = vmul.f32 0.02, %v467_v52  ;;  %v766_v8 = vmul.f32 0.02, %v592_v41  ;;  %v936_v4 = vadd.f32 %v2482_v10, %v865_v1 }
 0x10f   :  { %vm671_vm8 = vcmp.ge.f32.partialorder %v467_v52, 0.0  ;;  %vm702_vm9 = vcmp.ge.f32.partialorder %v592_v41, 0.0  ;;  %v1194_v12 = vsel %vm1052_vm6, %v2731_v37, -inf  ;;  %v2751_v32 = vmul.f32 3.0, %v937_v24 }
 0x110   :  { %v769_v45 = vmul.f32 0.02, %v603_v23  ;;  %v767_v11 = vmul.f32 0.02, %v595_v55  ;;  %v1191_v46 = vsel %vm1052_vm6, %v2733_v51, -inf  ;;  %v2755_v57 = vmul.f32 3.0, %v936_v4 }
 0x111   :  { %1195 = vmax.xlane.f32.xlu1 %v1194_v12  ;;  %vm705_vm10 = vcmp.ge.f32.partialorder %v603_v23, 0.0  ;;  %vm703_vm11 = vcmp.ge.f32.partialorder %v595_v55, 0.0  ;;  %v898_v59 = vmul.f32 %v2476_v62, %v827_v56  ;;  %v897_v0 = vmul.f32 %v2476_v62, %v2685_v44 }
 0x112   :  { %3724 = vst [vmem:[#allocation2_spill] sm:$0xff] %v2755_v57  ;;  %1192 = vmax.xlane.f32.xlu0 %v1191_v46  ;;  %v799_v14 = vsel %vm671_vm8, %v467_v52, %v735_v13  ;;  %v2760_v53 = vsel %vm702_vm9, %v592_v41, %v766_v8  ;;  %v488_v21 = vadd.f32 %v1954_v47, %v2460_v36  ;;  %v1092_v24 = vsel %vm1052_vm6, %v2751_v32, -inf }
 0x113   :  { %v480_v43 = vadd.f32 %v2460_v36, %v479_v18  ;;  %v491_v34 = vadd.f32 %v1955_v33, %v2460_v36  ;;  %v969_v1 = vadd.f32 %v2482_v10, %v898_v59  ;;  %v968_v56 = vadd.f32 %v2482_v10, %v897_v0 }
 0x114   :  { %v833_v4 = vsel %vm705_vm10, %v603_v23, %v769_v45  ;;  %v2769_v44 = vsel %vm703_vm11, %v595_v55, %v767_v11  ;;  %v1089_v52 = vsel %vm1052_vm6, %v2755_v57, -inf  ;;  %v872_v41 = vmul.f32 %v2476_v62, %v801_v19  ;;  %v1987_v23 = vpop.f32.mrf.mxu1  ;;  %v482_v11 = vpop.f32.mrf.mxu0 }
 0x115   :  { %1093 = vmax.xlane.f32.xlu1 %v1092_v24  ;;  %v616_v47 = vadd.f32 %v1986_v25, %v2460_v36  ;;  %v2775_v13 = vmul.f32 3.0, %v969_v1  ;;  %v2777_v8 = vmul.f32 3.0, %v968_v56  ;;  %v871_v18 = vmul.f32 %v2476_v62, %v800_v6 }
 0x116   :  { %1090 = vmax.xlane.f32.xlu0 %v1089_v52  ;;  %vm676_vm12 = vcmp.ge.f32.partialorder %v488_v21, 0.0  ;;  %v740_v12 = vmul.f32 0.02, %v488_v21  ;;  %vm674_vm13 = vcmp.ge.f32.partialorder %v480_v43, 0.0  ;;  %v943_v55 = vadd.f32 %v2482_v10, %v872_v41  ;;  %v1958_v56 = vpop.f32.mrf.mxu0  ;;  %v610_v41 = vpop.f32.mrf.mxu1 }
 0x117   :  { %3725 = vst [vmem:[#allocation3_spill] sm:$0xff] %v2775_v13  ;;  %3726 = vst [vmem:[#allocation4_spill] sm:$0xff] %v2777_v8  ;;  %v738_v45 = vmul.f32 0.02, %v480_v43  ;;  %vm677_vm14 = vcmp.ge.f32.partialorder %v491_v34, 0.0  ;;  %v1188_v19 = vsel %vm1052_vm6, %v2775_v13, -inf  ;;  %v942_v25 = vadd.f32 %v2482_v10, %v871_v18 }
 0x118   :  { %v1185_v46 = vsel %vm1052_vm6, %v2777_v8, -inf  ;;  %v2786_v59 = vmul.f32 3.0, %v943_v55  ;;  %v904_v6 = vmul.f32 %v2476_v62, %v833_v4  ;;  %v903_v0 = vmul.f32 %v2476_v62, %v832_v20 }
 0x119   :  { %1189 = vmax.xlane.f32.xlu1 %v1188_v19  ;;  %v741_v33 = vmul.f32 0.02, %v491_v34  ;;  %vm708_vm15 = vcmp.ge.f32.partialorder %v616_v47, 0.0  ;;  %v772_v24 = vmul.f32 0.02, %v616_v47  ;;  %v2790_v1 = vmul.f32 3.0, %v942_v25 }
 0x11a   :  { %3727 = vst [vmem:[#allocation5_spill] sm:$0xff] %v2786_v59  ;;  %1186 = vmax.xlane.f32.xlu0 %v1185_v46  ;;  %v483_v52 = vadd.f32 %v2460_v36, %v482_v11  ;;  %v975_v18 = vadd.f32 %v2482_v10, %v904_v6  ;;  %v974_v19 = vadd.f32 %v2482_v10, %v903_v0  ;;  %v1110_v8 = vsel %vm1052_vm6, %v2786_v59, -inf  ;;  %v1990_v0 = vpop.f32.mrf.mxu1 }
 0x11b   :  { %3728 = vst [vmem:[#allocation6_spill] sm:$0xff] %v2790_v1  ;;  %v870_v55 = vmul.f32 %v2476_v62, %v799_v14  ;;  %v608_v4 = vadd.f32 %v2460_v36, %v607_v35  ;;  %v619_v20 = vadd.f32 %v1987_v23, %v2460_v36  ;;  %v1107_v25 = vsel %vm1052_vm6, %v2790_v1, -inf }
 0x11c   :  { %v2802_v46 = vmul.f32 3.0, %v975_v18  ;;  %v2804_v11 = vmul.f32 3.0, %v974_v19  ;;  %v869_v14 = vmul.f32 %v2476_v62, %v2744_v7  ;;  %v804_v35 = vsel %vm676_vm12, %v488_v21, %v740_v12  ;;  %v495_v18 = vpop.f32.mrf.mxu0 }
 0x11d   :  { %1111 = vmax.xlane.f32.xlu1 %v1110_v8  ;;  %v941_v6 = vadd.f32 %v2482_v10, %v870_v55  ;;  %v2811_v23 = vsel %vm674_vm13, %v480_v43, %v738_v45  ;;  %v805_v59 = vsel %vm677_vm14, %v491_v34, %v741_v33  ;;  %v611_v8 = vadd.f32 %v2460_v36, %v610_v41 }
 0x11e   :  { %3729 = vst [vmem:[#allocation7_spill] sm:$0xff] %v2802_v46  ;;  %3730 = vst [vmem:[#allocation8_spill] sm:$0xff] %v2804_v11  ;;  %1108 = vmax.xlane.f32.xlu0 %v1107_v25  ;;  %v836_v19 = vsel %vm708_vm15, %v616_v47, %v772_v24  ;;  %vm675_vm0 = vcmp.ge.f32.partialorder %v483_v52, 0.0  ;;  %v504_v55 = vadd.f32 %v1958_v56, %v2460_v36  ;;  %v739_v7 = vmul.f32 0.02, %v483_v52  ;;  %v623_v47 = vpop.f32.mrf.mxu1  ;;  %v1959_v56 = vpop.f32.mrf.mxu0 }
 0x11f   :  { %v940_v1 = vadd.f32 %v2482_v10, %v869_v14  ;;  %vm706_vm1 = vcmp.ge.f32.partialorder %v608_v4, 0.0  ;;  %v1206_v21 = vsel %vm1052_vm6, %v2802_v46, -inf  ;;  %v2820_v43 = vmul.f32 3.0, %v941_v6 }
 0x120   :  { %v770_v12 = vmul.f32 0.02, %v608_v4  ;;  %v773_v34 = vmul.f32 0.02, %v619_v20  ;;  %v1203_v45 = vsel %vm1052_vm6, %v2804_v11, -inf  ;;  %vm709_vm2 = vcmp.ge.f32.partialorder %v619_v20, 0.0  ;;  %v1991_v13 = vpop.f32.mrf.mxu1 }
 0x121   :  { %1207 = vmax.xlane.f32.xlu1 %v1206_v21  ;;  %v2824_v33 = vmul.f32 3.0, %v940_v1  ;;  %v771_v24 = vmul.f32 0.02, %v611_v8  ;;  %v902_v41 = vmul.f32 %v2476_v62, %v2769_v44  ;;  %v901_v25 = vmul.f32 %v2476_v62, %v2760_v53 }
 0x122   :  { %1204 = vmax.xlane.f32.xlu0 %v1203_v45  ;;  %vm707_vm3 = vcmp.ge.f32.partialorder %v611_v8, 0.0  ;;  %vm680_vm4 = vcmp.ge.f32.partialorder %v504_v55, 0.0  ;;  %v744_v6 = vmul.f32 0.02, %v504_v55  ;;  %v496_v14 = vadd.f32 %v2460_v36, %v495_v18 }
 0x123   :  { %3731 = vst [vmem:[#allocation9_spill] sm:$0xff] %v2824_v33  ;;  %v1104_v1 = vsel %vm1052_vm6, %v2820_v43, -inf  ;;  %v973_v21 = vadd.f32 %v2482_v10, %v902_v41  ;;  %v972_v11 = vadd.f32 %v2482_v10, %v901_v25  ;;  %v876_v45 = vmul.f32 %v2476_v62, %v805_v59 }
 0x124   :  { %v803_v46 = vsel %vm675_vm0, %v483_v52, %v739_v7  ;;  %v2838_v44 = vsel %vm706_vm1, %v608_v4, %v770_v12  ;;  %v837_v53 = vsel %vm709_vm2, %v619_v20, %v773_v34  ;;  %v1101_v18 = vsel %vm1052_vm6, %v2824_v33, -inf  ;;  %v498_v52 = vpop.f32.mrf.mxu0 }
 0x125   :  { %1105 = vmax.xlane.f32.xlu1 %v1104_v1  ;;  %v2843_v57 = vsel %vm707_vm3, %v611_v8, %v771_v24  ;;  %v507_v41 = vadd.f32 %v1959_v56, %v2460_v36  ;;  %v2846_v25 = vmul.f32 3.0, %v973_v21  ;;  %v2848_v59 = vmul.f32 3.0, %v972_v11 }
 0x126   :  { %1102 = vmax.xlane.f32.xlu0 %v1101_v18  ;;  %v2851_v4 = vsel %vm680_vm4, %v504_v55, %v744_v6  ;;  %v632_v20 = vadd.f32 %v1990_v0, %v2460_v36  ;;  %v947_v7 = vadd.f32 %v2482_v10, %v876_v45  ;;  %v875_v12 = vmul.f32 %v2476_v62, %v804_v35  ;;  %v1962_v11 = vpop.f32.mrf.mxu0  ;;  %v626_v6 = vpop.f32.mrf.mxu1 }
 0x127   :  { %3732 = vst [vmem:[#allocation10_spill] sm:$0xff] %v2846_v25  ;;  %3733 = vst [vmem:[#allocation11_spill] sm:$0xff] %v2848_v59  ;;  %vm678_vm5 = vcmp.ge.f32.partialorder %v496_v14, 0.0  ;;  %v742_v8 = vmul.f32 0.02, %v496_v14  ;;  %v1200_v34 = vsel %vm1052_vm6, %v2846_v25, -inf  ;;  %v908_v0 = vmul.f32 %v2476_v62, %v837_v53 }
 0x128   :  { %v1197_v24 = vsel %vm1052_vm6, %v2848_v59, -inf  ;;  %v2860_v56 = vmul.f32 3.0, %v947_v7  ;;  %v946_v55 = vadd.f32 %v2482_v10, %v875_v12  ;;  %v907_v1 = vmul.f32 %v2476_v62, %v836_v19 }
 0x129   :  { %1201 = vmax.xlane.f32.xlu1 %v1200_v34  ;;  %vm681_vm7 = vcmp.ge.f32.partialorder %v507_v41, 0.0  ;;  %v745_v35 = vmul.f32 0.02, %v507_v41  ;;  %v499_v21 = vadd.f32 %v2460_v36, %v498_v52  ;;  %v874_v45 = vmul.f32 %v2476_v62, %v803_v46  ;;  %v2877_v52 = vpop.f32.mrf.mxu0 }
 0x12a   :  { %3734 = vst [vmem:[#allocation12_spill] sm:$0xff] %v2860_v56  ;;  %1198 = vmax.xlane.f32.xlu0 %v1197_v24  ;;  %v624_v18 = vadd.f32 %v2460_v36, %v623_v47  ;;  %v2868_v59 = vmul.f32 3.0, %v946_v55  ;;  %v979_v7 = vadd.f32 %v2482_v10, %v908_v0  ;;  %v978_v12 = vadd.f32 %v2482_v10, %v907_v1  ;;  %v1994_v0 = vpop.f32.mrf.mxu1 }
 0x12b   :  { %v635_v34 = vadd.f32 %v1991_v13, %v2460_v36  ;;  %v1122_v19 = vsel %vm1052_vm6, %v2860_v56, -inf  ;;  %v627_v53 = vadd.f32 %v2460_v36, %v626_v6  ;;  %v945_v24 = vadd.f32 %v2482_v10, %v874_v45 }
 0x12c   :  { %3735 = vst [vmem:[#allocation13_spill] sm:$0xff] %v2868_v59  ;;  %v1119_v46 = vsel %vm1052_vm6, %v2868_v59, -inf  ;;  %v2881_v47 = vmul.f32 3.0, %v979_v7  ;;  %v2883_v55 = vmul.f32 3.0, %v978_v12  ;;  %v873_v13 = vmul.f32 %v2476_v62, %v2811_v23  ;;  %v1963_v23 = vpop.f32.mrf.mxu0  ;;  %v2900_v33 = vpop.f32.mrf.mxu1 }
 0x12d   :  { %1123 = vmax.xlane.f32.xlu1 %v1122_v19  ;;  %v2888_v1 = vsel %vm678_vm5, %v496_v14, %v742_v8  ;;  %vm712_vm8 = vcmp.ge.f32.partialorder %v632_v20, 0.0  ;;  %v776_v6 = vmul.f32 0.02, %v632_v20  ;;  %vm679_vm9 = vcmp.ge.f32.partialorder %v499_v21, 0.0 }
 0x12e   :  { %3736 = vst [vmem:[#allocation14_spill] sm:$0xff] %v2881_v47  ;;  %3737 = vst [vmem:[#allocation15_spill] sm:$0xff] %v2883_v55  ;;  %1120 = vmax.xlane.f32.xlu0 %v1119_v46  ;;  %v743_v45 = vmul.f32 0.02, %v499_v21  ;;  %vm710_vm10 = vcmp.ge.f32.partialorder %v624_v18, 0.0  ;;  %v944_v59 = vadd.f32 %v2482_v10, %v873_v13  ;;  %vm713_vm11 = vcmp.ge.f32.partialorder %v635_v34, 0.0 }
 0x12f   :  { %v774_v19 = vmul.f32 0.02, %v624_v18  ;;  %v777_v7 = vmul.f32 0.02, %v635_v34  ;;  %v1218_v12 = vsel %vm1052_vm6, %v2881_v47, -inf  ;;  %v2893_v56 = vmul.f32 3.0, %v945_v24 }
 0x130   :  { %v775_v25 = vmul.f32 0.02, %v627_v53  ;;  %v1215_v14 = vsel %vm1052_vm6, %v2883_v55, -inf  ;;  %v2897_v8 = vmul.f32 3.0, %v944_v59  ;;  %v523_v46 = vadd.f32 %v1963_v23, %v2460_v36  ;;  %v2913_v36 = vld [vmem:[%s3693_s2] ss:$0 sm:$0xff] }
 0x131   :  { %1219 = vmax.xlane.f32.xlu1 %v1218_v12  ;;  %v809_v13 = vsel %vm681_vm7, %v507_v41, %v745_v35  ;;  %vm711_vm12 = vcmp.ge.f32.partialorder %v627_v53, 0.0  ;;  %v906_v24 = vmul.f32 %v2476_v62, %v2843_v57  ;;  %v905_v47 = vmul.f32 %v2476_v62, %v2838_v44 }
 0x132   :  { %1216 = vmax.xlane.f32.xlu0 %v1215_v14  ;;  %v840_v12 = vsel %vm712_vm8, %v632_v20, %v776_v6  ;;  %v807_v55 = vsel %vm679_vm9, %v499_v21, %v743_v45  ;;  %v838_v59 = vsel %vm710_vm10, %v624_v18, %v774_v19  ;;  %v520_v41 = vadd.f32 %v2913_v36, %v1962_v11  ;;  %v514_v45 = vpop.f32.mrf.mxu0  ;;  %v1995_v19 = vpop.f32.mrf.mxu1 }
 0x133   :  { %v841_v35 = vsel %vm713_vm11, %v635_v34, %v777_v7  ;;  %v1116_v57 = vsel %vm1052_vm6, %v2893_v56, -inf  ;;  %v977_v44 = vadd.f32 %v2482_v10, %v906_v24  ;;  %v976_v20 = vadd.f32 %v2482_v10, %v905_v47 }
 0x134   :  { %v839_v6 = vsel %vm711_vm12, %v627_v53, %v775_v25  ;;  %v1113_v21 = vsel %vm1052_vm6, %v2897_v8, -inf  ;;  %v749_v18 = vmul.f32 0.02, %v523_v46  ;;  %v880_v23 = vmul.f32 %v2476_v62, %v809_v13 }
 0x135   :  { %1117 = vmax.xlane.f32.xlu1 %v1116_v57  ;;  %v2924_v11 = vmul.f32 3.0, %v977_v44  ;;  %v2926_v34 = vmul.f32 3.0, %v976_v20  ;;  %v651_v7 = vadd.f32 %v2913_v36, %v1995_v19  ;;  %v879_v47 = vmul.f32 %v2476_v62, %v2851_v4 }
 0x136   :  { %1114 = vmax.xlane.f32.xlu0 %v1113_v21  ;;  %vm684_vm13 = vcmp.ge.f32.partialorder %v520_v41, 0.0  ;;  %v748_v25 = vmul.f32 0.02, %v520_v41  ;;  %vm685_vm14 = vcmp.ge.f32.partialorder %v523_v46, 0.0  ;;  %v951_v53 = vadd.f32 %v2482_v10, %v880_v23  ;;  %v2945_v21 = vld [vmem:[%s3694_s3] ss:$0 sm:$0xff] }
 0x137   :  { %v648_v14 = vadd.f32 %v2913_v36, %v1994_v0  ;;  %v1212_v13 = vsel %vm1052_vm6, %v2924_v11, -inf  ;;  %v515_v24 = vadd.f32 %v2913_v36, %v514_v45  ;;  %v950_v57 = vadd.f32 %v2482_v10, %v879_v47 }
 0x138   :  { %v1209_v44 = vsel %vm1052_vm6, %v2926_v34, -inf  ;;  %v2939_v20 = vmul.f32 3.0, %v951_v53  ;;  %v912_v4 = vmul.f32 %v2476_v62, %v841_v35  ;;  %v911_v0 = vmul.f32 %v2945_v21, %v840_v12  ;;  %v642_v12 = vpop.f32.mrf.mxu1 }
 0x139   :  { %1213 = vmax.xlane.f32.xlu1 %v1212_v13  ;;  %v813_v19 = vsel %vm685_vm14, %v523_v46, %v749_v18  ;;  %vm717_vm15 = vcmp.ge.f32.partialorder %v651_v7, 0.0  ;;  %v2948_v45 = vmul.f32 3.0, %v950_v57  ;;  %v878_v23 = vmul.f32 %v2945_v21, %v807_v55 }
 0x13a   :  { %1210 = vmax.xlane.f32.xlu0 %v1209_v44  ;;  %v781_v47 = vmul.f32 0.02, %v651_v7  ;;  %v983_v53 = vadd.f32 %v2482_v10, %v912_v4  ;;  %v982_v13 = vadd.f32 %v2482_v10, %v911_v0  ;;  %v877_v62 = vmul.f32 %v2945_v21, %v2888_v1  ;;  %v2968_v1 = vld [vmem:[%s3695_s4] ss:$0 sm:$0xff] }
 0x13b   :  { %3738 = vst [vmem:[#allocation16_spill] sm:$0xff] %v2948_v45  ;;  %v1134_v35 = vsel %vm1052_vm6, %v2939_v20, -inf  ;;  %v1131_v46 = vsel %vm1052_vm6, %v2948_v45, -inf  ;;  %v949_v18 = vadd.f32 %v2482_v10, %v878_v23  ;;  %v910_v57 = vmul.f32 %v2945_v21, %v839_v6 }
 0x13c   :  { %v2961_v55 = vmul.f32 3.0, %v983_v53  ;;  %v2963_v44 = vmul.f32 3.0, %v982_v13  ;;  %v948_v4 = vadd.f32 %v2968_v1, %v877_v62  ;;  %v909_v0 = vmul.f32 %v2945_v21, %v838_v59 }
 0x13d   :  { %1135 = vmax.xlane.f32.xlu1 %v1134_v35  ;;  %v812_v45 = vsel %vm684_vm13, %v520_v41, %v748_v25  ;;  %v512_v10 = vadd.f32 %v2913_v36, %v2877_v52  ;;  %vm716_vm0 = vcmp.ge.f32.partialorder %v648_v14, 0.0  ;;  %v780_v6 = vmul.f32 0.02, %v648_v14 }
 0x13e   :  { %1132 = vmax.xlane.f32.xlu0 %v1131_v46  ;;  %vm683_vm1 = vcmp.ge.f32.partialorder %v515_v24, 0.0  ;;  %v747_v23 = vmul.f32 0.02, %v515_v24  ;;  %v845_v53 = vsel %vm717_vm15, %v651_v7, %v781_v47  ;;  %v643_v13 = vadd.f32 %v2913_v36, %v642_v12 }
 0x13f   :  { %v1230_v35 = vsel %vm1052_vm6, %v2961_v55, -inf  ;;  %v2979_v62 = vmul.f32 3.0, %v949_v18  ;;  %v981_v59 = vadd.f32 %v2968_v1, %v910_v57  ;;  %v884_v41 = vmul.f32 %v2945_v21, %v813_v19 }
 0x140   :  { %v1227_v52 = vsel %vm1052_vm6, %v2963_v44, -inf  ;;  %v2985_v25 = vmul.f32 3.0, %v948_v4  ;;  %v980_v46 = vadd.f32 %v2968_v1, %v909_v0  ;;  %v883_v7 = vmul.f32 %v2945_v21, %v812_v45 }
 0x141   :  { %1231 = vmax.xlane.f32.xlu1 %v1230_v35  ;;  %v746_v47 = vmul.f32 0.02, %v512_v10  ;;  %v844_v12 = vsel %vm716_vm0, %v648_v14, %v780_v6  ;;  %v640_v18 = vadd.f32 %v2913_v36, %v2900_v33  ;;  %vm682_vm2 = vcmp.ge.f32.partialorder %v512_v10, 0.0 }
 0x142   :  { %1228 = vmax.xlane.f32.xlu0 %v1227_v52  ;;  %v811_v19 = vsel %vm683_vm1, %v515_v24, %v747_v23  ;;  %vm715_vm3 = vcmp.ge.f32.partialorder %v643_v13, 0.0  ;;  %v779_v57 = vmul.f32 0.02, %v643_v13  ;;  %v1128_v4 = vsel %vm1052_vm6, %v2979_v62, -inf }
 0x143   :  { %v2995_v35 = vmul.f32 3.0, %v981_v59  ;;  %v955_v0 = vadd.f32 %v2968_v1, %v884_v41  ;;  %v916_v45 = vmul.f32 %v2945_v21, %v845_v53  ;;  %v1125_v14 = vsel %vm1052_vm6, %v2985_v25, -inf }
 0x144   :  { %v3001_v33 = vmul.f32 3.0, %v980_v46  ;;  %v954_v36 = vadd.f32 %v2968_v1, %v883_v7  ;;  %v915_v24 = vmul.f32 %v2945_v21, %v844_v12  ;;  %v810_v6 = vsel %vm682_vm2, %v512_v10, %v746_v47 }
 0x145   :  { %1129 = vmax.xlane.f32.xlu1 %v1128_v4  ;;  %v778_v23 = vmul.f32 0.02, %v640_v18  ;;  %vm714_vm4 = vcmp.ge.f32.partialorder %v640_v18, 0.0  ;;  %v843_v59 = vsel %vm715_vm3, %v643_v13, %v779_v57  ;;  %v1224_v41 = vsel %vm1052_vm6, %v2995_v35, -inf }
 0x146   :  { %1126 = vmax.xlane.f32.xlu0 %v1125_v14  ;;  %v3007_v52 = vmul.f32 3.0, %v955_v0  ;;  %v987_v53 = vadd.f32 %v2968_v1, %v916_v45  ;;  %v882_v4 = vmul.f32 %v2945_v21, %v811_v19  ;;  %v1221_v46 = vsel %vm1052_vm6, %v3001_v33, -inf }
 0x147   :  { %v3013_v7 = vmul.f32 3.0, %v954_v36  ;;  %v986_v10 = vadd.f32 %v2968_v1, %v915_v24  ;;  %v881_v47 = vmul.f32 %v2945_v21, %v810_v6  ;;  %v842_v13 = vsel %vm714_vm4, %v640_v18, %v778_v23 }
 0x148   :  { %v1146_v12 = vsel %vm1052_vm6, %v3007_v52, -inf  ;;  %v3019_v57 = vmul.f32 3.0, %v987_v53  ;;  %v953_v0 = vadd.f32 %v2968_v1, %v882_v4  ;;  %v914_v19 = vmul.f32 %v2945_v21, %v843_v59 }
 0x149   :  { %1225 = vmax.xlane.f32.xlu1 %v1224_v41  ;;  %v1143_v45 = vsel %vm1052_vm6, %v3013_v7, -inf  ;;  %v3025_v14 = vmul.f32 3.0, %v986_v10  ;;  %v952_v36 = vadd.f32 %v2968_v1, %v881_v47  ;;  %v913_v18 = vmul.f32 %v2945_v21, %v842_v13 }
 0x14a   :  { %1222 = vmax.xlane.f32.xlu0 %v1221_v46  ;;  %v1242_v24 = vsel %vm1052_vm6, %v3019_v57, -inf  ;;  %v3031_v6 = vmul.f32 3.0, %v953_v0  ;;  %v985_v23 = vadd.f32 %v2968_v1, %v914_v19 }
 0x14b   :  { %v1239_v59 = vsel %vm1052_vm6, %v3025_v14, -inf  ;;  %v3036_v41 = vmul.f32 3.0, %v952_v36  ;;  %v984_v53 = vadd.f32 %v2968_v1, %v913_v18 }
 0x14c   :  { %v1140_v21 = vsel %vm1052_vm6, %v3031_v6, -inf  ;;  %v3041_v4 = vmul.f32 3.0, %v985_v23 }
 0x14d   :  { %1147 = vmax.xlane.f32.xlu1 %v1146_v12  ;;  %v1137_v46 = vsel %vm1052_vm6, %v3036_v41, -inf  ;;  %v3045_v10 = vmul.f32 3.0, %v984_v53 }
 0x14e   :  { %1144 = vmax.xlane.f32.xlu0 %v1143_v45  ;;  %v1236_v47 = vsel %vm1052_vm6, %v3041_v4, -inf }
 0x14f   :  { %v1233_v1 = vsel %vm1052_vm6, %v3045_v10, -inf }
 0x151   :  { %1243 = vmax.xlane.f32.xlu1 %v1242_v24 }
 0x152   :  { %1240 = vmax.xlane.f32.xlu0 %v1239_v59 }
 0x155   :  { %1141 = vmax.xlane.f32.xlu1 %v1140_v21 }
 0x156   :  { %1138 = vmax.xlane.f32.xlu0 %v1137_v46 }
 0x159   :  { %1237 = vmax.xlane.f32.xlu1 %v1236_v47 }
 0x15a   :  { %1234 = vmax.xlane.f32.xlu0 %v1233_v1 }
 0x165   :  { %v1157_v13 = vpop.xlane.xlu0 %1156 }
 0x166   :  { %v1061_v12 = vpop.xlane.xlu1 %1060  ;;  %v1279_v0 = vsub.f32 %v2497_v27, %v1157_v13 }
 0x167   :  { %v1247_v19 = vsub.f32 %v2499_v28, %v1061_v12 }
 0x168   :  { %v1377_v36 = vmul.f32 1.442695, %v1279_v0 }
 0x169   :  { %v1313_v45 = vmul.f32 1.442695, %v1247_v19 }
 0x16a   :  { %v1064_v18 = vpop.xlane.xlu1 %1063  ;;  %v1055_v24 = vpop.xlane.xlu0 %1054 }
 0x16b   :  { %v1248_v23 = vsub.f32 %v2509_v39, %v1064_v18  ;;  %v1245_v59 = vsub.f32 %v2511_v40, %v1055_v24  ;;  %2034 = vpow2.f32 %v1313_v45 }
 0x16c   :  { %2036 = vpow2.f32 %v1377_v36 }
 0x16d   :  { %v1315_v53 = vmul.f32 1.442695, %v1248_v23  ;;  %v1309_v21 = vmul.f32 1.442695, %v1245_v59 }
 0x16e   :  { %v1160_v46 = vpop.xlane.xlu1 %1159  ;;  %v1151_v47 = vpop.xlane.xlu0 %1150 }
 0x16f   :  { %2038 = vpow2.f32 %v1315_v53  ;;  %v1280_v1 = vsub.f32 %v2520_v50, %v1160_v46  ;;  %v1277_v27 = vsub.f32 %v2528_v58, %v1151_v47 }
 0x170   :  { %2040 = vpow2.f32 %v1309_v21 }
 0x171   :  { %v1379_v28 = vmul.f32 1.442695, %v1280_v1  ;;  %v1373_v13 = vmul.f32 1.442695, %v1277_v27 }
 0x172   :  { %v1154_v12 = vpop.xlane.xlu1 %1153  ;;  %v1058_v0 = vpop.xlane.xlu0 %1057 }
 0x173   :  { %2042 = vpow2.f32 %v1379_v28  ;;  %v1278_v39 = vsub.f32 %v2547_v15, %v1154_v12  ;;  %v1246_v40 = vsub.f32 %v2549_v16, %v1058_v0 }
 0x174   :  { %2044 = vpow2.f32 %v1373_v13 }
 0x175   :  { %v1375_v19 = vmul.f32 1.442695, %v1278_v39  ;;  %v1311_v45 = vmul.f32 1.442695, %v1246_v40 }
 0x176   :  { %v1076_v36 = vpop.xlane.xlu1 %1075  ;;  %v1073_v24 = vpop.xlane.xlu0 %1072 }
 0x177   :  { %v1252_v18 = vsub.f32 %v2562_v29, %v1076_v36  ;;  %2046 = vpow2.f32 %v1311_v45  ;;  %v1251_v50 = vsub.f32 %v2571_v38, %v1073_v24 }
 0x178   :  { %v3061_v58 = vpop.eup %2034  ;;  %2048 = vpow2.f32 %v1375_v19 }
 0x179   :  { %v1323_v23 = vmul.f32 1.442695, %v1252_v18  ;;  %v1321_v59 = vmul.f32 1.442695, %v1251_v50  ;;  %v1443_v15 = vsel %vm1052_vm6, %v3061_v58, 0.0  ;;  %v3065_v16 = vpop.eup %2036 }
 0x17a   :  { %v1172_v53 = vpop.xlane.xlu1 %1171  ;;  %1444 = vadd.xlane.f32.xlu0 %v1443_v15  ;;  %v1169_v46 = vpop.xlane.xlu0 %1168  ;;  %v1539_v13 = vsel %vm1052_vm6, %v3065_v16, 0.0 }
 0x17b   :  { %v1284_v21 = vsub.f32 %v2582_v48, %v1172_v53  ;;  %2050 = vpow2.f32 %v1321_v59  ;;  %v1283_v38 = vsub.f32 %v2584_v49, %v1169_v46 }
 0x17c   :  { %v3068_v29 = vpop.eup %2038  ;;  %2052 = vpow2.f32 %v1323_v23 }
 0x17d   :  { %v1387_v47 = vmul.f32 1.442695, %v1284_v21  ;;  %v1446_v1 = vsel %vm1052_vm6, %v3068_v29, 0.0  ;;  %v1385_v27 = vmul.f32 1.442695, %v1283_v38  ;;  %v3075_v12 = vpop.eup %2040 }
 0x17e   :  { %1447 = vadd.xlane.f32.xlu1 %v1446_v1  ;;  %v1070_v28 = vpop.xlane.xlu1 %1069  ;;  %1540 = vadd.xlane.f32.xlu0 %v1539_v13  ;;  %v1067_v0 = vpop.xlane.xlu0 %1066 }
 0x17f   :  { %v1250_v48 = vsub.f32 %v2595_v63, %v1070_v28  ;;  %2054 = vpow2.f32 %v1385_v27  ;;  %v1249_v49 = vsub.f32 %v2599_v3, %v1067_v0  ;;  %v1437_v63 = vsel %vm1052_vm6, %v3075_v12, 0.0 }
 0x180   :  { %v3078_v39 = vpop.eup %2042  ;;  %2056 = vpow2.f32 %v1387_v47 }
 0x181   :  { %v1542_v40 = vsel %vm1052_vm6, %v3078_v39, 0.0  ;;  %v3083_v19 = vpop.eup %2044  ;;  %v1319_v45 = vmul.f32 1.442695, %v1250_v48  ;;  %v1317_v36 = vmul.f32 1.442695, %v1249_v49 }
 0x182   :  { %1543 = vadd.xlane.f32.xlu1 %v1542_v40  ;;  %v1166_v18 = vpop.xlane.xlu1 %1165  ;;  %1438 = vadd.xlane.f32.xlu0 %v1437_v63  ;;  %v1163_v50 = vpop.xlane.xlu0 %1162  ;;  %v1533_v59 = vsel %vm1052_vm6, %v3083_v19, 0.0 }
 0x183   :  { %v1282_v24 = vsub.f32 %v2623_v30, %v1166_v18  ;;  %2058 = vpow2.f32 %v1317_v36  ;;  %v1281_v3 = vsub.f32 %v2625_v31, %v1163_v50 }
 0x184   :  { %v3089_v23 = vpop.eup %2046  ;;  %2060 = vpow2.f32 %v1319_v45 }
 0x185   :  { %v3093_v53 = vpop.eup %2048  ;;  %v1383_v15 = vmul.f32 1.442695, %v1282_v24  ;;  %v1381_v21 = vmul.f32 1.442695, %v1281_v3  ;;  %v1440_v38 = vsel %vm1052_vm6, %v3089_v23, 0.0 }
 0x186   :  { %v1088_v46 = vpop.xlane.xlu1 %1087  ;;  %1534 = vadd.xlane.f32.xlu0 %v1533_v59  ;;  %1441 = vadd.xlane.f32.xlu1 %v1440_v38  ;;  %v1085_v47 = vpop.xlane.xlu0 %1084  ;;  %v1536_v27 = vsel %vm1052_vm6, %v3093_v53, 0.0 }
 0x187   :  { %v1256_v30 = vsub.f32 %v2636_v17, %v1088_v46  ;;  %2062 = vpow2.f32 %v1381_v21  ;;  %v1255_v31 = vsub.f32 %v2642_v54, %v1085_v47 }
 0x188   :  { %v3099_v1 = vpop.eup %2050  ;;  %2064 = vpow2.f32 %v1383_v15 }
 0x189   :  { %v3103_v28 = vpop.eup %2052  ;;  %v1331_v13 = vmul.f32 1.442695, %v1256_v30  ;;  %v1329_v48 = vmul.f32 1.442695, %v1255_v31  ;;  %v1455_v17 = vsel %vm1052_vm6, %v3099_v1, 0.0 }
 0x18a   :  { %v1184_v0 = vpop.xlane.xlu1 %1183  ;;  %1537 = vadd.xlane.f32.xlu1 %v1536_v27  ;;  %1456 = vadd.xlane.f32.xlu0 %v1455_v17  ;;  %v1181_v40 = vpop.xlane.xlu0 %1180  ;;  %v1458_v36 = vsel %vm1052_vm6, %v3103_v28, 0.0 }
 0x18b   :  { %v1288_v49 = vsub.f32 %v2653_v2, %v1184_v0  ;;  %2066 = vpow2.f32 %v1329_v48  ;;  %v1287_v54 = vsub.f32 %v2655_v5, %v1181_v40 }
 0x18c   :  { %v3109_v45 = vpop.eup %2054  ;;  %2068 = vpow2.f32 %v1331_v13 }
 0x18d   :  { %v3113_v18 = vpop.eup %2056  ;;  %v1395_v63 = vmul.f32 1.442695, %v1288_v49  ;;  %v1393_v24 = vmul.f32 1.442695, %v1287_v54  ;;  %v1551_v2 = vsel %vm1052_vm6, %v3109_v45, 0.0 }
 0x18e   :  { %v1082_v50 = vpop.xlane.xlu1 %1081  ;;  %1459 = vadd.xlane.f32.xlu1 %v1458_v36  ;;  %1552 = vadd.xlane.f32.xlu0 %v1551_v2  ;;  %v1079_v59 = vpop.xlane.xlu0 %1078  ;;  %v1554_v21 = vsel %vm1052_vm6, %v3113_v18, 0.0 }
 0x18f   :  { %v1254_v3 = vsub.f32 %v2667_v26, %v1082_v50  ;;  %2070 = vpow2.f32 %v1393_v24  ;;  %v1253_v5 = vsub.f32 %v2677_v22, %v1079_v59 }
 0x190   :  { %v3119_v15 = vpop.eup %2058  ;;  %2072 = vpow2.f32 %v1395_v63 }
 0x191   :  { %v1327_v46 = vmul.f32 1.442695, %v1254_v3  ;;  %v1325_v38 = vmul.f32 1.442695, %v1253_v5  ;;  %v1449_v47 = vsel %vm1052_vm6, %v3119_v15, 0.0  ;;  %v3125_v31 = vpop.eup %2060 }
 0x192   :  { %v1178_v30 = vpop.xlane.xlu1 %1177  ;;  %1555 = vadd.xlane.f32.xlu1 %v1554_v21  ;;  %1450 = vadd.xlane.f32.xlu0 %v1449_v47  ;;  %v1175_v27 = vpop.xlane.xlu0 %1174  ;;  %v1452_v49 = vsel %vm1052_vm6, %v3125_v31, 0.0 }
 0x193   :  { %v1286_v26 = vsub.f32 %v2702_v60, %v1178_v30  ;;  %2074 = vpow2.f32 %v1325_v38  ;;  %v1285_v22 = vsub.f32 %v2704_v61, %v1175_v27 }
 0x194   :  { %v3129_v13 = vpop.eup %2062  ;;  %2076 = vpow2.f32 %v1327_v46 }
 0x195   :  { %v1391_v48 = vmul.f32 1.442695, %v1286_v26  ;;  %v1389_v0 = vmul.f32 1.442695, %v1285_v22  ;;  %v1545_v40 = vsel %vm1052_vm6, %v3129_v13, 0.0  ;;  %v3135_v54 = vpop.eup %2064 }
 0x196   :  { %v1100_v17 = vpop.xlane.xlu1 %1099  ;;  %1453 = vadd.xlane.f32.xlu1 %v1452_v49  ;;  %1546 = vadd.xlane.f32.xlu0 %v1545_v40  ;;  %v1548_v3 = vsel %vm1052_vm6, %v3135_v54, 0.0 }
 0x197   :  { %v1260_v60 = vsub.f32 %v2712_v9, %v1100_v17  ;;  %v1097_v36 = vpop.xlane.xlu0 %1096  ;;  %2078 = vpow2.f32 %v1389_v0 }
 0x198   :  { %v1259_v61 = vsub.f32 %v2720_v42, %v1097_v36  ;;  %v3139_v63 = vpop.eup %2066  ;;  %2080 = vpow2.f32 %v1391_v48 }
 0x199   :  { %v1339_v24 = vmul.f32 1.442695, %v1260_v60  ;;  %v1467_v59 = vsel %vm1052_vm6, %v3139_v63, 0.0  ;;  %v3145_v5 = vpop.eup %2068 }
 0x19a   :  { %v1337_v50 = vmul.f32 1.442695, %v1259_v61  ;;  %v1196_v2 = vpop.xlane.xlu1 %1195  ;;  %1549 = vadd.xlane.f32.xlu1 %v1548_v3  ;;  %1468 = vadd.xlane.f32.xlu0 %v1467_v59  ;;  %v1470_v26 = vsel %vm1052_vm6, %v3145_v5, 0.0  ;;  %v3741_v3 = vld [vmem:[#allocation4_spill] sm:$0xff] }
 0x19b   :  { %v1292_v9 = vsub.f32 %v2731_v37, %v1196_v2  ;;  %v1193_v21 = vpop.xlane.xlu0 %1192 }
 0x19c   :  { %2082 = vpow2.f32 %v1337_v50  ;;  %v1291_v42 = vsub.f32 %v2733_v51, %v1193_v21  ;;  %v3149_v46 = vpop.eup %2070  ;;  %v3739_v51 = vld [vmem:[#allocation2_spill] sm:$0xff] }
 0x19d   :  { %2084 = vpow2.f32 %v1339_v24  ;;  %v1403_v38 = vmul.f32 1.442695, %v1292_v9  ;;  %v1563_v27 = vsel %vm1052_vm6, %v3149_v46, 0.0  ;;  %v3155_v22 = vpop.eup %2072 }
 0x19e   :  { %v1401_v30 = vmul.f32 1.442695, %v1291_v42  ;;  %v1094_v47 = vpop.xlane.xlu1 %1093  ;;  %1471 = vadd.xlane.f32.xlu1 %v1470_v26  ;;  %1564 = vadd.xlane.f32.xlu0 %v1563_v27  ;;  %v1566_v36 = vsel %vm1052_vm6, %v3155_v22, 0.0  ;;  %v3742_v27 = vld [vmem:[#allocation5_spill] sm:$0xff] }
 0x19f   :  { %v1258_v37 = vsub.f32 %v2751_v32, %v1094_v47  ;;  %v1091_v48 = vpop.xlane.xlu0 %1090  ;;  %v3740_v32 = vld [vmem:[#allocation3_spill] sm:$0xff] }
 0x1a0   :  { %2086 = vpow2.f32 %v1401_v30  ;;  %v1257_v0 = vsub.f32 %v3739_v51, %v1091_v48  ;;  %v3159_v17 = vpop.eup %2074  ;;  %v3743_v51 = vld [vmem:[#allocation6_spill] sm:$0xff] }
 0x1a1   :  { %2088 = vpow2.f32 %v1403_v38  ;;  %v1335_v49 = vmul.f32 1.442695, %v1258_v37  ;;  %v1461_v61 = vsel %vm1052_vm6, %v3159_v17, 0.0  ;;  %v3165_v24 = vpop.eup %2076 }
 0x1a2   :  { %v1333_v40 = vmul.f32 1.442695, %v1257_v0  ;;  %v1190_v60 = vpop.xlane.xlu1 %1189  ;;  %1567 = vadd.xlane.f32.xlu1 %v1566_v36  ;;  %1462 = vadd.xlane.f32.xlu0 %v1461_v61  ;;  %v1464_v47 = vsel %vm1052_vm6, %v3165_v24, 0.0 }
 0x1a3   :  { %v1290_v50 = vsub.f32 %v3740_v32, %v1190_v60  ;;  %v1187_v2 = vpop.xlane.xlu0 %1186 }
 0x1a4   :  { %2090 = vpow2.f32 %v1333_v40  ;;  %v1289_v59 = vsub.f32 %v3741_v3, %v1187_v2  ;;  %v3169_v9 = vpop.eup %2078  ;;  %v3744_v2 = vld [vmem:[#allocation7_spill] sm:$0xff] }
 0x1a5   :  { %2092 = vpow2.f32 %v1335_v49  ;;  %v3171_v21 = vpop.eup %2080  ;;  %v1399_v42 = vmul.f32 1.442695, %v1290_v50  ;;  %v1557_v26 = vsel %vm1052_vm6, %v3169_v9, 0.0 }
 0x1a6   :  { %v1397_v38 = vmul.f32 1.442695, %v1289_v59  ;;  %v1112_v30 = vpop.xlane.xlu1 %1111  ;;  %1465 = vadd.xlane.f32.xlu1 %v1464_v47  ;;  %1558 = vadd.xlane.f32.xlu0 %v1557_v26  ;;  %v1560_v40 = vsel %vm1052_vm6, %v3171_v21, 0.0 }
 0x1a7   :  { %v1264_v37 = vsub.f32 %v3742_v27, %v1112_v30  ;;  %v1109_v48 = vpop.xlane.xlu0 %1108 }
 0x1a8   :  { %2094 = vpow2.f32 %v1397_v38  ;;  %v1263_v0 = vsub.f32 %v3743_v51, %v1109_v48  ;;  %v3745_v38 = vld [vmem:[#allocation8_spill] sm:$0xff] }
 0x1a9   :  { %v3179_v49 = vpop.eup %2082  ;;  %2096 = vpow2.f32 %v1399_v42  ;;  %v1347_v36 = vmul.f32 1.442695, %v1264_v37 }
 0x1aa   :  { %v3183_v60 = vpop.eup %2084  ;;  %v1345_v61 = vmul.f32 1.442695, %v1263_v0  ;;  %v1208_v32 = vpop.xlane.xlu1 %1207  ;;  %v1479_v50 = vsel %vm1052_vm6, %v3179_v49, 0.0  ;;  %1561 = vadd.xlane.f32.xlu1 %v1560_v40 }
 0x1ab   :  { %v1296_v3 = vsub.f32 %v3744_v2, %v1208_v32  ;;  %1480 = vadd.xlane.f32.xlu0 %v1479_v50  ;;  %v1205_v59 = vpop.xlane.xlu0 %1204  ;;  %v1482_v26 = vsel %vm1052_vm6, %v3183_v60, 0.0 }
 0x1ac   :  { %2098 = vpow2.f32 %v1345_v61  ;;  %v1295_v30 = vsub.f32 %v3745_v38, %v1205_v59  ;;  %v3747_v61 = vld [vmem:[#allocation9_spill] sm:$0xff] }
 0x1ad   :  { %v3189_v47 = vpop.eup %2086  ;;  %2100 = vpow2.f32 %v1347_v36  ;;  %v1411_v27 = vmul.f32 1.442695, %v1296_v3 }
 0x1ae   :  { %v3193_v42 = vpop.eup %2088  ;;  %v1409_v37 = vmul.f32 1.442695, %v1295_v30  ;;  %v1106_v48 = vpop.xlane.xlu1 %1105  ;;  %v1575_v51 = vsel %vm1052_vm6, %v3189_v47, 0.0  ;;  %1483 = vadd.xlane.f32.xlu1 %v1482_v26  ;;  %v3750_v30 = vld [vmem:[#allocation10_spill] sm:$0xff] }
 0x1af   :  { %3746 = vst [vmem:[#allocation2_spill] sm:$0xff] %v3193_v42  ;;  %v1262_v0 = vsub.f32 %v2820_v43, %v1106_v48  ;;  %1576 = vadd.xlane.f32.xlu0 %v1575_v51  ;;  %v1103_v40 = vpop.xlane.xlu0 %1102  ;;  %v1578_v2 = vsel %vm1052_vm6, %v3193_v42, 0.0  ;;  %v3751_v48 = vld [vmem:[#allocation11_spill] sm:$0xff] }
 0x1b0   :  { %2102 = vpow2.f32 %v1409_v37  ;;  %v1261_v32 = vsub.f32 %v3747_v61, %v1103_v40 }
 0x1b1   :  { %v3199_v50 = vpop.eup %2090  ;;  %2104 = vpow2.f32 %v1411_v27  ;;  %v1343_v3 = vmul.f32 1.442695, %v1262_v0 }
 0x1b2   :  { %3748 = vst [vmem:[#allocation3_spill] sm:$0xff] %v3199_v50  ;;  %v3203_v36 = vpop.eup %2092  ;;  %v1341_v59 = vmul.f32 1.442695, %v1261_v32  ;;  %v1202_v38 = vpop.xlane.xlu1 %1201  ;;  %v1473_v43 = vsel %vm1052_vm6, %v3199_v50, 0.0  ;;  %1579 = vadd.xlane.f32.xlu1 %v1578_v2  ;;  %v3754_v2 = vld [vmem:[#allocation12_spill] sm:$0xff] }
 0x1b3   :  { %3749 = vst [vmem:[#allocation4_spill] sm:$0xff] %v3203_v36  ;;  %v1294_v26 = vsub.f32 %v3750_v30, %v1202_v38  ;;  %1474 = vadd.xlane.f32.xlu0 %v1473_v43  ;;  %v1199_v37 = vpop.xlane.xlu0 %1198  ;;  %v1476_v61 = vsel %vm1052_vm6, %v3203_v36, 0.0  ;;  %v3755_v43 = vld [vmem:[#allocation13_spill] sm:$0xff] }
 0x1b4   :  { %2106 = vpow2.f32 %v1341_v59  ;;  %v1293_v51 = vsub.f32 %v3751_v48, %v1199_v37 }
 0x1b5   :  { %v3209_v40 = vpop.eup %2094  ;;  %2108 = vpow2.f32 %v1343_v3  ;;  %v1407_v27 = vmul.f32 1.442695, %v1294_v26 }
 0x1b6   :  { %3752 = vst [vmem:[#allocation5_spill] sm:$0xff] %v3209_v40  ;;  %v1405_v0 = vmul.f32 1.442695, %v1293_v51  ;;  %v1124_v32 = vpop.xlane.xlu1 %1123  ;;  %v1569_v50 = vsel %vm1052_vm6, %v3209_v40, 0.0  ;;  %v3215_v42 = vpop.eup %2096  ;;  %1477 = vadd.xlane.f32.xlu1 %v1476_v61  ;;  %v3757_v61 = vld [vmem:[#allocation14_spill] sm:$0xff] }
 0x1b7   :  { %3753 = vst [vmem:[#allocation6_spill] sm:$0xff] %v3215_v42  ;;  %v1268_v38 = vsub.f32 %v3754_v2, %v1124_v32  ;;  %1570 = vadd.xlane.f32.xlu0 %v1569_v50  ;;  %v1121_v59 = vpop.xlane.xlu0 %1120  ;;  %v1572_v51 = vsel %vm1052_vm6, %v3215_v42, 0.0  ;;  %v3758_v32 = vld [vmem:[#allocation15_spill] sm:$0xff] }
 0x1b8   :  { %2110 = vpow2.f32 %v1405_v0  ;;  %v1267_v30 = vsub.f32 %v3755_v43, %v1121_v59 }
 0x1b9   :  { %v3219_v37 = vpop.eup %2098  ;;  %v1355_v48 = vmul.f32 1.442695, %v1268_v38  ;;  %2112 = vpow2.f32 %v1407_v27 }
 0x1ba   :  { %3756 = vst [vmem:[#allocation7_spill] sm:$0xff] %v3219_v37  ;;  %v1353_v3 = vmul.f32 1.442695, %v1267_v30  ;;  %v1220_v26 = vpop.xlane.xlu1 %1219  ;;  %v1491_v40 = vsel %vm1052_vm6, %v3219_v37, 0.0  ;;  %v3225_v36 = vpop.eup %2100  ;;  %1573 = vadd.xlane.f32.xlu1 %v1572_v51 }
 0x1bb   :  { %v1300_v50 = vsub.f32 %v3757_v61, %v1220_v26  ;;  %1492 = vadd.xlane.f32.xlu0 %v1491_v40  ;;  %v1217_v0 = vpop.xlane.xlu0 %1216  ;;  %v1494_v30 = vsel %vm1052_vm6, %v3225_v36, 0.0 }
 0x1bc   :  { %2114 = vpow2.f32 %v1353_v3  ;;  %v1299_v2 = vsub.f32 %v3758_v32, %v1217_v0 }
 0x1bd   :  { %v3229_v38 = vpop.eup %2102  ;;  %2116 = vpow2.f32 %v1355_v48  ;;  %v1419_v27 = vmul.f32 1.442695, %v1300_v50 }
 0x1be   :  { %v1417_v59 = vmul.f32 1.442695, %v1299_v2  ;;  %v1118_v43 = vpop.xlane.xlu1 %1117  ;;  %v1587_v37 = vsel %vm1052_vm6, %v3229_v38, 0.0  ;;  %v3235_v42 = vpop.eup %2104  ;;  %1495 = vadd.xlane.f32.xlu1 %v1494_v30 }
 0x1bf   :  { %v1266_v40 = vsub.f32 %v2893_v56, %v1118_v43  ;;  %1588 = vadd.xlane.f32.xlu0 %v1587_v37  ;;  %v1115_v3 = vpop.xlane.xlu0 %1114  ;;  %v1590_v0 = vsel %vm1052_vm6, %v3235_v42, 0.0 }
 0x1c0   :  { %2118 = vpow2.f32 %v1417_v59  ;;  %v1265_v26 = vsub.f32 %v2897_v8, %v1115_v3 }
 0x1c1   :  { %v3239_v48 = vpop.eup %2106  ;;  %2120 = vpow2.f32 %v1419_v27  ;;  %v1351_v51 = vmul.f32 1.442695, %v1266_v40 }
 0x1c2   :  { %v1349_v61 = vmul.f32 1.442695, %v1265_v26  ;;  %v1214_v50 = vpop.xlane.xlu1 %1213  ;;  %v1485_v32 = vsel %vm1052_vm6, %v3239_v48, 0.0  ;;  %v3245_v2 = vpop.eup %2108  ;;  %1591 = vadd.xlane.f32.xlu1 %v1590_v0 }
 0x1c3   :  { %v1298_v56 = vsub.f32 %v2924_v11, %v1214_v50  ;;  %1486 = vadd.xlane.f32.xlu0 %v1485_v32  ;;  %v1211_v37 = vpop.xlane.xlu0 %1210  ;;  %v1488_v40 = vsel %vm1052_vm6, %v3245_v2, 0.0 }
 0x1c4   :  { %2122 = vpow2.f32 %v1349_v61  ;;  %v1297_v8 = vsub.f32 %v2926_v34, %v1211_v37  ;;  %v3759_v34 = vld [vmem:[#allocation16_spill] sm:$0xff] }
 0x1c5   :  { %v3249_v27 = vpop.eup %2110  ;;  %2124 = vpow2.f32 %v1351_v51  ;;  %v1415_v59 = vmul.f32 1.442695, %v1298_v56 }
 0x1c6   :  { %v1413_v43 = vmul.f32 1.442695, %v1297_v8  ;;  %v1136_v30 = vpop.xlane.xlu1 %1135  ;;  %v1581_v3 = vsel %vm1052_vm6, %v3249_v27, 0.0  ;;  %v3255_v26 = vpop.eup %2112  ;;  %1489 = vadd.xlane.f32.xlu1 %v1488_v40 }
 0x1c7   :  { %v1272_v11 = vsub.f32 %v2939_v20, %v1136_v30  ;;  %1582 = vadd.xlane.f32.xlu0 %v1581_v3  ;;  %v1133_v61 = vpop.xlane.xlu0 %1132  ;;  %v1584_v8 = vsel %vm1052_vm6, %v3255_v26, 0.0 }
 0x1c8   :  { %2126 = vpow2.f32 %v1413_v43  ;;  %v1271_v50 = vsub.f32 %v3759_v34, %v1133_v61 }
 0x1c9   :  { %v3259_v51 = vpop.eup %2114  ;;  %2128 = vpow2.f32 %v1415_v59  ;;  %v1363_v32 = vmul.f32 1.442695, %v1272_v11 }
 0x1ca   :  { %v3261_v0 = vpop.eup %2116  ;;  %v1361_v56 = vmul.f32 1.442695, %v1271_v50  ;;  %v1232_v37 = vpop.xlane.xlu1 %1231  ;;  %v1503_v20 = vsel %vm1052_vm6, %v3259_v51, 0.0  ;;  %1585 = vadd.xlane.f32.xlu1 %v1584_v8 }
 0x1cb   :  { %v1304_v30 = vsub.f32 %v2961_v55, %v1232_v37  ;;  %1504 = vadd.xlane.f32.xlu0 %v1503_v20  ;;  %v1229_v43 = vpop.xlane.xlu0 %1228  ;;  %v1506_v3 = vsel %vm1052_vm6, %v3261_v0, 0.0 }
 0x1cc   :  { %2130 = vpow2.f32 %v1361_v56  ;;  %v1303_v40 = vsub.f32 %v2963_v44, %v1229_v43 }
 0x1cd   :  { %v3269_v59 = vpop.eup %2118  ;;  %2132 = vpow2.f32 %v1363_v32  ;;  %v1427_v61 = vmul.f32 1.442695, %v1304_v30 }
 0x1ce   :  { %v3273_v11 = vpop.eup %2120  ;;  %v1425_v34 = vmul.f32 1.442695, %v1303_v40  ;;  %v1130_v50 = vpop.xlane.xlu1 %1129  ;;  %v1599_v55 = vsel %vm1052_vm6, %v3269_v59, 0.0  ;;  %1507 = vadd.xlane.f32.xlu1 %v1506_v3 }
 0x1cf   :  { %v1270_v37 = vsub.f32 %v2979_v62, %v1130_v50  ;;  %1600 = vadd.xlane.f32.xlu0 %v1599_v55  ;;  %v1127_v56 = vpop.xlane.xlu0 %1126  ;;  %v1602_v20 = vsel %vm1052_vm6, %v3273_v11, 0.0 }
 0x1d0   :  { %2134 = vpow2.f32 %v1425_v34  ;;  %v1269_v44 = vsub.f32 %v2985_v25, %v1127_v56 }
 0x1d1   :  { %v3279_v8 = vpop.eup %2122  ;;  %2136 = vpow2.f32 %v1427_v61  ;;  %v1359_v30 = vmul.f32 1.442695, %v1270_v37 }
 0x1d2   :  { %v3283_v32 = vpop.eup %2124  ;;  %v1357_v43 = vmul.f32 1.442695, %v1269_v44  ;;  %v1226_v40 = vpop.xlane.xlu1 %1225  ;;  %v1497_v62 = vsel %vm1052_vm6, %v3279_v8, 0.0  ;;  %1603 = vadd.xlane.f32.xlu1 %v1602_v20 }
 0x1d3   :  { %v1302_v3 = vsub.f32 %v2995_v35, %v1226_v40  ;;  %1498 = vadd.xlane.f32.xlu0 %v1497_v62  ;;  %v1223_v34 = vpop.xlane.xlu0 %1222  ;;  %v1500_v55 = vsel %vm1052_vm6, %v3283_v32, 0.0 }
 0x1d4   :  { %2138 = vpow2.f32 %v1357_v43  ;;  %v1301_v25 = vsub.f32 %v3001_v33, %v1223_v34 }
 0x1d5   :  { %v3289_v50 = vpop.eup %2126  ;;  %2140 = vpow2.f32 %v1359_v30  ;;  %v1423_v37 = vmul.f32 1.442695, %v1302_v3 }
 0x1d6   :  { %3760 = vst [vmem:[#allocation8_spill] sm:$0xff] %v3289_v50  ;;  %v3293_v61 = vpop.eup %2128  ;;  %v1421_v56 = vmul.f32 1.442695, %v1301_v25  ;;  %v1148_v44 = vpop.xlane.xlu1 %1147  ;;  %v1593_v35 = vsel %vm1052_vm6, %v3289_v50, 0.0  ;;  %1501 = vadd.xlane.f32.xlu1 %v1500_v55 }
 0x1d7   :  { %v1276_v20 = vsub.f32 %v3007_v52, %v1148_v44  ;;  %1594 = vadd.xlane.f32.xlu0 %v1593_v35  ;;  %v1145_v43 = vpop.xlane.xlu0 %1144  ;;  %v1596_v62 = vsel %vm1052_vm6, %v3293_v61, 0.0 }
 0x1d8   :  { %2142 = vpow2.f32 %v1421_v56  ;;  %v1275_v33 = vsub.f32 %v3013_v7, %v1145_v43 }
 0x1d9   :  { %v3299_v40 = vpop.eup %2130  ;;  %2144 = vpow2.f32 %v1423_v37  ;;  %v1371_v30 = vmul.f32 1.442695, %v1276_v20 }
 0x1da   :  { %v1369_v3 = vmul.f32 1.442695, %v1275_v33  ;;  %v1244_v34 = vpop.xlane.xlu1 %1243  ;;  %v1515_v25 = vsel %vm1052_vm6, %v3299_v40, 0.0  ;;  %v3305_v50 = vpop.eup %2132  ;;  %1597 = vadd.xlane.f32.xlu1 %v1596_v62 }
 0x1db   :  { %3761 = vst [vmem:[#allocation9_spill] sm:$0xff] %v3305_v50  ;;  %1516 = vadd.xlane.f32.xlu0 %v1515_v25  ;;  %v1241_v52 = vpop.xlane.xlu0 %1240  ;;  %v1518_v56 = vsel %vm1052_vm6, %v3305_v50, 0.0  ;;  %v1308_v62 = vsub.f32 %v3019_v57, %v1244_v34 }
 0x1dc   :  { %2146 = vpow2.f32 %v1369_v3  ;;  %v1307_v3 = vsub.f32 %v3025_v14, %v1241_v52 }
 0x1dd   :  { %v3307_v55 = vpop.eup %2134  ;;  %2148 = vpow2.f32 %v1371_v30  ;;  %v1435_v34 = vmul.f32 1.442695, %v1308_v62 }
 0x1de   :  { %3762 = vst [vmem:[#allocation10_spill] sm:$0xff] %v3307_v55  ;;  %v1142_v7 = vpop.xlane.xlu1 %1141  ;;  %v1611_v37 = vsel %vm1052_vm6, %v3307_v55, 0.0  ;;  %v3313_v44 = vpop.eup %2136  ;;  %1519 = vadd.xlane.f32.xlu1 %v1518_v56 }
 0x1df   :  { %v1274_v35 = vsub.f32 %v3031_v6, %v1142_v7  ;;  %1612 = vadd.xlane.f32.xlu0 %v1611_v37  ;;  %v1139_v20 = vpop.xlane.xlu0 %1138  ;;  %v1614_v55 = vsel %vm1052_vm6, %v3313_v44, 0.0  ;;  %v1433_v37 = vmul.f32 1.442695, %v1307_v3 }
 0x1e0   :  { %v1273_v43 = vsub.f32 %v3036_v41, %v1139_v20 }
 0x1e1   :  { %v3317_v33 = vpop.eup %2138  ;;  %v1367_v30 = vmul.f32 1.442695, %v1274_v35 }
 0x1e2   :  { %v1365_v25 = vmul.f32 1.442695, %v1273_v43  ;;  %v1238_v50 = vpop.xlane.xlu1 %1237  ;;  %v1509_v6 = vsel %vm1052_vm6, %v3317_v33, 0.0  ;;  %v3325_v7 = vpop.eup %2140  ;;  %1615 = vadd.xlane.f32.xlu1 %v1614_v55 }
 0x1e3   :  { %2150 = vpow2.f32 %v1367_v30  ;;  %v1306_v41 = vsub.f32 %v3041_v4, %v1238_v50  ;;  %1510 = vadd.xlane.f32.xlu0 %v1509_v6  ;;  %v1235_v56 = vpop.xlane.xlu0 %1234  ;;  %v1512_v20 = vsel %vm1052_vm6, %v3325_v7, 0.0 }
 0x1e4   :  { %2152 = vpow2.f32 %v1365_v25  ;;  %v1305_v57 = vsub.f32 %v3045_v10, %v1235_v56 }
 0x1e5   :  { %v3329_v14 = vpop.eup %2142  ;;  %v1431_v52 = vmul.f32 1.442695, %v1306_v41 }
 0x1e6   :  { %v1429_v35 = vmul.f32 1.442695, %v1305_v57  ;;  %v1605_v43 = vsel %vm1052_vm6, %v3329_v14, 0.0  ;;  %v3335_v30 = vpop.eup %2144  ;;  %1513 = vadd.xlane.f32.xlu1 %v1512_v20 }
 0x1e7   :  { %2154 = vpow2.f32 %v1431_v52  ;;  %1606 = vadd.xlane.f32.xlu0 %v1605_v43  ;;  %v1608_v10 = vsel %vm1052_vm6, %v3335_v30, 0.0 }
 0x1e8   :  { %2156 = vpow2.f32 %v1429_v35 }
 0x1e9   :  { %v3337_v4 = vpop.eup %2146  ;;  %2158 = vpow2.f32 %v1435_v34 }
 0x1ea   :  { %2160 = vpow2.f32 %v1433_v37  ;;  %v1527_v50 = vsel %vm1052_vm6, %v3337_v4, 0.0  ;;  %v3343_v55 = vpop.eup %2148  ;;  %1609 = vadd.xlane.f32.xlu1 %v1608_v10 }
 0x1eb   :  { %1528 = vadd.xlane.f32.xlu0 %v1527_v50  ;;  %v1530_v62 = vsel %vm1052_vm6, %v3343_v55, 0.0 }
 0x1ee   :  { %1531 = vadd.xlane.f32.xlu1 %v1530_v62 }
 0x1f0   :  { %v3347_v3 = vpop.eup %2150 }
 0x1f1   :  { %v3349_v25 = vpop.eup %2152  ;;  %v1524_v6 = vsel %vm1052_vm6, %v3347_v3, 0.0 }
 0x1f2   :  { %v1521_v41 = vsel %vm1052_vm6, %v3349_v25, 0.0  ;;  %1525 = vadd.xlane.f32.xlu1 %v1524_v6 }
 0x1f3   :  { %1522 = vadd.xlane.f32.xlu0 %v1521_v41 }
 0x1f4   :  { %v3355_v56 = vpop.eup %2154 }
 0x1f5   :  { %v3357_v57 = vpop.eup %2156  ;;  %v1620_v34 = vsel %vm1052_vm6, %v3355_v56, 0.0 }
 0x1f6   :  { %3763 = vst [vmem:[#allocation11_spill] sm:$0xff] %v3357_v57  ;;  %v3361_v52 = vpop.eup %2158  ;;  %v1617_v37 = vsel %vm1052_vm6, %v3357_v57, 0.0  ;;  %1621 = vadd.xlane.f32.xlu1 %v1620_v34 }
 0x1f7   :  { %3764 = vst [vmem:[#allocation12_spill] sm:$0xff] %v3361_v52  ;;  %v3365_v35 = vpop.eup %2160  ;;  %1618 = vadd.xlane.f32.xlu0 %v1617_v37  ;;  %v1626_v20 = vsel %vm1052_vm6, %v3361_v52, 0.0 }
 0x1f8   :  { %3765 = vst [vmem:[#allocation13_spill] sm:$0xff] %v3365_v35  ;;  %v1623_v43 = vsel %vm1052_vm6, %v3365_v35, 0.0 }
 0x1fa   :  { %1627 = vadd.xlane.f32.xlu1 %v1626_v20 }
 0x1fb   :  { %1624 = vadd.xlane.f32.xlu0 %v1623_v43 }
 0x203   :  { %v1445_v10 = vpop.xlane.xlu0 %1444 }
 0x204   :  { %2162 = vrcp.f32 %v1445_v10 }
 0x207   :  { %v1448_v50 = vpop.xlane.xlu1 %1447  ;;  %v1541_v62 = vpop.xlane.xlu0 %1540 }
 0x208   :  { %2164 = vrcp.f32 %v1448_v50 }
 0x209   :  { %2166 = vrcp.f32 %v1541_v62 }
 0x20b   :  { %v1544_v6 = vpop.xlane.xlu1 %1543  ;;  %v1439_v41 = vpop.xlane.xlu0 %1438 }
 0x20c   :  { %2168 = vrcp.f32 %v1544_v6 }
 0x20d   :  { %2170 = vrcp.f32 %v1439_v41 }
 0x20f   :  { %v1442_v34 = vpop.xlane.xlu1 %1441  ;;  %v1535_v37 = vpop.xlane.xlu0 %1534 }
 0x210   :  { %2172 = vrcp.f32 %v1442_v34 }
 0x211   :  { %v2163_v57 = vpop.eup %2162  ;;  %2174 = vrcp.f32 %v1535_v37 }
 0x212   :  { %v1634_v52 = vmul.f32 %v2163_v57, %v3061_v58 }
 0x213   :  { %v1538_v35 = vpop.xlane.xlu1 %1537  ;;  %v1457_v20 = vpop.xlane.xlu0 %1456 }
 0x214   :  { %1759 = vst.msk [vmem:[%s3696_s5 + $0x10] sm:$0xff] %vm1052_vm6, %v1634_v52  ;;  %2176 = vrcp.f32 %v1538_v35 }
 0x215   :  { %v2165_v43 = vpop.eup %2164  ;;  %2178 = vrcp.f32 %v1457_v20 }
 0x216   :  { %v2167_v10 = vpop.eup %2166  ;;  %v1636_v50 = vmul.f32 %v2165_v43, %v3068_v29 }
 0x217   :  { %v1698_v62 = vmul.f32 %v2167_v10, %v3065_v16  ;;  %v1460_v58 = vpop.xlane.xlu1 %1459  ;;  %v1553_v57 = vpop.xlane.xlu0 %1552 }
 0x218   :  { %1760 = vst.msk [vmem:[%s3696_s5 + $0x18] sm:$0xff] %vm1052_vm6, %v1636_v50  ;;  %2180 = vrcp.f32 %v1460_v58 }
 0x219   :  { %v2169_v6 = vpop.eup %2168  ;;  %1791 = vst.msk [vmem:[%s3696_s5 + $0x110] sm:$0xff] %vm1052_vm6, %v1698_v62  ;;  %2182 = vrcp.f32 %v1553_v57 }
 0x21a   :  { %v2171_v52 = vpop.eup %2170  ;;  %v1700_v29 = vmul.f32 %v2169_v6, %v3078_v39 }
 0x21b   :  { %v1630_v16 = vmul.f32 %v2171_v52, %v3075_v12  ;;  %v1556_v35 = vpop.xlane.xlu1 %1555  ;;  %v1451_v41 = vpop.xlane.xlu0 %1450 }
 0x21c   :  { %1792 = vst.msk [vmem:[%s3696_s5 + $0x118] sm:$0xff] %vm1052_vm6, %v1700_v29  ;;  %2184 = vrcp.f32 %v1556_v35 }
 0x21d   :  { %1757 = vst.msk [vmem:[%s3696_s5] sm:$0xff] %vm1052_vm6, %v1630_v16  ;;  %v2173_v34 = vpop.eup %2172  ;;  %2186 = vrcp.f32 %v1451_v41 }
 0x21e   :  { %v2175_v37 = vpop.eup %2174  ;;  %v1632_v39 = vmul.f32 %v2173_v34, %v3089_v23 }
 0x21f   :  { %v1694_v12 = vmul.f32 %v2175_v37, %v3083_v19  ;;  %v1454_v20 = vpop.xlane.xlu1 %1453  ;;  %v1547_v43 = vpop.xlane.xlu0 %1546 }
 0x220   :  { %1758 = vst.msk [vmem:[%s3696_s5 + $0x8] sm:$0xff] %vm1052_vm6, %v1632_v39  ;;  %2188 = vrcp.f32 %v1454_v20 }
 0x221   :  { %v2177_v10 = vpop.eup %2176  ;;  %1789 = vst.msk [vmem:[%s3696_s5 + $0x100] sm:$0xff] %vm1052_vm6, %v1694_v12  ;;  %2190 = vrcp.f32 %v1547_v43 }
 0x222   :  { %v2179_v50 = vpop.eup %2178  ;;  %v1696_v23 = vmul.f32 %v2177_v10, %v3093_v53 }
 0x223   :  { %v1642_v19 = vmul.f32 %v2179_v50, %v3099_v1  ;;  %v1550_v62 = vpop.xlane.xlu1 %1549  ;;  %v1469_v58 = vpop.xlane.xlu0 %1468 }
 0x224   :  { %1790 = vst.msk [vmem:[%s3696_s5 + $0x108] sm:$0xff] %vm1052_vm6, %v1696_v23  ;;  %2192 = vrcp.f32 %v1550_v62 }
 0x225   :  { %v2181_v57 = vpop.eup %2180  ;;  %1763 = vst.msk [vmem:[%s3696_s5 + $0x30] sm:$0xff] %vm1052_vm6, %v1642_v19  ;;  %2194 = vrcp.f32 %v1469_v58 }
 0x226   :  { %v2183_v6 = vpop.eup %2182  ;;  %v1644_v53 = vmul.f32 %v2181_v57, %v3103_v28 }
 0x227   :  { %v1706_v1 = vmul.f32 %v2183_v6, %v3109_v45  ;;  %v1472_v52 = vpop.xlane.xlu1 %1471  ;;  %v1565_v29 = vpop.xlane.xlu0 %1564 }
 0x228   :  { %1764 = vst.msk [vmem:[%s3696_s5 + $0x38] sm:$0xff] %vm1052_vm6, %v1644_v53  ;;  %2196 = vrcp.f32 %v1472_v52 }
 0x229   :  { %v2185_v16 = vpop.eup %2184  ;;  %1795 = vst.msk [vmem:[%s3696_s5 + $0x130] sm:$0xff] %vm1052_vm6, %v1706_v1  ;;  %2198 = vrcp.f32 %v1565_v29 }
 0x22a   :  { %v2187_v35 = vpop.eup %2186  ;;  %v1708_v28 = vmul.f32 %v2185_v16, %v3113_v18 }
 0x22b   :  { %v1638_v45 = vmul.f32 %v2187_v35, %v3119_v15  ;;  %v1568_v41 = vpop.xlane.xlu1 %1567  ;;  %v1463_v34 = vpop.xlane.xlu0 %1462 }
 0x22c   :  { %1796 = vst.msk [vmem:[%s3696_s5 + $0x138] sm:$0xff] %vm1052_vm6, %v1708_v28  ;;  %2200 = vrcp.f32 %v1568_v41 }
 0x22d   :  { %v2189_v37 = vpop.eup %2188  ;;  %1761 = vst.msk [vmem:[%s3696_s5 + $0x20] sm:$0xff] %vm1052_vm6, %v1638_v45  ;;  %2202 = vrcp.f32 %v1463_v34 }
 0x22e   :  { %v2191_v39 = vpop.eup %2190  ;;  %v1640_v18 = vmul.f32 %v2189_v37, %v3125_v31 }
 0x22f   :  { %v1702_v15 = vmul.f32 %v2191_v39, %v3129_v13  ;;  %v1466_v12 = vpop.xlane.xlu1 %1465  ;;  %v1559_v20 = vpop.xlane.xlu0 %1558 }
 0x230   :  { %1762 = vst.msk [vmem:[%s3696_s5 + $0x28] sm:$0xff] %vm1052_vm6, %v1640_v18  ;;  %2204 = vrcp.f32 %v1466_v12 }
 0x231   :  { %v2193_v43 = vpop.eup %2192  ;;  %1793 = vst.msk [vmem:[%s3696_s5 + $0x120] sm:$0xff] %vm1052_vm6, %v1702_v15  ;;  %2206 = vrcp.f32 %v1559_v20 }
 0x232   :  { %v2195_v10 = vpop.eup %2194  ;;  %v1704_v31 = vmul.f32 %v2193_v43, %v3135_v54 }
 0x233   :  { %v1650_v13 = vmul.f32 %v2195_v10, %v3139_v63  ;;  %v1562_v50 = vpop.xlane.xlu1 %1561  ;;  %v3766_v10 = vld [vmem:[#allocation2_spill] sm:$0xff] }
 0x234   :  { %v1481_v23 = vpop.xlane.xlu0 %1480  ;;  %1794 = vst.msk [vmem:[%s3696_s5 + $0x128] sm:$0xff] %vm1052_vm6, %v1704_v31  ;;  %2208 = vrcp.f32 %v1562_v50  ;;  %v3767_v31 = vld [vmem:[#allocation3_spill] sm:$0xff] }
 0x235   :  { %v2197_v19 = vpop.eup %2196  ;;  %1767 = vst.msk [vmem:[%s3696_s5 + $0x50] sm:$0xff] %vm1052_vm6, %v1650_v13  ;;  %2210 = vrcp.f32 %v1481_v23 }
 0x236   :  { %v2199_v62 = vpop.eup %2198  ;;  %v1652_v54 = vmul.f32 %v2197_v19, %v3145_v5 }
 0x237   :  { %v1714_v63 = vmul.f32 %v2199_v62, %v3149_v46  ;;  %v1484_v58 = vpop.xlane.xlu1 %1483  ;;  %v3768_v62 = vld [vmem:[#allocation4_spill] sm:$0xff] }
 0x238   :  { %v1577_v57 = vpop.xlane.xlu0 %1576  ;;  %1768 = vst.msk [vmem:[%s3696_s5 + $0x58] sm:$0xff] %vm1052_vm6, %v1652_v54  ;;  %2212 = vrcp.f32 %v1484_v58 }
 0x239   :  { %v2201_v6 = vpop.eup %2200  ;;  %1799 = vst.msk [vmem:[%s3696_s5 + $0x150] sm:$0xff] %vm1052_vm6, %v1714_v63  ;;  %2214 = vrcp.f32 %v1577_v57  ;;  %v3769_v63 = vld [vmem:[#allocation5_spill] sm:$0xff] }
 0x23a   :  { %v2203_v53 = vpop.eup %2202  ;;  %v1716_v5 = vmul.f32 %v2201_v6, %v3155_v22 }
 0x23b   :  { %v1646_v46 = vmul.f32 %v2203_v53, %v3159_v17  ;;  %v1580_v1 = vpop.xlane.xlu1 %1579 }
 0x23c   :  { %v1475_v52 = vpop.xlane.xlu0 %1474  ;;  %1800 = vst.msk [vmem:[%s3696_s5 + $0x158] sm:$0xff] %vm1052_vm6, %v1716_v5  ;;  %2216 = vrcp.f32 %v1580_v1 }
 0x23d   :  { %v2205_v29 = vpop.eup %2204  ;;  %1765 = vst.msk [vmem:[%s3696_s5 + $0x40] sm:$0xff] %vm1052_vm6, %v1646_v46  ;;  %2218 = vrcp.f32 %v1475_v52  ;;  %v3770_v46 = vld [vmem:[#allocation6_spill] sm:$0xff]  ;;  %v3771_v52 = vld [vmem:[#allocation7_spill] sm:$0xff] }
 0x23e   :  { %v2207_v16 = vpop.eup %2206  ;;  %v1648_v22 = vmul.f32 %v2205_v29, %v3165_v24 }
 0x23f   :  { %v1710_v17 = vmul.f32 %v2207_v16, %v3169_v9  ;;  %v1478_v35 = vpop.xlane.xlu1 %1477 }
 0x240   :  { %v1571_v28 = vpop.xlane.xlu0 %1570  ;;  %1766 = vst.msk [vmem:[%s3696_s5 + $0x48] sm:$0xff] %vm1052_vm6, %v1648_v22  ;;  %2220 = vrcp.f32 %v1478_v35 }
 0x241   :  { %v2209_v45 = vpop.eup %2208  ;;  %1797 = vst.msk [vmem:[%s3696_s5 + $0x140] sm:$0xff] %vm1052_vm6, %v1710_v17  ;;  %2222 = vrcp.f32 %v1571_v28 }
 0x242   :  { %v2211_v41 = vpop.eup %2210  ;;  %v1712_v24 = vmul.f32 %v2209_v45, %v3171_v21 }
 0x243   :  { %v1658_v9 = vmul.f32 %v2211_v41, %v3179_v49  ;;  %v1574_v34 = vpop.xlane.xlu1 %1573 }
 0x244   :  { %v1493_v37 = vpop.xlane.xlu0 %1492  ;;  %1798 = vst.msk [vmem:[%s3696_s5 + $0x148] sm:$0xff] %vm1052_vm6, %v1712_v24  ;;  %2224 = vrcp.f32 %v1574_v34 }
 0x245   :  { %v2213_v39 = vpop.eup %2212  ;;  %1771 = vst.msk [vmem:[%s3696_s5 + $0x70] sm:$0xff] %vm1052_vm6, %v1658_v9  ;;  %2226 = vrcp.f32 %v1493_v37 }
 0x246   :  { %v2215_v18 = vpop.eup %2214  ;;  %v1660_v21 = vmul.f32 %v2213_v39, %v3183_v60 }
 0x247   :  { %v1722_v49 = vmul.f32 %v2215_v18, %v3189_v47  ;;  %v1496_v15 = vpop.xlane.xlu1 %1495 }
 0x248   :  { %v1589_v12 = vpop.xlane.xlu0 %1588  ;;  %1772 = vst.msk [vmem:[%s3696_s5 + $0x78] sm:$0xff] %vm1052_vm6, %v1660_v21  ;;  %2228 = vrcp.f32 %v1496_v15 }
 0x249   :  { %v2217_v20 = vpop.eup %2216  ;;  %1803 = vst.msk [vmem:[%s3696_s5 + $0x170] sm:$0xff] %vm1052_vm6, %v1722_v49  ;;  %2230 = vrcp.f32 %v1589_v12 }
 0x24a   :  { %v2219_v43 = vpop.eup %2218  ;;  %v1724_v60 = vmul.f32 %v2217_v20, %v3766_v10 }
 0x24b   :  { %v1654_v47 = vmul.f32 %v2219_v43, %v3767_v31  ;;  %v1592_v13 = vpop.xlane.xlu1 %1591 }
 0x24c   :  { %v1487_v50 = vpop.xlane.xlu0 %1486  ;;  %1804 = vst.msk [vmem:[%s3696_s5 + $0x178] sm:$0xff] %vm1052_vm6, %v1724_v60  ;;  %2232 = vrcp.f32 %v1592_v13 }
 0x24d   :  { %v2221_v23 = vpop.eup %2220  ;;  %1769 = vst.msk [vmem:[%s3696_s5 + $0x60] sm:$0xff] %vm1052_vm6, %v1654_v47  ;;  %2234 = vrcp.f32 %v1487_v50 }
 0x24e   :  { %v2223_v19 = vpop.eup %2222  ;;  %v1656_v54 = vmul.f32 %v2221_v23, %v3768_v62 }
 0x24f   :  { %v1718_v58 = vmul.f32 %v2223_v19, %v3769_v63  ;;  %v1490_v57 = vpop.xlane.xlu1 %1489 }
 0x250   :  { %v1583_v6 = vpop.xlane.xlu0 %1582  ;;  %1770 = vst.msk [vmem:[%s3696_s5 + $0x68] sm:$0xff] %vm1052_vm6, %v1656_v54  ;;  %2236 = vrcp.f32 %v1490_v57 }
 0x251   :  { %v2225_v53 = vpop.eup %2224  ;;  %1801 = vst.msk [vmem:[%s3696_s5 + $0x160] sm:$0xff] %vm1052_vm6, %v1718_v58  ;;  %2238 = vrcp.f32 %v1583_v6  ;;  %v3772_v58 = vld [vmem:[#allocation8_spill] sm:$0xff] }
 0x252   :  { %v2227_v5 = vpop.eup %2226  ;;  %v1720_v1 = vmul.f32 %v2225_v53, %v3770_v46 }
 0x253   :  { %v1666_v29 = vmul.f32 %v2227_v5, %v3771_v52  ;;  %v1586_v16 = vpop.xlane.xlu1 %1585 }
 0x254   :  { %v1505_v22 = vpop.xlane.xlu0 %1504  ;;  %1802 = vst.msk [vmem:[%s3696_s5 + $0x168] sm:$0xff] %vm1052_vm6, %v1720_v1  ;;  %2240 = vrcp.f32 %v1586_v16 }
 0x255   :  { %v2229_v17 = vpop.eup %2228  ;;  %1775 = vst.msk [vmem:[%s3696_s5 + $0x90] sm:$0xff] %vm1052_vm6, %v1666_v29  ;;  %2242 = vrcp.f32 %v1505_v22  ;;  %v3773_v22 = vld [vmem:[#allocation9_spill] sm:$0xff] }
 0x256   :  { %v2231_v35 = vpop.eup %2230  ;;  %v1668_v28 = vmul.f32 %v2229_v17, %v3225_v36  ;;  %v3774_v17 = vld [vmem:[#allocation10_spill] sm:$0xff] }
 0x257   :  { %v1730_v45 = vmul.f32 %v2231_v35, %v3229_v38  ;;  %v1508_v41 = vpop.xlane.xlu1 %1507 }
 0x258   :  { %v1601_v24 = vpop.xlane.xlu0 %1600  ;;  %1776 = vst.msk [vmem:[%s3696_s5 + $0x98] sm:$0xff] %vm1052_vm6, %v1668_v28  ;;  %2244 = vrcp.f32 %v1508_v41 }
 0x259   :  { %v2233_v9 = vpop.eup %2232  ;;  %1807 = vst.msk [vmem:[%s3696_s5 + $0x190] sm:$0xff] %vm1052_vm6, %v1730_v45  ;;  %2246 = vrcp.f32 %v1601_v24 }
 0x25a   :  { %v2235_v34 = vpop.eup %2234  ;;  %v1732_v36 = vmul.f32 %v2233_v9, %v3235_v42 }
 0x25b   :  { %v1662_v38 = vmul.f32 %v2235_v34, %v3239_v48  ;;  %v1604_v37 = vpop.xlane.xlu1 %1603 }
 0x25c   :  { %v1499_v39 = vpop.xlane.xlu0 %1498  ;;  %1808 = vst.msk [vmem:[%s3696_s5 + $0x198] sm:$0xff] %vm1052_vm6, %v1732_v36  ;;  %2248 = vrcp.f32 %v1604_v37 }
 0x25d   :  { %v2237_v18 = vpop.eup %2236  ;;  %1773 = vst.msk [vmem:[%s3696_s5 + $0x80] sm:$0xff] %vm1052_vm6, %v1662_v38  ;;  %2250 = vrcp.f32 %v1499_v39 }
 0x25e   :  { %v2239_v21 = vpop.eup %2238  ;;  %v1664_v42 = vmul.f32 %v2237_v18, %v3245_v2 }
 0x25f   :  { %v1726_v48 = vmul.f32 %v2239_v21, %v3249_v27  ;;  %v1502_v49 = vpop.xlane.xlu1 %1501 }
 0x260   :  { %v1595_v15 = vpop.xlane.xlu0 %1594  ;;  %1774 = vst.msk [vmem:[%s3696_s5 + $0x88] sm:$0xff] %vm1052_vm6, %v1664_v42  ;;  %2252 = vrcp.f32 %v1502_v49 }
 0x261   :  { %v2241_v12 = vpop.eup %2240  ;;  %1805 = vst.msk [vmem:[%s3696_s5 + $0x180] sm:$0xff] %vm1052_vm6, %v1726_v48  ;;  %2254 = vrcp.f32 %v1595_v15 }
 0x262   :  { %v2243_v20 = vpop.eup %2242  ;;  %v1728_v2 = vmul.f32 %v2241_v12, %v3255_v26 }
 0x263   :  { %v1674_v27 = vmul.f32 %v2243_v20, %v3259_v51  ;;  %v1598_v43 = vpop.xlane.xlu1 %1597 }
 0x264   :  { %v1517_v10 = vpop.xlane.xlu0 %1516  ;;  %1806 = vst.msk [vmem:[%s3696_s5 + $0x188] sm:$0xff] %vm1052_vm6, %v1728_v2  ;;  %2256 = vrcp.f32 %v1598_v43  ;;  %v3775_v43 = vld [vmem:[#allocation11_spill] sm:$0xff] }
 0x265   :  { %v2245_v60 = vpop.eup %2244  ;;  %1779 = vst.msk [vmem:[%s3696_s5 + $0xb0] sm:$0xff] %vm1052_vm6, %v1674_v27  ;;  %2258 = vrcp.f32 %v1517_v10 }
 0x266   :  { %v2247_v31 = vpop.eup %2246  ;;  %v1676_v26 = vmul.f32 %v2245_v60, %v3261_v0  ;;  %v3776_v60 = vld [vmem:[#allocation12_spill] sm:$0xff] }
 0x267   :  { %v1738_v51 = vmul.f32 %v2247_v31, %v3269_v59  ;;  %v1520_v47 = vpop.xlane.xlu1 %1519 }
 0x268   :  { %v1613_v13 = vpop.xlane.xlu0 %1612  ;;  %1780 = vst.msk [vmem:[%s3696_s5 + $0xb8] sm:$0xff] %vm1052_vm6, %v1676_v26  ;;  %2260 = vrcp.f32 %v1520_v47  ;;  %v3777_v26 = vld [vmem:[#allocation13_spill] sm:$0xff] }
 0x269   :  { %v2249_v50 = vpop.eup %2248  ;;  %1811 = vst.msk [vmem:[%s3696_s5 + $0x1b0] sm:$0xff] %vm1052_vm6, %v1738_v51  ;;  %2262 = vrcp.f32 %v1613_v13 }
 0x26a   :  { %v2251_v23 = vpop.eup %2250  ;;  %v1740_v0 = vmul.f32 %v2249_v50, %v3273_v11 }
 0x26b   :  { %v1670_v59 = vmul.f32 %v2251_v23, %v3279_v8  ;;  %v1616_v19 = vpop.xlane.xlu1 %1615 }
 0x26c   :  { %v1511_v62 = vpop.xlane.xlu0 %1510  ;;  %1812 = vst.msk [vmem:[%s3696_s5 + $0x1b8] sm:$0xff] %vm1052_vm6, %v1740_v0  ;;  %2264 = vrcp.f32 %v1616_v19 }
 0x26d   :  { %v2253_v54 = vpop.eup %2252  ;;  %1777 = vst.msk [vmem:[%s3696_s5 + $0xa0] sm:$0xff] %vm1052_vm6, %v1670_v59  ;;  %2266 = vrcp.f32 %v1511_v62 }
 0x26e   :  { %v2255_v63 = vpop.eup %2254  ;;  %v1672_v11 = vmul.f32 %v2253_v54, %v3283_v32 }
 0x26f   :  { %v1734_v8 = vmul.f32 %v2255_v63, %v3772_v58  ;;  %v1514_v57 = vpop.xlane.xlu1 %1513 }
 0x270   :  { %v1607_v6 = vpop.xlane.xlu0 %1606  ;;  %1778 = vst.msk [vmem:[%s3696_s5 + $0xa8] sm:$0xff] %vm1052_vm6, %v1672_v11  ;;  %2268 = vrcp.f32 %v1514_v57 }
 0x271   :  { %v2257_v53 = vpop.eup %2256  ;;  %1809 = vst.msk [vmem:[%s3696_s5 + $0x1a0] sm:$0xff] %vm1052_vm6, %v1734_v8  ;;  %2270 = vrcp.f32 %v1607_v6 }
 0x272   :  { %v2259_v5 = vpop.eup %2258  ;;  %v1736_v32 = vmul.f32 %v2257_v53, %v3293_v61 }
 0x273   :  { %v1682_v46 = vmul.f32 %v2259_v5, %v3299_v40  ;;  %v1610_v1 = vpop.xlane.xlu1 %1609 }
 0x274   :  { %v1529_v52 = vpop.xlane.xlu0 %1528  ;;  %1810 = vst.msk [vmem:[%s3696_s5 + $0x1a8] sm:$0xff] %vm1052_vm6, %v1736_v32  ;;  %2272 = vrcp.f32 %v1610_v1 }
 0x275   :  { %v2261_v29 = vpop.eup %2260  ;;  %1783 = vst.msk [vmem:[%s3696_s5 + $0xd0] sm:$0xff] %vm1052_vm6, %v1682_v46  ;;  %2274 = vrcp.f32 %v1529_v52 }
 0x276   :  { %v2263_v16 = vpop.eup %2262  ;;  %v1684_v61 = vmul.f32 %v2261_v29, %v3773_v22 }
 0x277   :  { %v1746_v40 = vmul.f32 %v2263_v16, %v3774_v17  ;;  %v1532_v35 = vpop.xlane.xlu1 %1531 }
 0x278   :  { %1784 = vst.msk [vmem:[%s3696_s5 + $0xd8] sm:$0xff] %vm1052_vm6, %v1684_v61  ;;  %2276 = vrcp.f32 %v1532_v35 }
 0x279   :  { %v2265_v28 = vpop.eup %2264  ;;  %1815 = vst.msk [vmem:[%s3696_s5 + $0x1d0] sm:$0xff] %vm1052_vm6, %v1746_v40 }
 0x27a   :  { %v2267_v45 = vpop.eup %2266  ;;  %v1748_v41 = vmul.f32 %v2265_v28, %v3313_v44 }
 0x27b   :  { %v1678_v24 = vmul.f32 %v2267_v45, %v3317_v33  ;;  %v1526_v9 = vpop.xlane.xlu1 %1525 }
 0x27c   :  { %v1523_v34 = vpop.xlane.xlu0 %1522  ;;  %1816 = vst.msk [vmem:[%s3696_s5 + $0x1d8] sm:$0xff] %vm1052_vm6, %v1748_v41  ;;  %2278 = vrcp.f32 %v1526_v9 }
 0x27d   :  { %v2269_v36 = vpop.eup %2268  ;;  %1781 = vst.msk [vmem:[%s3696_s5 + $0xc0] sm:$0xff] %vm1052_vm6, %v1678_v24  ;;  %2280 = vrcp.f32 %v1523_v34 }
 0x27e   :  { %v2271_v38 = vpop.eup %2270  ;;  %v1680_v44 = vmul.f32 %v2269_v36, %v3325_v7 }
 0x27f   :  { %v1742_v33 = vmul.f32 %v2271_v38, %v3329_v14  ;;  %v1622_v37 = vpop.xlane.xlu1 %1621 }
 0x280   :  { %v1619_v39 = vpop.xlane.xlu0 %1618  ;;  %1782 = vst.msk [vmem:[%s3696_s5 + $0xc8] sm:$0xff] %vm1052_vm6, %v1680_v44  ;;  %2282 = vrcp.f32 %v1622_v37 }
 0x281   :  { %v2273_v18 = vpop.eup %2272  ;;  %1813 = vst.msk [vmem:[%s3696_s5 + $0x1c0] sm:$0xff] %vm1052_vm6, %v1742_v33  ;;  %2284 = vrcp.f32 %v1619_v39 }
 0x282   :  { %v2275_v21 = vpop.eup %2274  ;;  %v1744_v7 = vmul.f32 %v2273_v18, %v3335_v30 }
 0x283   :  { %v1690_v14 = vmul.f32 %v2275_v21, %v3337_v4  ;;  %v1628_v42 = vpop.xlane.xlu1 %1627 }
 0x284   :  { %v1625_v48 = vpop.xlane.xlu0 %1624  ;;  %1814 = vst.msk [vmem:[%s3696_s5 + $0x1c8] sm:$0xff] %vm1052_vm6, %v1744_v7  ;;  %2286 = vrcp.f32 %v1628_v42 }
 0x285   :  { %v2277_v49 = vpop.eup %2276  ;;  %1787 = vst.msk [vmem:[%s3696_s5 + $0xf0] sm:$0xff] %vm1052_vm6, %v1690_v14  ;;  %2288 = vrcp.f32 %v1625_v48 }
 0x286   :  { %v1692_v15 = vmul.f32 %v2277_v49, %v3343_v55 }
 0x288   :  { %1788 = vst.msk [vmem:[%s3696_s5 + $0xf8] sm:$0xff] %vm1052_vm6, %v1692_v15 }
 0x289   :  { %v2279_v30 = vpop.eup %2278 }
 0x28a   :  { %v2281_v4 = vpop.eup %2280  ;;  %v1688_v12 = vmul.f32 %v2279_v30, %v3347_v3 }
 0x28b   :  { %v1686_v20 = vmul.f32 %v2281_v4, %v3349_v25 }
 0x28c   :  { %1786 = vst.msk [vmem:[%s3696_s5 + $0xe8] sm:$0xff] %vm1052_vm6, %v1688_v12 }
 0x28d   :  { %v2283_v2 = vpop.eup %2282  ;;  %1785 = vst.msk [vmem:[%s3696_s5 + $0xe0] sm:$0xff] %vm1052_vm6, %v1686_v20 }
 0x28e   :  { %v2285_v55 = vpop.eup %2284  ;;  %v1752_v27 = vmul.f32 %v2283_v2, %v3355_v56 }
 0x28f   :  { %v1750_v10 = vmul.f32 %v2285_v55, %v3775_v43 }
 0x290   :  { %1818 = vst.msk [vmem:[%s3696_s5 + $0x1e8] sm:$0xff] %vm1052_vm6, %v1752_v27 }
 0x291   :  { %v2287_v3 = vpop.eup %2286  ;;  %1817 = vst.msk [vmem:[%s3696_s5 + $0x1e0] sm:$0xff] %vm1052_vm6, %v1750_v10 }
 0x292   :  { %v2289_v25 = vpop.eup %2288  ;;  %v1756_v31 = vmul.f32 %v2287_v3, %v3776_v60 }
 0x293   :  { %v1754_v51 = vmul.f32 %v2289_v25, %v3777_v26 }
 0x294   :  { %1820 = vst.msk [vmem:[%s3696_s5 + $0x1f8] sm:$0xff] %vm1052_vm6, %v1756_v31 }
 0x295   :  { %1819 = vst.msk [vmem:[%s3696_s5 + $0x1f0] sm:$0xff] %vm1052_vm6, %v1754_v51 }

// kernel: _lambda_.17
= control target key start
LH: loop header
LB: loop body
LE: loop exit
PB: predicated region body
PF: predicated region fallthrough
CT: control target
= control target key end

     0   :  { %v4907_v0 = vmov 0   ;;  %vm3835_vm0 = vcmask 261120   ;;  %s7148_s1 = inlined_call_operand.vmem [shape: bf16[1152,32], index: 1, kind: input, shape index: {}]   ;;  %s7149_s0 = inlined_call_operand.vmem [shape: bf16[512,1152], index: 0, kind: input, shape index: {}]   ;;  %s7150_s2 = inlined_call_operand.vmem [shape: f32[1,32], index: 2, kind: input, shape index: {}]   ;;  %s7151_s3 = inlined_call_operand.vmem [shape: f32[512,32], index: 3, kind: output, shape index: {}]  }
   0x1   :  { %2390 = vmatprep.subr.bf16.mxu0 %v4907_v0  ;;  %4385 = vmatprep.subr.bf16.mxu1 %v4907_v0  ;;  %v4418_v1 = vld [vmem:[%s7148_s1 + $0x38] sm:$0xff]   ;;  %v4419_v2 = vld [vmem:[%s7148_s1 + $0x30] sm:$0xff]   ;;  %v4420_v3 = vld [vmem:[%s7148_s1 + $0x28] sm:$0xff]  }
   0x2   :  { %2391 = vmatpush1.bf16.msra.mxu0 %v4418_v1  ;;  %4401 = vmatpush1.bf16.msra.mxu1 %v4418_v1  ;;  %v4421_v4 = vld [vmem:[%s7148_s1 + $0x20] sm:$0xff]   ;;  %v4422_v5 = vld [vmem:[%s7148_s1 + $0x18] sm:$0xff]   ;;  %v4423_v7 = vld [vmem:[%s7148_s1 + $0x10] sm:$0xff]  }
   0x3   :  { %2392 = vmatprep.subr.bf16.mxu0 %v4907_v0  ;;  %4386 = vmatprep.subr.bf16.mxu1 %v4907_v0  ;;  %v4436_v6 = vld [vmem:[%s7149_s0 + $0x4] ss:$36 sps:$4 sm:$0xff]   ;;  %v4426_v11 = vld [vmem:[%s7148_s1 + $0x78] sm:$0xff]   ;;  %v4427_v12 = vld [vmem:[%s7148_s1 + $0x70] sm:$0xff]  }
   0x4   :  { %v4439_v8 = vld [vmem:[%s7149_s0 + $0x6c4] ss:$36 sps:$4 sm:$0xff]   ;;  %2422 = vmatprep.mubr.bf16.mxu0 %v4436_v6  ;;  %v4430_v15 = vld [vmem:[%s7148_s1 + $0x58] sm:$0xff]   ;;  %v4431_v16 = vld [vmem:[%s7148_s1 + $0x50] sm:$0xff]  }
   0x5   :  { %2614 = vmatprep.mubr.bf16.mxu1 %v4439_v8  ;;  %v4424_v9 = vld [vmem:[%s7148_s1 + $0x8] sm:$0xff]   ;;  %v4425_v10 = vld [vmem:[%s7148_s1] sm:$0xff]   ;;  %v4440_v21 = vld [vmem:[%s7148_s1 + $0xb8] sm:$0xff]  }
   0x6   :  { %2393 = vmatpush1.bf16.msra.mxu0 %v4419_v2  ;;  %4402 = vmatpush1.bf16.msra.mxu1 %v4419_v2  ;;  %v4428_v13 = vld [vmem:[%s7148_s1 + $0x68] sm:$0xff]   ;;  %v4429_v14 = vld [vmem:[%s7148_s1 + $0x60] sm:$0xff]   ;;  %v4441_v22 = vld [vmem:[%s7148_s1 + $0x138] sm:$0xff]  }
   0x7   :  { %2394 = vmatprep.subr.bf16.mxu0 %v4907_v0  ;;  %4387 = vmatprep.subr.bf16.mxu1 %v4907_v0  ;;  %v4432_v17 = vld [vmem:[%s7148_s1 + $0x48] sm:$0xff]   ;;  %v4433_v18 = vld [vmem:[%s7148_s1 + $0x40] sm:$0xff]   ;;  %v4442_v25 = vld [vmem:[%s7148_s1 + $0xb0] sm:$0xff]  }
   0x8   :  { %v4434_v19 = vld [vmem:[%s7149_s0] ss:$36 sps:$4 sm:$0xff]   ;;  %v4443_v23 = vld [vmem:[%s7149_s0 + $0x4c] ss:$36 sps:$4 sm:$0xff]   ;;  %v4452_v30 = vld [vmem:[%s7149_s0 + $0x94] ss:$36 sps:$4 sm:$0xff]  }
   0x9   :  { %v4437_v20 = vld [vmem:[%s7149_s0 + $0x6c0] ss:$36 sps:$4 sm:$0xff]   ;;  %v4445_v24 = vld [vmem:[%s7149_s0 + $0x70c] ss:$36 sps:$4 sm:$0xff]   ;;  %v4454_v31 = vld [vmem:[%s7149_s0 + $0x754] ss:$36 sps:$4 sm:$0xff]  }
   0xa   :  { %2395 = vmatpush1.bf16.msra.mxu0 %v4420_v3  ;;  %4403 = vmatpush1.bf16.msra.mxu1 %v4420_v3  ;;  %v4451_v26 = vld [vmem:[%s7148_s1 + $0x130] sm:$0xff]   ;;  %v4447_v27 = vld [vmem:[%s7149_s0 + $0x48] ss:$36 sps:$4 sm:$0xff]   ;;  %v4450_v33 = vld [vmem:[%s7148_s1 + $0xa0] sm:$0xff]  }
   0xb   :  { %2396 = vmatprep.subr.bf16.mxu0 %v4907_v0  ;;  %4388 = vmatprep.subr.bf16.mxu1 %v4907_v0  ;;  %v4448_v28 = vld [vmem:[%s7149_s0 + $0x708] ss:$36 sps:$4 sm:$0xff]   ;;  %v4456_v34 = vld [vmem:[%s7149_s0 + $0x90] ss:$36 sps:$4 sm:$0xff]   ;;  %v4477_v36 = vld [vmem:[%s7148_s1 + $0x120] sm:$0xff]  }
   0xc   :  { %v4449_v29 = vld [vmem:[%s7148_s1 + $0xa8] sm:$0xff]   ;;  %v4457_v35 = vld [vmem:[%s7149_s0 + $0x750] ss:$36 sps:$4 sm:$0xff]   ;;  %v4458_v37 = vld [vmem:[%s7148_s1 + $0x98] sm:$0xff]  }
   0xd   :  { %v4467_v32 = vld [vmem:[%s7148_s1 + $0x128] sm:$0xff]   ;;  %v4460_v38 = vld [vmem:[%s7149_s0 + $0xdc] ss:$36 sps:$4 sm:$0xff]   ;;  %v4459_v41 = vld [vmem:[%s7148_s1 + $0x90] sm:$0xff]  }
   0xe   :  { %2397 = vmatpush1.bf16.msra.mxu0 %v4421_v4  ;;  %4404 = vmatpush1.bf16.msra.mxu1 %v4421_v4  ;;  %v4462_v39 = vld [vmem:[%s7149_s0 + $0x79c] ss:$36 sps:$4 sm:$0xff]   ;;  %v4466_v44 = vld [vmem:[%s7148_s1 + $0x88] sm:$0xff]   ;;  %v4503_v47 = vld [vmem:[%s7148_s1 + $0x110] sm:$0xff]  }
   0xf   :  { %2398 = vmatprep.subr.bf16.mxu0 %v4907_v0  ;;  %4389 = vmatprep.subr.bf16.mxu1 %v4907_v0  ;;  %v4493_v40 = vld [vmem:[%s7148_s1 + $0x118] sm:$0xff]   ;;  %v4469_v45 = vld [vmem:[%s7149_s0 + $0x124] ss:$36 sps:$4 sm:$0xff]   ;;  %v4478_v53 = vld [vmem:[%s7149_s0 + $0x16c] ss:$36 sps:$4 sm:$0xff]  }
  0x10   :  { %v4464_v42 = vld [vmem:[%s7149_s0 + $0xd8] ss:$36 sps:$4 sm:$0xff]   ;;  %v4471_v46 = vld [vmem:[%s7149_s0 + $0x7e4] ss:$36 sps:$4 sm:$0xff]   ;;  %v4480_v54 = vld [vmem:[%s7149_s0 + $0x82c] ss:$36 sps:$4 sm:$0xff]  }
  0x11   :  { %v4465_v43 = vld [vmem:[%s7149_s0 + $0x798] ss:$36 sps:$4 sm:$0xff]   ;;  %v4468_v48 = vld [vmem:[%s7148_s1 + $0x80] sm:$0xff]   ;;  %v4517_v51 = vld [vmem:[%s7148_s1 + $0x108] sm:$0xff]  }
  0x12   :  { %2399 = vmatpush1.bf16.msra.mxu0 %v4422_v5  ;;  %4405 = vmatpush1.bf16.msra.mxu1 %v4422_v5  ;;  %v4473_v49 = vld [vmem:[%s7149_s0 + $0x120] ss:$36 sps:$4 sm:$0xff]   ;;  %v4475_v52 = vld [vmem:[%s7148_s1 + $0xf8] sm:$0xff]   ;;  %v4476_v56 = vld [vmem:[%s7148_s1 + $0xf0] sm:$0xff]  }
  0x13   :  { %2400 = vmatprep.subr.bf16.mxu0 %v4907_v0  ;;  %4390 = vmatprep.subr.bf16.mxu1 %v4907_v0  ;;  %v4474_v50 = vld [vmem:[%s7149_s0 + $0x7e0] ss:$36 sps:$4 sm:$0xff]   ;;  %v4482_v57 = vld [vmem:[%s7149_s0 + $0x168] ss:$36 sps:$4 sm:$0xff]   ;;  %v4486_v60 = vld [vmem:[%s7149_s0 + $0x1b4] ss:$36 sps:$4 sm:$0xff]  }
  0x14   :  { %v4525_v55 = vld [vmem:[%s7148_s1 + $0x100] sm:$0xff]   ;;  %v4483_v58 = vld [vmem:[%s7149_s0 + $0x828] ss:$36 sps:$4 sm:$0xff]   ;;  %v4488_v61 = vld [vmem:[%s7149_s0 + $0x874] ss:$36 sps:$4 sm:$0xff]  }
  0x15   :  { %v4484_v59 = vld [vmem:[%s7148_s1 + $0xe8] sm:$0xff]   ;;  %v4538_v62 = vld [vmem:[%s7148_s1 + $0x178] sm:$0xff]   ;;  %v4485_v63 = vld [vmem:[%s7148_s1 + $0xe0] sm:$0xff]  }
  0x16   :  { %2401 = vmatpush1.bf16.msra.mxu0 %v4423_v7  ;;  %4406 = vmatpush1.bf16.msra.mxu1 %v4423_v7  ;;  %v4490_v1 = vld [vmem:[%s7149_s0 + $0x1b0] ss:$36 sps:$4 sm:$0xff]   ;;  %v4492_v4 = vld [vmem:[%s7148_s1 + $0xd8] sm:$0xff]   ;;  %v4560_v7 = vld [vmem:[%s7148_s1 + $0x168] sm:$0xff]  }
  0x17   :  { %2402 = vmatprep.subr.bf16.mxu0 %v4907_v0  ;;  %4391 = vmatprep.subr.bf16.mxu1 %v4907_v0  ;;  %v4491_v2 = vld [vmem:[%s7149_s0 + $0x870] ss:$36 sps:$4 sm:$0xff]   ;;  %v4495_v5 = vld [vmem:[%s7149_s0 + $0x1fc] ss:$36 sps:$4 sm:$0xff]  }
  0x18   :  { %v4546_v3 = vld [vmem:[%s7148_s1 + $0x170] sm:$0xff]   ;;  %v4497_v6 = vld [vmem:[%s7149_s0 + $0x8bc] ss:$36 sps:$4 sm:$0xff]  }
  0x19   :  { %v4494_v8 = vld [vmem:[%s7148_s1 + $0xd0] sm:$0xff]  }
  0x1a   :  { %2403 = vmatpush1.bf16.msra.mxu0 %v4424_v9  ;;  %4407 = vmatpush1.bf16.msra.mxu1 %v4424_v9  ;;  %v4499_v9 = vld [vmem:[%s7149_s0 + $0x1f8] ss:$36 sps:$4 sm:$0xff]  }
  0x1b   :  { %2404 = vmatprep.subr.bf16.mxu0 %v4907_v0  ;;  %4392 = vmatprep.subr.bf16.mxu1 %v4907_v0 }
  0x1e   :  { %2405 = vmatpush1.bf16.msra.mxu0 %v4425_v10  ;;  %4408 = vmatpush1.bf16.msra.mxu1 %v4425_v10  ;;  %v4500_v10 = vld [vmem:[%s7149_s0 + $0x8b8] ss:$36 sps:$4 sm:$0xff]  }
  0x1f   :  { %2406 = vmatprep.subr.bf16.mxu0 %v4907_v0  ;;  %4393 = vmatprep.subr.bf16.mxu1 %v4907_v0 }
  0x22   :  { %2407 = vmatpush2.bf16.msra.mxu0 %v4426_v11  ;;  %4409 = vmatpush2.bf16.msra.mxu1 %v4426_v11  ;;  %v4501_v11 = vld [vmem:[%s7148_s1 + $0xc8] sm:$0xff]  }
  0x23   :  { %2408 = vmatprep.subr.bf16.mxu0 %v4907_v0  ;;  %4394 = vmatprep.subr.bf16.mxu1 %v4907_v0 }
  0x26   :  { %2409 = vmatpush2.bf16.msra.mxu0 %v4427_v12  ;;  %4410 = vmatpush2.bf16.msra.mxu1 %v4427_v12  ;;  %v4504_v12 = vld [vmem:[%s7149_s0 + $0x244] ss:$36 sps:$4 sm:$0xff]  }
  0x27   :  { %2410 = vmatprep.subr.bf16.mxu0 %v4907_v0  ;;  %4395 = vmatprep.subr.bf16.mxu1 %v4907_v0 }
  0x2a   :  { %2411 = vmatpush2.bf16.msra.mxu0 %v4428_v13  ;;  %4411 = vmatpush2.bf16.msra.mxu1 %v4428_v13  ;;  %v4508_v13 = vld [vmem:[%s7149_s0 + $0xc] ss:$36 sps:$4 sm:$0xff]  }
  0x2b   :  { %2412 = vmatprep.subr.bf16.mxu0 %v4907_v0  ;;  %4396 = vmatprep.subr.bf16.mxu1 %v4907_v0 }
  0x2e   :  { %2413 = vmatpush2.bf16.msra.mxu0 %v4429_v14  ;;  %4412 = vmatpush2.bf16.msra.mxu1 %v4429_v14  ;;  %v4568_v14 = vld [vmem:[%s7148_s1 + $0x160] sm:$0xff]  }
  0x2f   :  { %2414 = vmatprep.subr.bf16.mxu0 %v4907_v0  ;;  %4397 = vmatprep.subr.bf16.mxu1 %v4907_v0 }
  0x32   :  { %2415 = vmatpush2.bf16.msra.mxu0 %v4430_v15  ;;  %4413 = vmatpush2.bf16.msra.mxu1 %v4430_v15  ;;  %v4502_v15 = vld [vmem:[%s7148_s1 + $0xc0] sm:$0xff]  }
  0x33   :  { %2416 = vmatprep.subr.bf16.mxu0 %v4907_v0  ;;  %4398 = vmatprep.subr.bf16.mxu1 %v4907_v0 }
  0x36   :  { %2417 = vmatpush2.bf16.msra.mxu0 %v4431_v16  ;;  %4414 = vmatpush2.bf16.msra.mxu1 %v4431_v16  ;;  %v4506_v16 = vld [vmem:[%s7149_s0 + $0x8] ss:$36 sps:$4 sm:$0xff]  }
  0x37   :  { %2418 = vmatprep.subr.bf16.mxu0 %v4907_v0  ;;  %4399 = vmatprep.subr.bf16.mxu1 %v4907_v0 }
  0x3a   :  { %2419 = vmatpush2.bf16.msra.mxu0 %v4432_v17  ;;  %4415 = vmatpush2.bf16.msra.mxu1 %v4432_v17  ;;  %v4509_v17 = vld [vmem:[%s7149_s0 + $0x240] ss:$36 sps:$4 sm:$0xff]  }
  0x3b   :  { %2420 = vmatprep.subr.bf16.mxu0 %v4907_v0  ;;  %4400 = vmatprep.subr.bf16.mxu1 %v4907_v0 }
  0x3e   :  { %2421 = vmatpush2.bf16.msra.mxu0 %v4433_v18  ;;  %4416 = vmatpush2.bf16.msra.mxu1 %v4433_v18  ;;  %v4581_v18 = vld [vmem:[%s7148_s1 + $0x158] sm:$0xff]  }
  0x3f   :  { %2679 = vmatprep.subr.bf16.mxu1 %v4907_v0  ;;  %2968 = vmatprep.subr.bf16.mxu0 %v4907_v0 }
  0x41   :  { %2423 = vmatmul.mubr.bf16.vlgmr.msra.gmra.mxu0 %v4434_v19  ;;  %2615 = vmatmul.mubr.bf16.vlgmr.msra.gmra.mxu1 %v4437_v20  ;;  %v4510_v19 = vld [vmem:[%s7148_s1 + $0x1b8] sm:$0xff]   ;;  %v4511_v20 = vld [vmem:[%s7149_s0 + $0x28c] ss:$36 sps:$4 sm:$0xff]  }
  0x42   :  { %2680 = vmatpush1.bf16.msra.mxu1 %v4440_v21  ;;  %2969 = vmatpush1.bf16.msra.mxu0 %v4441_v22  ;;  %v4513_v21 = vld [vmem:[%s7149_s0 + $0x54] ss:$36 sps:$4 sm:$0xff]  }
  0x43   :  { %2681 = vmatprep.subr.bf16.mxu1 %v4907_v0  ;;  %2430 = vmatprep.mubr.bf16.mxu0 %v4443_v23  ;;  %v4589_v22 = vld [vmem:[%s7148_s1 + $0x150] sm:$0xff]  }
  0x44   :  { %2622 = vmatprep.mubr.bf16.mxu1 %v4445_v24  ;;  %2970 = vmatprep.subr.bf16.mxu0 %v4907_v0  ;;  %v4524_v23 = vld [vmem:[%s7148_s1 + $0x1b0] sm:$0xff]   ;;  %v4515_v24 = vld [vmem:[%s7149_s0 + $0x288] ss:$36 sps:$4 sm:$0xff]  }
  0x46   :  { %2682 = vmatpush1.bf16.msra.mxu1 %v4442_v25  ;;  %2971 = vmatpush1.bf16.msra.mxu0 %v4451_v26  ;;  %v4516_v25 = vld [vmem:[%s7149_s0 + $0x50] ss:$36 sps:$4 sm:$0xff]  }
  0x47   :  { %2683 = vmatprep.subr.bf16.mxu1 %v4907_v0  ;;  %2972 = vmatprep.subr.bf16.mxu0 %v4907_v0  ;;  %v4518_v26 = vld [vmem:[%s7149_s0 + $0x2d4] ss:$36 sps:$4 sm:$0xff]  }
  0x49   :  { %2431 = vmatmul.mubr.bf16.gmra.mxu0 %v4447_v27  ;;  %2623 = vmatmul.mubr.bf16.gmra.mxu1 %v4448_v28  ;;  %v4520_v27 = vld [vmem:[%s7149_s0 + $0x9c] ss:$36 sps:$4 sm:$0xff]   ;;  %v4539_v28 = vld [vmem:[%s7148_s1 + $0x1a8] sm:$0xff]  }
  0x4a   :  { %2684 = vmatpush1.bf16.msra.mxu1 %v4449_v29  ;;  %2438 = vmatprep.mubr.bf16.mxu0 %v4452_v30  ;;  %v4603_v29 = vld [vmem:[%s7148_s1 + $0x148] sm:$0xff]   ;;  %v4553_v30 = vld [vmem:[%s7148_s1 + $0x1a0] sm:$0xff]  }
  0x4b   :  { %2685 = vmatprep.subr.bf16.mxu1 %v4907_v0  ;;  %2630 = vmatprep.mubr.bf16.mxu1 %v4454_v31  ;;  %v4611_v31 = vld [vmem:[%s7148_s1 + $0x140] sm:$0xff]  }
  0x4c   :  { %2973 = vmatpush1.bf16.msra.mxu0 %v4467_v32  ;;  %v5279_v32 = vld [vmem:[%s7148_s1 + $0x238] sm:$0xff]  }
  0x4d   :  { %2974 = vmatprep.subr.bf16.mxu0 %v4907_v0 }
  0x4e   :  { %2686 = vmatpush1.bf16.msra.mxu1 %v4450_v33  ;;  %v4522_v33 = vld [vmem:[%s7149_s0 + $0x2d0] ss:$36 sps:$4 sm:$0xff]  }
  0x4f   :  { %2687 = vmatprep.subr.bf16.mxu1 %v4907_v0 }
  0x50   :  { %2975 = vmatpush1.bf16.msra.mxu0 %v4477_v36  ;;  %v4528_v36 = vld [vmem:[%s7149_s0 + $0xe4] ss:$36 sps:$4 sm:$0xff]  }
  0x51   :  { %2439 = vmatmul.mubr.bf16.gmra.mxu0 %v4456_v34  ;;  %2631 = vmatmul.mubr.bf16.gmra.mxu1 %v4457_v35  ;;  %v4523_v34 = vld [vmem:[%s7149_s0 + $0x98] ss:$36 sps:$4 sm:$0xff]  }
  0x52   :  { %2688 = vmatpush1.bf16.msra.mxu1 %v4458_v37  ;;  %2446 = vmatprep.mubr.bf16.mxu0 %v4460_v38  ;;  %v4526_v35 = vld [vmem:[%s7149_s0 + $0x31c] ss:$36 sps:$4 sm:$0xff]   ;;  %v4582_v38 = vld [vmem:[%s7148_s1 + $0x190] sm:$0xff]  }
  0x53   :  { %2689 = vmatprep.subr.bf16.mxu1 %v4907_v0  ;;  %2638 = vmatprep.mubr.bf16.mxu1 %v4462_v39  ;;  %v4567_v37 = vld [vmem:[%s7148_s1 + $0x198] sm:$0xff]  }
  0x54   :  { %2976 = vmatprep.subr.bf16.mxu0 %v4907_v0  ;;  %v4530_v39 = vld [vmem:[%s7149_s0 + $0x318] ss:$36 sps:$4 sm:$0xff]  }
  0x55   :  { %2977 = vmatpush1.bf16.msra.mxu0 %v4493_v40  ;;  %v4531_v40 = vld [vmem:[%s7149_s0 + $0xe0] ss:$36 sps:$4 sm:$0xff]  }
  0x56   :  { %2690 = vmatpush1.bf16.msra.mxu1 %v4459_v41  ;;  %2978 = vmatprep.subr.bf16.mxu0 %v4907_v0  ;;  %v4532_v41 = vld [vmem:[%s7149_s0 + $0x364] ss:$36 sps:$4 sm:$0xff]  }
  0x57   :  { %2691 = vmatprep.subr.bf16.mxu1 %v4907_v0 }
  0x59   :  { %2447 = vmatmul.mubr.bf16.gmra.mxu0 %v4464_v42  ;;  %2639 = vmatmul.mubr.bf16.gmra.mxu1 %v4465_v43  ;;  %v4534_v42 = vld [vmem:[%s7149_s0 + $0x12c] ss:$36 sps:$4 sm:$0xff]  }
  0x5a   :  { %2692 = vmatpush1.bf16.msra.mxu1 %v4466_v44  ;;  %2454 = vmatprep.mubr.bf16.mxu0 %v4469_v45  ;;  %v4596_v43 = vld [vmem:[%s7148_s1 + $0x188] sm:$0xff]   ;;  %v4610_v44 = vld [vmem:[%s7148_s1 + $0x180] sm:$0xff]  }
  0x5b   :  { %2693 = vmatprep.subr.bf16.mxu1 %v4907_v0  ;;  %2646 = vmatprep.mubr.bf16.mxu1 %v4471_v46  ;;  %v4536_v45 = vld [vmem:[%s7149_s0 + $0x360] ss:$36 sps:$4 sm:$0xff]   ;;  %v4537_v46 = vld [vmem:[%s7149_s0 + $0x128] ss:$36 sps:$4 sm:$0xff]  }
  0x5c   :  { %2979 = vmatpush1.bf16.msra.mxu0 %v4503_v47  ;;  %v4540_v47 = vld [vmem:[%s7149_s0 + $0x3ac] ss:$36 sps:$4 sm:$0xff]  }
  0x5d   :  { %2980 = vmatprep.subr.bf16.mxu0 %v4907_v0 }
  0x5e   :  { %2694 = vmatpush1.bf16.msra.mxu1 %v4468_v48  ;;  %v4542_v48 = vld [vmem:[%s7149_s0 + $0x174] ss:$36 sps:$4 sm:$0xff]  }
  0x5f   :  { %2695 = vmatprep.subr.bf16.mxu1 %v4907_v0 }
  0x60   :  { %2981 = vmatpush1.bf16.msra.mxu0 %v4517_v51  ;;  %v4544_v51 = vld [vmem:[%s7149_s0 + $0x3a8] ss:$36 sps:$4 sm:$0xff]  }
  0x61   :  { %2455 = vmatmul.mubr.bf16.gmra.mxu0 %v4473_v49  ;;  %2647 = vmatmul.mubr.bf16.gmra.mxu1 %v4474_v50  ;;  %v4625_v49 = vld [vmem:[%s7148_s1 + $0x1f8] sm:$0xff]   ;;  %v4638_v50 = vld [vmem:[%s7148_s1 + $0x1f0] sm:$0xff]  }
  0x62   :  { %2696 = vmatpush2.bf16.msra.mxu1 %v4475_v52  ;;  %2462 = vmatprep.mubr.bf16.mxu0 %v4478_v53  ;;  %v4545_v52 = vld [vmem:[%s7149_s0 + $0x170] ss:$36 sps:$4 sm:$0xff]  }
  0x63   :  { %2697 = vmatprep.subr.bf16.mxu1 %v4907_v0  ;;  %2654 = vmatprep.mubr.bf16.mxu1 %v4480_v54  ;;  %v4547_v53 = vld [vmem:[%s7149_s0 + $0x3f4] ss:$36 sps:$4 sm:$0xff]   ;;  %v4549_v54 = vld [vmem:[%s7149_s0 + $0x1bc] ss:$36 sps:$4 sm:$0xff]  }
  0x64   :  { %2982 = vmatprep.subr.bf16.mxu0 %v4907_v0 }
  0x65   :  { %2983 = vmatpush1.bf16.msra.mxu0 %v4525_v55  ;;  %v4652_v55 = vld [vmem:[%s7148_s1 + $0x1e8] sm:$0xff]  }
  0x66   :  { %2698 = vmatpush2.bf16.msra.mxu1 %v4476_v56  ;;  %2984 = vmatprep.subr.bf16.mxu0 %v4907_v0  ;;  %v4551_v56 = vld [vmem:[%s7149_s0 + $0x3f0] ss:$36 sps:$4 sm:$0xff]  }
  0x67   :  { %2699 = vmatprep.subr.bf16.mxu1 %v4907_v0 }
  0x69   :  { %2463 = vmatmul.mubr.bf16.gmra.mxu0 %v4482_v57  ;;  %2655 = vmatmul.mubr.bf16.gmra.mxu1 %v4483_v58  ;;  %v4552_v57 = vld [vmem:[%s7149_s0 + $0x1b8] ss:$36 sps:$4 sm:$0xff]  }
  0x6a   :  { %2700 = vmatpush2.bf16.msra.mxu1 %v4484_v59  ;;  %2470 = vmatprep.mubr.bf16.mxu0 %v4486_v60  ;;  %v4554_v58 = vld [vmem:[%s7149_s0 + $0x43c] ss:$36 sps:$4 sm:$0xff]   ;;  %v4556_v59 = vld [vmem:[%s7149_s0 + $0x204] ss:$36 sps:$4 sm:$0xff]  }
  0x6b   :  { %2701 = vmatprep.subr.bf16.mxu1 %v4907_v0  ;;  %2662 = vmatprep.mubr.bf16.mxu1 %v4488_v61  ;;  %v4665_v60 = vld [vmem:[%s7148_s1 + $0x1e0] sm:$0xff]   ;;  %v4558_v61 = vld [vmem:[%s7149_s0 + $0x438] ss:$36 sps:$4 sm:$0xff]  }
  0x6c   :  { %2985 = vmatpush2.bf16.msra.mxu0 %v4538_v62  ;;  %v4559_v62 = vld [vmem:[%s7149_s0 + $0x200] ss:$36 sps:$4 sm:$0xff]  }
  0x6d   :  { %2986 = vmatprep.subr.bf16.mxu0 %v4907_v0 }
  0x6e   :  { %2702 = vmatpush2.bf16.msra.mxu1 %v4485_v63  ;;  %v4561_v63 = vld [vmem:[%s7149_s0 + $0x484] ss:$36 sps:$4 sm:$0xff]  }
  0x6f   :  { %2703 = vmatprep.subr.bf16.mxu1 %v4907_v0 }
  0x70   :  { %2987 = vmatpush2.bf16.msra.mxu0 %v4546_v3  ;;  %v4566_v3 = vld [vmem:[%s7149_s0 + $0x248] ss:$36 sps:$4 sm:$0xff]  }
  0x71   :  { %2471 = vmatmul.mubr.bf16.gmra.mxu0 %v4490_v1  ;;  %2663 = vmatmul.mubr.bf16.gmra.mxu1 %v4491_v2  ;;  %v4563_v1 = vld [vmem:[%s7149_s0 + $0x24c] ss:$36 sps:$4 sm:$0xff]   ;;  %v4565_v2 = vld [vmem:[%s7149_s0 + $0x480] ss:$36 sps:$4 sm:$0xff]  }
  0x72   :  { %2704 = vmatpush2.bf16.msra.mxu1 %v4492_v4  ;;  %2478 = vmatprep.mubr.bf16.mxu0 %v4495_v5  ;;  %v4569_v4 = vld [vmem:[%s7149_s0 + $0x4cc] ss:$36 sps:$4 sm:$0xff]   ;;  %v4571_v5 = vld [vmem:[%s7149_s0 + $0x294] ss:$36 sps:$4 sm:$0xff]  }
  0x73   :  { %2705 = vmatprep.subr.bf16.mxu1 %v4907_v0  ;;  %2670 = vmatprep.mubr.bf16.mxu1 %v4497_v6  ;;  %v4679_v6 = vld [vmem:[%s7148_s1 + $0x1d8] sm:$0xff]  }
  0x74   :  { %2988 = vmatprep.subr.bf16.mxu0 %v4907_v0 }
  0x75   :  { %2989 = vmatpush2.bf16.msra.mxu0 %v4560_v7  ;;  %v4573_v7 = vld [vmem:[%s7149_s0 + $0x4c8] ss:$36 sps:$4 sm:$0xff]  }
  0x76   :  { %2706 = vmatpush2.bf16.msra.mxu1 %v4494_v8  ;;  %2990 = vmatprep.subr.bf16.mxu0 %v4907_v0  ;;  %v4574_v8 = vld [vmem:[%s7149_s0 + $0x290] ss:$36 sps:$4 sm:$0xff]  }
  0x77   :  { %2707 = vmatprep.subr.bf16.mxu1 %v4907_v0 }
  0x79   :  { %2479 = vmatmul.mubr.bf16.gmra.mxu0 %v4499_v9  ;;  %2671 = vmatmul.mubr.bf16.gmra.mxu1 %v4500_v10  ;;  %v4575_v9 = vld [vmem:[%s7149_s0 + $0x514] ss:$36 sps:$4 sm:$0xff]   ;;  %v4577_v10 = vld [vmem:[%s7149_s0 + $0x2dc] ss:$36 sps:$4 sm:$0xff]  }
  0x7a   :  { %2708 = vmatpush2.bf16.msra.mxu1 %v4501_v11  ;;  %2486 = vmatprep.mubr.bf16.mxu0 %v4504_v12  ;;  %v4579_v11 = vld [vmem:[%s7149_s0 + $0x510] ss:$36 sps:$4 sm:$0xff]   ;;  %v4580_v12 = vld [vmem:[%s7149_s0 + $0x2d8] ss:$36 sps:$4 sm:$0xff]  }
  0x7b   :  { %2709 = vmatprep.subr.bf16.mxu1 %v4907_v0  ;;  %2711 = vmatprep.mubr.bf16.mxu1 %v4508_v13  ;;  %v4583_v13 = vld [vmem:[%s7149_s0 + $0x55c] ss:$36 sps:$4 sm:$0xff]  }
  0x7c   :  { %2991 = vmatpush2.bf16.msra.mxu0 %v4568_v14  ;;  %v4585_v14 = vld [vmem:[%s7149_s0 + $0x324] ss:$36 sps:$4 sm:$0xff]  }
  0x7d   :  { %2992 = vmatprep.subr.bf16.mxu0 %v4907_v0 }
  0x7e   :  { %2710 = vmatpush2.bf16.msra.mxu1 %v4502_v15  ;;  %v4692_v15 = vld [vmem:[%s7148_s1 + $0x1d0] sm:$0xff]  }
  0x7f   :  { %3257 = vmatprep.subr.bf16.mxu1 %v4907_v0 }
  0x80   :  { %2993 = vmatpush2.bf16.msra.mxu0 %v4581_v18  ;;  %v4590_v18 = vld [vmem:[%s7149_s0 + $0x5a4] ss:$36 sps:$4 sm:$0xff]  }
  0x81   :  { %2487 = vmatmul.mubr.bf16.gmra.mxu0 %v4509_v17  ;;  %2712 = vmatmul.mubr.bf16.vlgmr.msra.gmra.mxu1 %v4506_v16  ;;  %v4587_v16 = vld [vmem:[%s7149_s0 + $0x558] ss:$36 sps:$4 sm:$0xff]   ;;  %v4588_v17 = vld [vmem:[%s7149_s0 + $0x320] ss:$36 sps:$4 sm:$0xff]  }
  0x82   :  { %3258 = vmatpush1.bf16.msra.mxu1 %v4510_v19  ;;  %2494 = vmatprep.mubr.bf16.mxu0 %v4511_v20  ;;  %v4592_v19 = vld [vmem:[%s7149_s0 + $0x36c] ss:$36 sps:$4 sm:$0xff]   ;;  %v4594_v20 = vld [vmem:[%s7149_s0 + $0x5a0] ss:$36 sps:$4 sm:$0xff]  }
  0x83   :  { %2719 = vmatprep.mubr.bf16.mxu1 %v4513_v21  ;;  %3259 = vmatprep.subr.bf16.mxu1 %v4907_v0  ;;  %v4595_v21 = vld [vmem:[%s7149_s0 + $0x368] ss:$36 sps:$4 sm:$0xff]  }
  0x84   :  { %2994 = vmatprep.subr.bf16.mxu0 %v4907_v0 }
  0x85   :  { %2995 = vmatpush2.bf16.msra.mxu0 %v4589_v22  ;;  %v4597_v22 = vld [vmem:[%s7149_s0 + $0x5ec] ss:$36 sps:$4 sm:$0xff]  }
  0x86   :  { %3260 = vmatpush1.bf16.msra.mxu1 %v4524_v23  ;;  %2996 = vmatprep.subr.bf16.mxu0 %v4907_v0  ;;  %v4599_v23 = vld [vmem:[%s7149_s0 + $0x3b4] ss:$36 sps:$4 sm:$0xff]  }
  0x87   :  { %3261 = vmatprep.subr.bf16.mxu1 %v4907_v0 }
  0x89   :  { %2495 = vmatmul.mubr.bf16.gmra.mxu0 %v4515_v24  ;;  %2720 = vmatmul.mubr.bf16.gmra.mxu1 %v4516_v25  ;;  %v4706_v24 = vld [vmem:[%s7148_s1 + $0x1c8] sm:$0xff]  }
  0x8a   :  { %2502 = vmatprep.mubr.bf16.mxu0 %v4518_v26  ;;  %2727 = vmatprep.mubr.bf16.mxu1 %v4520_v27  ;;  %v4601_v25 = vld [vmem:[%s7149_s0 + $0x5e8] ss:$36 sps:$4 sm:$0xff]   ;;  %v4602_v26 = vld [vmem:[%s7149_s0 + $0x3b0] ss:$36 sps:$4 sm:$0xff]  }
  0x8b   :  { %3262 = vmatpush1.bf16.msra.mxu1 %v4539_v28  ;;  %2997 = vmatpush2.bf16.msra.mxu0 %v4603_v29  ;;  %v4604_v27 = vld [vmem:[%s7149_s0 + $0x634] ss:$36 sps:$4 sm:$0xff]   ;;  %v4606_v28 = vld [vmem:[%s7149_s0 + $0x3fc] ss:$36 sps:$4 sm:$0xff]  }
  0x8c   :  { %3263 = vmatprep.subr.bf16.mxu1 %v4907_v0  ;;  %2998 = vmatprep.subr.bf16.mxu0 %v4907_v0  ;;  %v4608_v29 = vld [vmem:[%s7149_s0 + $0x630] ss:$36 sps:$4 sm:$0xff]  }
  0x8f   :  { %3264 = vmatpush1.bf16.msra.mxu1 %v4553_v30  ;;  %2999 = vmatpush2.bf16.msra.mxu0 %v4611_v31  ;;  %v4612_v30 = vld [vmem:[%s7149_s0 + $0x67c] ss:$36 sps:$4 sm:$0xff]   ;;  %v4614_v31 = vld [vmem:[%s7149_s0 + $0x444] ss:$36 sps:$4 sm:$0xff]  }
  0x90   :  { %3265 = vmatprep.subr.bf16.mxu1 %v4907_v0  ;;  %4305 = vmatprep.subr.bf16.mxu0 %v5279_v32 }
  0x91   :  { %2503 = vmatmul.mubr.bf16.gmra.mxu0 %v4522_v33  ;;  %2728 = vmatmul.mubr.bf16.gmra.mxu1 %v4523_v34  ;;  %v4719_v33 = vld [vmem:[%s7148_s1 + $0x1c0] sm:$0xff]   ;;  %v4616_v34 = vld [vmem:[%s7149_s0 + $0x678] ss:$36 sps:$4 sm:$0xff]  }
  0x92   :  { %2510 = vmatprep.mubr.bf16.mxu0 %v4526_v35  ;;  %2735 = vmatprep.mubr.bf16.mxu1 %v4528_v36  ;;  %v4617_v35 = vld [vmem:[%s7149_s0 + $0x440] ss:$36 sps:$4 sm:$0xff]   ;;  %v4618_v36 = vld [vmem:[%s7149_s0 + $0x48c] ss:$36 sps:$4 sm:$0xff]  }
  0x93   :  { %3266 = vmatpush1.bf16.msra.mxu1 %v4567_v37  ;;  %v4622_v37 = vld [vmem:[%s7149_s0 + $0x14] ss:$36 sps:$4 sm:$0xff]  }
  0x94   :  { %3267 = vmatprep.subr.bf16.mxu1 %v4907_v0 }
  0x97   :  { %3268 = vmatpush1.bf16.msra.mxu1 %v4582_v38  ;;  %v4620_v38 = vld [vmem:[%s7149_s0 + $0x10] ss:$36 sps:$4 sm:$0xff]  }
  0x98   :  { %3269 = vmatprep.subr.bf16.mxu1 %v4907_v0 }
  0x99   :  { %2511 = vmatmul.mubr.bf16.gmra.mxu0 %v4530_v39  ;;  %2736 = vmatmul.mubr.bf16.gmra.mxu1 %v4531_v40  ;;  %v4623_v39 = vld [vmem:[%s7149_s0 + $0x488] ss:$36 sps:$4 sm:$0xff]   ;;  %v4626_v40 = vld [vmem:[%s7149_s0 + $0x4d4] ss:$36 sps:$4 sm:$0xff]  }
  0x9a   :  { %2518 = vmatprep.mubr.bf16.mxu0 %v4532_v41  ;;  %2743 = vmatprep.mubr.bf16.mxu1 %v4534_v42  ;;  %v4628_v41 = vld [vmem:[%s7149_s0 + $0x5c] ss:$36 sps:$4 sm:$0xff]   ;;  %v4651_v42 = vld [vmem:[%s7148_s1 + $0x230] sm:$0xff]  }
  0x9b   :  { %3270 = vmatpush1.bf16.msra.mxu1 %v4596_v43 }
  0x9c   :  { %3271 = vmatprep.subr.bf16.mxu1 %v4907_v0 }
  0x9f   :  { %3272 = vmatpush1.bf16.msra.mxu1 %v4610_v44 }
  0xa0   :  { %3273 = vmatprep.subr.bf16.mxu1 %v4907_v0 }
  0xa1   :  { %2519 = vmatmul.mubr.bf16.gmra.mxu0 %v4536_v45  ;;  %2744 = vmatmul.mubr.bf16.gmra.mxu1 %v4537_v46 }
  0xa2   :  { %2526 = vmatprep.mubr.bf16.mxu0 %v4540_v47  ;;  %2751 = vmatprep.mubr.bf16.mxu1 %v4542_v48  ;;  %v4678_v47 = vld [vmem:[%s7148_s1 + $0x228] sm:$0xff]  }
  0xa3   :  { %3274 = vmatpush2.bf16.msra.mxu1 %v4625_v49 }
  0xa4   :  { %3275 = vmatprep.subr.bf16.mxu1 %v4907_v0 }
  0xa7   :  { %3276 = vmatpush2.bf16.msra.mxu1 %v4638_v50  ;;  %v4630_v50 = vld [vmem:[%s7149_s0 + $0x4d0] ss:$36 sps:$4 sm:$0xff]  }
  0xa8   :  { %3277 = vmatprep.subr.bf16.mxu1 %v4907_v0 }
  0xa9   :  { %2527 = vmatmul.mubr.bf16.gmra.mxu0 %v4544_v51  ;;  %2752 = vmatmul.mubr.bf16.gmra.mxu1 %v4545_v52  ;;  %v4632_v51 = vld [vmem:[%s7149_s0 + $0x51c] ss:$36 sps:$4 sm:$0xff]   ;;  %v4634_v52 = vld [vmem:[%s7149_s0 + $0xa4] ss:$36 sps:$4 sm:$0xff]  }
  0xaa   :  { %2534 = vmatprep.mubr.bf16.mxu0 %v4547_v53  ;;  %2759 = vmatprep.mubr.bf16.mxu1 %v4549_v54 }
  0xab   :  { %3278 = vmatpush2.bf16.msra.mxu1 %v4652_v55  ;;  %v4705_v55 = vld [vmem:[%s7148_s1 + $0x220] sm:$0xff]  }
  0xac   :  { %3279 = vmatprep.subr.bf16.mxu1 %v4907_v0 }
  0xaf   :  { %3280 = vmatpush2.bf16.msra.mxu1 %v4665_v60  ;;  %v4732_v60 = vld [vmem:[%s7148_s1 + $0x218] sm:$0xff]  }
  0xb0   :  { %3281 = vmatprep.subr.bf16.mxu1 %v4907_v0 }
  0xb1   :  { %2535 = vmatmul.mubr.bf16.gmra.mxu0 %v4551_v56  ;;  %2760 = vmatmul.mubr.bf16.gmra.mxu1 %v4552_v57 }
  0xb2   :  { %2542 = vmatprep.mubr.bf16.mxu0 %v4554_v58  ;;  %2767 = vmatprep.mubr.bf16.mxu1 %v4556_v59 }
  0xb3   :  { %3282 = vmatpush2.bf16.msra.mxu1 %v4679_v6 }
  0xb4   :  { %3283 = vmatprep.subr.bf16.mxu1 %v4907_v0 }
  0xb7   :  { %3284 = vmatpush2.bf16.msra.mxu1 %v4692_v15  ;;  %v4650_v15 = vld [vmem:[%s7149_s0 + $0x134] ss:$36 sps:$4 sm:$0xff]  }
  0xb8   :  { %3285 = vmatprep.subr.bf16.mxu1 %v4907_v0 }
  0xb9   :  { %2543 = vmatmul.mubr.bf16.gmra.mxu0 %v4558_v61  ;;  %2768 = vmatmul.mubr.bf16.gmra.mxu1 %v4559_v62 }
  0xba   :  { %2550 = vmatprep.mubr.bf16.mxu0 %v4561_v63  ;;  %2775 = vmatprep.mubr.bf16.mxu1 %v4563_v1  ;;  %v4636_v63 = vld [vmem:[%s7149_s0 + $0x518] ss:$36 sps:$4 sm:$0xff]   ;;  %v4637_v1 = vld [vmem:[%s7149_s0 + $0xa0] ss:$36 sps:$4 sm:$0xff]  }
  0xbb   :  { %3286 = vmatpush2.bf16.msra.mxu1 %v4706_v24  ;;  %v4645_v24 = vld [vmem:[%s7149_s0 + $0x5a8] ss:$36 sps:$4 sm:$0xff]  }
  0xbc   :  { %3287 = vmatprep.subr.bf16.mxu1 %v4907_v0  ;;  %v4609_v0 = vld [vmem:[%s7149_s0 + $0x3f8] ss:$36 sps:$4 sm:$0xff]  }
  0xbf   :  { %3288 = vmatpush2.bf16.msra.mxu1 %v4719_v33 }
  0xc1   :  { %2551 = vmatmul.mubr.bf16.gmra.mxu0 %v4565_v2  ;;  %2776 = vmatmul.mubr.bf16.gmra.mxu1 %v4566_v3  ;;  %v4639_v2 = vld [vmem:[%s7149_s0 + $0x564] ss:$36 sps:$4 sm:$0xff]   ;;  %v4641_v3 = vld [vmem:[%s7149_s0 + $0xec] ss:$36 sps:$4 sm:$0xff]  }
  0xc2   :  { %2558 = vmatprep.mubr.bf16.mxu0 %v4569_v4  ;;  %2783 = vmatprep.mubr.bf16.mxu1 %v4571_v5 }
  0xc9   :  { %2559 = vmatmul.mubr.bf16.gmra.mxu0 %v4573_v7  ;;  %2784 = vmatmul.mubr.bf16.gmra.mxu1 %v4574_v8 }
  0xca   :  { %2566 = vmatprep.mubr.bf16.mxu0 %v4575_v9  ;;  %2791 = vmatprep.mubr.bf16.mxu1 %v4577_v10 }
  0xd1   :  { %2567 = vmatmul.mubr.bf16.gmra.mxu0 %v4579_v11  ;;  %2792 = vmatmul.mubr.bf16.gmra.mxu1 %v4580_v12  ;;  %v4643_v12 = vld [vmem:[%s7149_s0 + $0x560] ss:$36 sps:$4 sm:$0xff]  }
  0xd2   :  { %2574 = vmatprep.mubr.bf16.mxu0 %v4583_v13  ;;  %2799 = vmatprep.mubr.bf16.mxu1 %v4585_v14  ;;  %v4644_v13 = vld [vmem:[%s7149_s0 + $0xe8] ss:$36 sps:$4 sm:$0xff]  }
  0xd3   :  { %v4647_v14 = vld [vmem:[%s7149_s0 + $0x5ac] ss:$36 sps:$4 sm:$0xff]  }
  0xd9   :  { %2575 = vmatmul.mubr.bf16.gmra.mxu0 %v4587_v16  ;;  %2800 = vmatmul.mubr.bf16.gmra.mxu1 %v4588_v17 }
  0xda   :  { %2582 = vmatprep.mubr.bf16.mxu0 %v4590_v18  ;;  %2807 = vmatprep.mubr.bf16.mxu1 %v4592_v19 }
  0xe1   :  { %2583 = vmatmul.mubr.bf16.gmra.mxu0 %v4594_v20  ;;  %2808 = vmatmul.mubr.bf16.gmra.mxu1 %v4595_v21 }
  0xe2   :  { %2590 = vmatprep.mubr.bf16.mxu0 %v4597_v22  ;;  %2815 = vmatprep.mubr.bf16.mxu1 %v4599_v23 }
  0xe9   :  { %2591 = vmatmul.mubr.bf16.gmra.mxu0 %v4601_v25  ;;  %2816 = vmatmul.mubr.bf16.gmra.mxu1 %v4602_v26  ;;  %v4648_v25 = vld [vmem:[%s7149_s0 + $0x130] ss:$36 sps:$4 sm:$0xff]  }
  0xea   :  { %2598 = vmatprep.mubr.bf16.mxu0 %v4604_v27  ;;  %2823 = vmatprep.mubr.bf16.mxu1 %v4606_v28  ;;  %v4655_v26 = vld [vmem:[%s7149_s0 + $0x5f4] ss:$36 sps:$4 sm:$0xff]   ;;  %v4658_v27 = vld [vmem:[%s7149_s0 + $0x17c] ss:$36 sps:$4 sm:$0xff]  }
  0xf1   :  { %2599 = vmatmul.mubr.bf16.gmra.mxu0 %v4608_v29  ;;  %2824 = vmatmul.mubr.bf16.gmra.mxu1 %v4609_v0 }
  0xf2   :  { %2606 = vmatprep.mubr.bf16.mxu0 %v4612_v30  ;;  %2831 = vmatprep.mubr.bf16.mxu1 %v4614_v31  ;;  %v4757_v31 = vld [vmem:[%s7148_s1 + $0x210] sm:$0xff]  }
  0xf9   :  { %2607 = vmatmul.mubr.bf16.gmra.mxu0 %v4616_v34  ;;  %2832 = vmatmul.mubr.bf16.gmra.mxu1 %v4617_v35 }
  0xfa   :  { %2839 = vmatprep.mubr.bf16.mxu1 %v4618_v36  ;;  %3000 = vmatprep.mubr.bf16.mxu0 %v4622_v37  ;;  %v4653_v37 = vld [vmem:[%s7149_s0 + $0x5f0] ss:$36 sps:$4 sm:$0xff]  }
 0x101   :  { %v5515_v43 = vpop.f32.mrf.mxu0  ;;  %v5517_v44 = vpop.f32.mrf.mxu1  ;;  %2840 = vmatmul.mubr.bf16.gmra.mxu1 %v4623_v39  ;;  %3001 = vmatmul.mubr.bf16.vlgmr.msra.gmra.mxu0 %v4620_v38  ;;  %v4656_v38 = vld [vmem:[%s7149_s0 + $0x178] ss:$36 sps:$4 sm:$0xff]  }
 0x102   :  { %4306 = vmatpush3.bf16.msra.mxu0 %v5279_v32  ;;  %2847 = vmatprep.mubr.bf16.mxu1 %v4626_v40  ;;  %v4631_v32 = vld [vmem:[%s7149_s0 + $0x58] ss:$36 sps:$4 sm:$0xff]   ;;  %v4664_v40 = vld [vmem:[%s7149_s0 + $0x1c4] ss:$36 sps:$4 sm:$0xff]  }
 0x103   :  { %v2426_v45 = vpop.f32.mrf.mxu0  ;;  %v2618_v46 = vpop.f32.mrf.mxu1  ;;  %3008 = vmatprep.mubr.bf16.mxu0 %v4628_v41  ;;  %4307 = vmatprep.subr.bf16.mxu0 %v4651_v42  ;;  %v4661_v39 = vld [vmem:[%s7149_s0 + $0x63c] ss:$36 sps:$4 sm:$0xff]  }
 0x105   :  { %v5523_v48 = vpop.f32.mrf.mxu0  ;;  %v5525_v49 = vpop.f32.mrf.mxu1 }
 0x106   :  { %4308 = vmatpush3.bf16.msra.mxu0 %v4651_v42 }
 0x107   :  { %v2429_v53 = vpop.f32.mrf.mxu0  ;;  %v2621_v54 = vpop.f32.mrf.mxu1  ;;  %4309 = vmatprep.subr.bf16.mxu0 %v4678_v47 }
 0x108   :  { %v4662_v53 = vld [vmem:[%s7149_s0 + $0x1c0] ss:$36 sps:$4 sm:$0xff]  }
 0x109   :  { %v5542_v56 = vpop.f32.mrf.mxu0  ;;  %v5544_v57 = vpop.f32.mrf.mxu1  ;;  %2848 = vmatmul.mubr.bf16.gmra.mxu1 %v4630_v50  ;;  %3009 = vmatmul.mubr.bf16.gmra.mxu0 %v4631_v32  ;;  %v4668_v54 = vld [vmem:[%s7149_s0 + $0x684] ss:$36 sps:$4 sm:$0xff]  }
 0x10a   :  { %2855 = vmatprep.mubr.bf16.mxu1 %v4632_v51  ;;  %3016 = vmatprep.mubr.bf16.mxu0 %v4634_v52  ;;  %v4659_v52 = vld [vmem:[%s7149_s0 + $0x638] ss:$36 sps:$4 sm:$0xff]  }
 0x10b   :  { %v2434_v58 = vpop.f32.mrf.mxu0  ;;  %v2626_v59 = vpop.f32.mrf.mxu1  ;;  %4310 = vmatpush3.bf16.msra.mxu0 %v4678_v47 }
 0x10c   :  { %4311 = vmatprep.subr.bf16.mxu0 %v4705_v55 }
 0x10d   :  { %v5549_v61 = vpop.f32.mrf.mxu0  ;;  %v5551_v62 = vpop.f32.mrf.mxu1 }
 0x10f   :  { %v2437_v4 = vpop.f32.mrf.mxu0  ;;  %v2629_v5 = vpop.f32.mrf.mxu1  ;;  %4312 = vmatpush3.bf16.msra.mxu0 %v4705_v55  ;;  %v4671_v55 = vld [vmem:[%s7149_s0 + $0x20c] ss:$36 sps:$4 sm:$0xff]  }
 0x110   :  { %4313 = vmatprep.subr.bf16.mxu0 %v4732_v60  ;;  %v4666_v5 = vld [vmem:[%s7149_s0 + $0x680] ss:$36 sps:$4 sm:$0xff]  }
 0x111   :  { %v5565_v6 = vpop.f32.mrf.mxu0  ;;  %v5567_v7 = vpop.f32.mrf.mxu1  ;;  %2856 = vmatmul.mubr.bf16.gmra.mxu1 %v4636_v63  ;;  %3017 = vmatmul.mubr.bf16.gmra.mxu0 %v4637_v1 }
 0x112   :  { %2863 = vmatprep.mubr.bf16.mxu1 %v4639_v2  ;;  %3024 = vmatprep.mubr.bf16.mxu0 %v4641_v3 }
 0x113   :  { %v2442_v8 = vpop.f32.mrf.mxu0  ;;  %v2634_v9 = vpop.f32.mrf.mxu1  ;;  %4314 = vmatpush3.bf16.msra.mxu0 %v4732_v60 }
 0x114   :  { %4315 = vmatprep.subr.bf16.mxu0 %v4757_v31  ;;  %v4669_v8 = vld [vmem:[%s7149_s0 + $0x208] ss:$36 sps:$4 sm:$0xff]  }
 0x115   :  { %v5569_v10 = vpop.f32.mrf.mxu0  ;;  %v5571_v11 = vpop.f32.mrf.mxu1  ;;  %v4674_v9 = vld [vmem:[%s7149_s0 + $0x6cc] ss:$36 sps:$4 sm:$0xff]  }
 0x117   :  { %v2445_v16 = vpop.f32.mrf.mxu0  ;;  %v2637_v17 = vpop.f32.mrf.mxu1  ;;  %4316 = vmatpush3.bf16.msra.mxu0 %v4757_v31 }
 0x119   :  { %v5585_v18 = vpop.f32.mrf.mxu0  ;;  %v5587_v19 = vpop.f32.mrf.mxu1  ;;  %2864 = vmatmul.mubr.bf16.gmra.mxu1 %v4643_v12  ;;  %3025 = vmatmul.mubr.bf16.gmra.mxu0 %v4644_v13  ;;  %v4677_v12 = vld [vmem:[%s7149_s0 + $0x254] ss:$36 sps:$4 sm:$0xff]  }
 0x11a   :  { %2871 = vmatprep.mubr.bf16.mxu1 %v4647_v14  ;;  %3032 = vmatprep.mubr.bf16.mxu0 %v4650_v15 }
 0x11b   :  { %v2450_v20 = vpop.f32.mrf.mxu0  ;;  %v2642_v21 = vpop.f32.mrf.mxu1 }
 0x11c   :  { %v5675_v21 = vld [vmem:[%s7150_s2] ss:$0 sm:$0xff] }
 0x11d   :  { %v5589_v22 = vpop.f32.mrf.mxu0  ;;  %v5591_v23 = vpop.f32.mrf.mxu1 }
 0x11f   :  { %v2453_v28 = vpop.f32.mrf.mxu0  ;;  %v2645_v29 = vpop.f32.mrf.mxu1 }
 0x120   :  { %v4682_v28 = vld [vmem:[%s7149_s0 + $0x714] ss:$36 sps:$4 sm:$0xff]   ;;  %v4685_v29 = vld [vmem:[%s7149_s0 + $0x29c] ss:$36 sps:$4 sm:$0xff]  }
 0x121   :  { %v5605_v0 = vpop.f32.mrf.mxu0  ;;  %v5607_v30 = vpop.f32.mrf.mxu1  ;;  %2872 = vmatmul.mubr.bf16.gmra.mxu1 %v4645_v24  ;;  %3033 = vmatmul.mubr.bf16.gmra.mxu0 %v4648_v25 }
 0x122   :  { %2879 = vmatprep.mubr.bf16.mxu1 %v4655_v26  ;;  %3040 = vmatprep.mubr.bf16.mxu0 %v4658_v27  ;;  %v4672_v26 = vld [vmem:[%s7149_s0 + $0x6c8] ss:$36 sps:$4 sm:$0xff]   ;;  %v4675_v27 = vld [vmem:[%s7149_s0 + $0x250] ss:$36 sps:$4 sm:$0xff]  }
 0x123   :  { %v2458_v33 = vpop.f32.mrf.mxu0  ;;  %v2650_v34 = vpop.f32.mrf.mxu1 }
 0x124   :  { %v2425_v34 = vadd.f32 %v5675_v21, %v5515_v43 }
 0x125   :  { %v5612_v35 = vpop.f32.mrf.mxu0  ;;  %v5614_v36 = vpop.f32.mrf.mxu1 }
 0x126   :  { %7152 = vst [vmem:[#allocation2_spill] sm:$0xff] %v5614_v36 }
 0x127   :  { %v2461_v41 = vpop.f32.mrf.mxu0  ;;  %v2653_v42 = vpop.f32.mrf.mxu1 }
 0x129   :  { %v5628_v45 = vpop.f32.mrf.mxu0  ;;  %v5630_v46 = vpop.f32.mrf.mxu1  ;;  %2880 = vmatmul.mubr.bf16.gmra.mxu1 %v4653_v37  ;;  %3041 = vmatmul.mubr.bf16.gmra.mxu0 %v4656_v38 }
 0x12a   :  { %7153 = vst [vmem:[#allocation3_spill] sm:$0xff] %v5630_v46  ;;  %2887 = vmatprep.mubr.bf16.mxu1 %v4661_v39  ;;  %3048 = vmatprep.mubr.bf16.mxu0 %v4664_v40  ;;  %v4782_v40 = vld [vmem:[%s7148_s1 + $0x208] sm:$0xff]  }
 0x12b   :  { %v2466_v47 = vpop.f32.mrf.mxu0  ;;  %v2658_v50 = vpop.f32.mrf.mxu1  ;;  %4317 = vmatprep.subr.bf16.mxu0 %v4782_v40 }
 0x12c   :  { %v2428_v47 = vadd.f32 %v5675_v21, %v5523_v48  ;;  %4318 = vmatpush3.bf16.msra.mxu0 %v4782_v40  ;;  %v4691_v48 = vld [vmem:[%s7149_s0 + $0x2e4] ss:$36 sps:$4 sm:$0xff]  }
 0x12d   :  { %v5632_v32 = vpop.f32.mrf.mxu0  ;;  %v5634_v51 = vpop.f32.mrf.mxu1 }
 0x12e   :  { %7154 = vst [vmem:[#allocation4_spill] sm:$0xff] %v5634_v51 }
 0x12f   :  { %v2469_v58 = vpop.f32.mrf.mxu0  ;;  %v2661_v59 = vpop.f32.mrf.mxu1 }
 0x131   :  { %v5648_v60 = vpop.f32.mrf.mxu0  ;;  %v5650_v63 = vpop.f32.mrf.mxu1  ;;  %2888 = vmatmul.mubr.bf16.gmra.mxu1 %v4659_v52  ;;  %3049 = vmatmul.mubr.bf16.gmra.mxu0 %v4662_v53  ;;  %v4680_v52 = vld [vmem:[%s7149_s0 + $0x710] ss:$36 sps:$4 sm:$0xff]   ;;  %v4683_v53 = vld [vmem:[%s7149_s0 + $0x298] ss:$36 sps:$4 sm:$0xff]  }
 0x132   :  { %7155 = vst [vmem:[#allocation5_spill] sm:$0xff] %v5650_v63  ;;  %2895 = vmatprep.mubr.bf16.mxu1 %v4668_v54  ;;  %3056 = vmatprep.mubr.bf16.mxu0 %v4671_v55  ;;  %v4688_v55 = vld [vmem:[%s7149_s0 + $0x75c] ss:$36 sps:$4 sm:$0xff]  }
 0x133   :  { %v2474_v1 = vpop.f32.mrf.mxu0  ;;  %v2666_v2 = vpop.f32.mrf.mxu1 }
 0x134   :  { %v2433_v1 = vadd.f32 %v5675_v21, %v5542_v56  ;;  %v4686_v56 = vld [vmem:[%s7149_s0 + $0x758] ss:$36 sps:$4 sm:$0xff]  }
 0x135   :  { %v5652_v3 = vpop.f32.mrf.mxu0  ;;  %v5654_v4 = vpop.f32.mrf.mxu1 }
 0x136   :  { %7156 = vst [vmem:[#allocation6_spill] sm:$0xff] %v5654_v4 }
 0x137   :  { %v2477_v13 = vpop.f32.mrf.mxu0  ;;  %v2669_v14 = vpop.f32.mrf.mxu1 }
 0x138   :  { %v2436_v13 = vadd.f32 %v5675_v21, %v5549_v61  ;;  %v4698_v61 = vld [vmem:[%s7149_s0 + $0x32c] ss:$36 sps:$4 sm:$0xff]  }
 0x139   :  { %v5668_v15 = vpop.f32.mrf.mxu0  ;;  %v5670_v16 = vpop.f32.mrf.mxu1  ;;  %2896 = vmatmul.mubr.bf16.gmra.mxu1 %v4666_v5  ;;  %3057 = vmatmul.mubr.bf16.gmra.mxu0 %v4669_v8 }
 0x13a   :  { %7157 = vst [vmem:[#allocation7_spill] sm:$0xff] %v5670_v16  ;;  %2903 = vmatprep.mubr.bf16.mxu1 %v4674_v9  ;;  %3064 = vmatprep.mubr.bf16.mxu0 %v4677_v12 }
 0x13b   :  { %v2482_v17 = vpop.f32.mrf.mxu0  ;;  %v2674_v20 = vpop.f32.mrf.mxu1 }
 0x13c   :  { %v4689_v20 = vld [vmem:[%s7149_s0 + $0x2e0] ss:$36 sps:$4 sm:$0xff]  }
 0x13d   :  { %v5677_v24 = vpop.f32.mrf.mxu0  ;;  %v5679_v25 = vpop.f32.mrf.mxu1 }
 0x13e   :  { %7158 = vst [vmem:[#allocation8_spill] sm:$0xff] %v5679_v25 }
 0x13f   :  { %v2485_v31 = vpop.f32.mrf.mxu0  ;;  %v2677_v33 = vpop.f32.mrf.mxu1 }
 0x140   :  { %v2441_v31 = vadd.f32 %v5675_v21, %v5565_v6  ;;  %v4693_v6 = vld [vmem:[%s7149_s0 + $0x7a0] ss:$36 sps:$4 sm:$0xff]  }
 0x141   :  { %v5695_v37 = vpop.f32.mrf.mxu0  ;;  %v2713_v38 = vpop.f32.mrf.mxu1  ;;  %2904 = vmatmul.mubr.bf16.gmra.mxu1 %v4672_v26  ;;  %3065 = vmatmul.mubr.bf16.gmra.mxu0 %v4675_v27  ;;  %v4695_v27 = vld [vmem:[%s7149_s0 + $0x7a4] ss:$36 sps:$4 sm:$0xff]  }
 0x142   :  { %v5697_v39 = vadd.f32 %v2713_v38, %v2425_v34  ;;  %2911 = vmatprep.mubr.bf16.mxu1 %v4682_v28  ;;  %3072 = vmatprep.mubr.bf16.mxu0 %v4685_v29 }
 0x143   :  { %v2490_v41 = vpop.f32.mrf.mxu0  ;;  %v2715_v42 = vpop.f32.mrf.mxu1 }
 0x144   :  { %v2444_v42 = vadd.f32 %v5675_v21, %v5569_v10  ;;  %v4704_v10 = vld [vmem:[%s7149_s0 + $0x374] ss:$36 sps:$4 sm:$0xff]  }
 0x145   :  { %v5704_v43 = vpop.f32.mrf.mxu0  ;;  %v2716_v50 = vpop.f32.mrf.mxu1 }
 0x146   :  { %v5712_v54 = vadd.f32 %v2716_v50, %v2428_v47 }
 0x147   :  { %v2493_v58 = vpop.f32.mrf.mxu0  ;;  %v2718_v59 = vpop.f32.mrf.mxu1 }
 0x148   :  { %v2449_v59 = vadd.f32 %v5675_v21, %v5585_v18  ;;  %v4699_v18 = vld [vmem:[%s7149_s0 + $0x7e8] ss:$36 sps:$4 sm:$0xff]  }
 0x149   :  { %v5722_v2 = vpop.f32.mrf.mxu0  ;;  %v2721_v5 = vpop.f32.mrf.mxu1  ;;  %2912 = vmatmul.mubr.bf16.gmra.mxu1 %v4680_v52  ;;  %3073 = vmatmul.mubr.bf16.gmra.mxu0 %v4683_v53  ;;  %v4696_v52 = vld [vmem:[%s7149_s0 + $0x328] ss:$36 sps:$4 sm:$0xff]  }
 0x14a   :  { %v5724_v8 = vadd.f32 %v2721_v5, %v2433_v1  ;;  %2919 = vmatprep.mubr.bf16.mxu1 %v4688_v55  ;;  %3080 = vmatprep.mubr.bf16.mxu0 %v4691_v48  ;;  %v4701_v55 = vld [vmem:[%s7149_s0 + $0x7ec] ss:$36 sps:$4 sm:$0xff]  }
 0x14b   :  { %v2498_v9 = vpop.f32.mrf.mxu0  ;;  %v2723_v12 = vpop.f32.mrf.mxu1 }
 0x14d   :  { %v5728_v14 = vpop.f32.mrf.mxu0  ;;  %v2724_v17 = vpop.f32.mrf.mxu1 }
 0x14e   :  { %v5736_v26 = vadd.f32 %v2724_v17, %v2436_v13  ;;  %v2452_v17 = vadd.f32 %v5675_v21, %v5589_v22  ;;  %v4712_v22 = vld [vmem:[%s7149_s0 + $0x3bc] ss:$36 sps:$4 sm:$0xff]  }
 0x14f   :  { %v2501_v28 = vpop.f32.mrf.mxu0  ;;  %v2726_v29 = vpop.f32.mrf.mxu1 }
 0x150   :  { %v4709_v28 = vld [vmem:[%s7149_s0 + $0x834] ss:$36 sps:$4 sm:$0xff]  }
 0x151   :  { %v5746_v33 = vpop.f32.mrf.mxu0  ;;  %v2729_v34 = vpop.f32.mrf.mxu1  ;;  %2920 = vmatmul.mubr.bf16.gmra.mxu1 %v4686_v56  ;;  %3081 = vmatmul.mubr.bf16.gmra.mxu0 %v4689_v20 }
 0x152   :  { %v5748_v38 = vadd.f32 %v2729_v34, %v2441_v31  ;;  %2927 = vmatprep.mubr.bf16.mxu1 %v4695_v27  ;;  %3088 = vmatprep.mubr.bf16.mxu0 %v4698_v61  ;;  %v4702_v27 = vld [vmem:[%s7149_s0 + $0x370] ss:$36 sps:$4 sm:$0xff]   ;;  %v2457_v34 = vadd.f32 %v5675_v21, %v5605_v0 }
 0x153   :  { %v2506_v40 = vpop.f32.mrf.mxu0  ;;  %v2731_v41 = vpop.f32.mrf.mxu1 }
 0x155   :  { %v5752_v47 = vpop.f32.mrf.mxu0  ;;  %v2732_v50 = vpop.f32.mrf.mxu1 }
 0x156   :  { %v5760_v53 = vadd.f32 %v2732_v50, %v2444_v42  ;;  %v4807_v50 = vld [vmem:[%s7148_s1 + $0x200] sm:$0xff]   ;;  %v2508_v16 = vadd.f32 %v5675_v21, %v5752_v47 }
 0x157   :  { %v2509_v48 = vpop.f32.mrf.mxu0  ;;  %v2734_v58 = vpop.f32.mrf.mxu1  ;;  %4319 = vmatprep.subr.bf16.mxu0 %v4807_v50  ;;  %v4756_v47 = vld [vmem:[%s7149_s0 + $0x13c] ss:$36 sps:$4 sm:$0xff]  }
 0x158   :  { %v4707_v48 = vld [vmem:[%s7149_s0 + $0x830] ss:$36 sps:$4 sm:$0xff]   ;;  %v4710_v58 = vld [vmem:[%s7149_s0 + $0x3b8] ss:$36 sps:$4 sm:$0xff]   ;;  %4320 = vmatpush3.bf16.msra.mxu0 %v4807_v50 }
 0x159   :  { %v5770_v1 = vpop.f32.mrf.mxu0  ;;  %v2737_v5 = vpop.f32.mrf.mxu1  ;;  %2928 = vmatmul.mubr.bf16.gmra.mxu1 %v4693_v6  ;;  %3089 = vmatmul.mubr.bf16.gmra.mxu0 %v4696_v52 }
 0x15a   :  { %v5772_v9 = vadd.f32 %v2737_v5, %v2449_v59  ;;  %2935 = vmatprep.mubr.bf16.mxu1 %v4701_v55  ;;  %3096 = vmatprep.mubr.bf16.mxu0 %v4704_v10  ;;  %v2460_v55 = vadd.f32 %v5675_v21, %v5612_v35  ;;  %v4715_v5 = vld [vmem:[%s7149_s0 + $0x87c] ss:$36 sps:$4 sm:$0xff]   ;;  %v4718_v35 = vld [vmem:[%s7149_s0 + $0x404] ss:$36 sps:$4 sm:$0xff]  }
 0x15b   :  { %v2514_v12 = vpop.f32.mrf.mxu0  ;;  %v2739_v13 = vpop.f32.mrf.mxu1 }
 0x15d   :  { %v5776_v56 = vpop.f32.mrf.mxu0  ;;  %v2740_v20 = vpop.f32.mrf.mxu1 }
 0x15e   :  { %v5784_v61 = vadd.f32 %v2740_v20, %v2452_v17  ;;  %v2465_v17 = vadd.f32 %v5675_v21, %v5628_v45  ;;  %v4713_v45 = vld [vmem:[%s7149_s0 + $0x878] ss:$36 sps:$4 sm:$0xff]   ;;  %v2516_v63 = vadd.f32 %v5675_v21, %v5776_v56  ;;  %v4763_v56 = vld [vmem:[%s7149_s0 + $0x184] ss:$36 sps:$4 sm:$0xff]  }
 0x15f   :  { %v2517_v29 = vpop.f32.mrf.mxu0  ;;  %v2742_v31 = vpop.f32.mrf.mxu1 }
 0x160   :  { %v2468_v29 = vadd.f32 %v5675_v21, %v5632_v32  ;;  %v4725_v32 = vld [vmem:[%s7149_s0 + $0x44c] ss:$36 sps:$4 sm:$0xff]  }
 0x161   :  { %v5794_v40 = vpop.f32.mrf.mxu0  ;;  %v2745_v41 = vpop.f32.mrf.mxu1  ;;  %2936 = vmatmul.mubr.bf16.gmra.mxu1 %v4699_v18  ;;  %3097 = vmatmul.mubr.bf16.gmra.mxu0 %v4702_v27 }
 0x162   :  { %v5796_v42 = vadd.f32 %v2745_v41, %v2457_v34  ;;  %2943 = vmatprep.mubr.bf16.mxu1 %v4709_v28  ;;  %3104 = vmatprep.mubr.bf16.mxu0 %v4712_v22  ;;  %v4716_v41 = vld [vmem:[%s7149_s0 + $0x400] ss:$36 sps:$4 sm:$0xff]  }
 0x163   :  { %v2522_v6 = vpop.f32.mrf.mxu0  ;;  %v2747_v52 = vpop.f32.mrf.mxu1 }
 0x164   :  { %v4722_v6 = vld [vmem:[%s7149_s0 + $0x8c4] ss:$36 sps:$4 sm:$0xff]  }
 0x165   :  { %v5803_v0 = vpop.f32.mrf.mxu0  ;;  %v2748_v10 = vpop.f32.mrf.mxu1 }
 0x166   :  { %v5811_v59 = vadd.f32 %v2748_v10, %v2460_v55  ;;  %v2473_v10 = vadd.f32 %v5675_v21, %v5648_v60  ;;  %v4720_v60 = vld [vmem:[%s7149_s0 + $0x8c0] ss:$36 sps:$4 sm:$0xff]   ;;  %v2524_v46 = vadd.f32 %v5675_v21, %v5803_v0  ;;  %v4769_v0 = vld [vmem:[%s7149_s0 + $0x1cc] ss:$36 sps:$4 sm:$0xff]  }
 0x167   :  { %v2525_v12 = vpop.f32.mrf.mxu0  ;;  %v2750_v13 = vpop.f32.mrf.mxu1 }
 0x168   :  { %v2476_v13 = vadd.f32 %v5675_v21, %v5652_v3  ;;  %v4731_v3 = vld [vmem:[%s7149_s0 + $0x1c] ss:$36 sps:$4 sm:$0xff]  }
 0x169   :  { %v5821_v20 = vpop.f32.mrf.mxu0  ;;  %v2753_v18 = vpop.f32.mrf.mxu1  ;;  %2944 = vmatmul.mubr.bf16.gmra.mxu1 %v4707_v48  ;;  %3105 = vmatmul.mubr.bf16.gmra.mxu0 %v4710_v58 }
 0x16a   :  { %v5823_v27 = vadd.f32 %v2753_v18, %v2465_v17  ;;  %2951 = vmatprep.mubr.bf16.mxu1 %v4715_v5  ;;  %3112 = vmatprep.mubr.bf16.mxu0 %v4718_v35 }
 0x16b   :  { %v2530_v28 = vpop.f32.mrf.mxu0  ;;  %v2755_v22 = vpop.f32.mrf.mxu1 }
 0x16c   :  { %v4723_v28 = vld [vmem:[%s7149_s0 + $0x448] ss:$36 sps:$4 sm:$0xff]  }
 0x16d   :  { %v5827_v31 = vpop.f32.mrf.mxu0  ;;  %v2756_v34 = vpop.f32.mrf.mxu1 }
 0x16e   :  { %v5835_v50 = vadd.f32 %v2756_v34, %v2468_v29  ;;  %v4728_v29 = vld [vmem:[%s7149_s0 + $0x494] ss:$36 sps:$4 sm:$0xff]  }
 0x16f   :  { %v2533_v52 = vpop.f32.mrf.mxu0  ;;  %v2758_v55 = vpop.f32.mrf.mxu1 }
 0x171   :  { %v5845_v48 = vpop.f32.mrf.mxu0  ;;  %v2761_v58 = vpop.f32.mrf.mxu1  ;;  %2952 = vmatmul.mubr.bf16.gmra.mxu1 %v4713_v45  ;;  %3113 = vmatmul.mubr.bf16.gmra.mxu0 %v4716_v41  ;;  %v2481_v41 = vadd.f32 %v5675_v21, %v5668_v15  ;;  %v4726_v15 = vld [vmem:[%s7149_s0 + $0x490] ss:$36 sps:$4 sm:$0xff]  }
 0x172   :  { %v5847_v5 = vadd.f32 %v2761_v58, %v2473_v10  ;;  %2959 = vmatprep.mubr.bf16.mxu1 %v4722_v6  ;;  %3120 = vmatprep.mubr.bf16.mxu0 %v4725_v32  ;;  %v2484_v58 = vadd.f32 %v5675_v21, %v5677_v24  ;;  %v4738_v24 = vld [vmem:[%s7149_s0 + $0x64] ss:$36 sps:$4 sm:$0xff]  }
 0x173   :  { %v2538_v35 = vpop.f32.mrf.mxu0  ;;  %v2763_v12 = vpop.f32.mrf.mxu1 }
 0x175   :  { %v5851_v17 = vpop.f32.mrf.mxu0  ;;  %v2764_v18 = vpop.f32.mrf.mxu1 }
 0x176   :  { %v5859_v22 = vadd.f32 %v2764_v18, %v2476_v13  ;;  %v4729_v13 = vld [vmem:[%s7149_s0 + $0x18] ss:$36 sps:$4 sm:$0xff]  }
 0x177   :  { %v2541_v34 = vpop.f32.mrf.mxu0  ;;  %v2766_v45 = vpop.f32.mrf.mxu1 }
 0x179   :  { %v5869_v6 = vpop.f32.mrf.mxu0  ;;  %v2769_v32 = vpop.f32.mrf.mxu1  ;;  %2960 = vmatmul.mubr.bf16.gmra.mxu1 %v4720_v60  ;;  %3121 = vmatmul.mubr.bf16.gmra.mxu0 %v4723_v28  ;;  %v4735_v60 = vld [vmem:[%s7149_s0 + $0x4dc] ss:$36 sps:$4 sm:$0xff]  }
 0x17a   :  { %v5871_v52 = vadd.f32 %v2769_v32, %v2481_v41  ;;  %3128 = vmatprep.mubr.bf16.mxu0 %v4728_v29  ;;  %3289 = vmatprep.mubr.bf16.mxu1 %v4731_v3  ;;  %v2489_v3 = vadd.f32 %v5675_v21, %v5695_v37  ;;  %v4733_v37 = vld [vmem:[%s7149_s0 + $0x4d8] ss:$36 sps:$4 sm:$0xff]  }
 0x17b   :  { %v2546_v55 = vpop.f32.mrf.mxu0  ;;  %v2771_v10 = vpop.f32.mrf.mxu1 }
 0x17c   :  { %v2492_v10 = vadd.f32 %v5675_v21, %v5704_v43  ;;  %v4744_v43 = vld [vmem:[%s7149_s0 + $0xac] ss:$36 sps:$4 sm:$0xff]  }
 0x17d   :  { %v5875_v35 = vpop.f32.mrf.mxu0  ;;  %v2772_v12 = vpop.f32.mrf.mxu1 }
 0x17e   :  { %v5883_v18 = vadd.f32 %v2772_v12, %v2484_v58 }
 0x17f   :  { %v2549_v28 = vpop.f32.mrf.mxu0  ;;  %v2774_v29 = vpop.f32.mrf.mxu1 }
 0x180   :  { %v2497_v29 = vadd.f32 %v5675_v21, %v5722_v2  ;;  %v4739_v2 = vld [vmem:[%s7149_s0 + $0x520] ss:$36 sps:$4 sm:$0xff]  }
 0x181   :  { %v5893_v34 = vpop.f32.mrf.mxu0  ;;  %v2777_v45 = vpop.f32.mrf.mxu1  ;;  %3129 = vmatmul.mubr.bf16.gmra.mxu0 %v4726_v15  ;;  %3290 = vmatmul.mubr.bf16.vlgmr.msra.gmra.mxu1 %v4729_v13  ;;  %v4736_v15 = vld [vmem:[%s7149_s0 + $0x60] ss:$36 sps:$4 sm:$0xff]  }
 0x182   :  { %v5895_v41 = vadd.f32 %v2777_v45, %v2489_v3  ;;  %3136 = vmatprep.mubr.bf16.mxu0 %v4735_v60  ;;  %3297 = vmatprep.mubr.bf16.mxu1 %v4738_v24  ;;  %v4741_v60 = vld [vmem:[%s7149_s0 + $0x524] ss:$36 sps:$4 sm:$0xff]  }
 0x183   :  { %v2554_v32 = vpop.f32.mrf.mxu0  ;;  %v2779_v55 = vpop.f32.mrf.mxu1 }
 0x185   :  { %v5899_v58 = vpop.f32.mrf.mxu0  ;;  %v2780_v12 = vpop.f32.mrf.mxu1 }
 0x186   :  { %v5907_v13 = vadd.f32 %v2780_v12, %v2492_v10  ;;  %v2500_v12 = vadd.f32 %v5675_v21, %v5728_v14  ;;  %v4750_v14 = vld [vmem:[%s7149_s0 + $0xf4] ss:$36 sps:$4 sm:$0xff]  }
 0x187   :  { %v2557_v24 = vpop.f32.mrf.mxu0  ;;  %v2782_v28 = vpop.f32.mrf.mxu1 }
 0x189   :  { %v5917_v3 = vpop.f32.mrf.mxu0  ;;  %v2785_v45 = vpop.f32.mrf.mxu1  ;;  %3137 = vmatmul.mubr.bf16.gmra.mxu0 %v4733_v37  ;;  %3298 = vmatmul.mubr.bf16.gmra.mxu1 %v4736_v15  ;;  %v4742_v37 = vld [vmem:[%s7149_s0 + $0xa8] ss:$36 sps:$4 sm:$0xff]  }
 0x18a   :  { %v5919_v32 = vadd.f32 %v2785_v45, %v2497_v29  ;;  %3144 = vmatprep.mubr.bf16.mxu0 %v4741_v60  ;;  %3305 = vmatprep.mubr.bf16.mxu1 %v4744_v43  ;;  %v4747_v60 = vld [vmem:[%s7149_s0 + $0x56c] ss:$36 sps:$4 sm:$0xff]   ;;  %v2505_v29 = vadd.f32 %v5675_v21, %v5746_v33 }
 0x18b   :  { %v2562_v55 = vpop.f32.mrf.mxu0  ;;  %v2787_v10 = vpop.f32.mrf.mxu1  ;;  %v4745_v33 = vld [vmem:[%s7149_s0 + $0x568] ss:$36 sps:$4 sm:$0xff]  }
 0x18d   :  { %v5923_v25 = vpop.f32.mrf.mxu0  ;;  %v2788_v24 = vpop.f32.mrf.mxu1 }
 0x18e   :  { %v5931_v15 = vadd.f32 %v2788_v24, %v2500_v12 }
 0x18f   :  { %v2565_v43 = vpop.f32.mrf.mxu0  ;;  %v2790_v28 = vpop.f32.mrf.mxu1 }
 0x191   :  { %v5941_v45 = vpop.f32.mrf.mxu0  ;;  %v2793_v55 = vpop.f32.mrf.mxu1  ;;  %3145 = vmatmul.mubr.bf16.gmra.mxu0 %v4739_v2  ;;  %3306 = vmatmul.mubr.bf16.gmra.mxu1 %v4742_v37  ;;  %v4748_v2 = vld [vmem:[%s7149_s0 + $0xf0] ss:$36 sps:$4 sm:$0xff]  }
 0x192   :  { %v5943_v10 = vadd.f32 %v2793_v55, %v2505_v29  ;;  %3152 = vmatprep.mubr.bf16.mxu0 %v4747_v60  ;;  %3313 = vmatprep.mubr.bf16.mxu1 %v4750_v14  ;;  %v4753_v60 = vld [vmem:[%s7149_s0 + $0x5b4] ss:$36 sps:$4 sm:$0xff]   ;;  %v2513_v29 = vadd.f32 %v5675_v21, %v5770_v1 }
 0x193   :  { %v2570_v12 = vpop.f32.mrf.mxu0  ;;  %v2795_v24 = vpop.f32.mrf.mxu1  ;;  %v4751_v1 = vld [vmem:[%s7149_s0 + $0x5b0] ss:$36 sps:$4 sm:$0xff]  }
 0x195   :  { %v5947_v4 = vpop.f32.mrf.mxu0  ;;  %v2796_v43 = vpop.f32.mrf.mxu1 }
 0x196   :  { %v5955_v37 = vadd.f32 %v2796_v43, %v2508_v16 }
 0x197   :  { %v2573_v14 = vpop.f32.mrf.mxu0  ;;  %v2798_v28 = vpop.f32.mrf.mxu1 }
 0x199   :  { %v5965_v55 = vpop.f32.mrf.mxu0  ;;  %v2801_v12 = vpop.f32.mrf.mxu1  ;;  %3153 = vmatmul.mubr.bf16.gmra.mxu0 %v4745_v33  ;;  %3314 = vmatmul.mubr.bf16.gmra.mxu1 %v4748_v2  ;;  %v4754_v33 = vld [vmem:[%s7149_s0 + $0x138] ss:$36 sps:$4 sm:$0xff]  }
 0x19a   :  { %v5967_v16 = vadd.f32 %v2801_v12, %v2513_v29  ;;  %3160 = vmatprep.mubr.bf16.mxu0 %v4753_v60  ;;  %3321 = vmatprep.mubr.bf16.mxu1 %v4756_v47  ;;  %v4760_v60 = vld [vmem:[%s7149_s0 + $0x5fc] ss:$36 sps:$4 sm:$0xff]   ;;  %v2521_v29 = vadd.f32 %v5675_v21, %v5794_v40 }
 0x19b   :  { %v2578_v24 = vpop.f32.mrf.mxu0  ;;  %v2803_v43 = vpop.f32.mrf.mxu1  ;;  %v4758_v40 = vld [vmem:[%s7149_s0 + $0x5f8] ss:$36 sps:$4 sm:$0xff]  }
 0x19d   :  { %v5971_v51 = vpop.f32.mrf.mxu0  ;;  %v2804_v14 = vpop.f32.mrf.mxu1 }
 0x19e   :  { %v5979_v2 = vadd.f32 %v2804_v14, %v2516_v63 }
 0x19f   :  { %v2581_v47 = vpop.f32.mrf.mxu0  ;;  %v2806_v28 = vpop.f32.mrf.mxu1 }
 0x1a1   :  { %v5989_v12 = vpop.f32.mrf.mxu0  ;;  %v2809_v24 = vpop.f32.mrf.mxu1  ;;  %3161 = vmatmul.mubr.bf16.gmra.mxu0 %v4751_v1  ;;  %3322 = vmatmul.mubr.bf16.gmra.mxu1 %v4754_v33  ;;  %v4761_v1 = vld [vmem:[%s7149_s0 + $0x180] ss:$36 sps:$4 sm:$0xff]  }
 0x1a2   :  { %v5991_v63 = vadd.f32 %v2809_v24, %v2521_v29  ;;  %3168 = vmatprep.mubr.bf16.mxu0 %v4760_v60  ;;  %3329 = vmatprep.mubr.bf16.mxu1 %v4763_v56  ;;  %v4766_v60 = vld [vmem:[%s7149_s0 + $0x644] ss:$36 sps:$4 sm:$0xff]   ;;  %v2529_v29 = vadd.f32 %v5675_v21, %v5821_v20 }
 0x1a3   :  { %v2586_v43 = vpop.f32.mrf.mxu0  ;;  %v2811_v14 = vpop.f32.mrf.mxu1  ;;  %v4764_v20 = vld [vmem:[%s7149_s0 + $0x640] ss:$36 sps:$4 sm:$0xff]  }
 0x1a4   :  { %7159 = vst [vmem:[#allocation9_spill] sm:$0xff] %v5991_v63 }
 0x1a5   :  { %v5995_v36 = vpop.f32.mrf.mxu0  ;;  %v2812_v47 = vpop.f32.mrf.mxu1 }
 0x1a6   :  { %v6003_v33 = vadd.f32 %v2812_v47, %v2524_v46 }
 0x1a7   :  { %v2589_v56 = vpop.f32.mrf.mxu0  ;;  %v2814_v28 = vpop.f32.mrf.mxu1 }
 0x1a8   :  { %7160 = vst [vmem:[#allocation10_spill] sm:$0xff] %v6003_v33  ;;  %v2532_v33 = vadd.f32 %v5675_v21, %v5827_v31  ;;  %v4775_v31 = vld [vmem:[%s7149_s0 + $0x214] ss:$36 sps:$4 sm:$0xff]  }
 0x1a9   :  { %v6013_v24 = vpop.f32.mrf.mxu0  ;;  %v2817_v43 = vpop.f32.mrf.mxu1  ;;  %3169 = vmatmul.mubr.bf16.gmra.mxu0 %v4758_v40  ;;  %3330 = vmatmul.mubr.bf16.gmra.mxu1 %v4761_v1  ;;  %v4767_v40 = vld [vmem:[%s7149_s0 + $0x1c8] ss:$36 sps:$4 sm:$0xff]  }
 0x1aa   :  { %v6015_v46 = vadd.f32 %v2817_v43, %v2529_v29  ;;  %3176 = vmatprep.mubr.bf16.mxu0 %v4766_v60  ;;  %3337 = vmatprep.mubr.bf16.mxu1 %v4769_v0  ;;  %v4772_v60 = vld [vmem:[%s7149_s0 + $0x68c] ss:$36 sps:$4 sm:$0xff]   ;;  %v2537_v29 = vadd.f32 %v5675_v21, %v5845_v48 }
 0x1ab   :  { %v2594_v14 = vpop.f32.mrf.mxu0  ;;  %v2819_v47 = vpop.f32.mrf.mxu1  ;;  %v4770_v48 = vld [vmem:[%s7149_s0 + $0x688] ss:$36 sps:$4 sm:$0xff]  }
 0x1ac   :  { %7161 = vst [vmem:[#allocation11_spill] sm:$0xff] %v6015_v46 }
 0x1ad   :  { %v6019_v63 = vpop.f32.mrf.mxu0  ;;  %v2820_v56 = vpop.f32.mrf.mxu1 }
 0x1ae   :  { %v6027_v1 = vadd.f32 %v2820_v56, %v2532_v33 }
 0x1af   :  { %v2597_v0 = vpop.f32.mrf.mxu0  ;;  %v2822_v28 = vpop.f32.mrf.mxu1 }
 0x1b0   :  { %7162 = vst [vmem:[#allocation12_spill] sm:$0xff] %v6027_v1  ;;  %v2540_v1 = vadd.f32 %v5675_v21, %v5851_v17  ;;  %v4781_v17 = vld [vmem:[%s7149_s0 + $0x25c] ss:$36 sps:$4 sm:$0xff]  }
 0x1b1   :  { %v6037_v43 = vpop.f32.mrf.mxu0  ;;  %v2825_v14 = vpop.f32.mrf.mxu1  ;;  %3177 = vmatmul.mubr.bf16.gmra.mxu0 %v4764_v20  ;;  %3338 = vmatmul.mubr.bf16.gmra.mxu1 %v4767_v40  ;;  %v4773_v20 = vld [vmem:[%s7149_s0 + $0x210] ss:$36 sps:$4 sm:$0xff]  }
 0x1b2   :  { %v6039_v33 = vadd.f32 %v2825_v14, %v2537_v29  ;;  %3184 = vmatprep.mubr.bf16.mxu0 %v4772_v60  ;;  %3345 = vmatprep.mubr.bf16.mxu1 %v4775_v31  ;;  %v4778_v60 = vld [vmem:[%s7149_s0 + $0x6d4] ss:$36 sps:$4 sm:$0xff]   ;;  %v2545_v29 = vadd.f32 %v5675_v21, %v5869_v6 }
 0x1b3   :  { %v2602_v47 = vpop.f32.mrf.mxu0  ;;  %v2827_v56 = vpop.f32.mrf.mxu1  ;;  %v4776_v6 = vld [vmem:[%s7149_s0 + $0x6d0] ss:$36 sps:$4 sm:$0xff]  }
 0x1b4   :  { %7163 = vst [vmem:[#allocation13_spill] sm:$0xff] %v6039_v33 }
 0x1b5   :  { %v6043_v46 = vpop.f32.mrf.mxu0  ;;  %v2828_v0 = vpop.f32.mrf.mxu1 }
 0x1b6   :  { %v6051_v40 = vadd.f32 %v2828_v0, %v2540_v1 }
 0x1b7   :  { %v2605_v31 = vpop.f32.mrf.mxu0  ;;  %v2830_v28 = vpop.f32.mrf.mxu1 }
 0x1b8   :  { %7164 = vst [vmem:[#allocation14_spill] sm:$0xff] %v6051_v40  ;;  %v2548_v40 = vadd.f32 %v5675_v21, %v5875_v35  ;;  %v4788_v35 = vld [vmem:[%s7149_s0 + $0x2a4] ss:$36 sps:$4 sm:$0xff]  }
 0x1b9   :  { %v6061_v14 = vpop.f32.mrf.mxu0  ;;  %v2833_v47 = vpop.f32.mrf.mxu1  ;;  %3185 = vmatmul.mubr.bf16.gmra.mxu0 %v4770_v48  ;;  %3346 = vmatmul.mubr.bf16.gmra.mxu1 %v4773_v20  ;;  %v4779_v48 = vld [vmem:[%s7149_s0 + $0x258] ss:$36 sps:$4 sm:$0xff]  }
 0x1ba   :  { %v6063_v1 = vadd.f32 %v2833_v47, %v2545_v29  ;;  %3192 = vmatprep.mubr.bf16.mxu0 %v4778_v60  ;;  %3353 = vmatprep.mubr.bf16.mxu1 %v4781_v17  ;;  %v4785_v60 = vld [vmem:[%s7149_s0 + $0x71c] ss:$36 sps:$4 sm:$0xff]   ;;  %v2553_v29 = vadd.f32 %v5675_v21, %v5893_v34 }
 0x1bb   :  { %v2610_v56 = vpop.f32.mrf.mxu0  ;;  %v2835_v0 = vpop.f32.mrf.mxu1  ;;  %v4783_v34 = vld [vmem:[%s7149_s0 + $0x718] ss:$36 sps:$4 sm:$0xff]  }
 0x1bc   :  { %7165 = vst [vmem:[#allocation15_spill] sm:$0xff] %v6063_v1 }
 0x1bd   :  { %v6067_v33 = vpop.f32.mrf.mxu0  ;;  %v2836_v31 = vpop.f32.mrf.mxu1 }
 0x1be   :  { %v6075_v20 = vadd.f32 %v2836_v31, %v2548_v40 }
 0x1bf   :  { %v2613_v17 = vpop.f32.mrf.mxu0  ;;  %v2838_v28 = vpop.f32.mrf.mxu1 }
 0x1c0   :  { %7166 = vst [vmem:[#allocation16_spill] sm:$0xff] %v6075_v20  ;;  %v2556_v17 = vadd.f32 %v5675_v21, %v5899_v58  ;;  %v4794_v58 = vld [vmem:[%s7149_s0 + $0x2ec] ss:$36 sps:$4 sm:$0xff]  }
 0x1c1   :  { %v2841_v47 = vpop.f32.mrf.mxu1  ;;  %v3002_v56 = vpop.f32.mrf.mxu0  ;;  %3193 = vmatmul.mubr.bf16.gmra.mxu0 %v4776_v6  ;;  %3354 = vmatmul.mubr.bf16.gmra.mxu1 %v4779_v48  ;;  %v4786_v6 = vld [vmem:[%s7149_s0 + $0x2a0] ss:$36 sps:$4 sm:$0xff]  }
 0x1c2   :  { %v6085_v0 = vadd.f32 %v2841_v47, %v2553_v29  ;;  %v6088_v40 = vadd.f32 %v3002_v56, %v5697_v39  ;;  %3200 = vmatprep.mubr.bf16.mxu0 %v4785_v60  ;;  %3361 = vmatprep.mubr.bf16.mxu1 %v4788_v35  ;;  %v2561_v29 = vadd.f32 %v5675_v21, %v5917_v3  ;;  %v4789_v3 = vld [vmem:[%s7149_s0 + $0x760] ss:$36 sps:$4 sm:$0xff]  }
 0x1c3   :  { %v2843_v31 = vpop.f32.mrf.mxu1  ;;  %v3004_v20 = vpop.f32.mrf.mxu0 }
 0x1c4   :  { %v4791_v20 = vld [vmem:[%s7149_s0 + $0x764] ss:$36 sps:$4 sm:$0xff]  }
 0x1c5   :  { %v2844_v28 = vpop.f32.mrf.mxu1  ;;  %v3005_v1 = vpop.f32.mrf.mxu0 }
 0x1c6   :  { %v6098_v48 = vadd.f32 %v2844_v28, %v2556_v17  ;;  %v6101_v39 = vadd.f32 %v3005_v1, %v5712_v54  ;;  %v2564_v28 = vadd.f32 %v5675_v21, %v5923_v25  ;;  %v4800_v25 = vld [vmem:[%s7149_s0 + $0x334] ss:$36 sps:$4 sm:$0xff]  }
 0x1c7   :  { %v2846_v60 = vpop.f32.mrf.mxu1  ;;  %v3007_v35 = vpop.f32.mrf.mxu0 }
 0x1c9   :  { %v2849_v47 = vpop.f32.mrf.mxu1  ;;  %v3010_v56 = vpop.f32.mrf.mxu0  ;;  %3201 = vmatmul.mubr.bf16.gmra.mxu0 %v4783_v34  ;;  %3362 = vmatmul.mubr.bf16.gmra.mxu1 %v4786_v6  ;;  %v4792_v34 = vld [vmem:[%s7149_s0 + $0x2e8] ss:$36 sps:$4 sm:$0xff]  }
 0x1ca   :  { %v6111_v31 = vadd.f32 %v2849_v47, %v2561_v29  ;;  %v6114_v54 = vadd.f32 %v3010_v56, %v5724_v8  ;;  %3208 = vmatprep.mubr.bf16.mxu0 %v4791_v20  ;;  %3369 = vmatprep.mubr.bf16.mxu1 %v4794_v58  ;;  %v4797_v20 = vld [vmem:[%s7149_s0 + $0x7ac] ss:$36 sps:$4 sm:$0xff]   ;;  %v2569_v47 = vadd.f32 %v5675_v21, %v5941_v45 }
 0x1cb   :  { %v2851_v1 = vpop.f32.mrf.mxu1  ;;  %v3012_v17 = vpop.f32.mrf.mxu0  ;;  %v4795_v45 = vld [vmem:[%s7149_s0 + $0x7a8] ss:$36 sps:$4 sm:$0xff]  }
 0x1cd   :  { %v2852_v60 = vpop.f32.mrf.mxu1  ;;  %v3013_v35 = vpop.f32.mrf.mxu0 }
 0x1ce   :  { %v6124_v6 = vadd.f32 %v2852_v60, %v2564_v28  ;;  %v6127_v8 = vadd.f32 %v3013_v35, %v5736_v26  ;;  %v2572_v35 = vadd.f32 %v5675_v21, %v5947_v4  ;;  %v4806_v4 = vld [vmem:[%s7149_s0 + $0x37c] ss:$36 sps:$4 sm:$0xff]  }
 0x1cf   :  { %v2854_v58 = vpop.f32.mrf.mxu1  ;;  %v3015_v29 = vpop.f32.mrf.mxu0 }
 0x1d1   :  { %v2857_v56 = vpop.f32.mrf.mxu1  ;;  %v3018_v1 = vpop.f32.mrf.mxu0  ;;  %3209 = vmatmul.mubr.bf16.gmra.mxu0 %v4789_v3  ;;  %3370 = vmatmul.mubr.bf16.gmra.mxu1 %v4792_v34  ;;  %v4798_v3 = vld [vmem:[%s7149_s0 + $0x330] ss:$36 sps:$4 sm:$0xff]  }
 0x1d2   :  { %v6137_v17 = vadd.f32 %v2857_v56, %v2569_v47  ;;  %v6140_v26 = vadd.f32 %v3018_v1, %v5748_v38  ;;  %3216 = vmatprep.mubr.bf16.mxu0 %v4797_v20  ;;  %3377 = vmatprep.mubr.bf16.mxu1 %v4800_v25  ;;  %v4803_v20 = vld [vmem:[%s7149_s0 + $0x7f4] ss:$36 sps:$4 sm:$0xff]   ;;  %v2577_v56 = vadd.f32 %v5675_v21, %v5965_v55 }
 0x1d3   :  { %v2859_v28 = vpop.f32.mrf.mxu1  ;;  %v3020_v60 = vpop.f32.mrf.mxu0  ;;  %v4801_v55 = vld [vmem:[%s7149_s0 + $0x7f0] ss:$36 sps:$4 sm:$0xff]  }
 0x1d5   :  { %v2860_v58 = vpop.f32.mrf.mxu1  ;;  %v3021_v29 = vpop.f32.mrf.mxu0 }
 0x1d6   :  { %v6150_v34 = vadd.f32 %v2860_v58, %v2572_v35  ;;  %v6153_v38 = vadd.f32 %v3021_v29, %v5760_v53  ;;  %v2580_v29 = vadd.f32 %v5675_v21, %v5971_v51  ;;  %v4813_v51 = vld [vmem:[%s7149_s0 + $0x3c4] ss:$36 sps:$4 sm:$0xff]  }
 0x1d7   :  { %v2862_v25 = vpop.f32.mrf.mxu1  ;;  %v3023_v47 = vpop.f32.mrf.mxu0 }
 0x1d9   :  { %v2865_v1 = vpop.f32.mrf.mxu1  ;;  %v3026_v28 = vpop.f32.mrf.mxu0  ;;  %3217 = vmatmul.mubr.bf16.gmra.mxu0 %v4795_v45  ;;  %3378 = vmatmul.mubr.bf16.gmra.mxu1 %v4798_v3  ;;  %v4804_v45 = vld [vmem:[%s7149_s0 + $0x378] ss:$36 sps:$4 sm:$0xff]  }
 0x1da   :  { %v6163_v60 = vadd.f32 %v2865_v1, %v2577_v56  ;;  %v6166_v53 = vadd.f32 %v3026_v28, %v5772_v9  ;;  %3224 = vmatprep.mubr.bf16.mxu0 %v4803_v20  ;;  %3385 = vmatprep.mubr.bf16.mxu1 %v4806_v4  ;;  %v4810_v20 = vld [vmem:[%s7149_s0 + $0x83c] ss:$36 sps:$4 sm:$0xff]   ;;  %v2585_v1 = vadd.f32 %v5675_v21, %v5989_v12 }
 0x1db   :  { %v2867_v35 = vpop.f32.mrf.mxu1  ;;  %v3028_v58 = vpop.f32.mrf.mxu0  ;;  %v4808_v12 = vld [vmem:[%s7149_s0 + $0x838] ss:$36 sps:$4 sm:$0xff]  }
 0x1dd   :  { %v2868_v25 = vpop.f32.mrf.mxu1  ;;  %v3029_v47 = vpop.f32.mrf.mxu0 }
 0x1de   :  { %v6176_v3 = vadd.f32 %v2868_v25, %v2580_v29  ;;  %v6179_v9 = vadd.f32 %v3029_v47, %v5784_v61  ;;  %v2588_v47 = vadd.f32 %v5675_v21, %v5995_v36  ;;  %v4819_v36 = vld [vmem:[%s7149_s0 + $0x40c] ss:$36 sps:$4 sm:$0xff]  }
 0x1df   :  { %v2870_v4 = vpop.f32.mrf.mxu1  ;;  %v3031_v56 = vpop.f32.mrf.mxu0 }
 0x1e1   :  { %v2873_v28 = vpop.f32.mrf.mxu1  ;;  %v3034_v35 = vpop.f32.mrf.mxu0  ;;  %3225 = vmatmul.mubr.bf16.gmra.mxu0 %v4801_v55  ;;  %3386 = vmatmul.mubr.bf16.gmra.mxu1 %v4804_v45  ;;  %v4811_v55 = vld [vmem:[%s7149_s0 + $0x3c0] ss:$36 sps:$4 sm:$0xff]  }
 0x1e2   :  { %v6189_v58 = vadd.f32 %v2873_v28, %v2585_v1  ;;  %v6192_v61 = vadd.f32 %v3034_v35, %v5796_v42  ;;  %3232 = vmatprep.mubr.bf16.mxu0 %v4810_v20  ;;  %3393 = vmatprep.mubr.bf16.mxu1 %v4813_v51  ;;  %v4816_v20 = vld [vmem:[%s7149_s0 + $0x884] ss:$36 sps:$4 sm:$0xff]   ;;  %v2593_v28 = vadd.f32 %v5675_v21, %v6013_v24 }
 0x1e3   :  { %v2875_v29 = vpop.f32.mrf.mxu1  ;;  %v3036_v25 = vpop.f32.mrf.mxu0  ;;  %v4814_v24 = vld [vmem:[%s7149_s0 + $0x880] ss:$36 sps:$4 sm:$0xff]  }
 0x1e5   :  { %v2876_v4 = vpop.f32.mrf.mxu1  ;;  %v3037_v56 = vpop.f32.mrf.mxu0 }
 0x1e6   :  { %v6202_v45 = vadd.f32 %v2876_v4, %v2588_v47  ;;  %v6205_v42 = vadd.f32 %v3037_v56, %v5811_v59  ;;  %v2596_v56 = vadd.f32 %v5675_v21, %v6019_v63  ;;  %v4825_v63 = vld [vmem:[%s7149_s0 + $0x454] ss:$36 sps:$4 sm:$0xff]  }
 0x1e7   :  { %v2878_v51 = vpop.f32.mrf.mxu1  ;;  %v3039_v1 = vpop.f32.mrf.mxu0 }
 0x1e9   :  { %v2881_v35 = vpop.f32.mrf.mxu1  ;;  %v3042_v29 = vpop.f32.mrf.mxu0  ;;  %3233 = vmatmul.mubr.bf16.gmra.mxu0 %v4808_v12  ;;  %3394 = vmatmul.mubr.bf16.gmra.mxu1 %v4811_v55  ;;  %v4817_v12 = vld [vmem:[%s7149_s0 + $0x408] ss:$36 sps:$4 sm:$0xff]  }
 0x1ea   :  { %v6215_v25 = vadd.f32 %v2881_v35, %v2593_v28  ;;  %v6218_v59 = vadd.f32 %v3042_v29, %v5823_v27  ;;  %3240 = vmatprep.mubr.bf16.mxu0 %v4816_v20  ;;  %3401 = vmatprep.mubr.bf16.mxu1 %v4819_v36  ;;  %v4822_v20 = vld [vmem:[%s7149_s0 + $0x8cc] ss:$36 sps:$4 sm:$0xff]   ;;  %v2601_v35 = vadd.f32 %v5675_v21, %v6037_v43 }
 0x1eb   :  { %v2883_v47 = vpop.f32.mrf.mxu1  ;;  %v3044_v4 = vpop.f32.mrf.mxu0  ;;  %v4820_v43 = vld [vmem:[%s7149_s0 + $0x8c8] ss:$36 sps:$4 sm:$0xff]  }
 0x1ed   :  { %v2884_v51 = vpop.f32.mrf.mxu1  ;;  %v3045_v1 = vpop.f32.mrf.mxu0 }
 0x1ee   :  { %v6228_v55 = vadd.f32 %v2884_v51, %v2596_v56  ;;  %v6231_v27 = vadd.f32 %v3045_v1, %v5835_v50  ;;  %v2604_v1 = vadd.f32 %v5675_v21, %v6043_v46  ;;  %v4829_v46 = vld [vmem:[%s7149_s0 + $0x20] ss:$36 sps:$4 sm:$0xff]  }
 0x1ef   :  { %v2886_v36 = vpop.f32.mrf.mxu1  ;;  %v3047_v28 = vpop.f32.mrf.mxu0 }
 0x1f1   :  { %v2889_v29 = vpop.f32.mrf.mxu1  ;;  %v3050_v47 = vpop.f32.mrf.mxu0  ;;  %3241 = vmatmul.mubr.bf16.gmra.mxu0 %v4814_v24  ;;  %3402 = vmatmul.mubr.bf16.gmra.mxu1 %v4817_v12  ;;  %v4823_v24 = vld [vmem:[%s7149_s0 + $0x450] ss:$36 sps:$4 sm:$0xff]  }
 0x1f2   :  { %v6241_v4 = vadd.f32 %v2889_v29, %v2601_v35  ;;  %v6244_v50 = vadd.f32 %v3050_v47, %v5847_v5  ;;  %3248 = vmatprep.mubr.bf16.mxu0 %v4822_v20  ;;  %3409 = vmatprep.mubr.bf16.mxu1 %v4825_v63  ;;  %v4828_v20 = vld [vmem:[%s7149_s0 + $0x49c] ss:$36 sps:$4 sm:$0xff]   ;;  %v2609_v29 = vadd.f32 %v5675_v21, %v6061_v14 }
 0x1f3   :  { %v2891_v56 = vpop.f32.mrf.mxu1  ;;  %v3052_v51 = vpop.f32.mrf.mxu0  ;;  %v4826_v14 = vld [vmem:[%s7149_s0 + $0x498] ss:$36 sps:$4 sm:$0xff]  }
 0x1f5   :  { %v2892_v36 = vpop.f32.mrf.mxu1  ;;  %v3053_v28 = vpop.f32.mrf.mxu0 }
 0x1f6   :  { %v6254_v12 = vadd.f32 %v2892_v36, %v2604_v1  ;;  %v6257_v5 = vadd.f32 %v3053_v28, %v5859_v22  ;;  %v2612_v28 = vadd.f32 %v5675_v21, %v6067_v33  ;;  %v4834_v33 = vld [vmem:[%s7149_s0 + $0xb0] ss:$36 sps:$4 sm:$0xff]  }
 0x1f7   :  { %v2894_v63 = vpop.f32.mrf.mxu1  ;;  %v3055_v35 = vpop.f32.mrf.mxu0 }
 0x1f9   :  { %v2897_v47 = vpop.f32.mrf.mxu1  ;;  %v3058_v56 = vpop.f32.mrf.mxu0  ;;  %3249 = vmatmul.mubr.bf16.gmra.mxu0 %v4820_v43  ;;  %3410 = vmatmul.mubr.bf16.gmra.mxu1 %v4823_v24  ;;  %v4830_v43 = vld [vmem:[%s7149_s0 + $0x68] ss:$36 sps:$4 sm:$0xff]  }
 0x1fa   :  { %v6267_v51 = vadd.f32 %v2897_v47, %v2609_v29  ;;  %v6270_v22 = vadd.f32 %v3058_v56, %v5871_v52  ;;  %3417 = vmatprep.mubr.bf16.mxu1 %v4828_v20  ;;  %4321 = vmatprep.mubr.bf16.mxu0 %v4829_v46  ;;  %v4833_v20 = vld [vmem:[%s7149_s0 + $0x4e4] ss:$36 sps:$4 sm:$0xff]   ;;  %v2617_v47 = vadd.f32 %v5675_v21, %v5517_v44 }
 0x1fb   :  { %v2899_v1 = vpop.f32.mrf.mxu1  ;;  %v3060_v36 = vpop.f32.mrf.mxu0 }
 0x1fd   :  { %v2900_v63 = vpop.f32.mrf.mxu1  ;;  %v3061_v35 = vpop.f32.mrf.mxu0 }
 0x1fe   :  { %v6280_v24 = vadd.f32 %v2900_v63, %v2612_v28  ;;  %v6283_v52 = vadd.f32 %v3061_v35, %v5883_v18  ;;  %v6301_v35 = vld [vmem:[%s7150_s2] ss:$0 sm:$0xff] }
 0x1ff   :  { %v2902_v46 = vpop.f32.mrf.mxu1  ;;  %v3063_v29 = vpop.f32.mrf.mxu0  ;;  %v2620_v44 = vadd.f32 %v6301_v35, %v5525_v49  ;;  %v4839_v49 = vld [vmem:[%s7149_s0 + $0x140] ss:$36 sps:$4 sm:$0xff]  }
 0x200   :  { %v4838_v46 = vld [vmem:[%s7149_s0 + $0x52c] ss:$36 sps:$4 sm:$0xff]  }
 0x201   :  { %v2905_v56 = vpop.f32.mrf.mxu1  ;;  %v3066_v1 = vpop.f32.mrf.mxu0  ;;  %3418 = vmatmul.mubr.bf16.gmra.mxu1 %v4826_v14  ;;  %4322 = vmatmul.mubr.bf16.vlgmr.msra.gmra.mxu0 %v4830_v43  ;;  %v4831_v43 = vld [vmem:[%s7149_s0 + $0x4e0] ss:$36 sps:$4 sm:$0xff]  }
 0x202   :  { %v6293_v36 = vadd.f32 %v2905_v56, %v2617_v47  ;;  %v6296_v18 = vadd.f32 %v3066_v1, %v5895_v41  ;;  %3425 = vmatprep.mubr.bf16.mxu1 %v4833_v20  ;;  %4325 = vmatprep.mubr.bf16.mxu0 %v4834_v33  ;;  %v4835_v41 = vld [vmem:[%s7149_s0 + $0xf8] ss:$36 sps:$4 sm:$0xff]   ;;  %v2625_v56 = vadd.f32 %v6301_v35, %v5544_v57  ;;  %v4836_v57 = vld [vmem:[%s7149_s0 + $0x528] ss:$36 sps:$4 sm:$0xff]  }
 0x203   :  { %v2907_v28 = vpop.f32.mrf.mxu1  ;;  %v3068_v63 = vpop.f32.mrf.mxu0 }
 0x205   :  { %v2908_v21 = vpop.f32.mrf.mxu1  ;;  %v3069_v14 = vpop.f32.mrf.mxu0 }
 0x206   :  { %v6311_v20 = vadd.f32 %v2908_v21, %v2620_v44  ;;  %v6314_v33 = vadd.f32 %v3069_v14, %v5907_v13  ;;  %v2628_v14 = vadd.f32 %v6301_v35, %v5551_v62  ;;  %v4844_v62 = vld [vmem:[%s7149_s0 + $0x1d0] ss:$36 sps:$4 sm:$0xff]  }
 0x207   :  { %v2910_v29 = vpop.f32.mrf.mxu1  ;;  %v3071_v47 = vpop.f32.mrf.mxu0 }
 0x209   :  { %v2913_v1 = vpop.f32.mrf.mxu1  ;;  %v3074_v28 = vpop.f32.mrf.mxu0  ;;  %3426 = vmatmul.mubr.bf16.gmra.mxu1 %v4831_v43  ;;  %4326 = vmatmul.mubr.bf16.gmra.mxu0 %v4835_v41  ;;  %v4840_v43 = vld [vmem:[%s7149_s0 + $0x188] ss:$36 sps:$4 sm:$0xff]  }
 0x20a   :  { %v6324_v63 = vadd.f32 %v2913_v1, %v2625_v56  ;;  %v6327_v13 = vadd.f32 %v3074_v28, %v5919_v32  ;;  %3433 = vmatprep.mubr.bf16.mxu1 %v4838_v46  ;;  %4329 = vmatprep.mubr.bf16.mxu0 %v4839_v49  ;;  %v4843_v46 = vld [vmem:[%s7149_s0 + $0x574] ss:$36 sps:$4 sm:$0xff]   ;;  %v2633_v1 = vadd.f32 %v6301_v35, %v5567_v7 }
 0x20b   :  { %v2915_v44 = vpop.f32.mrf.mxu1  ;;  %v3076_v21 = vpop.f32.mrf.mxu0  ;;  %v4841_v7 = vld [vmem:[%s7149_s0 + $0x570] ss:$36 sps:$4 sm:$0xff]  }
 0x20d   :  { %v2916_v29 = vpop.f32.mrf.mxu1  ;;  %v3077_v47 = vpop.f32.mrf.mxu0 }
 0x20e   :  { %v6337_v41 = vadd.f32 %v2916_v29, %v2628_v14  ;;  %v6340_v32 = vadd.f32 %v3077_v47, %v5931_v15  ;;  %v2636_v47 = vadd.f32 %v6301_v35, %v5571_v11  ;;  %v4849_v11 = vld [vmem:[%s7149_s0 + $0x260] ss:$36 sps:$4 sm:$0xff]  }
 0x20f   :  { %v2918_v49 = vpop.f32.mrf.mxu1  ;;  %v3079_v56 = vpop.f32.mrf.mxu0 }
 0x211   :  { %v2921_v28 = vpop.f32.mrf.mxu1  ;;  %v3082_v44 = vpop.f32.mrf.mxu0  ;;  %3434 = vmatmul.mubr.bf16.gmra.mxu1 %v4836_v57  ;;  %4330 = vmatmul.mubr.bf16.gmra.mxu0 %v4840_v43  ;;  %v4845_v57 = vld [vmem:[%s7149_s0 + $0x218] ss:$36 sps:$4 sm:$0xff]  }
 0x212   :  { %v6350_v21 = vadd.f32 %v2921_v28, %v2633_v1  ;;  %v6353_v15 = vadd.f32 %v3082_v44, %v5943_v10  ;;  %3441 = vmatprep.mubr.bf16.mxu1 %v4843_v46  ;;  %4333 = vmatprep.mubr.bf16.mxu0 %v4844_v62  ;;  %v4848_v46 = vld [vmem:[%s7149_s0 + $0x5bc] ss:$36 sps:$4 sm:$0xff]   ;;  %v2641_v28 = vadd.f32 %v6301_v35, %v5587_v19 }
 0x213   :  { %v2923_v14 = vpop.f32.mrf.mxu1  ;;  %v3084_v29 = vpop.f32.mrf.mxu0  ;;  %v4846_v19 = vld [vmem:[%s7149_s0 + $0x5b8] ss:$36 sps:$4 sm:$0xff]  }
 0x215   :  { %v2924_v49 = vpop.f32.mrf.mxu1  ;;  %v3085_v56 = vpop.f32.mrf.mxu0 }
 0x216   :  { %v6363_v43 = vadd.f32 %v2924_v49, %v2636_v47  ;;  %v6366_v10 = vadd.f32 %v3085_v56, %v5955_v37  ;;  %v2644_v56 = vadd.f32 %v6301_v35, %v5591_v23  ;;  %v4854_v23 = vld [vmem:[%s7149_s0 + $0x2f0] ss:$36 sps:$4 sm:$0xff]  }
 0x217   :  { %v2926_v62 = vpop.f32.mrf.mxu1  ;;  %v3087_v1 = vpop.f32.mrf.mxu0 }
 0x219   :  { %v2929_v44 = vpop.f32.mrf.mxu1  ;;  %v3090_v14 = vpop.f32.mrf.mxu0  ;;  %3442 = vmatmul.mubr.bf16.gmra.mxu1 %v4841_v7  ;;  %4334 = vmatmul.mubr.bf16.gmra.mxu0 %v4845_v57  ;;  %v4850_v7 = vld [vmem:[%s7149_s0 + $0x2a8] ss:$36 sps:$4 sm:$0xff]  }
 0x21a   :  { %v6376_v29 = vadd.f32 %v2929_v44, %v2641_v28  ;;  %v6379_v37 = vadd.f32 %v3090_v14, %v5967_v16  ;;  %3449 = vmatprep.mubr.bf16.mxu1 %v4848_v46  ;;  %4337 = vmatprep.mubr.bf16.mxu0 %v4849_v11  ;;  %v4853_v46 = vld [vmem:[%s7149_s0 + $0x604] ss:$36 sps:$4 sm:$0xff]   ;;  %v2649_v44 = vadd.f32 %v6301_v35, %v5607_v30 }
 0x21b   :  { %v2931_v47 = vpop.f32.mrf.mxu1  ;;  %v3092_v49 = vpop.f32.mrf.mxu0  ;;  %v4851_v30 = vld [vmem:[%s7149_s0 + $0x600] ss:$36 sps:$4 sm:$0xff]  }
 0x21d   :  { %v2932_v62 = vpop.f32.mrf.mxu1  ;;  %v3093_v1 = vpop.f32.mrf.mxu0 }
 0x21e   :  { %v6389_v57 = vadd.f32 %v2932_v62, %v2644_v56  ;;  %v6392_v16 = vadd.f32 %v3093_v1, %v5979_v2  ;;  %v7170_v2 = vld [vmem:[#allocation9_spill] sm:$0xff] }
 0x21f   :  { %v2934_v11 = vpop.f32.mrf.mxu1  ;;  %v3095_v28 = vpop.f32.mrf.mxu0 }
 0x220   :  { %7167 = vst [vmem:[#allocation17_spill] sm:$0xff] %v6389_v57  ;;  %7168 = vst [vmem:[#allocation18_spill] sm:$0xff] %v6392_v16  ;;  %v7172_v16 = vld [vmem:[#allocation2_spill] sm:$0xff] }
 0x221   :  { %v2937_v14 = vpop.f32.mrf.mxu1  ;;  %v3098_v47 = vpop.f32.mrf.mxu0  ;;  %3450 = vmatmul.mubr.bf16.gmra.mxu1 %v4846_v19  ;;  %4338 = vmatmul.mubr.bf16.gmra.mxu0 %v4850_v7  ;;  %v2652_v11 = vadd.f32 %v6301_v35, %v7172_v16  ;;  %v4855_v19 = vld [vmem:[%s7149_s0 + $0x338] ss:$36 sps:$4 sm:$0xff]   ;;  %v4859_v16 = vld [vmem:[%s7149_s0 + $0x380] ss:$36 sps:$4 sm:$0xff]  }
 0x222   :  { %v6402_v49 = vadd.f32 %v2937_v14, %v2649_v44  ;;  %v6405_v56 = vadd.f32 %v3098_v47, %v7170_v2  ;;  %3457 = vmatprep.mubr.bf16.mxu1 %v4853_v46  ;;  %4341 = vmatprep.mubr.bf16.mxu0 %v4854_v23  ;;  %v7174_v44 = vld [vmem:[#allocation10_spill] sm:$0xff]  ;;  %v4858_v23 = vld [vmem:[%s7149_s0 + $0x64c] ss:$36 sps:$4 sm:$0xff]  }
 0x223   :  { %v2939_v62 = vpop.f32.mrf.mxu1  ;;  %v3100_v1 = vpop.f32.mrf.mxu0  ;;  %v7176_v2 = vld [vmem:[#allocation3_spill] sm:$0xff] }
 0x224   :  { %7169 = vst [vmem:[#allocation19_spill] sm:$0xff] %v6402_v49  ;;  %7171 = vst [vmem:[#allocation9_spill] sm:$0xff] %v6405_v56  ;;  %v2657_v62 = vadd.f32 %v6301_v35, %v7176_v2  ;;  %v4856_v2 = vld [vmem:[%s7149_s0 + $0x648] ss:$36 sps:$4 sm:$0xff]  }
 0x225   :  { %v2940_v28 = vpop.f32.mrf.mxu1  ;;  %v3101_v57 = vpop.f32.mrf.mxu0 }
 0x226   :  { %v6415_v7 = vadd.f32 %v2940_v28, %v2652_v11  ;;  %v6418_v46 = vadd.f32 %v3101_v57, %v7174_v44  ;;  %v7178_v57 = vld [vmem:[#allocation11_spill] sm:$0xff] }
 0x227   :  { %v2942_v14 = vpop.f32.mrf.mxu1  ;;  %v3103_v47 = vpop.f32.mrf.mxu0 }
 0x228   :  { %7173 = vst [vmem:[#allocation2_spill] sm:$0xff] %v6415_v7  ;;  %7175 = vst [vmem:[#allocation10_spill] sm:$0xff] %v6418_v46  ;;  %v7180_v7 = vld [vmem:[#allocation4_spill] sm:$0xff] }
 0x229   :  { %v2945_v1 = vpop.f32.mrf.mxu1  ;;  %v3106_v56 = vpop.f32.mrf.mxu0  ;;  %3458 = vmatmul.mubr.bf16.gmra.mxu1 %v4851_v30  ;;  %4342 = vmatmul.mubr.bf16.gmra.mxu0 %v4855_v19  ;;  %v2660_v14 = vadd.f32 %v6301_v35, %v7180_v7  ;;  %v4860_v30 = vld [vmem:[%s7149_s0 + $0x3c8] ss:$36 sps:$4 sm:$0xff]   ;;  %v4864_v7 = vld [vmem:[%s7149_s0 + $0x410] ss:$36 sps:$4 sm:$0xff]  }
 0x22a   :  { %v6428_v11 = vadd.f32 %v2945_v1, %v2657_v62  ;;  %v6431_v28 = vadd.f32 %v3106_v56, %v7178_v57  ;;  %3465 = vmatprep.mubr.bf16.mxu1 %v4858_v23  ;;  %4345 = vmatprep.mubr.bf16.mxu0 %v4859_v16  ;;  %v7182_v56 = vld [vmem:[#allocation12_spill] sm:$0xff]  ;;  %v7184_v1 = vld [vmem:[#allocation5_spill] sm:$0xff] }
 0x22b   :  { %v2947_v44 = vpop.f32.mrf.mxu1  ;;  %v3108_v46 = vpop.f32.mrf.mxu0  ;;  %v2665_v57 = vadd.f32 %v6301_v35, %v7184_v1  ;;  %v4861_v1 = vld [vmem:[%s7149_s0 + $0x690] ss:$36 sps:$4 sm:$0xff]  }
 0x22c   :  { %7177 = vst [vmem:[#allocation3_spill] sm:$0xff] %v6428_v11  ;;  %7179 = vst [vmem:[#allocation11_spill] sm:$0xff] %v6431_v28  ;;  %v4863_v46 = vld [vmem:[%s7149_s0 + $0x694] ss:$36 sps:$4 sm:$0xff]  }
 0x22d   :  { %v2948_v47 = vpop.f32.mrf.mxu1  ;;  %v3109_v49 = vpop.f32.mrf.mxu0 }
 0x22e   :  { %v6441_v19 = vadd.f32 %v2948_v47, %v2660_v14  ;;  %v6444_v23 = vadd.f32 %v3109_v49, %v7182_v56  ;;  %v7186_v49 = vld [vmem:[#allocation13_spill] sm:$0xff] }
 0x22f   :  { %v2950_v16 = vpop.f32.mrf.mxu1  ;;  %v3111_v62 = vpop.f32.mrf.mxu0 }
 0x230   :  { %7181 = vst [vmem:[#allocation4_spill] sm:$0xff] %v6441_v19  ;;  %7183 = vst [vmem:[#allocation12_spill] sm:$0xff] %v6444_v23  ;;  %v7188_v19 = vld [vmem:[#allocation6_spill] sm:$0xff] }
 0x231   :  { %v2953_v44 = vpop.f32.mrf.mxu1  ;;  %v3114_v28 = vpop.f32.mrf.mxu0  ;;  %3466 = vmatmul.mubr.bf16.gmra.mxu1 %v4856_v2  ;;  %4346 = vmatmul.mubr.bf16.gmra.mxu0 %v4860_v30  ;;  %v2668_v16 = vadd.f32 %v6301_v35, %v7188_v19  ;;  %v4865_v2 = vld [vmem:[%s7149_s0 + $0x458] ss:$36 sps:$4 sm:$0xff]   ;;  %v4869_v19 = vld [vmem:[%s7149_s0 + $0x4a0] ss:$36 sps:$4 sm:$0xff]  }
 0x232   :  { %v6454_v14 = vadd.f32 %v2953_v44, %v2665_v57  ;;  %v6457_v47 = vadd.f32 %v3114_v28, %v7186_v49  ;;  %3473 = vmatprep.mubr.bf16.mxu1 %v4863_v46  ;;  %4349 = vmatprep.mubr.bf16.mxu0 %v4864_v7  ;;  %v7190_v28 = vld [vmem:[#allocation14_spill] sm:$0xff]  ;;  %v7192_v44 = vld [vmem:[#allocation7_spill] sm:$0xff] }
 0x233   :  { %v2955_v56 = vpop.f32.mrf.mxu1  ;;  %v3116_v23 = vpop.f32.mrf.mxu0  ;;  %v2673_v49 = vadd.f32 %v6301_v35, %v7192_v44  ;;  %v4866_v44 = vld [vmem:[%s7149_s0 + $0x6d8] ss:$36 sps:$4 sm:$0xff]  }
 0x234   :  { %7185 = vst [vmem:[#allocation5_spill] sm:$0xff] %v6454_v14  ;;  %7187 = vst [vmem:[#allocation13_spill] sm:$0xff] %v6457_v47  ;;  %v4868_v23 = vld [vmem:[%s7149_s0 + $0x6dc] ss:$36 sps:$4 sm:$0xff]  }
 0x235   :  { %v2956_v62 = vpop.f32.mrf.mxu1  ;;  %v3117_v11 = vpop.f32.mrf.mxu0 }
 0x236   :  { %v6467_v30 = vadd.f32 %v2956_v62, %v2668_v16  ;;  %v6470_v46 = vadd.f32 %v3117_v11, %v7190_v28  ;;  %v7193_v11 = vld [vmem:[#allocation15_spill] sm:$0xff] }
 0x237   :  { %v2958_v7 = vpop.f32.mrf.mxu1  ;;  %v3119_v57 = vpop.f32.mrf.mxu0 }
 0x238   :  { %7189 = vst [vmem:[#allocation6_spill] sm:$0xff] %v6467_v30  ;;  %7191 = vst [vmem:[#allocation14_spill] sm:$0xff] %v6470_v46  ;;  %v7194_v30 = vld [vmem:[#allocation8_spill] sm:$0xff] }
 0x239   :  { %v2961_v56 = vpop.f32.mrf.mxu1  ;;  %v3122_v47 = vpop.f32.mrf.mxu0  ;;  %3474 = vmatmul.mubr.bf16.gmra.mxu1 %v4861_v1  ;;  %4350 = vmatmul.mubr.bf16.gmra.mxu0 %v4865_v2  ;;  %v2676_v7 = vadd.f32 %v6301_v35, %v7194_v30  ;;  %v4870_v1 = vld [vmem:[%s7149_s0 + $0x4e8] ss:$36 sps:$4 sm:$0xff]   ;;  %v4874_v35 = vld [vmem:[%s7149_s0 + $0x530] ss:$36 sps:$4 sm:$0xff]  }
 0x23a   :  { %v6480_v16 = vadd.f32 %v2961_v56, %v2673_v49  ;;  %v6483_v62 = vadd.f32 %v3122_v47, %v7193_v11  ;;  %3481 = vmatprep.mubr.bf16.mxu1 %v4868_v23  ;;  %4353 = vmatprep.mubr.bf16.mxu0 %v4869_v19  ;;  %v7195_v47 = vld [vmem:[#allocation16_spill] sm:$0xff] }
 0x23b   :  { %v2963_v28 = vpop.f32.mrf.mxu1  ;;  %v3124_v46 = vpop.f32.mrf.mxu0 }
 0x23c   :  { %v4873_v46 = vld [vmem:[%s7149_s0 + $0x724] ss:$36 sps:$4 sm:$0xff]  }
 0x23d   :  { %v2964_v57 = vpop.f32.mrf.mxu1  ;;  %v3125_v14 = vpop.f32.mrf.mxu0 }
 0x23e   :  { %v6493_v2 = vadd.f32 %v2964_v57, %v2676_v7  ;;  %v6496_v23 = vadd.f32 %v3125_v14, %v7195_v47 }
 0x23f   :  { %v2966_v30 = vpop.f32.mrf.mxu1  ;;  %v3127_v19 = vpop.f32.mrf.mxu0 }
 0x240   :  { %v4871_v30 = vld [vmem:[%s7149_s0 + $0x720] ss:$36 sps:$4 sm:$0xff]  }
 0x241   :  { %v3130_v49 = vpop.f32.mrf.mxu0  ;;  %v3291_v56 = vpop.f32.mrf.mxu1  ;;  %3482 = vmatmul.mubr.bf16.gmra.mxu1 %v4866_v44  ;;  %4354 = vmatmul.mubr.bf16.gmra.mxu0 %v4870_v1  ;;  %v4875_v44 = vld [vmem:[%s7149_s0 + $0x578] ss:$36 sps:$4 sm:$0xff]   ;;  %v4878_v1 = vld [vmem:[%s7149_s0 + $0x76c] ss:$36 sps:$4 sm:$0xff]  }
 0x242   :  { %v6505_v11 = vadd.f32 %v3130_v49, %v6085_v0  ;;  %v6508_v14 = vadd.f32 %v3291_v56, %v6088_v40  ;;  %3489 = vmatprep.mubr.bf16.mxu1 %v4873_v46  ;;  %4357 = vmatprep.mubr.bf16.mxu0 %v4874_v35  ;;  %v4879_v46 = vld [vmem:[%s7149_s0 + $0x5c0] ss:$36 sps:$4 sm:$0xff]  }
 0x243   :  { %v3132_v28 = vpop.f32.mrf.mxu0  ;;  %v3293_v7 = vpop.f32.mrf.mxu1 }
 0x245   :  { %v3133_v57 = vpop.f32.mrf.mxu0  ;;  %v3294_v47 = vpop.f32.mrf.mxu1 }
 0x246   :  { %v6517_v0 = vadd.f32 %v3133_v57, %v6098_v48  ;;  %v6520_v40 = vadd.f32 %v3294_v47, %v6101_v39 }
 0x247   :  { %v3135_v35 = vpop.f32.mrf.mxu0  ;;  %v3296_v19 = vpop.f32.mrf.mxu1 }
 0x248   :  { %v4876_v35 = vld [vmem:[%s7149_s0 + $0x768] ss:$36 sps:$4 sm:$0xff]  }
 0x249   :  { %v3138_v49 = vpop.f32.mrf.mxu0  ;;  %v3299_v56 = vpop.f32.mrf.mxu1  ;;  %3490 = vmatmul.mubr.bf16.gmra.mxu1 %v4871_v30  ;;  %4358 = vmatmul.mubr.bf16.gmra.mxu0 %v4875_v44  ;;  %v4880_v30 = vld [vmem:[%s7149_s0 + $0x608] ss:$36 sps:$4 sm:$0xff]   ;;  %v4883_v44 = vld [vmem:[%s7149_s0 + $0x7b4] ss:$36 sps:$4 sm:$0xff]  }
 0x24a   :  { %v6529_v48 = vadd.f32 %v3138_v49, %v6111_v31  ;;  %v6532_v39 = vadd.f32 %v3299_v56, %v6114_v54  ;;  %3497 = vmatprep.mubr.bf16.mxu1 %v4878_v1  ;;  %4361 = vmatprep.mubr.bf16.mxu0 %v4879_v46  ;;  %v4884_v1 = vld [vmem:[%s7149_s0 + $0x650] ss:$36 sps:$4 sm:$0xff]  }
 0x24b   :  { %v3140_v28 = vpop.f32.mrf.mxu0  ;;  %v3301_v7 = vpop.f32.mrf.mxu1 }
 0x24d   :  { %v3141_v57 = vpop.f32.mrf.mxu0  ;;  %v3302_v47 = vpop.f32.mrf.mxu1 }
 0x24e   :  { %v6541_v31 = vadd.f32 %v3141_v57, %v6124_v6  ;;  %v6544_v54 = vadd.f32 %v3302_v47, %v6127_v8 }
 0x24f   :  { %v3143_v46 = vpop.f32.mrf.mxu0  ;;  %v3304_v19 = vpop.f32.mrf.mxu1 }
 0x250   :  { %v4881_v46 = vld [vmem:[%s7149_s0 + $0x7b0] ss:$36 sps:$4 sm:$0xff]  }
 0x251   :  { %v3146_v49 = vpop.f32.mrf.mxu0  ;;  %v3307_v56 = vpop.f32.mrf.mxu1  ;;  %3498 = vmatmul.mubr.bf16.gmra.mxu1 %v4876_v35  ;;  %4362 = vmatmul.mubr.bf16.gmra.mxu0 %v4880_v30  ;;  %v4885_v35 = vld [vmem:[%s7149_s0 + $0x698] ss:$36 sps:$4 sm:$0xff]  }
 0x252   :  { %v6553_v6 = vadd.f32 %v3146_v49, %v6137_v17  ;;  %v6556_v8 = vadd.f32 %v3307_v56, %v6140_v26  ;;  %3505 = vmatprep.mubr.bf16.mxu1 %v4883_v44  ;;  %4365 = vmatprep.mubr.bf16.mxu0 %v4884_v1  ;;  %v4888_v30 = vld [vmem:[%s7149_s0 + $0x7fc] ss:$36 sps:$4 sm:$0xff]  }
 0x253   :  { %v3148_v28 = vpop.f32.mrf.mxu0  ;;  %v3309_v7 = vpop.f32.mrf.mxu1  ;;  %v4889_v44 = vld [vmem:[%s7149_s0 + $0x6e0] ss:$36 sps:$4 sm:$0xff]  }
 0x255   :  { %v3149_v57 = vpop.f32.mrf.mxu0  ;;  %v3310_v47 = vpop.f32.mrf.mxu1 }
 0x256   :  { %v6565_v17 = vadd.f32 %v3149_v57, %v6150_v34  ;;  %v6568_v26 = vadd.f32 %v3310_v47, %v6153_v38 }
 0x257   :  { %v3151_v1 = vpop.f32.mrf.mxu0  ;;  %v3312_v19 = vpop.f32.mrf.mxu1 }
 0x258   :  { %v4886_v1 = vld [vmem:[%s7149_s0 + $0x7f8] ss:$36 sps:$4 sm:$0xff]  }
 0x259   :  { %v3154_v49 = vpop.f32.mrf.mxu0  ;;  %v3315_v56 = vpop.f32.mrf.mxu1  ;;  %3506 = vmatmul.mubr.bf16.gmra.mxu1 %v4881_v46  ;;  %4366 = vmatmul.mubr.bf16.gmra.mxu0 %v4885_v35  ;;  %v4890_v46 = vld [vmem:[%s7149_s0 + $0x728] ss:$36 sps:$4 sm:$0xff]  }
 0x25a   :  { %v6577_v34 = vadd.f32 %v3154_v49, %v6163_v60  ;;  %v6580_v38 = vadd.f32 %v3315_v56, %v6166_v53  ;;  %3513 = vmatprep.mubr.bf16.mxu1 %v4888_v30  ;;  %4369 = vmatprep.mubr.bf16.mxu0 %v4889_v44  ;;  %v4893_v35 = vld [vmem:[%s7149_s0 + $0x844] ss:$36 sps:$4 sm:$0xff]   ;;  %v4894_v30 = vld [vmem:[%s7149_s0 + $0x770] ss:$36 sps:$4 sm:$0xff]  }
 0x25b   :  { %v3156_v28 = vpop.f32.mrf.mxu0  ;;  %v3317_v7 = vpop.f32.mrf.mxu1 }
 0x25d   :  { %v3157_v57 = vpop.f32.mrf.mxu0  ;;  %v3318_v47 = vpop.f32.mrf.mxu1 }
 0x25e   :  { %v6589_v60 = vadd.f32 %v3157_v57, %v6176_v3  ;;  %v6592_v53 = vadd.f32 %v3318_v47, %v6179_v9 }
 0x25f   :  { %v3159_v44 = vpop.f32.mrf.mxu0  ;;  %v3320_v19 = vpop.f32.mrf.mxu1 }
 0x260   :  { %v4891_v44 = vld [vmem:[%s7149_s0 + $0x840] ss:$36 sps:$4 sm:$0xff]  }
 0x261   :  { %v3162_v49 = vpop.f32.mrf.mxu0  ;;  %v3323_v56 = vpop.f32.mrf.mxu1  ;;  %3514 = vmatmul.mubr.bf16.gmra.mxu1 %v4886_v1  ;;  %4370 = vmatmul.mubr.bf16.gmra.mxu0 %v4890_v46  ;;  %v4895_v1 = vld [vmem:[%s7149_s0 + $0x7b8] ss:$36 sps:$4 sm:$0xff]   ;;  %v4898_v46 = vld [vmem:[%s7149_s0 + $0x88c] ss:$36 sps:$4 sm:$0xff]  }
 0x262   :  { %v6601_v3 = vadd.f32 %v3162_v49, %v6189_v58  ;;  %v6604_v9 = vadd.f32 %v3323_v56, %v6192_v61  ;;  %3521 = vmatprep.mubr.bf16.mxu1 %v4893_v35  ;;  %4373 = vmatprep.mubr.bf16.mxu0 %v4894_v30  ;;  %v4899_v35 = vld [vmem:[%s7149_s0 + $0x800] ss:$36 sps:$4 sm:$0xff]  }
 0x263   :  { %v3164_v28 = vpop.f32.mrf.mxu0  ;;  %v3325_v7 = vpop.f32.mrf.mxu1 }
 0x265   :  { %v3165_v57 = vpop.f32.mrf.mxu0  ;;  %v3326_v47 = vpop.f32.mrf.mxu1 }
 0x266   :  { %v6613_v58 = vadd.f32 %v3165_v57, %v6202_v45  ;;  %v6616_v61 = vadd.f32 %v3326_v47, %v6205_v42 }
 0x267   :  { %v3167_v30 = vpop.f32.mrf.mxu0  ;;  %v3328_v19 = vpop.f32.mrf.mxu1 }
 0x268   :  { %v4896_v30 = vld [vmem:[%s7149_s0 + $0x888] ss:$36 sps:$4 sm:$0xff]  }
 0x269   :  { %v3170_v49 = vpop.f32.mrf.mxu0  ;;  %v3331_v56 = vpop.f32.mrf.mxu1  ;;  %3522 = vmatmul.mubr.bf16.gmra.mxu1 %v4891_v44  ;;  %4374 = vmatmul.mubr.bf16.gmra.mxu0 %v4895_v1  ;;  %v4900_v44 = vld [vmem:[%s7149_s0 + $0x848] ss:$36 sps:$4 sm:$0xff]   ;;  %v4903_v1 = vld [vmem:[%s7149_s0 + $0x8d4] ss:$36 sps:$4 sm:$0xff]  }
 0x26a   :  { %v6625_v45 = vadd.f32 %v3170_v49, %v6215_v25  ;;  %v6628_v42 = vadd.f32 %v3331_v56, %v6218_v59  ;;  %3529 = vmatprep.mubr.bf16.mxu1 %v4898_v46  ;;  %4377 = vmatprep.mubr.bf16.mxu0 %v4899_v35  ;;  %v4904_v46 = vld [vmem:[%s7149_s0 + $0x890] ss:$36 sps:$4 sm:$0xff]  }
 0x26b   :  { %v3172_v28 = vpop.f32.mrf.mxu0  ;;  %v3333_v7 = vpop.f32.mrf.mxu1 }
 0x26d   :  { %v3173_v57 = vpop.f32.mrf.mxu0  ;;  %v3334_v47 = vpop.f32.mrf.mxu1 }
 0x26e   :  { %v6637_v25 = vadd.f32 %v3173_v57, %v6228_v55  ;;  %v6640_v59 = vadd.f32 %v3334_v47, %v6231_v27 }
 0x26f   :  { %v3175_v35 = vpop.f32.mrf.mxu0  ;;  %v3336_v19 = vpop.f32.mrf.mxu1 }
 0x270   :  { %v4901_v35 = vld [vmem:[%s7149_s0 + $0x8d0] ss:$36 sps:$4 sm:$0xff]  }
 0x271   :  { %v3178_v49 = vpop.f32.mrf.mxu0  ;;  %v3339_v56 = vpop.f32.mrf.mxu1  ;;  %3530 = vmatmul.mubr.bf16.gmra.mxu1 %v4896_v30  ;;  %4378 = vmatmul.mubr.bf16.gmra.mxu0 %v4900_v44  ;;  %v4905_v30 = vld [vmem:[%s7149_s0 + $0x8d8] ss:$36 sps:$4 sm:$0xff]  }
 0x272   :  { %v6649_v55 = vadd.f32 %v3178_v49, %v6241_v4  ;;  %v6652_v27 = vadd.f32 %v3339_v56, %v6244_v50  ;;  %3537 = vmatprep.mubr.bf16.mxu1 %v4903_v1  ;;  %4381 = vmatprep.mubr.bf16.mxu0 %v4904_v46 }
 0x273   :  { %v3180_v28 = vpop.f32.mrf.mxu0  ;;  %v3341_v7 = vpop.f32.mrf.mxu1 }
 0x274   :  { %7196 = vst [vmem:[#allocation7_spill] sm:$0xff] %v6649_v55 }
 0x275   :  { %v3181_v57 = vpop.f32.mrf.mxu0  ;;  %v3342_v47 = vpop.f32.mrf.mxu1 }
 0x276   :  { %v6661_v4 = vadd.f32 %v3181_v57, %v6254_v12  ;;  %v6664_v50 = vadd.f32 %v3342_v47, %v6257_v5 }
 0x277   :  { %v3183_v44 = vpop.f32.mrf.mxu0  ;;  %v3344_v1 = vpop.f32.mrf.mxu1 }
 0x278   :  { %7197 = vst [vmem:[#allocation15_spill] sm:$0xff] %v6661_v4  ;;  %v7222_v4 = vld [vmem:[#allocation6_spill] sm:$0xff] }
 0x279   :  { %v3186_v46 = vpop.f32.mrf.mxu0  ;;  %v3347_v19 = vpop.f32.mrf.mxu1  ;;  %3538 = vmatmul.mubr.bf16.gmra.mxu1 %v4901_v35  ;;  %4382 = vmatmul.mubr.bf16.gmra.mxu0 %v4905_v30 }
 0x27a   :  { %v6667_v49 = vadd.f32 %v3186_v46, %v6267_v51  ;;  %v6670_v56 = vadd.f32 %v3347_v19, %v6270_v22 }
 0x27b   :  { %v3188_v28 = vpop.f32.mrf.mxu0  ;;  %v3349_v7 = vpop.f32.mrf.mxu1 }
 0x27d   :  { %v3189_v55 = vpop.f32.mrf.mxu0  ;;  %v3350_v12 = vpop.f32.mrf.mxu1 }
 0x27e   :  { %v6673_v57 = vadd.f32 %v3189_v55, %v6280_v24  ;;  %v6676_v5 = vadd.f32 %v3350_v12, %v6283_v52 }
 0x27f   :  { %v3191_v47 = vpop.f32.mrf.mxu0  ;;  %v3352_v44 = vpop.f32.mrf.mxu1 }
 0x281   :  { %v3194_v35 = vpop.f32.mrf.mxu0  ;;  %v3355_v30 = vpop.f32.mrf.mxu1 }
 0x282   :  { %v6679_v51 = vadd.f32 %v3194_v35, %v6293_v36  ;;  %v6682_v22 = vadd.f32 %v3355_v30, %v6296_v18 }
 0x283   :  { %v3196_v1 = vpop.f32.mrf.mxu0  ;;  %v3357_v46 = vpop.f32.mrf.mxu1 }
 0x284   :  { %7198 = vst [vmem:[#allocation8_spill] sm:$0xff] %v6679_v51  ;;  %v7217_v51 = vld [vmem:[#allocation4_spill] sm:$0xff] }
 0x285   :  { %v3197_v19 = vpop.f32.mrf.mxu0  ;;  %v3358_v28 = vpop.f32.mrf.mxu1 }
 0x286   :  { %v6685_v24 = vadd.f32 %v3197_v19, %v6311_v20  ;;  %v6688_v52 = vadd.f32 %v3358_v28, %v6314_v33 }
 0x287   :  { %v3199_v55 = vpop.f32.mrf.mxu0  ;;  %v3360_v7 = vpop.f32.mrf.mxu1 }
 0x288   :  { %7199 = vst [vmem:[#allocation16_spill] sm:$0xff] %v6685_v24  ;;  %v7211_v24 = vld [vmem:[#allocation2_spill] sm:$0xff] }
 0x289   :  { %v3202_v12 = vpop.f32.mrf.mxu0  ;;  %v3363_v47 = vpop.f32.mrf.mxu1 }
 0x28a   :  { %v6691_v36 = vadd.f32 %v3202_v12, %v6324_v63  ;;  %v6694_v18 = vadd.f32 %v3363_v47, %v6327_v13 }
 0x28b   :  { %v3204_v44 = vpop.f32.mrf.mxu0  ;;  %v3365_v35 = vpop.f32.mrf.mxu1 }
 0x28c   :  { %7200 = vst [vmem:[#allocation20_spill] sm:$0xff] %v6691_v36  ;;  %v7220_v36 = vld [vmem:[#allocation5_spill] sm:$0xff] }
 0x28d   :  { %v3205_v30 = vpop.f32.mrf.mxu0  ;;  %v3366_v1 = vpop.f32.mrf.mxu1 }
 0x28e   :  { %v6697_v20 = vadd.f32 %v3205_v30, %v6337_v41  ;;  %v6700_v33 = vadd.f32 %v3366_v1, %v6340_v32 }
 0x28f   :  { %v3207_v46 = vpop.f32.mrf.mxu0  ;;  %v3368_v19 = vpop.f32.mrf.mxu1 }
 0x290   :  { %7201 = vst [vmem:[#allocation21_spill] sm:$0xff] %v6697_v20  ;;  %v7214_v20 = vld [vmem:[#allocation3_spill] sm:$0xff] }
 0x291   :  { %v3210_v28 = vpop.f32.mrf.mxu0  ;;  %v3371_v55 = vpop.f32.mrf.mxu1 }
 0x292   :  { %v6703_v63 = vadd.f32 %v3210_v28, %v6350_v21  ;;  %v6706_v13 = vadd.f32 %v3371_v55, %v6353_v15 }
 0x293   :  { %v3212_v7 = vpop.f32.mrf.mxu0  ;;  %v3373_v12 = vpop.f32.mrf.mxu1 }
 0x294   :  { %7202 = vst [vmem:[#allocation22_spill] sm:$0xff] %v6703_v63  ;;  %v7205_v12 = vld [vmem:[#allocation17_spill] sm:$0xff]  ;;  %v7208_v63 = vld [vmem:[#allocation19_spill] sm:$0xff] }
 0x295   :  { %v3213_v47 = vpop.f32.mrf.mxu0  ;;  %v3374_v44 = vpop.f32.mrf.mxu1 }
 0x296   :  { %v6709_v41 = vadd.f32 %v3213_v47, %v6363_v43  ;;  %v6712_v32 = vadd.f32 %v3374_v44, %v6366_v10  ;;  %v7207_v47 = vld [vmem:[#allocation18_spill] sm:$0xff] }
 0x297   :  { %v3215_v35 = vpop.f32.mrf.mxu0  ;;  %v3376_v30 = vpop.f32.mrf.mxu1 }
 0x298   :  { %7203 = vst [vmem:[#allocation23_spill] sm:$0xff] %v6709_v41 }
 0x299   :  { %v3218_v1 = vpop.f32.mrf.mxu0  ;;  %v3379_v46 = vpop.f32.mrf.mxu1 }
 0x29a   :  { %v6715_v21 = vadd.f32 %v3218_v1, %v6376_v29  ;;  %v6718_v15 = vadd.f32 %v3379_v46, %v6379_v37  ;;  %v7210_v1 = vld [vmem:[#allocation9_spill] sm:$0xff] }
 0x29b   :  { %v3220_v19 = vpop.f32.mrf.mxu0  ;;  %v3381_v28 = vpop.f32.mrf.mxu1 }
 0x29c   :  { %7204 = vst [vmem:[#allocation24_spill] sm:$0xff] %v6715_v21 }
 0x29d   :  { %v3221_v55 = vpop.f32.mrf.mxu0  ;;  %v3382_v7 = vpop.f32.mrf.mxu1 }
 0x29e   :  { %v6721_v43 = vadd.f32 %v3221_v55, %v7205_v12  ;;  %v6724_v10 = vadd.f32 %v3382_v7, %v7207_v47  ;;  %v7213_v12 = vld [vmem:[#allocation10_spill] sm:$0xff] }
 0x29f   :  { %v3223_v44 = vpop.f32.mrf.mxu0  ;;  %v3384_v35 = vpop.f32.mrf.mxu1 }
 0x2a0   :  { %7206 = vst [vmem:[#allocation17_spill] sm:$0xff] %v6721_v43 }
 0x2a1   :  { %v3226_v30 = vpop.f32.mrf.mxu0  ;;  %v3387_v41 = vpop.f32.mrf.mxu1 }
 0x2a2   :  { %v6727_v29 = vadd.f32 %v3226_v30, %v7208_v63  ;;  %v6730_v37 = vadd.f32 %v3387_v41, %v7210_v1  ;;  %v7216_v30 = vld [vmem:[#allocation11_spill] sm:$0xff] }
 0x2a3   :  { %v3228_v46 = vpop.f32.mrf.mxu0  ;;  %v3389_v19 = vpop.f32.mrf.mxu1 }
 0x2a4   :  { %7209 = vst [vmem:[#allocation18_spill] sm:$0xff] %v6727_v29 }
 0x2a5   :  { %v3229_v28 = vpop.f32.mrf.mxu0  ;;  %v3390_v21 = vpop.f32.mrf.mxu1 }
 0x2a6   :  { %v6733_v55 = vadd.f32 %v3229_v28, %v7211_v24  ;;  %v6736_v7 = vadd.f32 %v3390_v21, %v7213_v12  ;;  %v7219_v28 = vld [vmem:[#allocation12_spill] sm:$0xff] }
 0x2a7   :  { %v3231_v47 = vpop.f32.mrf.mxu0  ;;  %v3392_v44 = vpop.f32.mrf.mxu1 }
 0x2a8   :  { %7212 = vst [vmem:[#allocation19_spill] sm:$0xff] %v6733_v55 }
 0x2a9   :  { %v3234_v35 = vpop.f32.mrf.mxu0  ;;  %v3395_v43 = vpop.f32.mrf.mxu1 }
 0x2aa   :  { %v6739_v63 = vadd.f32 %v3234_v35, %v7214_v20  ;;  %v6742_v41 = vadd.f32 %v3395_v43, %v7216_v30  ;;  %v7221_v35 = vld [vmem:[#allocation13_spill] sm:$0xff] }
 0x2ab   :  { %v3236_v1 = vpop.f32.mrf.mxu0  ;;  %v3397_v46 = vpop.f32.mrf.mxu1 }
 0x2ac   :  { %7215 = vst [vmem:[#allocation9_spill] sm:$0xff] %v6739_v63 }
 0x2ad   :  { %v3237_v19 = vpop.f32.mrf.mxu0  ;;  %v3398_v29 = vpop.f32.mrf.mxu1 }
 0x2ae   :  { %v6745_v24 = vadd.f32 %v3237_v19, %v7217_v51  ;;  %v6748_v21 = vadd.f32 %v3398_v29, %v7219_v28  ;;  %v7223_v19 = vld [vmem:[#allocation14_spill] sm:$0xff] }
 0x2af   :  { %v3239_v12 = vpop.f32.mrf.mxu0  ;;  %v3400_v47 = vpop.f32.mrf.mxu1 }
 0x2b0   :  { %7218 = vst [vmem:[#allocation2_spill] sm:$0xff] %v6745_v24 }
 0x2b1   :  { %v3242_v44 = vpop.f32.mrf.mxu0  ;;  %v3403_v55 = vpop.f32.mrf.mxu1 }
 0x2b2   :  { %v6751_v20 = vadd.f32 %v3242_v44, %v7220_v36  ;;  %v6754_v43 = vadd.f32 %v3403_v55, %v7221_v35 }
 0x2b3   :  { %v3244_v30 = vpop.f32.mrf.mxu0  ;;  %v3405_v1 = vpop.f32.mrf.mxu1 }
 0x2b5   :  { %v3245_v46 = vpop.f32.mrf.mxu0  ;;  %v3406_v63 = vpop.f32.mrf.mxu1 }
 0x2b6   :  { %v6757_v51 = vadd.f32 %v3245_v46, %v7222_v4  ;;  %v6760_v29 = vadd.f32 %v3406_v63, %v7223_v19 }
 0x2b7   :  { %v3247_v28 = vpop.f32.mrf.mxu0  ;;  %v3408_v12 = vpop.f32.mrf.mxu1 }
 0x2b9   :  { %v3250_v47 = vpop.f32.mrf.mxu0  ;;  %v6762_v24 = vpop.f32.mrf.mxu1 }
 0x2ba   :  { %v6765_v36 = vadd.f32 %v3250_v47, %v6480_v16 }
 0x2bb   :  { %v3252_v55 = vpop.f32.mrf.mxu0  ;;  %v3413_v44 = vpop.f32.mrf.mxu1 }
 0x2bd   :  { %v3253_v35 = vpop.f32.mrf.mxu0  ;;  %v6767_v30 = vpop.f32.mrf.mxu1 }
 0x2be   :  { %v6770_v1 = vadd.f32 %v3253_v35, %v6493_v2 }
 0x2bf   :  { %v3255_v4 = vpop.f32.mrf.mxu0  ;;  %v3416_v46 = vpop.f32.mrf.mxu1 }
 0x2c1   :  { %v3419_v63 = vpop.f32.mrf.mxu1  ;;  %v4323_v19 = vpop.f32.mrf.mxu0 }
 0x2c2   :  { %v6773_v28 = vadd.f32 %v3419_v63, %v6505_v11  ;;  %v3589_v12 = vadd.f32 %v4323_v19, %v6532_v39 }
 0x2c3   :  { %v3421_v16 = vpop.f32.mrf.mxu1  ;;  %v3580_v47 = vpop.f32.mrf.mxu0 }
 0x2c4   :  { %3838 = vst.msk [vmem:[%s7151_s3 + $0x10] sm:$0xff] %vm3835_vm0, %v3589_v12  ;;  %v3581_v2 = vadd.f32 %v3580_v47, %v6508_v14 }
 0x2c5   :  { %v3422_v55 = vpop.f32.mrf.mxu1  ;;  %v4324_v44 = vpop.f32.mrf.mxu0 }
 0x2c6   :  { %3836 = vst.msk [vmem:[%s7151_s3] sm:$0xff] %vm3835_vm0, %v3581_v2  ;;  %v6786_v11 = vadd.f32 %v3422_v55, %v6517_v0  ;;  %v3592_v39 = vadd.f32 %v4324_v44, %v6544_v54 }
 0x2c7   :  { %v3424_v35 = vpop.f32.mrf.mxu1  ;;  %v3583_v4 = vpop.f32.mrf.mxu0 }
 0x2c8   :  { %3839 = vst.msk [vmem:[%s7151_s3 + $0x18] sm:$0xff] %vm3835_vm0, %v3592_v39  ;;  %v3584_v14 = vadd.f32 %v3583_v4, %v6520_v40 }
 0x2c9   :  { %v6794_v46 = vpop.f32.mrf.mxu1  ;;  %v4327_v63 = vpop.f32.mrf.mxu0 }
 0x2ca   :  { %3837 = vst.msk [vmem:[%s7151_s3 + $0x8] sm:$0xff] %vm3835_vm0, %v3584_v14  ;;  %v3605_v0 = vadd.f32 %v4327_v63, %v6580_v38 }
 0x2cb   :  { %v3429_v54 = vpop.f32.mrf.mxu1  ;;  %v3596_v19 = vpop.f32.mrf.mxu0 }
 0x2cc   :  { %3842 = vst.msk [vmem:[%s7151_s3 + $0x30] sm:$0xff] %vm3835_vm0, %v3605_v0  ;;  %v3597_v12 = vadd.f32 %v3596_v19, %v6556_v8 }
 0x2cd   :  { %v6806_v40 = vpop.f32.mrf.mxu1  ;;  %v4328_v16 = vpop.f32.mrf.mxu0 }
 0x2ce   :  { %3840 = vst.msk [vmem:[%s7151_s3 + $0x20] sm:$0xff] %vm3835_vm0, %v3597_v12  ;;  %v3608_v47 = vadd.f32 %v4328_v16, %v6592_v53 }
 0x2cf   :  { %v3432_v38 = vpop.f32.mrf.mxu1  ;;  %v3599_v2 = vpop.f32.mrf.mxu0 }
 0x2d0   :  { %3843 = vst.msk [vmem:[%s7151_s3 + $0x38] sm:$0xff] %vm3835_vm0, %v3608_v47  ;;  %v3600_v55 = vadd.f32 %v3599_v2, %v6568_v26 }
 0x2d1   :  { %v6818_v8 = vpop.f32.mrf.mxu1  ;;  %v4331_v44 = vpop.f32.mrf.mxu0 }
 0x2d2   :  { %3841 = vst.msk [vmem:[%s7151_s3 + $0x28] sm:$0xff] %vm3835_vm0, %v3600_v55  ;;  %v3621_v39 = vadd.f32 %v4331_v44, %v6628_v42 }
 0x2d3   :  { %v3437_v53 = vpop.f32.mrf.mxu1  ;;  %v3612_v35 = vpop.f32.mrf.mxu0 }
 0x2d4   :  { %3846 = vst.msk [vmem:[%s7151_s3 + $0x50] sm:$0xff] %vm3835_vm0, %v3621_v39  ;;  %v3613_v4 = vadd.f32 %v3612_v35, %v6604_v9 }
 0x2d5   :  { %v6830_v26 = vpop.f32.mrf.mxu1  ;;  %v4332_v14 = vpop.f32.mrf.mxu0 }
 0x2d6   :  { %3844 = vst.msk [vmem:[%s7151_s3 + $0x40] sm:$0xff] %vm3835_vm0, %v3613_v4  ;;  %v3624_v63 = vadd.f32 %v4332_v14, %v6640_v59 }
 0x2d7   :  { %v3440_v42 = vpop.f32.mrf.mxu1  ;;  %v3615_v0 = vpop.f32.mrf.mxu0 }
 0x2d8   :  { %3847 = vst.msk [vmem:[%s7151_s3 + $0x58] sm:$0xff] %vm3835_vm0, %v3624_v63  ;;  %v3616_v54 = vadd.f32 %v3615_v0, %v6616_v61 }
 0x2d9   :  { %v6842_v9 = vpop.f32.mrf.mxu1  ;;  %v4335_v19 = vpop.f32.mrf.mxu0 }
 0x2da   :  { %3845 = vst.msk [vmem:[%s7151_s3 + $0x48] sm:$0xff] %vm3835_vm0, %v3616_v54  ;;  %v3637_v12 = vadd.f32 %v4335_v19, %v6670_v56 }
 0x2db   :  { %v3445_v59 = vpop.f32.mrf.mxu1  ;;  %v3628_v16 = vpop.f32.mrf.mxu0 }
 0x2dc   :  { %3850 = vst.msk [vmem:[%s7151_s3 + $0x70] sm:$0xff] %vm3835_vm0, %v3637_v12  ;;  %v3629_v47 = vadd.f32 %v3628_v16, %v6652_v27 }
 0x2dd   :  { %v6854_v61 = vpop.f32.mrf.mxu1  ;;  %v4336_v38 = vpop.f32.mrf.mxu0 }
 0x2de   :  { %3848 = vst.msk [vmem:[%s7151_s3 + $0x60] sm:$0xff] %vm3835_vm0, %v3629_v47  ;;  %v3640_v2 = vadd.f32 %v4336_v38, %v6676_v5 }
 0x2df   :  { %v3448_v56 = vpop.f32.mrf.mxu1  ;;  %v3631_v55 = vpop.f32.mrf.mxu0 }
 0x2e0   :  { %3851 = vst.msk [vmem:[%s7151_s3 + $0x78] sm:$0xff] %vm3835_vm0, %v3640_v2  ;;  %v3632_v44 = vadd.f32 %v3631_v55, %v6664_v50 }
 0x2e1   :  { %v6866_v27 = vpop.f32.mrf.mxu1  ;;  %v4339_v39 = vpop.f32.mrf.mxu0 }
 0x2e2   :  { %3849 = vst.msk [vmem:[%s7151_s3 + $0x68] sm:$0xff] %vm3835_vm0, %v3632_v44  ;;  %v3653_v53 = vadd.f32 %v4339_v39, %v6694_v18 }
 0x2e3   :  { %v3453_v5 = vpop.f32.mrf.mxu1  ;;  %v3644_v35 = vpop.f32.mrf.mxu0 }
 0x2e4   :  { %3854 = vst.msk [vmem:[%s7151_s3 + $0x90] sm:$0xff] %vm3835_vm0, %v3653_v53  ;;  %v3645_v4 = vadd.f32 %v3644_v35, %v6682_v22 }
 0x2e5   :  { %v6878_v50 = vpop.f32.mrf.mxu1  ;;  %v4340_v14 = vpop.f32.mrf.mxu0 }
 0x2e6   :  { %3852 = vst.msk [vmem:[%s7151_s3 + $0x80] sm:$0xff] %vm3835_vm0, %v3645_v4  ;;  %v3656_v63 = vadd.f32 %v4340_v14, %v6700_v33  ;;  %v3412_v4 = vadd.f32 %v6762_v24, %v6483_v62  ;;  %v3415_v62 = vadd.f32 %v6767_v30, %v6496_v23  ;;  %v3428_v23 = vadd.f32 %v6794_v46, %v6529_v48 }
 0x2e7   :  { %v3456_v18 = vpop.f32.mrf.mxu1  ;;  %v3647_v42 = vpop.f32.mrf.mxu0  ;;  %v3431_v48 = vadd.f32 %v6806_v40, %v6541_v31  ;;  %v3444_v31 = vadd.f32 %v6842_v9, %v6577_v34  ;;  %v3447_v9 = vadd.f32 %v6854_v61, %v6589_v60 }
 0x2e8   :  { %3855 = vst.msk [vmem:[%s7151_s3 + $0x98] sm:$0xff] %vm3835_vm0, %v3656_v63  ;;  %v3648_v0 = vadd.f32 %v3647_v42, %v6688_v52 }
 0x2e9   :  { %v6890_v22 = vpop.f32.mrf.mxu1  ;;  %v4343_v54 = vpop.f32.mrf.mxu0 }
 0x2ea   :  { %3853 = vst.msk [vmem:[%s7151_s3 + $0x88] sm:$0xff] %vm3835_vm0, %v3648_v0  ;;  %v3669_v19 = vadd.f32 %v4343_v54, %v6718_v15  ;;  %v3460_v60 = vadd.f32 %v6890_v22, %v6625_v45 }
 0x2eb   :  { %v3461_v33 = vpop.f32.mrf.mxu1  ;;  %v3660_v12 = vpop.f32.mrf.mxu0 }
 0x2ec   :  { %3858 = vst.msk [vmem:[%s7151_s3 + $0xb0] sm:$0xff] %vm3835_vm0, %v3669_v19  ;;  %v3661_v59 = vadd.f32 %v3660_v12, %v6706_v13 }
 0x2ed   :  { %v6902_v52 = vpop.f32.mrf.mxu1  ;;  %v4344_v16 = vpop.f32.mrf.mxu0 }
 0x2ee   :  { %3856 = vst.msk [vmem:[%s7151_s3 + $0xa0] sm:$0xff] %vm3835_vm0, %v3661_v59  ;;  %v3672_v47 = vadd.f32 %v4344_v16, %v6724_v10  ;;  %v3463_v45 = vadd.f32 %v6902_v52, %v6637_v25 }
 0x2ef   :  { %v3464_v15 = vpop.f32.mrf.mxu1  ;;  %v3663_v38 = vpop.f32.mrf.mxu0 }
 0x2f0   :  { %3859 = vst.msk [vmem:[%s7151_s3 + $0xb8] sm:$0xff] %vm3835_vm0, %v3672_v47  ;;  %v3664_v2 = vadd.f32 %v3663_v38, %v6712_v32 }
 0x2f1   :  { %v6914_v13 = vpop.f32.mrf.mxu1  ;;  %v4347_v56 = vpop.f32.mrf.mxu0 }
 0x2f2   :  { %3857 = vst.msk [vmem:[%s7151_s3 + $0xa8] sm:$0xff] %vm3835_vm0, %v3664_v2  ;;  %v3685_v55 = vadd.f32 %v4347_v56, %v6742_v41 }
 0x2f3   :  { %v3469_v10 = vpop.f32.mrf.mxu1  ;;  %v3676_v44 = vpop.f32.mrf.mxu0 }
 0x2f4   :  { %3862 = vst.msk [vmem:[%s7151_s3 + $0xd0] sm:$0xff] %vm3835_vm0, %v3685_v55  ;;  %v3677_v39 = vadd.f32 %v3676_v44, %v6730_v37  ;;  %v3436_v10 = vadd.f32 %v6818_v8, %v6553_v6  ;;  %v3439_v6 = vadd.f32 %v6830_v26, %v6565_v17  ;;  %v3452_v17 = vadd.f32 %v6866_v27, %v6601_v3 }
 0x2f5   :  { %v6926_v32 = vpop.f32.mrf.mxu1  ;;  %v4348_v53 = vpop.f32.mrf.mxu0  ;;  %v3455_v3 = vadd.f32 %v6878_v50, %v6613_v58  ;;  %v7224_v58 = vld [vmem:[#allocation7_spill] sm:$0xff] }
 0x2f6   :  { %3860 = vst.msk [vmem:[%s7151_s3 + $0xc0] sm:$0xff] %vm3835_vm0, %v3677_v39  ;;  %v3688_v5 = vadd.f32 %v4348_v53, %v6748_v21  ;;  %v3468_v50 = vadd.f32 %v6914_v13, %v7224_v58  ;;  %v7225_v13 = vld [vmem:[#allocation15_spill] sm:$0xff]  ;;  %v7235_v58 = vld [vmem:[#allocation18_spill] sm:$0xff] }
 0x2f7   :  { %v3472_v41 = vpop.f32.mrf.mxu1  ;;  %v3679_v35 = vpop.f32.mrf.mxu0 }
 0x2f8   :  { %3863 = vst.msk [vmem:[%s7151_s3 + $0xd8] sm:$0xff] %vm3835_vm0, %v3688_v5  ;;  %v3680_v37 = vadd.f32 %v3679_v35, %v6736_v7 }
 0x2f9   :  { %v6940_v14 = vpop.f32.mrf.mxu1  ;;  %v4351_v63 = vpop.f32.mrf.mxu0 }
 0x2fa   :  { %3861 = vst.msk [vmem:[%s7151_s3 + $0xc8] sm:$0xff] %vm3835_vm0, %v3680_v37  ;;  %v3701_v21 = vadd.f32 %v4351_v63, %v3412_v4  ;;  %v3476_v25 = vadd.f32 %v6940_v14, %v6667_v49 }
 0x2fb   :  { %v3477_v18 = vpop.f32.mrf.mxu1  ;;  %v3692_v42 = vpop.f32.mrf.mxu0 }
 0x2fc   :  { %3866 = vst.msk [vmem:[%s7151_s3 + $0xf0] sm:$0xff] %vm3835_vm0, %v3701_v21  ;;  %v3693_v7 = vadd.f32 %v3692_v42, %v6754_v43 }
 0x2fd   :  { %v6953_v24 = vpop.f32.mrf.mxu1  ;;  %v4352_v0 = vpop.f32.mrf.mxu0 }
 0x2fe   :  { %3864 = vst.msk [vmem:[%s7151_s3 + $0xe0] sm:$0xff] %vm3835_vm0, %v3693_v7  ;;  %v3704_v54 = vadd.f32 %v4352_v0, %v3415_v62  ;;  %v3479_v49 = vadd.f32 %v6953_v24, %v6673_v57  ;;  %v7226_v57 = vld [vmem:[#allocation20_spill] sm:$0xff] }
 0x2ff   :  { %v3480_v19 = vpop.f32.mrf.mxu1  ;;  %v3695_v33 = vpop.f32.mrf.mxu0 }
 0x300   :  { %3867 = vst.msk [vmem:[%s7151_s3 + $0xf8] sm:$0xff] %vm3835_vm0, %v3704_v54  ;;  %v3696_v43 = vadd.f32 %v3695_v33, %v6760_v29 }
 0x301   :  { %v6966_v30 = vpop.f32.mrf.mxu1  ;;  %v4355_v12 = vpop.f32.mrf.mxu0 }
 0x302   :  { %3865 = vst.msk [vmem:[%s7151_s3 + $0xe8] sm:$0xff] %vm3835_vm0, %v3696_v43  ;;  %v3717_v59 = vadd.f32 %v4355_v12, %v3428_v23 }
 0x303   :  { %v3485_v16 = vpop.f32.mrf.mxu1  ;;  %v3708_v47 = vpop.f32.mrf.mxu0 }
 0x304   :  { %3870 = vst.msk [vmem:[%s7151_s3 + $0x110] sm:$0xff] %vm3835_vm0, %v3717_v59  ;;  %v3709_v29 = vadd.f32 %v3708_v47, %v6773_v28  ;;  %v3471_v59 = vadd.f32 %v6926_v32, %v7225_v13  ;;  %v7237_v13 = vld [vmem:[#allocation19_spill] sm:$0xff] }
 0x305   :  { %v6979_v46 = vpop.f32.mrf.mxu1  ;;  %v4356_v15 = vpop.f32.mrf.mxu0 }
 0x306   :  { %3868 = vst.msk [vmem:[%s7151_s3 + $0x100] sm:$0xff] %vm3835_vm0, %v3709_v29  ;;  %v3720_v38 = vadd.f32 %v4356_v15, %v3431_v48 }
 0x307   :  { %v3488_v2 = vpop.f32.mrf.mxu1  ;;  %v3711_v56 = vpop.f32.mrf.mxu0 }
 0x308   :  { %3871 = vst.msk [vmem:[%s7151_s3 + $0x118] sm:$0xff] %vm3835_vm0, %v3720_v38  ;;  %v3712_v28 = vadd.f32 %v3711_v56, %v6786_v11  ;;  %v7227_v2 = vld [vmem:[#allocation8_spill] sm:$0xff] }
 0x309   :  { %v3491_v40 = vpop.f32.mrf.mxu1  ;;  %v4359_v55 = vpop.f32.mrf.mxu0  ;;  %v3484_v32 = vadd.f32 %v6966_v30, %v7227_v2 }
 0x30a   :  { %3869 = vst.msk [vmem:[%s7151_s3 + $0x108] sm:$0xff] %vm3835_vm0, %v3712_v28  ;;  %v3733_v44 = vadd.f32 %v4359_v55, %v3444_v31  ;;  %v3492_v24 = vadd.f32 %v3491_v40, %v7226_v57  ;;  %v7228_v40 = vld [vmem:[#allocation21_spill] sm:$0xff] }
 0x30b   :  { %v3493_v39 = vpop.f32.mrf.mxu1  ;;  %v3724_v34 = vpop.f32.mrf.mxu0 }
 0x30c   :  { %3874 = vst.msk [vmem:[%s7151_s3 + $0x130] sm:$0xff] %vm3835_vm0, %v3733_v44  ;;  %v3725_v11 = vadd.f32 %v3724_v34, %v3436_v10  ;;  %v7229_v34 = vld [vmem:[#allocation16_spill] sm:$0xff] }
 0x30d   :  { %v3494_v53 = vpop.f32.mrf.mxu1  ;;  %v4360_v5 = vpop.f32.mrf.mxu0  ;;  %v3487_v30 = vadd.f32 %v6979_v46, %v7229_v34 }
 0x30e   :  { %3872 = vst.msk [vmem:[%s7151_s3 + $0x120] sm:$0xff] %vm3835_vm0, %v3725_v11  ;;  %v3736_v8 = vadd.f32 %v4360_v5, %v3447_v9  ;;  %v3495_v55 = vadd.f32 %v3494_v53, %v7228_v40  ;;  %v7230_v53 = vld [vmem:[#allocation24_spill] sm:$0xff] }
 0x30f   :  { %v3496_v41 = vpop.f32.mrf.mxu1  ;;  %v3727_v35 = vpop.f32.mrf.mxu0 }
 0x310   :  { %3875 = vst.msk [vmem:[%s7151_s3 + $0x138] sm:$0xff] %vm3835_vm0, %v3736_v8  ;;  %v3728_v61 = vadd.f32 %v3727_v35, %v3439_v6 }
 0x311   :  { %v3499_v4 = vpop.f32.mrf.mxu1  ;;  %v4363_v37 = vpop.f32.mrf.mxu0 }
 0x312   :  { %3873 = vst.msk [vmem:[%s7151_s3 + $0x128] sm:$0xff] %vm3835_vm0, %v3728_v61  ;;  %v3749_v26 = vadd.f32 %v4363_v37, %v3460_v60  ;;  %v7231_v60 = vld [vmem:[#allocation22_spill] sm:$0xff] }
 0x313   :  { %v3501_v63 = vpop.f32.mrf.mxu1  ;;  %v3740_v21 = vpop.f32.mrf.mxu0  ;;  %v3500_v46 = vadd.f32 %v3499_v4, %v7231_v60 }
 0x314   :  { %3878 = vst.msk [vmem:[%s7151_s3 + $0x150] sm:$0xff] %vm3835_vm0, %v3749_v26  ;;  %v3741_v22 = vadd.f32 %v3740_v21, %v3452_v17  ;;  %v7232_v26 = vld [vmem:[#allocation17_spill] sm:$0xff] }
 0x315   :  { %v3502_v18 = vpop.f32.mrf.mxu1  ;;  %v4364_v42 = vpop.f32.mrf.mxu0 }
 0x316   :  { %3876 = vst.msk [vmem:[%s7151_s3 + $0x140] sm:$0xff] %vm3835_vm0, %v3741_v22  ;;  %v3752_v27 = vadd.f32 %v4364_v42, %v3463_v45  ;;  %v7233_v42 = vld [vmem:[#allocation23_spill] sm:$0xff] }
 0x317   :  { %v3504_v62 = vpop.f32.mrf.mxu1  ;;  %v3743_v7 = vpop.f32.mrf.mxu0  ;;  %v3503_v4 = vadd.f32 %v3502_v18, %v7233_v42 }
 0x318   :  { %3879 = vst.msk [vmem:[%s7151_s3 + $0x158] sm:$0xff] %vm3835_vm0, %v3752_v27  ;;  %v3744_v52 = vadd.f32 %v3743_v7, %v3455_v3  ;;  %v7234_v7 = vld [vmem:[#allocation9_spill] sm:$0xff] }
 0x319   :  { %v3507_v0 = vpop.f32.mrf.mxu1  ;;  %v4367_v54 = vpop.f32.mrf.mxu0 }
 0x31a   :  { %3877 = vst.msk [vmem:[%s7151_s3 + $0x148] sm:$0xff] %vm3835_vm0, %v3744_v52  ;;  %v3765_v19 = vadd.f32 %v4367_v54, %v3476_v25  ;;  %v3508_v6 = vadd.f32 %v3507_v0, %v7230_v53 }
 0x31b   :  { %v3509_v33 = vpop.f32.mrf.mxu1  ;;  %v3756_v23 = vpop.f32.mrf.mxu0 }
 0x31c   :  { %3882 = vst.msk [vmem:[%s7151_s3 + $0x170] sm:$0xff] %vm3835_vm0, %v3765_v19  ;;  %v3757_v14 = vadd.f32 %v3756_v23, %v3468_v50  ;;  %v7236_v23 = vld [vmem:[#allocation2_spill] sm:$0xff] }
 0x31d   :  { %v3510_v43 = vpop.f32.mrf.mxu1  ;;  %v4368_v12 = vpop.f32.mrf.mxu0 }
 0x31e   :  { %3880 = vst.msk [vmem:[%s7151_s3 + $0x160] sm:$0xff] %vm3835_vm0, %v3757_v14  ;;  %v3768_v16 = vadd.f32 %v4368_v12, %v3479_v49  ;;  %v3511_v63 = vadd.f32 %v3510_v43, %v7232_v26 }
 0x31f   :  { %v3512_v47 = vpop.f32.mrf.mxu1  ;;  %v3759_v48 = vpop.f32.mrf.mxu0 }
 0x320   :  { %3883 = vst.msk [vmem:[%s7151_s3 + $0x178] sm:$0xff] %vm3835_vm0, %v3768_v16  ;;  %v3760_v29 = vadd.f32 %v3759_v48, %v3471_v59 }
 0x321   :  { %v3515_v15 = vpop.f32.mrf.mxu1  ;;  %v4371_v38 = vpop.f32.mrf.mxu0 }
 0x322   :  { %3881 = vst.msk [vmem:[%s7151_s3 + $0x168] sm:$0xff] %vm3835_vm0, %v3760_v29  ;;  %v3781_v56 = vadd.f32 %v4371_v38, %v3492_v24  ;;  %v3516_v18 = vadd.f32 %v3515_v15, %v7235_v58 }
 0x323   :  { %v3517_v31 = vpop.f32.mrf.mxu1  ;;  %v3772_v28 = vpop.f32.mrf.mxu0 }
 0x324   :  { %3886 = vst.msk [vmem:[%s7151_s3 + $0x190] sm:$0xff] %vm3835_vm0, %v3781_v56  ;;  %v3773_v10 = vadd.f32 %v3772_v28, %v3484_v32 }
 0x325   :  { %v3518_v44 = vpop.f32.mrf.mxu1  ;;  %v4372_v39 = vpop.f32.mrf.mxu0 }
 0x326   :  { %3884 = vst.msk [vmem:[%s7151_s3 + $0x180] sm:$0xff] %vm3835_vm0, %v3773_v10  ;;  %v3784_v9 = vadd.f32 %v4372_v39, %v3495_v55  ;;  %v3519_v59 = vadd.f32 %v3518_v44, %v7237_v13 }
 0x327   :  { %v3520_v11 = vpop.f32.mrf.mxu1  ;;  %v3775_v5 = vpop.f32.mrf.mxu0 }
 0x328   :  { %3887 = vst.msk [vmem:[%s7151_s3 + $0x198] sm:$0xff] %vm3835_vm0, %v3784_v9  ;;  %v3776_v8 = vadd.f32 %v3775_v5, %v3487_v30 }
 0x329   :  { %v3523_v41 = vpop.f32.mrf.mxu1  ;;  %v4375_v35 = vpop.f32.mrf.mxu0 }
 0x32a   :  { %3885 = vst.msk [vmem:[%s7151_s3 + $0x188] sm:$0xff] %vm3835_vm0, %v3776_v8  ;;  %v3797_v61 = vadd.f32 %v4375_v35, %v3508_v6  ;;  %v3524_v25 = vadd.f32 %v3523_v41, %v7234_v7 }
 0x32b   :  { %v3525_v37 = vpop.f32.mrf.mxu1  ;;  %v3788_v17 = vpop.f32.mrf.mxu0 }
 0x32c   :  { %3890 = vst.msk [vmem:[%s7151_s3 + $0x1b0] sm:$0xff] %vm3835_vm0, %v3797_v61  ;;  %v3789_v21 = vadd.f32 %v3788_v17, %v3500_v46 }
 0x32d   :  { %v3526_v45 = vpop.f32.mrf.mxu1  ;;  %v4376_v22 = vpop.f32.mrf.mxu0 }
 0x32e   :  { %3888 = vst.msk [vmem:[%s7151_s3 + $0x1a0] sm:$0xff] %vm3835_vm0, %v3789_v21  ;;  %v3800_v3 = vadd.f32 %v4376_v22, %v3511_v63  ;;  %v3527_v49 = vadd.f32 %v3526_v45, %v7236_v23 }
 0x32f   :  { %v3528_v27 = vpop.f32.mrf.mxu1  ;;  %v3791_v62 = vpop.f32.mrf.mxu0 }
 0x330   :  { %3891 = vst.msk [vmem:[%s7151_s3 + $0x1b8] sm:$0xff] %vm3835_vm0, %v3800_v3  ;;  %v3792_v52 = vadd.f32 %v3791_v62, %v3503_v4 }
 0x331   :  { %v3531_v0 = vpop.f32.mrf.mxu1  ;;  %v4379_v54 = vpop.f32.mrf.mxu0 }
 0x332   :  { %3889 = vst.msk [vmem:[%s7151_s3 + $0x1a8] sm:$0xff] %vm3835_vm0, %v3792_v52  ;;  %v3813_v50 = vadd.f32 %v4379_v54, %v3524_v25  ;;  %v3532_v15 = vadd.f32 %v3531_v0, %v6751_v20 }
 0x333   :  { %v3533_v19 = vpop.f32.mrf.mxu1  ;;  %v3804_v33 = vpop.f32.mrf.mxu0 }
 0x334   :  { %3894 = vst.msk [vmem:[%s7151_s3 + $0x1d0] sm:$0xff] %vm3835_vm0, %v3813_v50  ;;  %v3805_v14 = vadd.f32 %v3804_v33, %v3516_v18 }
 0x335   :  { %v3534_v43 = vpop.f32.mrf.mxu1  ;;  %v4380_v12 = vpop.f32.mrf.mxu0 }
 0x336   :  { %3892 = vst.msk [vmem:[%s7151_s3 + $0x1c0] sm:$0xff] %vm3835_vm0, %v3805_v14  ;;  %v3816_v16 = vadd.f32 %v4380_v12, %v3527_v49  ;;  %v3535_v55 = vadd.f32 %v3534_v43, %v6757_v51 }
 0x337   :  { %v3536_v47 = vpop.f32.mrf.mxu1  ;;  %v3807_v48 = vpop.f32.mrf.mxu0 }
 0x338   :  { %3895 = vst.msk [vmem:[%s7151_s3 + $0x1d8] sm:$0xff] %vm3835_vm0, %v3816_v16  ;;  %v3808_v57 = vadd.f32 %v3807_v48, %v3519_v59 }
 0x339   :  { %v3539_v24 = vpop.f32.mrf.mxu1  ;;  %v4383_v29 = vpop.f32.mrf.mxu0 }
 0x33a   :  { %3893 = vst.msk [vmem:[%s7151_s3 + $0x1c8] sm:$0xff] %vm3835_vm0, %v3808_v57  ;;  %v3540_v38 = vadd.f32 %v3539_v24, %v6765_v36 }
 0x33b   :  { %v3541_v2 = vpop.f32.mrf.mxu1  ;;  %v3820_v32 = vpop.f32.mrf.mxu0 }
 0x33c   :  { %v3829_v56 = vadd.f32 %v4383_v29, %v3540_v38  ;;  %v3821_v31 = vadd.f32 %v3820_v32, %v3532_v15 }
 0x33d   :  { %v3542_v28 = vpop.f32.mrf.mxu1  ;;  %v4384_v40 = vpop.f32.mrf.mxu0 }
 0x33e   :  { %3898 = vst.msk [vmem:[%s7151_s3 + $0x1f0] sm:$0xff] %vm3835_vm0, %v3829_v56  ;;  %3896 = vst.msk [vmem:[%s7151_s3 + $0x1e0] sm:$0xff] %vm3835_vm0, %v3821_v31  ;;  %v3543_v20 = vadd.f32 %v3542_v28, %v6770_v1 }
 0x33f   :  { %v3544_v36 = vpop.f32.mrf.mxu1  ;;  %v3823_v10 = vpop.f32.mrf.mxu0 }
 0x340   :  { %v3832_v44 = vadd.f32 %v4384_v40, %v3543_v20  ;;  %v3824_v39 = vadd.f32 %v3823_v10, %v3535_v55 }
 0x342   :  { %3899 = vst.msk [vmem:[%s7151_s3 + $0x1f8] sm:$0xff] %vm3835_vm0, %v3832_v44  ;;  %3897 = vst.msk [vmem:[%s7151_s3 + $0x1e8] sm:$0xff] %vm3835_vm0, %v3824_v39 }

</bundles_post_ra>
